<compile_context>
chip_gen: v5e
topology: v5e:2x2
jax: 0.10.0
libtpu: 0.0.40
codegen_flags: <defaults>
</compile_context>

<pallas_src>
import math

import jax
import jax.numpy as jnp
from jax.experimental import pallas as pl
from jax.experimental.pallas import tpu as pltpu

_BN_EPS = 1e-5
_MXU_DTYPE = jnp.bfloat16   # MXU operand dtype (accumulate in f32, epilogue in f32)
_ACT_DTYPE = jnp.bfloat16   # activation storage dtype between layers


def _round_up(x, m):
    return (x + m - 1) // m * m


# ----------------------------------------------------------------------------
# Pallas kernel: tiled  out = act(A @ B * scale + bias [+ residual])
# ----------------------------------------------------------------------------
def _make_mm_bn_act_kernel(relu, has_residual):
    def _epilogue(acc, s_ref, c_ref, r_ref):
        out = acc * s_ref[...] + c_ref[...]
        if r_ref is not None:
            out = out + r_ref[...].astype(jnp.float32)
        if relu:
            out = jnp.maximum(out, 0.0)
        return out

    if has_residual:
        def kernel(a_ref, b_ref, s_ref, c_ref, r_ref, o_ref, acc_ref):
            @pl.when(pl.program_id(2) == 0)
            def _():
                acc_ref[...] = jnp.zeros_like(acc_ref)

            acc_ref[...] += jnp.dot(a_ref[...], b_ref[...],
                                    preferred_element_type=jnp.float32)

            @pl.when(pl.program_id(2) == pl.num_programs(2) - 1)
            def _():
                o_ref[...] = _epilogue(acc_ref[...], s_ref, c_ref, r_ref).astype(o_ref.dtype)
    else:
        def kernel(a_ref, b_ref, s_ref, c_ref, o_ref, acc_ref):
            @pl.when(pl.program_id(2) == 0)
            def _():
                acc_ref[...] = jnp.zeros_like(acc_ref)

            acc_ref[...] += jnp.dot(a_ref[...], b_ref[...],
                                    preferred_element_type=jnp.float32)

            @pl.when(pl.program_id(2) == pl.num_programs(2) - 1)
            def _():
                o_ref[...] = _epilogue(acc_ref[...], s_ref, c_ref, None).astype(o_ref.dtype)
    return kernel


def matmul_bn_act(a, b, scale, bias, residual=None, relu=True,
                  mxu_dtype=_MXU_DTYPE, out_dtype=_ACT_DTYPE):
    """a: [M,K], b: [K,N], scale/bias: [N], residual: [M,N] or None -> [M,N]."""
    M, K = a.shape
    Kb, N = b.shape
    assert K == Kb
    # Tile selection.  tm/tn=256 suits v6e/v7x (2x256 MXU); v5e (4x128 MXU) would prefer
    # tn=128 -- still correct, just pick smaller tiles there if tuning per generation.
    tm = min(256, _round_up(M, 8))
    tn = min(256, _round_up(N, 128))
    K_pad = _round_up(K, 128)
    tk = next(t for t in (512, 384, 256, 128) if K_pad % t == 0)
    M_pad = _round_up(M, tm)
    N_pad = _round_up(N, tn)

    a_p = a.astype(mxu_dtype)
    if (M_pad, K_pad) != (M, K):
        a_p = jnp.pad(a_p, ((0, M_pad - M), (0, K_pad - K)))
    b_p = b.astype(mxu_dtype)
    if (K_pad, N_pad) != (K, N):
        b_p = jnp.pad(b_p, ((0, K_pad - K), (0, N_pad - N)))
    s_p = jnp.pad(scale.astype(jnp.float32), (0, N_pad - N),
                  constant_values=1.0).reshape(1, N_pad)
    c_p = jnp.pad(bias.astype(jnp.float32), (0, N_pad - N)).reshape(1, N_pad)

    args = [a_p, b_p, s_p, c_p]
    in_specs = [
        pl.BlockSpec((tm, tk), lambda i, j, k: (i, k)),
        pl.BlockSpec((tk, tn), lambda i, j, k: (k, j)),
        pl.BlockSpec((1, tn), lambda i, j, k: (0, j)),
        pl.BlockSpec((1, tn), lambda i, j, k: (0, j)),
    ]
    if residual is not None:
        r_p = residual.astype(out_dtype)
        if r_p.shape != (M_pad, N_pad):
            r_p = jnp.pad(r_p, ((0, M_pad - M), (0, N_pad - N)))
        args.append(r_p)
        in_specs.append(pl.BlockSpec((tm, tn), lambda i, j, k: (i, j)))

    out = pl.pallas_call(
        _make_mm_bn_act_kernel(relu, residual is not None),
        out_shape=jax.ShapeDtypeStruct((M_pad, N_pad), out_dtype),
        grid=(M_pad // tm, N_pad // tn, K_pad // tk),
        in_specs=in_specs,
        out_specs=pl.BlockSpec((tm, tn), lambda i, j, k: (i, j)),
        scratch_shapes=[pltpu.VMEM((tm, tn), jnp.float32)],
        compiler_params=pltpu.CompilerParams(
            dimension_semantics=("parallel", "parallel", "arbitrary")),
    )(*args)

    if (M_pad, N_pad) != (M, N):
        out = out[:M, :N]
    return out


# ----------------------------------------------------------------------------
# Layer wrappers (im2col / pooling glue in plain JAX, matmuls in Pallas)
# ----------------------------------------------------------------------------
def conv_bn_act(x, w, scale, bias, stride, padding, relu=True, residual=None):
    """x: [N,H,W,Cin] NHWC, w: [KH,KW,Cin,Cout] HWIO -> [N,OH,OW,Cout]."""
    N, H, W, Cin = x.shape
    KH, KW, Cin_w, Cout = w.shape
    assert Cin_w == Cin
    OH = (H + 2 * padding - KH) // stride + 1
    OW = (W + 2 * padding - KW) // stride + 1
    xp = jnp.pad(x, ((0, 0), (padding, padding), (padding, padding), (0, 0))) if padding else x
    views = []
    for kh in range(KH):
        for kw in range(KW):
            views.append(xp[:, kh:kh + stride * (OH - 1) + 1:stride,
                               kw:kw + stride * (OW - 1) + 1:stride, :])
    if len(views) == 1:
        patches = views[0].reshape(N * OH * OW, Cin)
    else:
        # patch layout (kh, kw, cin) matches w.reshape(KH*KW*Cin, Cout)
        patches = jnp.concatenate(views, axis=-1).reshape(N * OH * OW, KH * KW * Cin)
    w2d = w.reshape(KH * KW * Cin, Cout)
    res2d = None if residual is None else residual.reshape(N * OH * OW, Cout)
    out = matmul_bn_act(patches, w2d, scale, bias, residual=res2d, relu=relu)
    return out.reshape(N, OH, OW, Cout)


def maxpool_3x3_s2_p1(x):
    """nn.MaxPool2d(kernel_size=3, stride=2, padding=1) on NHWC (running max, XLA fuses)."""
    N, H, W, C = x.shape
    k, stride, pad = 3, 2, 1
    OH = (H + 2 * pad - k) // stride + 1
    OW = (W + 2 * pad - k) // stride + 1
    xp = jnp.pad(x, ((0, 0), (pad, pad), (pad, pad), (0, 0)),
                 constant_values=-jnp.inf)
    out = None
    for kh in range(k):
        for kw in range(k):
            v = xp[:, kh:kh + stride * (OH - 1) + 1:stride,
                      kw:kw + stride * (OW - 1) + 1:stride, :]
            out = v if out is None else jnp.maximum(out, v)
    return out


# ----------------------------------------------------------------------------
# Parameter init (matches ResNet.__init__ init scheme; channel dims padded to 128)
# ----------------------------------------------------------------------------
def _conv_w(key, kh, kw, cin, cout):
    std = math.sqrt(2.0 / (kh * kw * cout))   # normal_(0, sqrt(2/n)), n = kh*kw*out_channels
    return jax.random.normal(key, (kh, kw, cin, cout), jnp.float32) * std


def _pad_w(w, cin_pad, cout_pad):
    kh, kw, cin, cout = w.shape
    return jnp.pad(w, ((0, 0), (0, 0), (0, cin_pad - cin), (0, cout_pad - cout)))


def _bn_folded(cout, cout_pad):
    # BatchNorm2d eval semantics: gamma=1, beta=0, running_mean=0, running_var=1.
    scale = jnp.full((cout,), 1.0 / math.sqrt(1.0 + _BN_EPS), jnp.float32)
    bias = jnp.zeros((cout,), jnp.float32)
    # Padded output channels see acc==0 (zero weights); bias 0 keeps them exactly zero.
    scale = jnp.pad(scale, (0, cout_pad - cout), constant_values=1.0)
    bias = jnp.pad(bias, (0, cout_pad - cout))
    return scale, bias


def _cpad(c):
    return max(128, _round_up(c, 128))


def init_resnet_params(key, layers=(2, 2, 2, 2), num_classes=10):
    params = {}
    key, k = jax.random.split(key)
    c1p = _cpad(64)
    params['conv1_w'] = _pad_w(_conv_w(k, 7, 7, 3, 64), 3, c1p).astype(_MXU_DTYPE)
    params['bn1'] = _bn_folded(64, c1p)

    inplanes, inplanes_p = 64, c1p
    expansion = 1  # BasicBlock
    for stage_idx, (planes, blocks) in enumerate(zip((64, 128, 256, 512), layers), start=1):
        stride = 1 if stage_idx == 1 else 2
        planes_p = _cpad(planes * expansion)
        blks = []
        for i in range(blocks):
            s = stride if i == 0 else 1
            key, k1, k2, k3 = jax.random.split(key, 4)
            p = {'conv1_w': _pad_w(_conv_w(k1, 3, 3, inplanes, planes),
                                   inplanes_p, planes_p).astype(_MXU_DTYPE),
                 'bn1': _bn_folded(planes, planes_p),
                 'conv2_w': _pad_w(_conv_w(k2, 3, 3, planes, planes),
                                   planes_p, planes_p).astype(_MXU_DTYPE),
                 'bn2': _bn_folded(planes, planes_p)}
            if s != 1 or inplanes != planes * expansion:
                p['down_w'] = _pad_w(_conv_w(k3, 1, 1, inplanes, planes * expansion),
                                     inplanes_p, planes_p).astype(_MXU_DTYPE)
                p['down_bn'] = _bn_folded(planes * expansion, planes_p)
            blks.append(p)
            inplanes, inplanes_p = planes * expansion, planes_p
        params[f'layer{stage_idx}'] = blks

    key, kw, kb = jax.random.split(key, 3)
    bound = 1.0 / math.sqrt(512 * expansion)   # nn.Linear default init
    params['fc_w'] = jax.random.uniform(kw, (512 * expansion, num_classes),
                                        jnp.float32, -bound, bound)
    params['fc_b'] = jax.random.uniform(kb, (num_classes,), jnp.float32, -bound, bound)
    return params


# ----------------------------------------------------------------------------
# Forward pass
# ----------------------------------------------------------------------------
def basic_block(x, p, stride):
    if 'down_w' in p:
        identity = conv_bn_act(x, p['down_w'], *p['down_bn'],
                               stride=stride, padding=0, relu=False)
    else:
        identity = x
    out = conv_bn_act(x, p['conv1_w'], *p['bn1'], stride=stride, padding=1, relu=True)
    out = conv_bn_act(out, p['conv2_w'], *p['bn2'], stride=1, padding=1, relu=True,
                      residual=identity)   # fused: bn2 + residual add + relu
    return out


@jax.jit
def resnet_forward(params, x_nchw):
    x = jnp.transpose(x_nchw, (0, 2, 3, 1)).astype(_ACT_DTYPE)   # NCHW -> NHWC, bf16
    x = conv_bn_act(x, params['conv1_w'], *params['bn1'], stride=2, padding=3, relu=True)
    x = maxpool_3x3_s2_p1(x)                                     # do_pool1=True
    for stage_idx, stage_stride in ((1, 1), (2, 2), (3, 2), (4, 2)):
        for blk_idx, blk in enumerate(params[f'layer{stage_idx}']):
            x = basic_block(x, blk, stage_stride if blk_idx == 0 else 1)
    # AdaptiveAvgPool2d((1,1)) + flatten, then the FC through the tiled Pallas matmul (f32).
    pooled = jnp.mean(x.astype(jnp.float32), axis=(1, 2))
    logits = matmul_bn_act(pooled, params['fc_w'],
                           jnp.ones_like(params['fc_b']), params['fc_b'],
                           relu=False, mxu_dtype=jnp.float32, out_dtype=jnp.float32)
    return logits


# ----------------------------------------------------------------------------
if __name__ == "__main__":
    key = jax.random.PRNGKey(0)
    key, pkey, xkey = jax.random.split(key, 3)

    params = init_resnet_params(pkey, layers=(2, 2, 2, 2), num_classes=10)
    # Small, module-consistent input: batch=2, RGB, 32x32 spatial
    # (32 -> conv1/2 -> 16 -> maxpool -> 8 -> layer1 8 -> 4 -> 2 -> 1 -> avgpool -> fc)
    x = jax.random.normal(xkey, (2, 3, 32, 32), jnp.float32)

    logits = resnet_forward(params, x)
    jax.block_until_ready(logits)
    assert logits.shape == (2, 10) and logits.dtype == jnp.float32
    print("KERNEL_OK")
</pallas_src>

<mosaic_0001>
module attributes {stable_mosaic.version = 11 : i64} {
  func.func @kernel(%arg0: i32, %arg1: i32, %arg2: i32, %arg3: memref<256x256xbf16, #tpu.memory_space<vmem>>, %arg4: memref<256x128xbf16, #tpu.memory_space<vmem>>, %arg5: memref<1x128xf32, #tpu.memory_space<vmem>>, %arg6: memref<1x128xf32, #tpu.memory_space<vmem>>, %arg7: memref<256x128xbf16, #tpu.memory_space<vmem>>, %arg8: memref<256x128xf32, #tpu.memory_space<vmem>>) attributes {dimension_semantics = [#tpu.dimension_semantics<parallel>, #tpu.dimension_semantics<parallel>, #tpu.dimension_semantics<arbitrary>], iteration_bounds = array<i64: 2, 1, 1>, scalar_prefetch = 0 : i64, scratch_operands = 1 : i64, tpu.core_type = #tpu.core_type<tc>, window_params = [{transform_indices = @transform_0, window_bounds = array<i64: 256, 256>}, {transform_indices = @transform_1, window_bounds = array<i64: 256, 128>}, {transform_indices = @transform_2, window_bounds = array<i64: 1, 128>}, {transform_indices = @transform_3, window_bounds = array<i64: 1, 128>}, {transform_indices = @transform_4, window_bounds = array<i64: 256, 128>}]} {
    %c0_i32 = arith.constant 0 : i32
    %0 = arith.cmpi eq, %arg2, %c0_i32 : i32
    %1 = arith.extui %0 : i1 to i32
    %c0_i32_0 = arith.constant 0 : i32
    %2 = arith.cmpi ne, %1, %c0_i32_0 : i32
    scf.if %2 {
      %cst_10 = arith.constant 0.000000e+00 : f32
      %12 = vector.broadcast %cst_10 : f32 to vector<256x128xf32>
      %c0_11 = arith.constant 0 : index
      %c0_12 = arith.constant 0 : index
      %13 = vector.load %arg8[%c0_11, %c0_12] : memref<256x128xf32, #tpu.memory_space<vmem>>, vector<256x128xf32>
      tpu.vector_store %arg8[%c0_11, %c0_12], %12 {strides = array<i32>} : memref<256x128xf32, #tpu.memory_space<vmem>>, vector<256x128xf32>,
    } else {
    }
    %c0 = arith.constant 0 : index
    %c0_1 = arith.constant 0 : index
    %3 = vector.load %arg8[%c0, %c0_1] : memref<256x128xf32, #tpu.memory_space<vmem>>, vector<256x128xf32>
    %c0_2 = arith.constant 0 : index
    %c0_3 = arith.constant 0 : index
    %4 = vector.load %arg3[%c0_2, %c0_3] : memref<256x256xbf16, #tpu.memory_space<vmem>>, vector<256x256xbf16>
    %c0_4 = arith.constant 0 : index
    %c0_5 = arith.constant 0 : index
    %5 = vector.load %arg4[%c0_4, %c0_5] : memref<256x128xbf16, #tpu.memory_space<vmem>>, vector<256x128xbf16>
    %cst = arith.constant dense<0.000000e+00> : vector<256x128xf32>
    %6 = tpu.matmul %4, %5, %cst {dimension_numbers = #tpu.dot_dimension_numbers<[1], [0], [0], [1], [0, 0, 1, 1], [], []>} : vector<256x256xbf16>, vector<256x128xbf16>, vector<256x128xf32> -> vector<256x128xf32>
    %7 = arith.addf %3, %6 : vector<256x128xf32>
    %c0_6 = arith.constant 0 : index
    %c0_7 = arith.constant 0 : index
    %8 = vector.load %arg8[%c0_6, %c0_7] : memref<256x128xf32, #tpu.memory_space<vmem>>, vector<256x128xf32>
    tpu.vector_store %arg8[%c0_6, %c0_7], %7 {strides = array<i32>} : memref<256x128xf32, #tpu.memory_space<vmem>>, vector<256x128xf32>,
    %c0_i32_8 = arith.constant 0 : i32
    %9 = arith.cmpi eq, %arg2, %c0_i32_8 : i32
    %10 = arith.extui %9 : i1 to i32
    %c0_i32_9 = arith.constant 0 : i32
    %11 = arith.cmpi ne, %10, %c0_i32_9 : i32
    scf.if %11 {
      %c0_10 = arith.constant 0 : index
      %c0_11 = arith.constant 0 : index
      %12 = vector.load %arg8[%c0_10, %c0_11] : memref<256x128xf32, #tpu.memory_space<vmem>>, vector<256x128xf32>
      %c0_12 = arith.constant 0 : index
      %c0_13 = arith.constant 0 : index
      %13 = vector.load %arg5[%c0_12, %c0_13] : memref<1x128xf32, #tpu.memory_space<vmem>>, vector<1x128xf32>
      %14 = vector.broadcast %13 : vector<1x128xf32> to vector<256x128xf32>
      %15 = arith.mulf %12, %14 : vector<256x128xf32>
      %c0_14 = arith.constant 0 : index
      %c0_15 = arith.constant 0 : index
      %16 = vector.load %arg6[%c0_14, %c0_15] : memref<1x128xf32, #tpu.memory_space<vmem>>, vector<1x128xf32>
      %17 = vector.broadcast %16 : vector<1x128xf32> to vector<256x128xf32>
      %18 = arith.addf %15, %17 : vector<256x128xf32>
      %cst_16 = arith.constant 0.000000e+00 : f32
      %19 = vector.broadcast %cst_16 : f32 to vector<256x128xf32>
      %20 = arith.maximumf %18, %19 : vector<256x128xf32>
      %21 = arith.truncf %20 : vector<256x128xf32> to vector<256x128xbf16>
      %c0_17 = arith.constant 0 : index
      %c0_18 = arith.constant 0 : index
      %22 = vector.load %arg7[%c0_17, %c0_18] : memref<256x128xbf16, #tpu.memory_space<vmem>>, vector<256x128xbf16>
      tpu.vector_store %arg7[%c0_17, %c0_18], %21 {strides = array<i32>} : memref<256x128xbf16, #tpu.memory_space<vmem>>, vector<256x128xbf16>,
    } else {
    }
    return
  }
  func.func @transform_0(%arg0: i32, %arg1: i32, %arg2: i32) -> (i32, i32) {
    %c0_i32 = arith.constant 0 : i32
    return %arg0, %arg2 : i32, i32
  }
  func.func @transform_1(%arg0: i32, %arg1: i32, %arg2: i32) -> (i32, i32) {
    %c0_i32 = arith.constant 0 : i32
    return %arg2, %arg1 : i32, i32
  }
  func.func @transform_2(%arg0: i32, %arg1: i32, %arg2: i32) -> (i32, i32) {
    %c0_i32 = arith.constant 0 : i32
    %c0_i32_0 = arith.constant 0 : i32
    return %c0_i32, %arg1 : i32, i32
  }
  func.func @transform_3(%arg0: i32, %arg1: i32, %arg2: i32) -> (i32, i32) {
    %c0_i32 = arith.constant 0 : i32
    %c0_i32_0 = arith.constant 0 : i32
    return %c0_i32, %arg1 : i32, i32
  }
  func.func @transform_4(%arg0: i32, %arg1: i32, %arg2: i32) -> (i32, i32) {
    %c0_i32 = arith.constant 0 : i32
    return %arg0, %arg1 : i32, i32
  }
}

module attributes {stable_mosaic.version = 11 : i64} {
  func.func @kernel(%arg0: i32, %arg1: i32, %arg2: i32, %arg3: memref<128x384xbf16, #tpu.memory_space<vmem>>, %arg4: memref<384x128xbf16, #tpu.memory_space<vmem>>, %arg5: memref<1x128xf32, #tpu.memory_space<vmem>>, %arg6: memref<1x128xf32, #tpu.memory_space<vmem>>, %arg7: memref<128x128xbf16, #tpu.memory_space<vmem>>, %arg8: memref<128x128xf32, #tpu.memory_space<vmem>>) attributes {dimension_semantics = [#tpu.dimension_semantics<parallel>, #tpu.dimension_semantics<parallel>, #tpu.dimension_semantics<arbitrary>], iteration_bounds = array<i64: 1, 1, 3>, scalar_prefetch = 0 : i64, scratch_operands = 1 : i64, tpu.core_type = #tpu.core_type<tc>, window_params = [{transform_indices = @transform_0, window_bounds = array<i64: 128, 384>}, {transform_indices = @transform_1, window_bounds = array<i64: 384, 128>}, {transform_indices = @transform_2, window_bounds = array<i64: 1, 128>}, {transform_indices = @transform_3, window_bounds = array<i64: 1, 128>}, {transform_indices = @transform_4, window_bounds = array<i64: 128, 128>}]} {
    %c0_i32 = arith.constant 0 : i32
    %0 = arith.cmpi eq, %arg2, %c0_i32 : i32
    %1 = arith.extui %0 : i1 to i32
    %c0_i32_0 = arith.constant 0 : i32
    %2 = arith.cmpi ne, %1, %c0_i32_0 : i32
    scf.if %2 {
      %cst_9 = arith.constant 0.000000e+00 : f32
      %12 = vector.broadcast %cst_9 : f32 to vector<128x128xf32>
      %c0_10 = arith.constant 0 : index
      %c0_11 = arith.constant 0 : index
      %13 = vector.load %arg8[%c0_10, %c0_11] : memref<128x128xf32, #tpu.memory_space<vmem>>, vector<128x128xf32>
      tpu.vector_store %arg8[%c0_10, %c0_11], %12 {strides = array<i32>} : memref<128x128xf32, #tpu.memory_space<vmem>>, vector<128x128xf32>,
    } else {
    }
    %c0 = arith.constant 0 : index
    %c0_1 = arith.constant 0 : index
    %3 = vector.load %arg8[%c0, %c0_1] : memref<128x128xf32, #tpu.memory_space<vmem>>, vector<128x128xf32>
    %c0_2 = arith.constant 0 : index
    %c0_3 = arith.constant 0 : index
    %4 = vector.load %arg3[%c0_2, %c0_3] : memref<128x384xbf16, #tpu.memory_space<vmem>>, vector<128x384xbf16>
    %c0_4 = arith.constant 0 : index
    %c0_5 = arith.constant 0 : index
    %5 = vector.load %arg4[%c0_4, %c0_5] : memref<384x128xbf16, #tpu.memory_space<vmem>>, vector<384x128xbf16>
    %cst = arith.constant dense<0.000000e+00> : vector<128x128xf32>
    %6 = tpu.matmul %4, %5, %cst {dimension_numbers = #tpu.dot_dimension_numbers<[1], [0], [0], [1], [0, 0, 1, 1], [], []>} : vector<128x384xbf16>, vector<384x128xbf16>, vector<128x128xf32> -> vector<128x128xf32>
    %7 = arith.addf %3, %6 : vector<128x128xf32>
    %c0_6 = arith.constant 0 : index
    %c0_7 = arith.constant 0 : index
    %8 = vector.load %arg8[%c0_6, %c0_7] : memref<128x128xf32, #tpu.memory_space<vmem>>, vector<128x128xf32>
    tpu.vector_store %arg8[%c0_6, %c0_7], %7 {strides = array<i32>} : memref<128x128xf32, #tpu.memory_space<vmem>>, vector<128x128xf32>,
    %c2_i32 = arith.constant 2 : i32
    %9 = arith.cmpi eq, %arg2, %c2_i32 : i32
    %10 = arith.extui %9 : i1 to i32
    %c0_i32_8 = arith.constant 0 : i32
    %11 = arith.cmpi ne, %10, %c0_i32_8 : i32
    scf.if %11 {
      %c0_9 = arith.constant 0 : index
      %c0_10 = arith.constant 0 : index
      %12 = vector.load %arg8[%c0_9, %c0_10] : memref<128x128xf32, #tpu.memory_space<vmem>>, vector<128x128xf32>
      %c0_11 = arith.constant 0 : index
      %c0_12 = arith.constant 0 : index
      %13 = vector.load %arg5[%c0_11, %c0_12] : memref<1x128xf32, #tpu.memory_space<vmem>>, vector<1x128xf32>
      %14 = vector.broadcast %13 : vector<1x128xf32> to vector<128x128xf32>
      %15 = arith.mulf %12, %14 : vector<128x128xf32>
      %c0_13 = arith.constant 0 : index
      %c0_14 = arith.constant 0 : index
      %16 = vector.load %arg6[%c0_13, %c0_14] : memref<1x128xf32, #tpu.memory_space<vmem>>, vector<1x128xf32>
      %17 = vector.broadcast %16 : vector<1x128xf32> to vector<128x128xf32>
      %18 = arith.addf %15, %17 : vector<128x128xf32>
      %cst_15 = arith.constant 0.000000e+00 : f32
      %19 = vector.broadcast %cst_15 : f32 to vector<128x128xf32>
      %20 = arith.maximumf %18, %19 : vector<128x128xf32>
      %21 = arith.truncf %20 : vector<128x128xf32> to vector<128x128xbf16>
      %c0_16 = arith.constant 0 : index
      %c0_17 = arith.constant 0 : index
      %22 = vector.load %arg7[%c0_16, %c0_17] : memref<128x128xbf16, #tpu.memory_space<vmem>>, vector<128x128xbf16>
      tpu.vector_store %arg7[%c0_16, %c0_17], %21 {strides = array<i32>} : memref<128x128xbf16, #tpu.memory_space<vmem>>, vector<128x128xbf16>,
    } else {
    }
    return
  }
  func.func @transform_0(%arg0: i32, %arg1: i32, %arg2: i32) -> (i32, i32) {
    %c0_i32 = arith.constant 0 : i32
    return %arg0, %arg2 : i32, i32
  }
  func.func @transform_1(%arg0: i32, %arg1: i32, %arg2: i32) -> (i32, i32) {
    %c0_i32 = arith.constant 0 : i32
    return %arg2, %arg1 : i32, i32
  }
  func.func @transform_2(%arg0: i32, %arg1: i32, %arg2: i32) -> (i32, i32) {
    %c0_i32 = arith.constant 0 : i32
    %c0_i32_0 = arith.constant 0 : i32
    return %c0_i32, %arg1 : i32, i32
  }
  func.func @transform_3(%arg0: i32, %arg1: i32, %arg2: i32) -> (i32, i32) {
    %c0_i32 = arith.constant 0 : i32
    %c0_i32_0 = arith.constant 0 : i32
    return %c0_i32, %arg1 : i32, i32
  }
  func.func @transform_4(%arg0: i32, %arg1: i32, %arg2: i32) -> (i32, i32) {
    %c0_i32 = arith.constant 0 : i32
    return %arg0, %arg1 : i32, i32
  }
}

module attributes {stable_mosaic.version = 11 : i64} {
  func.func @kernel(%arg0: i32, %arg1: i32, %arg2: i32, %arg3: memref<128x384xbf16, #tpu.memory_space<vmem>>, %arg4: memref<384x128xbf16, #tpu.memory_space<vmem>>, %arg5: memref<1x128xf32, #tpu.memory_space<vmem>>, %arg6: memref<1x128xf32, #tpu.memory_space<vmem>>, %arg7: memref<128x128xbf16, #tpu.memory_space<vmem>>, %arg8: memref<128x128xf32, #tpu.memory_space<vmem>>) attributes {dimension_semantics = [#tpu.dimension_semantics<parallel>, #tpu.dimension_semantics<parallel>, #tpu.dimension_semantics<arbitrary>], iteration_bounds = array<i64: 1, 1, 3>, scalar_prefetch = 0 : i64, scratch_operands = 1 : i64, tpu.core_type = #tpu.core_type<tc>, window_params = [{transform_indices = @transform_0, window_bounds = array<i64: 128, 384>}, {transform_indices = @transform_1, window_bounds = array<i64: 384, 128>}, {transform_indices = @transform_2, window_bounds = array<i64: 1, 128>}, {transform_indices = @transform_3, window_bounds = array<i64: 1, 128>}, {transform_indices = @transform_4, window_bounds = array<i64: 128, 128>}]} {
    %c0_i32 = arith.constant 0 : i32
    %0 = arith.cmpi eq, %arg2, %c0_i32 : i32
    %1 = arith.extui %0 : i1 to i32
    %c0_i32_0 = arith.constant 0 : i32
    %2 = arith.cmpi ne, %1, %c0_i32_0 : i32
    scf.if %2 {
      %cst_9 = arith.constant 0.000000e+00 : f32
      %12 = vector.broadcast %cst_9 : f32 to vector<128x128xf32>
      %c0_10 = arith.constant 0 : index
      %c0_11 = arith.constant 0 : index
      %13 = vector.load %arg8[%c0_10, %c0_11] : memref<128x128xf32, #tpu.memory_space<vmem>>, vector<128x128xf32>
      tpu.vector_store %arg8[%c0_10, %c0_11], %12 {strides = array<i32>} : memref<128x128xf32, #tpu.memory_space<vmem>>, vector<128x128xf32>,
    } else {
    }
    %c0 = arith.constant 0 : index
    %c0_1 = arith.constant 0 : index
    %3 = vector.load %arg8[%c0, %c0_1] : memref<128x128xf32, #tpu.memory_space<vmem>>, vector<128x128xf32>
    %c0_2 = arith.constant 0 : index
    %c0_3 = arith.constant 0 : index
    %4 = vector.load %arg3[%c0_2, %c0_3] : memref<128x384xbf16, #tpu.memory_space<vmem>>, vector<128x384xbf16>
    %c0_4 = arith.constant 0 : index
    %c0_5 = arith.constant 0 : index
    %5 = vector.load %arg4[%c0_4, %c0_5] : memref<384x128xbf16, #tpu.memory_space<vmem>>, vector<384x128xbf16>
    %cst = arith.constant dense<0.000000e+00> : vector<128x128xf32>
    %6 = tpu.matmul %4, %5, %cst {dimension_numbers = #tpu.dot_dimension_numbers<[1], [0], [0], [1], [0, 0, 1, 1], [], []>} : vector<128x384xbf16>, vector<384x128xbf16>, vector<128x128xf32> -> vector<128x128xf32>
    %7 = arith.addf %3, %6 : vector<128x128xf32>
    %c0_6 = arith.constant 0 : index
    %c0_7 = arith.constant 0 : index
    %8 = vector.load %arg8[%c0_6, %c0_7] : memref<128x128xf32, #tpu.memory_space<vmem>>, vector<128x128xf32>
    tpu.vector_store %arg8[%c0_6, %c0_7], %7 {strides = array<i32>} : memref<128x128xf32, #tpu.memory_space<vmem>>, vector<128x128xf32>,
    %c2_i32 = arith.constant 2 : i32
    %9 = arith.cmpi eq, %arg2, %c2_i32 : i32
    %10 = arith.extui %9 : i1 to i32
    %c0_i32_8 = arith.constant 0 : i32
    %11 = arith.cmpi ne, %10, %c0_i32_8 : i32
    scf.if %11 {
      %c0_9 = arith.constant 0 : index
      %c0_10 = arith.constant 0 : index
      %12 = vector.load %arg8[%c0_9, %c0_10] : memref<128x128xf32, #tpu.memory_space<vmem>>, vector<128x128xf32>
      %c0_11 = arith.constant 0 : index
      %c0_12 = arith.constant 0 : index
      %13 = vector.load %arg5[%c0_11, %c0_12] : memref<1x128xf32, #tpu.memory_space<vmem>>, vector<1x128xf32>
      %14 = vector.broadcast %13 : vector<1x128xf32> to vector<128x128xf32>
      %15 = arith.mulf %12, %14 : vector<128x128xf32>
      %c0_13 = arith.constant 0 : index
      %c0_14 = arith.constant 0 : index
      %16 = vector.load %arg6[%c0_13, %c0_14] : memref<1x128xf32, #tpu.memory_space<vmem>>, vector<1x128xf32>
      %17 = vector.broadcast %16 : vector<1x128xf32> to vector<128x128xf32>
      %18 = arith.addf %15, %17 : vector<128x128xf32>
      %cst_15 = arith.constant 0.000000e+00 : f32
      %19 = vector.broadcast %cst_15 : f32 to vector<128x128xf32>
      %20 = arith.maximumf %18, %19 : vector<128x128xf32>
      %21 = arith.truncf %20 : vector<128x128xf32> to vector<128x128xbf16>
      %c0_16 = arith.constant 0 : index
      %c0_17 = arith.constant 0 : index
      %22 = vector.load %arg7[%c0_16, %c0_17] : memref<128x128xbf16, #tpu.memory_space<vmem>>, vector<128x128xbf16>
      tpu.vector_store %arg7[%c0_16, %c0_17], %21 {strides = array<i32>} : memref<128x128xbf16, #tpu.memory_space<vmem>>, vector<128x128xbf16>,
    } else {
    }
    return
  }
  func.func @transform_0(%arg0: i32, %arg1: i32, %arg2: i32) -> (i32, i32) {
    %c0_i32 = arith.constant 0 : i32
    return %arg0, %arg2 : i32, i32
  }
  func.func @transform_1(%arg0: i32, %arg1: i32, %arg2: i32) -> (i32, i32) {
    %c0_i32 = arith.constant 0 : i32
    return %arg2, %arg1 : i32, i32
  }
  func.func @transform_2(%arg0: i32, %arg1: i32, %arg2: i32) -> (i32, i32) {
    %c0_i32 = arith.constant 0 : i32
    %c0_i32_0 = arith.constant 0 : i32
    return %c0_i32, %arg1 : i32, i32
  }
  func.func @transform_3(%arg0: i32, %arg1: i32, %arg2: i32) -> (i32, i32) {
    %c0_i32 = arith.constant 0 : i32
    %c0_i32_0 = arith.constant 0 : i32
    return %c0_i32, %arg1 : i32, i32
  }
  func.func @transform_4(%arg0: i32, %arg1: i32, %arg2: i32) -> (i32, i32) {
    %c0_i32 = arith.constant 0 : i32
    return %arg0, %arg1 : i32, i32
  }
}

module attributes {stable_mosaic.version = 11 : i64} {
  func.func @kernel(%arg0: i32, %arg1: i32, %arg2: i32, %arg3: memref<128x384xbf16, #tpu.memory_space<vmem>>, %arg4: memref<384x128xbf16, #tpu.memory_space<vmem>>, %arg5: memref<1x128xf32, #tpu.memory_space<vmem>>, %arg6: memref<1x128xf32, #tpu.memory_space<vmem>>, %arg7: memref<128x128xbf16, #tpu.memory_space<vmem>>, %arg8: memref<128x128xbf16, #tpu.memory_space<vmem>>, %arg9: memref<128x128xf32, #tpu.memory_space<vmem>>) attributes {dimension_semantics = [#tpu.dimension_semantics<parallel>, #tpu.dimension_semantics<parallel>, #tpu.dimension_semantics<arbitrary>], iteration_bounds = array<i64: 1, 1, 3>, scalar_prefetch = 0 : i64, scratch_operands = 1 : i64, tpu.core_type = #tpu.core_type<tc>, window_params = [{transform_indices = @transform_0, window_bounds = array<i64: 128, 384>}, {transform_indices = @transform_1, window_bounds = array<i64: 384, 128>}, {transform_indices = @transform_2, window_bounds = array<i64: 1, 128>}, {transform_indices = @transform_3, window_bounds = array<i64: 1, 128>}, {transform_indices = @transform_4, window_bounds = array<i64: 128, 128>}, {transform_indices = @transform_5, window_bounds = array<i64: 128, 128>}]} {
    %c0_i32 = arith.constant 0 : i32
    %0 = arith.cmpi eq, %arg2, %c0_i32 : i32
    %1 = arith.extui %0 : i1 to i32
    %c0_i32_0 = arith.constant 0 : i32
    %2 = arith.cmpi ne, %1, %c0_i32_0 : i32
    scf.if %2 {
      %cst_9 = arith.constant 0.000000e+00 : f32
      %12 = vector.broadcast %cst_9 : f32 to vector<128x128xf32>
      %c0_10 = arith.constant 0 : index
      %c0_11 = arith.constant 0 : index
      %13 = vector.load %arg9[%c0_10, %c0_11] : memref<128x128xf32, #tpu.memory_space<vmem>>, vector<128x128xf32>
      tpu.vector_store %arg9[%c0_10, %c0_11], %12 {strides = array<i32>} : memref<128x128xf32, #tpu.memory_space<vmem>>, vector<128x128xf32>,
    } else {
    }
    %c0 = arith.constant 0 : index
    %c0_1 = arith.constant 0 : index
    %3 = vector.load %arg9[%c0, %c0_1] : memref<128x128xf32, #tpu.memory_space<vmem>>, vector<128x128xf32>
    %c0_2 = arith.constant 0 : index
    %c0_3 = arith.constant 0 : index
    %4 = vector.load %arg3[%c0_2, %c0_3] : memref<128x384xbf16, #tpu.memory_space<vmem>>, vector<128x384xbf16>
    %c0_4 = arith.constant 0 : index
    %c0_5 = arith.constant 0 : index
    %5 = vector.load %arg4[%c0_4, %c0_5] : memref<384x128xbf16, #tpu.memory_space<vmem>>, vector<384x128xbf16>
    %cst = arith.constant dense<0.000000e+00> : vector<128x128xf32>
    %6 = tpu.matmul %4, %5, %cst {dimension_numbers = #tpu.dot_dimension_numbers<[1], [0], [0], [1], [0, 0, 1, 1], [], []>} : vector<128x384xbf16>, vector<384x128xbf16>, vector<128x128xf32> -> vector<128x128xf32>
    %7 = arith.addf %3, %6 : vector<128x128xf32>
    %c0_6 = arith.constant 0 : index
    %c0_7 = arith.constant 0 : index
    %8 = vector.load %arg9[%c0_6, %c0_7] : memref<128x128xf32, #tpu.memory_space<vmem>>, vector<128x128xf32>
    tpu.vector_store %arg9[%c0_6, %c0_7], %7 {strides = array<i32>} : memref<128x128xf32, #tpu.memory_space<vmem>>, vector<128x128xf32>,
    %c2_i32 = arith.constant 2 : i32
    %9 = arith.cmpi eq, %arg2, %c2_i32 : i32
    %10 = arith.extui %9 : i1 to i32
    %c0_i32_8 = arith.constant 0 : i32
    %11 = arith.cmpi ne, %10, %c0_i32_8 : i32
    scf.if %11 {
      %c0_9 = arith.constant 0 : index
      %c0_10 = arith.constant 0 : index
      %12 = vector.load %arg9[%c0_9, %c0_10] : memref<128x128xf32, #tpu.memory_space<vmem>>, vector<128x128xf32>
      %c0_11 = arith.constant 0 : index
      %c0_12 = arith.constant 0 : index
      %13 = vector.load %arg5[%c0_11, %c0_12] : memref<1x128xf32, #tpu.memory_space<vmem>>, vector<1x128xf32>
      %14 = vector.broadcast %13 : vector<1x128xf32> to vector<128x128xf32>
      %15 = arith.mulf %12, %14 : vector<128x128xf32>
      %c0_13 = arith.constant 0 : index
      %c0_14 = arith.constant 0 : index
      %16 = vector.load %arg6[%c0_13, %c0_14] : memref<1x128xf32, #tpu.memory_space<vmem>>, vector<1x128xf32>
      %17 = vector.broadcast %16 : vector<1x128xf32> to vector<128x128xf32>
      %18 = arith.addf %15, %17 : vector<128x128xf32>
      %c0_15 = arith.constant 0 : index
      %c0_16 = arith.constant 0 : index
      %19 = vector.load %arg7[%c0_15, %c0_16] : memref<128x128xbf16, #tpu.memory_space<vmem>>, vector<128x128xbf16>
      %20 = arith.extf %19 : vector<128x128xbf16> to vector<128x128xf32>
      %21 = arith.addf %18, %20 : vector<128x128xf32>
      %cst_17 = arith.constant 0.000000e+00 : f32
      %22 = vector.broadcast %cst_17 : f32 to vector<128x128xf32>
      %23 = arith.maximumf %21, %22 : vector<128x128xf32>
      %24 = arith.truncf %23 : vector<128x128xf32> to vector<128x128xbf16>
      %c0_18 = arith.constant 0 : index
      %c0_19 = arith.constant 0 : index
      %25 = vector.load %arg8[%c0_18, %c0_19] : memref<128x128xbf16, #tpu.memory_space<vmem>>, vector<128x128xbf16>
      tpu.vector_store %arg8[%c0_18, %c0_19], %24 {strides = array<i32>} : memref<128x128xbf16, #tpu.memory_space<vmem>>, vector<128x128xbf16>,
    } else {
    }
    return
  }
  func.func @transform_0(%arg0: i32, %arg1: i32, %arg2: i32) -> (i32, i32) {
    %c0_i32 = arith.constant 0 : i32
    return %arg0, %arg2 : i32, i32
  }
  func.func @transform_1(%arg0: i32, %arg1: i32, %arg2: i32) -> (i32, i32) {
    %c0_i32 = arith.constant 0 : i32
    return %arg2, %arg1 : i32, i32
  }
  func.func @transform_2(%arg0: i32, %arg1: i32, %arg2: i32) -> (i32, i32) {
    %c0_i32 = arith.constant 0 : i32
    %c0_i32_0 = arith.constant 0 : i32
    return %c0_i32, %arg1 : i32, i32
  }
  func.func @transform_3(%arg0: i32, %arg1: i32, %arg2: i32) -> (i32, i32) {
    %c0_i32 = arith.constant 0 : i32
    %c0_i32_0 = arith.constant 0 : i32
    return %c0_i32, %arg1 : i32, i32
  }
  func.func @transform_4(%arg0: i32, %arg1: i32, %arg2: i32) -> (i32, i32) {
    %c0_i32 = arith.constant 0 : i32
    return %arg0, %arg1 : i32, i32
  }
  func.func @transform_5(%arg0: i32, %arg1: i32, %arg2: i32) -> (i32, i32) {
    %c0_i32 = arith.constant 0 : i32
    return %arg0, %arg1 : i32, i32
  }
}

module attributes {stable_mosaic.version = 11 : i64} {
  func.func @kernel(%arg0: i32, %arg1: i32, %arg2: i32, %arg3: memref<32x384xbf16, #tpu.memory_space<vmem>>, %arg4: memref<384x128xbf16, #tpu.memory_space<vmem>>, %arg5: memref<1x128xf32, #tpu.memory_space<vmem>>, %arg6: memref<1x128xf32, #tpu.memory_space<vmem>>, %arg7: memref<32x128xbf16, #tpu.memory_space<vmem>>, %arg8: memref<32x128xf32, #tpu.memory_space<vmem>>) attributes {dimension_semantics = [#tpu.dimension_semantics<parallel>, #tpu.dimension_semantics<parallel>, #tpu.dimension_semantics<arbitrary>], iteration_bounds = array<i64: 1, 1, 3>, scalar_prefetch = 0 : i64, scratch_operands = 1 : i64, tpu.core_type = #tpu.core_type<tc>, window_params = [{transform_indices = @transform_0, window_bounds = array<i64: 32, 384>}, {transform_indices = @transform_1, window_bounds = array<i64: 384, 128>}, {transform_indices = @transform_2, window_bounds = array<i64: 1, 128>}, {transform_indices = @transform_3, window_bounds = array<i64: 1, 128>}, {transform_indices = @transform_4, window_bounds = array<i64: 32, 128>}]} {
    %c0_i32 = arith.constant 0 : i32
    %0 = arith.cmpi eq, %arg2, %c0_i32 : i32
    %1 = arith.extui %0 : i1 to i32
    %c0_i32_0 = arith.constant 0 : i32
    %2 = arith.cmpi ne, %1, %c0_i32_0 : i32
    scf.if %2 {
      %cst_9 = arith.constant 0.000000e+00 : f32
      %12 = vector.broadcast %cst_9 : f32 to vector<32x128xf32>
      %c0_10 = arith.constant 0 : index
      %c0_11 = arith.constant 0 : index
      %13 = vector.load %arg8[%c0_10, %c0_11] : memref<32x128xf32, #tpu.memory_space<vmem>>, vector<32x128xf32>
      tpu.vector_store %arg8[%c0_10, %c0_11], %12 {strides = array<i32>} : memref<32x128xf32, #tpu.memory_space<vmem>>, vector<32x128xf32>,
    } else {
    }
    %c0 = arith.constant 0 : index
    %c0_1 = arith.constant 0 : index
    %3 = vector.load %arg8[%c0, %c0_1] : memref<32x128xf32, #tpu.memory_space<vmem>>, vector<32x128xf32>
    %c0_2 = arith.constant 0 : index
    %c0_3 = arith.constant 0 : index
    %4 = vector.load %arg3[%c0_2, %c0_3] : memref<32x384xbf16, #tpu.memory_space<vmem>>, vector<32x384xbf16>
    %c0_4 = arith.constant 0 : index
    %c0_5 = arith.constant 0 : index
    %5 = vector.load %arg4[%c0_4, %c0_5] : memref<384x128xbf16, #tpu.memory_space<vmem>>, vector<384x128xbf16>
    %cst = arith.constant dense<0.000000e+00> : vector<32x128xf32>
    %6 = tpu.matmul %4, %5, %cst {dimension_numbers = #tpu.dot_dimension_numbers<[1], [0], [0], [1], [0, 0, 1, 1], [], []>} : vector<32x384xbf16>, vector<384x128xbf16>, vector<32x128xf32> -> vector<32x128xf32>
    %7 = arith.addf %3, %6 : vector<32x128xf32>
    %c0_6 = arith.constant 0 : index
    %c0_7 = arith.constant 0 : index
    %8 = vector.load %arg8[%c0_6, %c0_7] : memref<32x128xf32, #tpu.memory_space<vmem>>, vector<32x128xf32>
    tpu.vector_store %arg8[%c0_6, %c0_7], %7 {strides = array<i32>} : memref<32x128xf32, #tpu.memory_space<vmem>>, vector<32x128xf32>,
    %c2_i32 = arith.constant 2 : i32
    %9 = arith.cmpi eq, %arg2, %c2_i32 : i32
    %10 = arith.extui %9 : i1 to i32
    %c0_i32_8 = arith.constant 0 : i32
    %11 = arith.cmpi ne, %10, %c0_i32_8 : i32
    scf.if %11 {
      %c0_9 = arith.constant 0 : index
      %c0_10 = arith.constant 0 : index
      %12 = vector.load %arg8[%c0_9, %c0_10] : memref<32x128xf32, #tpu.memory_space<vmem>>, vector<32x128xf32>
      %c0_11 = arith.constant 0 : index
      %c0_12 = arith.constant 0 : index
      %13 = vector.load %arg5[%c0_11, %c0_12] : memref<1x128xf32, #tpu.memory_space<vmem>>, vector<1x128xf32>
      %14 = vector.broadcast %13 : vector<1x128xf32> to vector<32x128xf32>
      %15 = arith.mulf %12, %14 : vector<32x128xf32>
      %c0_13 = arith.constant 0 : index
      %c0_14 = arith.constant 0 : index
      %16 = vector.load %arg6[%c0_13, %c0_14] : memref<1x128xf32, #tpu.memory_space<vmem>>, vector<1x128xf32>
      %17 = vector.broadcast %16 : vector<1x128xf32> to vector<32x128xf32>
      %18 = arith.addf %15, %17 : vector<32x128xf32>
      %cst_15 = arith.constant 0.000000e+00 : f32
      %19 = vector.broadcast %cst_15 : f32 to vector<32x128xf32>
      %20 = arith.maximumf %18, %19 : vector<32x128xf32>
      %21 = arith.truncf %20 : vector<32x128xf32> to vector<32x128xbf16>
      %c0_16 = arith.constant 0 : index
      %c0_17 = arith.constant 0 : index
      %22 = vector.load %arg7[%c0_16, %c0_17] : memref<32x128xbf16, #tpu.memory_space<vmem>>, vector<32x128xbf16>
      tpu.vector_store %arg7[%c0_16, %c0_17], %21 {strides = array<i32>} : memref<32x128xbf16, #tpu.memory_space<vmem>>, vector<32x128xbf16>,
    } else {
    }
    return
  }
  func.func @transform_0(%arg0: i32, %arg1: i32, %arg2: i32) -> (i32, i32) {
    %c0_i32 = arith.constant 0 : i32
    return %arg0, %arg2 : i32, i32
  }
  func.func @transform_1(%arg0: i32, %arg1: i32, %arg2: i32) -> (i32, i32) {
    %c0_i32 = arith.constant 0 : i32
    return %arg2, %arg1 : i32, i32
  }
  func.func @transform_2(%arg0: i32, %arg1: i32, %arg2: i32) -> (i32, i32) {
    %c0_i32 = arith.constant 0 : i32
    %c0_i32_0 = arith.constant 0 : i32
    return %c0_i32, %arg1 : i32, i32
  }
  func.func @transform_3(%arg0: i32, %arg1: i32, %arg2: i32) -> (i32, i32) {
    %c0_i32 = arith.constant 0 : i32
    %c0_i32_0 = arith.constant 0 : i32
    return %c0_i32, %arg1 : i32, i32
  }
  func.func @transform_4(%arg0: i32, %arg1: i32, %arg2: i32) -> (i32, i32) {
    %c0_i32 = arith.constant 0 : i32
    return %arg0, %arg1 : i32, i32
  }
}

module attributes {stable_mosaic.version = 11 : i64} {
  func.func @kernel(%arg0: i32, %arg1: i32, %arg2: i32, %arg3: memref<32x128xbf16, #tpu.memory_space<vmem>>, %arg4: memref<128x128xbf16, #tpu.memory_space<vmem>>, %arg5: memref<1x128xf32, #tpu.memory_space<vmem>>, %arg6: memref<1x128xf32, #tpu.memory_space<vmem>>, %arg7: memref<32x128xbf16, #tpu.memory_space<vmem>>, %arg8: memref<32x128xf32, #tpu.memory_space<vmem>>) attributes {dimension_semantics = [#tpu.dimension_semantics<parallel>, #tpu.dimension_semantics<parallel>, #tpu.dimension_semantics<arbitrary>], iteration_bounds = array<i64: 1, 1, 1>, scalar_prefetch = 0 : i64, scratch_operands = 1 : i64, tpu.core_type = #tpu.core_type<tc>, window_params = [{transform_indices = @transform_0, window_bounds = array<i64: 32, 128>}, {transform_indices = @transform_1, window_bounds = array<i64: 128, 128>}, {transform_indices = @transform_2, window_bounds = array<i64: 1, 128>}, {transform_indices = @transform_3, window_bounds = array<i64: 1, 128>}, {transform_indices = @transform_4, window_bounds = array<i64: 32, 128>}]} {
    %c0_i32 = arith.constant 0 : i32
    %0 = arith.cmpi eq, %arg2, %c0_i32 : i32
    %1 = arith.extui %0 : i1 to i32
    %c0_i32_0 = arith.constant 0 : i32
    %2 = arith.cmpi ne, %1, %c0_i32_0 : i32
    scf.if %2 {
      %cst_10 = arith.constant 0.000000e+00 : f32
      %12 = vector.broadcast %cst_10 : f32 to vector<32x128xf32>
      %c0_11 = arith.constant 0 : index
      %c0_12 = arith.constant 0 : index
      %13 = vector.load %arg8[%c0_11, %c0_12] : memref<32x128xf32, #tpu.memory_space<vmem>>, vector<32x128xf32>
      tpu.vector_store %arg8[%c0_11, %c0_12], %12 {strides = array<i32>} : memref<32x128xf32, #tpu.memory_space<vmem>>, vector<32x128xf32>,
    } else {
    }
    %c0 = arith.constant 0 : index
    %c0_1 = arith.constant 0 : index
    %3 = vector.load %arg8[%c0, %c0_1] : memref<32x128xf32, #tpu.memory_space<vmem>>, vector<32x128xf32>
    %c0_2 = arith.constant 0 : index
    %c0_3 = arith.constant 0 : index
    %4 = vector.load %arg3[%c0_2, %c0_3] : memref<32x128xbf16, #tpu.memory_space<vmem>>, vector<32x128xbf16>
    %c0_4 = arith.constant 0 : index
    %c0_5 = arith.constant 0 : index
    %5 = vector.load %arg4[%c0_4, %c0_5] : memref<128x128xbf16, #tpu.memory_space<vmem>>, vector<128x128xbf16>
    %cst = arith.constant dense<0.000000e+00> : vector<32x128xf32>
    %6 = tpu.matmul %4, %5, %cst {dimension_numbers = #tpu.dot_dimension_numbers<[1], [0], [0], [1], [0, 0, 1, 1], [], []>} : vector<32x128xbf16>, vector<128x128xbf16>, vector<32x128xf32> -> vector<32x128xf32>
    %7 = arith.addf %3, %6 : vector<32x128xf32>
    %c0_6 = arith.constant 0 : index
    %c0_7 = arith.constant 0 : index
    %8 = vector.load %arg8[%c0_6, %c0_7] : memref<32x128xf32, #tpu.memory_space<vmem>>, vector<32x128xf32>
    tpu.vector_store %arg8[%c0_6, %c0_7], %7 {strides = array<i32>} : memref<32x128xf32, #tpu.memory_space<vmem>>, vector<32x128xf32>,
    %c0_i32_8 = arith.constant 0 : i32
    %9 = arith.cmpi eq, %arg2, %c0_i32_8 : i32
    %10 = arith.extui %9 : i1 to i32
    %c0_i32_9 = arith.constant 0 : i32
    %11 = arith.cmpi ne, %10, %c0_i32_9 : i32
    scf.if %11 {
      %c0_10 = arith.constant 0 : index
      %c0_11 = arith.constant 0 : index
      %12 = vector.load %arg8[%c0_10, %c0_11] : memref<32x128xf32, #tpu.memory_space<vmem>>, vector<32x128xf32>
      %c0_12 = arith.constant 0 : index
      %c0_13 = arith.constant 0 : index
      %13 = vector.load %arg5[%c0_12, %c0_13] : memref<1x128xf32, #tpu.memory_space<vmem>>, vector<1x128xf32>
      %14 = vector.broadcast %13 : vector<1x128xf32> to vector<32x128xf32>
      %15 = arith.mulf %12, %14 : vector<32x128xf32>
      %c0_14 = arith.constant 0 : index
      %c0_15 = arith.constant 0 : index
      %16 = vector.load %arg6[%c0_14, %c0_15] : memref<1x128xf32, #tpu.memory_space<vmem>>, vector<1x128xf32>
      %17 = vector.broadcast %16 : vector<1x128xf32> to vector<32x128xf32>
      %18 = arith.addf %15, %17 : vector<32x128xf32>
      %19 = arith.truncf %18 : vector<32x128xf32> to vector<32x128xbf16>
      %c0_16 = arith.constant 0 : index
      %c0_17 = arith.constant 0 : index
      %20 = vector.load %arg7[%c0_16, %c0_17] : memref<32x128xbf16, #tpu.memory_space<vmem>>, vector<32x128xbf16>
      tpu.vector_store %arg7[%c0_16, %c0_17], %19 {strides = array<i32>} : memref<32x128xbf16, #tpu.memory_space<vmem>>, vector<32x128xbf16>,
    } else {
    }
    return
  }
  func.func @transform_0(%arg0: i32, %arg1: i32, %arg2: i32) -> (i32, i32) {
    %c0_i32 = arith.constant 0 : i32
    return %arg0, %arg2 : i32, i32
  }
  func.func @transform_1(%arg0: i32, %arg1: i32, %arg2: i32) -> (i32, i32) {
    %c0_i32 = arith.constant 0 : i32
    return %arg2, %arg1 : i32, i32
  }
  func.func @transform_2(%arg0: i32, %arg1: i32, %arg2: i32) -> (i32, i32) {
    %c0_i32 = arith.constant 0 : i32
    %c0_i32_0 = arith.constant 0 : i32
    return %c0_i32, %arg1 : i32, i32
  }
  func.func @transform_3(%arg0: i32, %arg1: i32, %arg2: i32) -> (i32, i32) {
    %c0_i32 = arith.constant 0 : i32
    %c0_i32_0 = arith.constant 0 : i32
    return %c0_i32, %arg1 : i32, i32
  }
  func.func @transform_4(%arg0: i32, %arg1: i32, %arg2: i32) -> (i32, i32) {
    %c0_i32 = arith.constant 0 : i32
    return %arg0, %arg1 : i32, i32
  }
}

module attributes {stable_mosaic.version = 11 : i64} {
  func.func @kernel(%arg0: i32, %arg1: i32, %arg2: i32, %arg3: memref<32x384xbf16, #tpu.memory_space<vmem>>, %arg4: memref<384x128xbf16, #tpu.memory_space<vmem>>, %arg5: memref<1x128xf32, #tpu.memory_space<vmem>>, %arg6: memref<1x128xf32, #tpu.memory_space<vmem>>, %arg7: memref<32x128xbf16, #tpu.memory_space<vmem>>, %arg8: memref<32x128xbf16, #tpu.memory_space<vmem>>, %arg9: memref<32x128xf32, #tpu.memory_space<vmem>>) attributes {dimension_semantics = [#tpu.dimension_semantics<parallel>, #tpu.dimension_semantics<parallel>, #tpu.dimension_semantics<arbitrary>], iteration_bounds = array<i64: 1, 1, 3>, scalar_prefetch = 0 : i64, scratch_operands = 1 : i64, tpu.core_type = #tpu.core_type<tc>, window_params = [{transform_indices = @transform_0, window_bounds = array<i64: 32, 384>}, {transform_indices = @transform_1, window_bounds = array<i64: 384, 128>}, {transform_indices = @transform_2, window_bounds = array<i64: 1, 128>}, {transform_indices = @transform_3, window_bounds = array<i64: 1, 128>}, {transform_indices = @transform_4, window_bounds = array<i64: 32, 128>}, {transform_indices = @transform_5, window_bounds = array<i64: 32, 128>}]} {
    %c0_i32 = arith.constant 0 : i32
    %0 = arith.cmpi eq, %arg2, %c0_i32 : i32
    %1 = arith.extui %0 : i1 to i32
    %c0_i32_0 = arith.constant 0 : i32
    %2 = arith.cmpi ne, %1, %c0_i32_0 : i32
    scf.if %2 {
      %cst_9 = arith.constant 0.000000e+00 : f32
      %12 = vector.broadcast %cst_9 : f32 to vector<32x128xf32>
      %c0_10 = arith.constant 0 : index
      %c0_11 = arith.constant 0 : index
      %13 = vector.load %arg9[%c0_10, %c0_11] : memref<32x128xf32, #tpu.memory_space<vmem>>, vector<32x128xf32>
      tpu.vector_store %arg9[%c0_10, %c0_11], %12 {strides = array<i32>} : memref<32x128xf32, #tpu.memory_space<vmem>>, vector<32x128xf32>,
    } else {
    }
    %c0 = arith.constant 0 : index
    %c0_1 = arith.constant 0 : index
    %3 = vector.load %arg9[%c0, %c0_1] : memref<32x128xf32, #tpu.memory_space<vmem>>, vector<32x128xf32>
    %c0_2 = arith.constant 0 : index
    %c0_3 = arith.constant 0 : index
    %4 = vector.load %arg3[%c0_2, %c0_3] : memref<32x384xbf16, #tpu.memory_space<vmem>>, vector<32x384xbf16>
    %c0_4 = arith.constant 0 : index
    %c0_5 = arith.constant 0 : index
    %5 = vector.load %arg4[%c0_4, %c0_5] : memref<384x128xbf16, #tpu.memory_space<vmem>>, vector<384x128xbf16>
    %cst = arith.constant dense<0.000000e+00> : vector<32x128xf32>
    %6 = tpu.matmul %4, %5, %cst {dimension_numbers = #tpu.dot_dimension_numbers<[1], [0], [0], [1], [0, 0, 1, 1], [], []>} : vector<32x384xbf16>, vector<384x128xbf16>, vector<32x128xf32> -> vector<32x128xf32>
    %7 = arith.addf %3, %6 : vector<32x128xf32>
    %c0_6 = arith.constant 0 : index
    %c0_7 = arith.constant 0 : index
    %8 = vector.load %arg9[%c0_6, %c0_7] : memref<32x128xf32, #tpu.memory_space<vmem>>, vector<32x128xf32>
    tpu.vector_store %arg9[%c0_6, %c0_7], %7 {strides = array<i32>} : memref<32x128xf32, #tpu.memory_space<vmem>>, vector<32x128xf32>,
    %c2_i32 = arith.constant 2 : i32
    %9 = arith.cmpi eq, %arg2, %c2_i32 : i32
    %10 = arith.extui %9 : i1 to i32
    %c0_i32_8 = arith.constant 0 : i32
    %11 = arith.cmpi ne, %10, %c0_i32_8 : i32
    scf.if %11 {
      %c0_9 = arith.constant 0 : index
      %c0_10 = arith.constant 0 : index
      %12 = vector.load %arg9[%c0_9, %c0_10] : memref<32x128xf32, #tpu.memory_space<vmem>>, vector<32x128xf32>
      %c0_11 = arith.constant 0 : index
      %c0_12 = arith.constant 0 : index
      %13 = vector.load %arg5[%c0_11, %c0_12] : memref<1x128xf32, #tpu.memory_space<vmem>>, vector<1x128xf32>
      %14 = vector.broadcast %13 : vector<1x128xf32> to vector<32x128xf32>
      %15 = arith.mulf %12, %14 : vector<32x128xf32>
      %c0_13 = arith.constant 0 : index
      %c0_14 = arith.constant 0 : index
      %16 = vector.load %arg6[%c0_13, %c0_14] : memref<1x128xf32, #tpu.memory_space<vmem>>, vector<1x128xf32>
      %17 = vector.broadcast %16 : vector<1x128xf32> to vector<32x128xf32>
      %18 = arith.addf %15, %17 : vector<32x128xf32>
      %c0_15 = arith.constant 0 : index
      %c0_16 = arith.constant 0 : index
      %19 = vector.load %arg7[%c0_15, %c0_16] : memref<32x128xbf16, #tpu.memory_space<vmem>>, vector<32x128xbf16>
      %20 = arith.extf %19 : vector<32x128xbf16> to vector<32x128xf32>
      %21 = arith.addf %18, %20 : vector<32x128xf32>
      %cst_17 = arith.constant 0.000000e+00 : f32
      %22 = vector.broadcast %cst_17 : f32 to vector<32x128xf32>
      %23 = arith.maximumf %21, %22 : vector<32x128xf32>
      %24 = arith.truncf %23 : vector<32x128xf32> to vector<32x128xbf16>
      %c0_18 = arith.constant 0 : index
      %c0_19 = arith.constant 0 : index
      %25 = vector.load %arg8[%c0_18, %c0_19] : memref<32x128xbf16, #tpu.memory_space<vmem>>, vector<32x128xbf16>
      tpu.vector_store %arg8[%c0_18, %c0_19], %24 {strides = array<i32>} : memref<32x128xbf16, #tpu.memory_space<vmem>>, vector<32x128xbf16>,
    } else {
    }
    return
  }
  func.func @transform_0(%arg0: i32, %arg1: i32, %arg2: i32) -> (i32, i32) {
    %c0_i32 = arith.constant 0 : i32
    return %arg0, %arg2 : i32, i32
  }
  func.func @transform_1(%arg0: i32, %arg1: i32, %arg2: i32) -> (i32, i32) {
    %c0_i32 = arith.constant 0 : i32
    return %arg2, %arg1 : i32, i32
  }
  func.func @transform_2(%arg0: i32, %arg1: i32, %arg2: i32) -> (i32, i32) {
    %c0_i32 = arith.constant 0 : i32
    %c0_i32_0 = arith.constant 0 : i32
    return %c0_i32, %arg1 : i32, i32
  }
  func.func @transform_3(%arg0: i32, %arg1: i32, %arg2: i32) -> (i32, i32) {
    %c0_i32 = arith.constant 0 : i32
    %c0_i32_0 = arith.constant 0 : i32
    return %c0_i32, %arg1 : i32, i32
  }
  func.func @transform_4(%arg0: i32, %arg1: i32, %arg2: i32) -> (i32, i32) {
    %c0_i32 = arith.constant 0 : i32
    return %arg0, %arg1 : i32, i32
  }
  func.func @transform_5(%arg0: i32, %arg1: i32, %arg2: i32) -> (i32, i32) {
    %c0_i32 = arith.constant 0 : i32
    return %arg0, %arg1 : i32, i32
  }
}

module attributes {stable_mosaic.version = 11 : i64} {
  func.func @kernel(%arg0: i32, %arg1: i32, %arg2: i32, %arg3: memref<8x384xbf16, #tpu.memory_space<vmem>>, %arg4: memref<384x256xbf16, #tpu.memory_space<vmem>>, %arg5: memref<1x256xf32, #tpu.memory_space<vmem>>, %arg6: memref<1x256xf32, #tpu.memory_space<vmem>>, %arg7: memref<8x256xbf16, #tpu.memory_space<vmem>>, %arg8: memref<8x256xf32, #tpu.memory_space<vmem>>) attributes {dimension_semantics = [#tpu.dimension_semantics<parallel>, #tpu.dimension_semantics<parallel>, #tpu.dimension_semantics<arbitrary>], iteration_bounds = array<i64: 1, 1, 3>, scalar_prefetch = 0 : i64, scratch_operands = 1 : i64, tpu.core_type = #tpu.core_type<tc>, window_params = [{transform_indices = @transform_0, window_bounds = array<i64: 8, 384>}, {transform_indices = @transform_1, window_bounds = array<i64: 384, 256>}, {transform_indices = @transform_2, window_bounds = array<i64: 1, 256>}, {transform_indices = @transform_3, window_bounds = array<i64: 1, 256>}, {transform_indices = @transform_4, window_bounds = array<i64: 8, 256>}]} {
    %c0_i32 = arith.constant 0 : i32
    %0 = arith.cmpi eq, %arg2, %c0_i32 : i32
    %1 = arith.extui %0 : i1 to i32
    %c0_i32_0 = arith.constant 0 : i32
    %2 = arith.cmpi ne, %1, %c0_i32_0 : i32
    scf.if %2 {
      %cst_9 = arith.constant 0.000000e+00 : f32
      %12 = vector.broadcast %cst_9 : f32 to vector<8x256xf32>
      %c0_10 = arith.constant 0 : index
      %c0_11 = arith.constant 0 : index
      %13 = vector.load %arg8[%c0_10, %c0_11] : memref<8x256xf32, #tpu.memory_space<vmem>>, vector<8x256xf32>
      tpu.vector_store %arg8[%c0_10, %c0_11], %12 {strides = array<i32>} : memref<8x256xf32, #tpu.memory_space<vmem>>, vector<8x256xf32>,
    } else {
    }
    %c0 = arith.constant 0 : index
    %c0_1 = arith.constant 0 : index
    %3 = vector.load %arg8[%c0, %c0_1] : memref<8x256xf32, #tpu.memory_space<vmem>>, vector<8x256xf32>
    %c0_2 = arith.constant 0 : index
    %c0_3 = arith.constant 0 : index
    %4 = vector.load %arg3[%c0_2, %c0_3] : memref<8x384xbf16, #tpu.memory_space<vmem>>, vector<8x384xbf16>
    %c0_4 = arith.constant 0 : index
    %c0_5 = arith.constant 0 : index
    %5 = vector.load %arg4[%c0_4, %c0_5] : memref<384x256xbf16, #tpu.memory_space<vmem>>, vector<384x256xbf16>
    %cst = arith.constant dense<0.000000e+00> : vector<8x256xf32>
    %6 = tpu.matmul %4, %5, %cst {dimension_numbers = #tpu.dot_dimension_numbers<[1], [0], [0], [1], [0, 0, 1, 1], [], []>} : vector<8x384xbf16>, vector<384x256xbf16>, vector<8x256xf32> -> vector<8x256xf32>
    %7 = arith.addf %3, %6 : vector<8x256xf32>
    %c0_6 = arith.constant 0 : index
    %c0_7 = arith.constant 0 : index
    %8 = vector.load %arg8[%c0_6, %c0_7] : memref<8x256xf32, #tpu.memory_space<vmem>>, vector<8x256xf32>
    tpu.vector_store %arg8[%c0_6, %c0_7], %7 {strides = array<i32>} : memref<8x256xf32, #tpu.memory_space<vmem>>, vector<8x256xf32>,
    %c2_i32 = arith.constant 2 : i32
    %9 = arith.cmpi eq, %arg2, %c2_i32 : i32
    %10 = arith.extui %9 : i1 to i32
    %c0_i32_8 = arith.constant 0 : i32
    %11 = arith.cmpi ne, %10, %c0_i32_8 : i32
    scf.if %11 {
      %c0_9 = arith.constant 0 : index
      %c0_10 = arith.constant 0 : index
      %12 = vector.load %arg8[%c0_9, %c0_10] : memref<8x256xf32, #tpu.memory_space<vmem>>, vector<8x256xf32>
      %c0_11 = arith.constant 0 : index
      %c0_12 = arith.constant 0 : index
      %13 = vector.load %arg5[%c0_11, %c0_12] : memref<1x256xf32, #tpu.memory_space<vmem>>, vector<1x256xf32>
      %14 = vector.broadcast %13 : vector<1x256xf32> to vector<8x256xf32>
      %15 = arith.mulf %12, %14 : vector<8x256xf32>
      %c0_13 = arith.constant 0 : index
      %c0_14 = arith.constant 0 : index
      %16 = vector.load %arg6[%c0_13, %c0_14] : memref<1x256xf32, #tpu.memory_space<vmem>>, vector<1x256xf32>
      %17 = vector.broadcast %16 : vector<1x256xf32> to vector<8x256xf32>
      %18 = arith.addf %15, %17 : vector<8x256xf32>
      %cst_15 = arith.constant 0.000000e+00 : f32
      %19 = vector.broadcast %cst_15 : f32 to vector<8x256xf32>
      %20 = arith.maximumf %18, %19 : vector<8x256xf32>
      %21 = arith.truncf %20 : vector<8x256xf32> to vector<8x256xbf16>
      %c0_16 = arith.constant 0 : index
      %c0_17 = arith.constant 0 : index
      %22 = vector.load %arg7[%c0_16, %c0_17] : memref<8x256xbf16, #tpu.memory_space<vmem>>, vector<8x256xbf16>
      tpu.vector_store %arg7[%c0_16, %c0_17], %21 {strides = array<i32>} : memref<8x256xbf16, #tpu.memory_space<vmem>>, vector<8x256xbf16>,
    } else {
    }
    return
  }
  func.func @transform_0(%arg0: i32, %arg1: i32, %arg2: i32) -> (i32, i32) {
    %c0_i32 = arith.constant 0 : i32
    return %arg0, %arg2 : i32, i32
  }
  func.func @transform_1(%arg0: i32, %arg1: i32, %arg2: i32) -> (i32, i32) {
    %c0_i32 = arith.constant 0 : i32
    return %arg2, %arg1 : i32, i32
  }
  func.func @transform_2(%arg0: i32, %arg1: i32, %arg2: i32) -> (i32, i32) {
    %c0_i32 = arith.constant 0 : i32
    %c0_i32_0 = arith.constant 0 : i32
    return %c0_i32, %arg1 : i32, i32
  }
  func.func @transform_3(%arg0: i32, %arg1: i32, %arg2: i32) -> (i32, i32) {
    %c0_i32 = arith.constant 0 : i32
    %c0_i32_0 = arith.constant 0 : i32
    return %c0_i32, %arg1 : i32, i32
  }
  func.func @transform_4(%arg0: i32, %arg1: i32, %arg2: i32) -> (i32, i32) {
    %c0_i32 = arith.constant 0 : i32
    return %arg0, %arg1 : i32, i32
  }
}

module attributes {stable_mosaic.version = 11 : i64} {
  func.func @kernel(%arg0: i32, %arg1: i32, %arg2: i32, %arg3: memref<8x384xbf16, #tpu.memory_space<vmem>>, %arg4: memref<384x256xbf16, #tpu.memory_space<vmem>>, %arg5: memref<1x256xf32, #tpu.memory_space<vmem>>, %arg6: memref<1x256xf32, #tpu.memory_space<vmem>>, %arg7: memref<8x256xbf16, #tpu.memory_space<vmem>>, %arg8: memref<8x256xbf16, #tpu.memory_space<vmem>>, %arg9: memref<8x256xf32, #tpu.memory_space<vmem>>) attributes {dimension_semantics = [#tpu.dimension_semantics<parallel>, #tpu.dimension_semantics<parallel>, #tpu.dimension_semantics<arbitrary>], iteration_bounds = array<i64: 1, 1, 6>, scalar_prefetch = 0 : i64, scratch_operands = 1 : i64, tpu.core_type = #tpu.core_type<tc>, window_params = [{transform_indices = @transform_0, window_bounds = array<i64: 8, 384>}, {transform_indices = @transform_1, window_bounds = array<i64: 384, 256>}, {transform_indices = @transform_2, window_bounds = array<i64: 1, 256>}, {transform_indices = @transform_3, window_bounds = array<i64: 1, 256>}, {transform_indices = @transform_4, window_bounds = array<i64: 8, 256>}, {transform_indices = @transform_5, window_bounds = array<i64: 8, 256>}]} {
    %c0_i32 = arith.constant 0 : i32
    %0 = arith.cmpi eq, %arg2, %c0_i32 : i32
    %1 = arith.extui %0 : i1 to i32
    %c0_i32_0 = arith.constant 0 : i32
    %2 = arith.cmpi ne, %1, %c0_i32_0 : i32
    scf.if %2 {
      %cst_9 = arith.constant 0.000000e+00 : f32
      %12 = vector.broadcast %cst_9 : f32 to vector<8x256xf32>
      %c0_10 = arith.constant 0 : index
      %c0_11 = arith.constant 0 : index
      %13 = vector.load %arg9[%c0_10, %c0_11] : memref<8x256xf32, #tpu.memory_space<vmem>>, vector<8x256xf32>
      tpu.vector_store %arg9[%c0_10, %c0_11], %12 {strides = array<i32>} : memref<8x256xf32, #tpu.memory_space<vmem>>, vector<8x256xf32>,
    } else {
    }
    %c0 = arith.constant 0 : index
    %c0_1 = arith.constant 0 : index
    %3 = vector.load %arg9[%c0, %c0_1] : memref<8x256xf32, #tpu.memory_space<vmem>>, vector<8x256xf32>
    %c0_2 = arith.constant 0 : index
    %c0_3 = arith.constant 0 : index
    %4 = vector.load %arg3[%c0_2, %c0_3] : memref<8x384xbf16, #tpu.memory_space<vmem>>, vector<8x384xbf16>
    %c0_4 = arith.constant 0 : index
    %c0_5 = arith.constant 0 : index
    %5 = vector.load %arg4[%c0_4, %c0_5] : memref<384x256xbf16, #tpu.memory_space<vmem>>, vector<384x256xbf16>
    %cst = arith.constant dense<0.000000e+00> : vector<8x256xf32>
    %6 = tpu.matmul %4, %5, %cst {dimension_numbers = #tpu.dot_dimension_numbers<[1], [0], [0], [1], [0, 0, 1, 1], [], []>} : vector<8x384xbf16>, vector<384x256xbf16>, vector<8x256xf32> -> vector<8x256xf32>
    %7 = arith.addf %3, %6 : vector<8x256xf32>
    %c0_6 = arith.constant 0 : index
    %c0_7 = arith.constant 0 : index
    %8 = vector.load %arg9[%c0_6, %c0_7] : memref<8x256xf32, #tpu.memory_space<vmem>>, vector<8x256xf32>
    tpu.vector_store %arg9[%c0_6, %c0_7], %7 {strides = array<i32>} : memref<8x256xf32, #tpu.memory_space<vmem>>, vector<8x256xf32>,
    %c5_i32 = arith.constant 5 : i32
    %9 = arith.cmpi eq, %arg2, %c5_i32 : i32
    %10 = arith.extui %9 : i1 to i32
    %c0_i32_8 = arith.constant 0 : i32
    %11 = arith.cmpi ne, %10, %c0_i32_8 : i32
    scf.if %11 {
      %c0_9 = arith.constant 0 : index
      %c0_10 = arith.constant 0 : index
      %12 = vector.load %arg9[%c0_9, %c0_10] : memref<8x256xf32, #tpu.memory_space<vmem>>, vector<8x256xf32>
      %c0_11 = arith.constant 0 : index
      %c0_12 = arith.constant 0 : index
      %13 = vector.load %arg5[%c0_11, %c0_12] : memref<1x256xf32, #tpu.memory_space<vmem>>, vector<1x256xf32>
      %14 = vector.broadcast %13 : vector<1x256xf32> to vector<8x256xf32>
      %15 = arith.mulf %12, %14 : vector<8x256xf32>
      %c0_13 = arith.constant 0 : index
      %c0_14 = arith.constant 0 : index
      %16 = vector.load %arg6[%c0_13, %c0_14] : memref<1x256xf32, #tpu.memory_space<vmem>>, vector<1x256xf32>
      %17 = vector.broadcast %16 : vector<1x256xf32> to vector<8x256xf32>
      %18 = arith.addf %15, %17 : vector<8x256xf32>
      %c0_15 = arith.constant 0 : index
      %c0_16 = arith.constant 0 : index
      %19 = vector.load %arg7[%c0_15, %c0_16] : memref<8x256xbf16, #tpu.memory_space<vmem>>, vector<8x256xbf16>
      %20 = arith.extf %19 : vector<8x256xbf16> to vector<8x256xf32>
      %21 = arith.addf %18, %20 : vector<8x256xf32>
      %cst_17 = arith.constant 0.000000e+00 : f32
      %22 = vector.broadcast %cst_17 : f32 to vector<8x256xf32>
      %23 = arith.maximumf %21, %22 : vector<8x256xf32>
      %24 = arith.truncf %23 : vector<8x256xf32> to vector<8x256xbf16>
      %c0_18 = arith.constant 0 : index
      %c0_19 = arith.constant 0 : index
      %25 = vector.load %arg8[%c0_18, %c0_19] : memref<8x256xbf16, #tpu.memory_space<vmem>>, vector<8x256xbf16>
      tpu.vector_store %arg8[%c0_18, %c0_19], %24 {strides = array<i32>} : memref<8x256xbf16, #tpu.memory_space<vmem>>, vector<8x256xbf16>,
    } else {
    }
    return
  }
  func.func @transform_0(%arg0: i32, %arg1: i32, %arg2: i32) -> (i32, i32) {
    %c0_i32 = arith.constant 0 : i32
    return %arg0, %arg2 : i32, i32
  }
  func.func @transform_1(%arg0: i32, %arg1: i32, %arg2: i32) -> (i32, i32) {
    %c0_i32 = arith.constant 0 : i32
    return %arg2, %arg1 : i32, i32
  }
  func.func @transform_2(%arg0: i32, %arg1: i32, %arg2: i32) -> (i32, i32) {
    %c0_i32 = arith.constant 0 : i32
    %c0_i32_0 = arith.constant 0 : i32
    return %c0_i32, %arg1 : i32, i32
  }
  func.func @transform_3(%arg0: i32, %arg1: i32, %arg2: i32) -> (i32, i32) {
    %c0_i32 = arith.constant 0 : i32
    %c0_i32_0 = arith.constant 0 : i32
    return %c0_i32, %arg1 : i32, i32
  }
  func.func @transform_4(%arg0: i32, %arg1: i32, %arg2: i32) -> (i32, i32) {
    %c0_i32 = arith.constant 0 : i32
    return %arg0, %arg1 : i32, i32
  }
  func.func @transform_5(%arg0: i32, %arg1: i32, %arg2: i32) -> (i32, i32) {
    %c0_i32 = arith.constant 0 : i32
    return %arg0, %arg1 : i32, i32
  }
}

module attributes {stable_mosaic.version = 11 : i64} {
  func.func @kernel(%arg0: i32, %arg1: i32, %arg2: i32, %arg3: memref<8x128xbf16, #tpu.memory_space<vmem>>, %arg4: memref<128x256xbf16, #tpu.memory_space<vmem>>, %arg5: memref<1x256xf32, #tpu.memory_space<vmem>>, %arg6: memref<1x256xf32, #tpu.memory_space<vmem>>, %arg7: memref<8x256xbf16, #tpu.memory_space<vmem>>, %arg8: memref<8x256xf32, #tpu.memory_space<vmem>>) attributes {dimension_semantics = [#tpu.dimension_semantics<parallel>, #tpu.dimension_semantics<parallel>, #tpu.dimension_semantics<arbitrary>], iteration_bounds = array<i64: 1, 1, 1>, scalar_prefetch = 0 : i64, scratch_operands = 1 : i64, tpu.core_type = #tpu.core_type<tc>, window_params = [{transform_indices = @transform_0, window_bounds = array<i64: 8, 128>}, {transform_indices = @transform_1, window_bounds = array<i64: 128, 256>}, {transform_indices = @transform_2, window_bounds = array<i64: 1, 256>}, {transform_indices = @transform_3, window_bounds = array<i64: 1, 256>}, {transform_indices = @transform_4, window_bounds = array<i64: 8, 256>}]} {
    %c0_i32 = arith.constant 0 : i32
    %0 = arith.cmpi eq, %arg2, %c0_i32 : i32
    %1 = arith.extui %0 : i1 to i32
    %c0_i32_0 = arith.constant 0 : i32
    %2 = arith.cmpi ne, %1, %c0_i32_0 : i32
    scf.if %2 {
      %cst_10 = arith.constant 0.000000e+00 : f32
      %12 = vector.broadcast %cst_10 : f32 to vector<8x256xf32>
      %c0_11 = arith.constant 0 : index
      %c0_12 = arith.constant 0 : index
      %13 = vector.load %arg8[%c0_11, %c0_12] : memref<8x256xf32, #tpu.memory_space<vmem>>, vector<8x256xf32>
      tpu.vector_store %arg8[%c0_11, %c0_12], %12 {strides = array<i32>} : memref<8x256xf32, #tpu.memory_space<vmem>>, vector<8x256xf32>,
    } else {
    }
    %c0 = arith.constant 0 : index
    %c0_1 = arith.constant 0 : index
    %3 = vector.load %arg8[%c0, %c0_1] : memref<8x256xf32, #tpu.memory_space<vmem>>, vector<8x256xf32>
    %c0_2 = arith.constant 0 : index
    %c0_3 = arith.constant 0 : index
    %4 = vector.load %arg3[%c0_2, %c0_3] : memref<8x128xbf16, #tpu.memory_space<vmem>>, vector<8x128xbf16>
    %c0_4 = arith.constant 0 : index
    %c0_5 = arith.constant 0 : index
    %5 = vector.load %arg4[%c0_4, %c0_5] : memref<128x256xbf16, #tpu.memory_space<vmem>>, vector<128x256xbf16>
    %cst = arith.constant dense<0.000000e+00> : vector<8x256xf32>
    %6 = tpu.matmul %4, %5, %cst {dimension_numbers = #tpu.dot_dimension_numbers<[1], [0], [0], [1], [0, 0, 1, 1], [], []>} : vector<8x128xbf16>, vector<128x256xbf16>, vector<8x256xf32> -> vector<8x256xf32>
    %7 = arith.addf %3, %6 : vector<8x256xf32>
    %c0_6 = arith.constant 0 : index
    %c0_7 = arith.constant 0 : index
    %8 = vector.load %arg8[%c0_6, %c0_7] : memref<8x256xf32, #tpu.memory_space<vmem>>, vector<8x256xf32>
    tpu.vector_store %arg8[%c0_6, %c0_7], %7 {strides = array<i32>} : memref<8x256xf32, #tpu.memory_space<vmem>>, vector<8x256xf32>,
    %c0_i32_8 = arith.constant 0 : i32
    %9 = arith.cmpi eq, %arg2, %c0_i32_8 : i32
    %10 = arith.extui %9 : i1 to i32
    %c0_i32_9 = arith.constant 0 : i32
    %11 = arith.cmpi ne, %10, %c0_i32_9 : i32
    scf.if %11 {
      %c0_10 = arith.constant 0 : index
      %c0_11 = arith.constant 0 : index
      %12 = vector.load %arg8[%c0_10, %c0_11] : memref<8x256xf32, #tpu.memory_space<vmem>>, vector<8x256xf32>
      %c0_12 = arith.constant 0 : index
      %c0_13 = arith.constant 0 : index
      %13 = vector.load %arg5[%c0_12, %c0_13] : memref<1x256xf32, #tpu.memory_space<vmem>>, vector<1x256xf32>
      %14 = vector.broadcast %13 : vector<1x256xf32> to vector<8x256xf32>
      %15 = arith.mulf %12, %14 : vector<8x256xf32>
      %c0_14 = arith.constant 0 : index
      %c0_15 = arith.constant 0 : index
      %16 = vector.load %arg6[%c0_14, %c0_15] : memref<1x256xf32, #tpu.memory_space<vmem>>, vector<1x256xf32>
      %17 = vector.broadcast %16 : vector<1x256xf32> to vector<8x256xf32>
      %18 = arith.addf %15, %17 : vector<8x256xf32>
      %19 = arith.truncf %18 : vector<8x256xf32> to vector<8x256xbf16>
      %c0_16 = arith.constant 0 : index
      %c0_17 = arith.constant 0 : index
      %20 = vector.load %arg7[%c0_16, %c0_17] : memref<8x256xbf16, #tpu.memory_space<vmem>>, vector<8x256xbf16>
      tpu.vector_store %arg7[%c0_16, %c0_17], %19 {strides = array<i32>} : memref<8x256xbf16, #tpu.memory_space<vmem>>, vector<8x256xbf16>,
    } else {
    }
    return
  }
  func.func @transform_0(%arg0: i32, %arg1: i32, %arg2: i32) -> (i32, i32) {
    %c0_i32 = arith.constant 0 : i32
    return %arg0, %arg2 : i32, i32
  }
  func.func @transform_1(%arg0: i32, %arg1: i32, %arg2: i32) -> (i32, i32) {
    %c0_i32 = arith.constant 0 : i32
    return %arg2, %arg1 : i32, i32
  }
  func.func @transform_2(%arg0: i32, %arg1: i32, %arg2: i32) -> (i32, i32) {
    %c0_i32 = arith.constant 0 : i32
    %c0_i32_0 = arith.constant 0 : i32
    return %c0_i32, %arg1 : i32, i32
  }
  func.func @transform_3(%arg0: i32, %arg1: i32, %arg2: i32) -> (i32, i32) {
    %c0_i32 = arith.constant 0 : i32
    %c0_i32_0 = arith.constant 0 : i32
    return %c0_i32, %arg1 : i32, i32
  }
  func.func @transform_4(%arg0: i32, %arg1: i32, %arg2: i32) -> (i32, i32) {
    %c0_i32 = arith.constant 0 : i32
    return %arg0, %arg1 : i32, i32
  }
}

module attributes {stable_mosaic.version = 11 : i64} {
  func.func @kernel(%arg0: i32, %arg1: i32, %arg2: i32, %arg3: memref<8x384xbf16, #tpu.memory_space<vmem>>, %arg4: memref<384x256xbf16, #tpu.memory_space<vmem>>, %arg5: memref<1x256xf32, #tpu.memory_space<vmem>>, %arg6: memref<1x256xf32, #tpu.memory_space<vmem>>, %arg7: memref<8x256xbf16, #tpu.memory_space<vmem>>, %arg8: memref<8x256xf32, #tpu.memory_space<vmem>>) attributes {dimension_semantics = [#tpu.dimension_semantics<parallel>, #tpu.dimension_semantics<parallel>, #tpu.dimension_semantics<arbitrary>], iteration_bounds = array<i64: 1, 1, 6>, scalar_prefetch = 0 : i64, scratch_operands = 1 : i64, tpu.core_type = #tpu.core_type<tc>, window_params = [{transform_indices = @transform_0, window_bounds = array<i64: 8, 384>}, {transform_indices = @transform_1, window_bounds = array<i64: 384, 256>}, {transform_indices = @transform_2, window_bounds = array<i64: 1, 256>}, {transform_indices = @transform_3, window_bounds = array<i64: 1, 256>}, {transform_indices = @transform_4, window_bounds = array<i64: 8, 256>}]} {
    %c0_i32 = arith.constant 0 : i32
    %0 = arith.cmpi eq, %arg2, %c0_i32 : i32
    %1 = arith.extui %0 : i1 to i32
    %c0_i32_0 = arith.constant 0 : i32
    %2 = arith.cmpi ne, %1, %c0_i32_0 : i32
    scf.if %2 {
      %cst_9 = arith.constant 0.000000e+00 : f32
      %12 = vector.broadcast %cst_9 : f32 to vector<8x256xf32>
      %c0_10 = arith.constant 0 : index
      %c0_11 = arith.constant 0 : index
      %13 = vector.load %arg8[%c0_10, %c0_11] : memref<8x256xf32, #tpu.memory_space<vmem>>, vector<8x256xf32>
      tpu.vector_store %arg8[%c0_10, %c0_11], %12 {strides = array<i32>} : memref<8x256xf32, #tpu.memory_space<vmem>>, vector<8x256xf32>,
    } else {
    }
    %c0 = arith.constant 0 : index
    %c0_1 = arith.constant 0 : index
    %3 = vector.load %arg8[%c0, %c0_1] : memref<8x256xf32, #tpu.memory_space<vmem>>, vector<8x256xf32>
    %c0_2 = arith.constant 0 : index
    %c0_3 = arith.constant 0 : index
    %4 = vector.load %arg3[%c0_2, %c0_3] : memref<8x384xbf16, #tpu.memory_space<vmem>>, vector<8x384xbf16>
    %c0_4 = arith.constant 0 : index
    %c0_5 = arith.constant 0 : index
    %5 = vector.load %arg4[%c0_4, %c0_5] : memref<384x256xbf16, #tpu.memory_space<vmem>>, vector<384x256xbf16>
    %cst = arith.constant dense<0.000000e+00> : vector<8x256xf32>
    %6 = tpu.matmul %4, %5, %cst {dimension_numbers = #tpu.dot_dimension_numbers<[1], [0], [0], [1], [0, 0, 1, 1], [], []>} : vector<8x384xbf16>, vector<384x256xbf16>, vector<8x256xf32> -> vector<8x256xf32>
    %7 = arith.addf %3, %6 : vector<8x256xf32>
    %c0_6 = arith.constant 0 : index
    %c0_7 = arith.constant 0 : index
    %8 = vector.load %arg8[%c0_6, %c0_7] : memref<8x256xf32, #tpu.memory_space<vmem>>, vector<8x256xf32>
    tpu.vector_store %arg8[%c0_6, %c0_7], %7 {strides = array<i32>} : memref<8x256xf32, #tpu.memory_space<vmem>>, vector<8x256xf32>,
    %c5_i32 = arith.constant 5 : i32
    %9 = arith.cmpi eq, %arg2, %c5_i32 : i32
    %10 = arith.extui %9 : i1 to i32
    %c0_i32_8 = arith.constant 0 : i32
    %11 = arith.cmpi ne, %10, %c0_i32_8 : i32
    scf.if %11 {
      %c0_9 = arith.constant 0 : index
      %c0_10 = arith.constant 0 : index
      %12 = vector.load %arg8[%c0_9, %c0_10] : memref<8x256xf32, #tpu.memory_space<vmem>>, vector<8x256xf32>
      %c0_11 = arith.constant 0 : index
      %c0_12 = arith.constant 0 : index
      %13 = vector.load %arg5[%c0_11, %c0_12] : memref<1x256xf32, #tpu.memory_space<vmem>>, vector<1x256xf32>
      %14 = vector.broadcast %13 : vector<1x256xf32> to vector<8x256xf32>
      %15 = arith.mulf %12, %14 : vector<8x256xf32>
      %c0_13 = arith.constant 0 : index
      %c0_14 = arith.constant 0 : index
      %16 = vector.load %arg6[%c0_13, %c0_14] : memref<1x256xf32, #tpu.memory_space<vmem>>, vector<1x256xf32>
      %17 = vector.broadcast %16 : vector<1x256xf32> to vector<8x256xf32>
      %18 = arith.addf %15, %17 : vector<8x256xf32>
      %cst_15 = arith.constant 0.000000e+00 : f32
      %19 = vector.broadcast %cst_15 : f32 to vector<8x256xf32>
      %20 = arith.maximumf %18, %19 : vector<8x256xf32>
      %21 = arith.truncf %20 : vector<8x256xf32> to vector<8x256xbf16>
      %c0_16 = arith.constant 0 : index
      %c0_17 = arith.constant 0 : index
      %22 = vector.load %arg7[%c0_16, %c0_17] : memref<8x256xbf16, #tpu.memory_space<vmem>>, vector<8x256xbf16>
      tpu.vector_store %arg7[%c0_16, %c0_17], %21 {strides = array<i32>} : memref<8x256xbf16, #tpu.memory_space<vmem>>, vector<8x256xbf16>,
    } else {
    }
    return
  }
  func.func @transform_0(%arg0: i32, %arg1: i32, %arg2: i32) -> (i32, i32) {
    %c0_i32 = arith.constant 0 : i32
    return %arg0, %arg2 : i32, i32
  }
  func.func @transform_1(%arg0: i32, %arg1: i32, %arg2: i32) -> (i32, i32) {
    %c0_i32 = arith.constant 0 : i32
    return %arg2, %arg1 : i32, i32
  }
  func.func @transform_2(%arg0: i32, %arg1: i32, %arg2: i32) -> (i32, i32) {
    %c0_i32 = arith.constant 0 : i32
    %c0_i32_0 = arith.constant 0 : i32
    return %c0_i32, %arg1 : i32, i32
  }
  func.func @transform_3(%arg0: i32, %arg1: i32, %arg2: i32) -> (i32, i32) {
    %c0_i32 = arith.constant 0 : i32
    %c0_i32_0 = arith.constant 0 : i32
    return %c0_i32, %arg1 : i32, i32
  }
  func.func @transform_4(%arg0: i32, %arg1: i32, %arg2: i32) -> (i32, i32) {
    %c0_i32 = arith.constant 0 : i32
    return %arg0, %arg1 : i32, i32
  }
}

module attributes {stable_mosaic.version = 11 : i64} {
  func.func @kernel(%arg0: i32, %arg1: i32, %arg2: i32, %arg3: memref<8x384xbf16, #tpu.memory_space<vmem>>, %arg4: memref<384x256xbf16, #tpu.memory_space<vmem>>, %arg5: memref<1x256xf32, #tpu.memory_space<vmem>>, %arg6: memref<1x256xf32, #tpu.memory_space<vmem>>, %arg7: memref<8x256xbf16, #tpu.memory_space<vmem>>, %arg8: memref<8x256xf32, #tpu.memory_space<vmem>>) attributes {dimension_semantics = [#tpu.dimension_semantics<parallel>, #tpu.dimension_semantics<parallel>, #tpu.dimension_semantics<arbitrary>], iteration_bounds = array<i64: 1, 2, 6>, scalar_prefetch = 0 : i64, scratch_operands = 1 : i64, tpu.core_type = #tpu.core_type<tc>, window_params = [{transform_indices = @transform_0, window_bounds = array<i64: 8, 384>}, {transform_indices = @transform_1, window_bounds = array<i64: 384, 256>}, {transform_indices = @transform_2, window_bounds = array<i64: 1, 256>}, {transform_indices = @transform_3, window_bounds = array<i64: 1, 256>}, {transform_indices = @transform_4, window_bounds = array<i64: 8, 256>}]} {
    %c0_i32 = arith.constant 0 : i32
    %0 = arith.cmpi eq, %arg2, %c0_i32 : i32
    %1 = arith.extui %0 : i1 to i32
    %c0_i32_0 = arith.constant 0 : i32
    %2 = arith.cmpi ne, %1, %c0_i32_0 : i32
    scf.if %2 {
      %cst_9 = arith.constant 0.000000e+00 : f32
      %12 = vector.broadcast %cst_9 : f32 to vector<8x256xf32>
      %c0_10 = arith.constant 0 : index
      %c0_11 = arith.constant 0 : index
      %13 = vector.load %arg8[%c0_10, %c0_11] : memref<8x256xf32, #tpu.memory_space<vmem>>, vector<8x256xf32>
      tpu.vector_store %arg8[%c0_10, %c0_11], %12 {strides = array<i32>} : memref<8x256xf32, #tpu.memory_space<vmem>>, vector<8x256xf32>,
    } else {
    }
    %c0 = arith.constant 0 : index
    %c0_1 = arith.constant 0 : index
    %3 = vector.load %arg8[%c0, %c0_1] : memref<8x256xf32, #tpu.memory_space<vmem>>, vector<8x256xf32>
    %c0_2 = arith.constant 0 : index
    %c0_3 = arith.constant 0 : index
    %4 = vector.load %arg3[%c0_2, %c0_3] : memref<8x384xbf16, #tpu.memory_space<vmem>>, vector<8x384xbf16>
    %c0_4 = arith.constant 0 : index
    %c0_5 = arith.constant 0 : index
    %5 = vector.load %arg4[%c0_4, %c0_5] : memref<384x256xbf16, #tpu.memory_space<vmem>>, vector<384x256xbf16>
    %cst = arith.constant dense<0.000000e+00> : vector<8x256xf32>
    %6 = tpu.matmul %4, %5, %cst {dimension_numbers = #tpu.dot_dimension_numbers<[1], [0], [0], [1], [0, 0, 1, 1], [], []>} : vector<8x384xbf16>, vector<384x256xbf16>, vector<8x256xf32> -> vector<8x256xf32>
    %7 = arith.addf %3, %6 : vector<8x256xf32>
    %c0_6 = arith.constant 0 : index
    %c0_7 = arith.constant 0 : index
    %8 = vector.load %arg8[%c0_6, %c0_7] : memref<8x256xf32, #tpu.memory_space<vmem>>, vector<8x256xf32>
    tpu.vector_store %arg8[%c0_6, %c0_7], %7 {strides = array<i32>} : memref<8x256xf32, #tpu.memory_space<vmem>>, vector<8x256xf32>,
    %c5_i32 = arith.constant 5 : i32
    %9 = arith.cmpi eq, %arg2, %c5_i32 : i32
    %10 = arith.extui %9 : i1 to i32
    %c0_i32_8 = arith.constant 0 : i32
    %11 = arith.cmpi ne, %10, %c0_i32_8 : i32
    scf.if %11 {
      %c0_9 = arith.constant 0 : index
      %c0_10 = arith.constant 0 : index
      %12 = vector.load %arg8[%c0_9, %c0_10] : memref<8x256xf32, #tpu.memory_space<vmem>>, vector<8x256xf32>
      %c0_11 = arith.constant 0 : index
      %c0_12 = arith.constant 0 : index
      %13 = vector.load %arg5[%c0_11, %c0_12] : memref<1x256xf32, #tpu.memory_space<vmem>>, vector<1x256xf32>
      %14 = vector.broadcast %13 : vector<1x256xf32> to vector<8x256xf32>
      %15 = arith.mulf %12, %14 : vector<8x256xf32>
      %c0_13 = arith.constant 0 : index
      %c0_14 = arith.constant 0 : index
      %16 = vector.load %arg6[%c0_13, %c0_14] : memref<1x256xf32, #tpu.memory_space<vmem>>, vector<1x256xf32>
      %17 = vector.broadcast %16 : vector<1x256xf32> to vector<8x256xf32>
      %18 = arith.addf %15, %17 : vector<8x256xf32>
      %cst_15 = arith.constant 0.000000e+00 : f32
      %19 = vector.broadcast %cst_15 : f32 to vector<8x256xf32>
      %20 = arith.maximumf %18, %19 : vector<8x256xf32>
      %21 = arith.truncf %20 : vector<8x256xf32> to vector<8x256xbf16>
      %c0_16 = arith.constant 0 : index
      %c0_17 = arith.constant 0 : index
      %22 = vector.load %arg7[%c0_16, %c0_17] : memref<8x256xbf16, #tpu.memory_space<vmem>>, vector<8x256xbf16>
      tpu.vector_store %arg7[%c0_16, %c0_17], %21 {strides = array<i32>} : memref<8x256xbf16, #tpu.memory_space<vmem>>, vector<8x256xbf16>,
    } else {
    }
    return
  }
  func.func @transform_0(%arg0: i32, %arg1: i32, %arg2: i32) -> (i32, i32) {
    %c0_i32 = arith.constant 0 : i32
    return %arg0, %arg2 : i32, i32
  }
  func.func @transform_1(%arg0: i32, %arg1: i32, %arg2: i32) -> (i32, i32) {
    %c0_i32 = arith.constant 0 : i32
    return %arg2, %arg1 : i32, i32
  }
  func.func @transform_2(%arg0: i32, %arg1: i32, %arg2: i32) -> (i32, i32) {
    %c0_i32 = arith.constant 0 : i32
    %c0_i32_0 = arith.constant 0 : i32
    return %c0_i32, %arg1 : i32, i32
  }
  func.func @transform_3(%arg0: i32, %arg1: i32, %arg2: i32) -> (i32, i32) {
    %c0_i32 = arith.constant 0 : i32
    %c0_i32_0 = arith.constant 0 : i32
    return %c0_i32, %arg1 : i32, i32
  }
  func.func @transform_4(%arg0: i32, %arg1: i32, %arg2: i32) -> (i32, i32) {
    %c0_i32 = arith.constant 0 : i32
    return %arg0, %arg1 : i32, i32
  }
}

module attributes {stable_mosaic.version = 11 : i64} {
  func.func @kernel(%arg0: i32, %arg1: i32, %arg2: i32, %arg3: memref<8x512xbf16, #tpu.memory_space<vmem>>, %arg4: memref<512x256xbf16, #tpu.memory_space<vmem>>, %arg5: memref<1x256xf32, #tpu.memory_space<vmem>>, %arg6: memref<1x256xf32, #tpu.memory_space<vmem>>, %arg7: memref<8x256xbf16, #tpu.memory_space<vmem>>, %arg8: memref<8x256xbf16, #tpu.memory_space<vmem>>, %arg9: memref<8x256xf32, #tpu.memory_space<vmem>>) attributes {dimension_semantics = [#tpu.dimension_semantics<parallel>, #tpu.dimension_semantics<parallel>, #tpu.dimension_semantics<arbitrary>], iteration_bounds = array<i64: 1, 2, 9>, scalar_prefetch = 0 : i64, scratch_operands = 1 : i64, tpu.core_type = #tpu.core_type<tc>, window_params = [{transform_indices = @transform_0, window_bounds = array<i64: 8, 512>}, {transform_indices = @transform_1, window_bounds = array<i64: 512, 256>}, {transform_indices = @transform_2, window_bounds = array<i64: 1, 256>}, {transform_indices = @transform_3, window_bounds = array<i64: 1, 256>}, {transform_indices = @transform_4, window_bounds = array<i64: 8, 256>}, {transform_indices = @transform_5, window_bounds = array<i64: 8, 256>}]} {
    %c0_i32 = arith.constant 0 : i32
    %0 = arith.cmpi eq, %arg2, %c0_i32 : i32
    %1 = arith.extui %0 : i1 to i32
    %c0_i32_0 = arith.constant 0 : i32
    %2 = arith.cmpi ne, %1, %c0_i32_0 : i32
    scf.if %2 {
      %cst_9 = arith.constant 0.000000e+00 : f32
      %12 = vector.broadcast %cst_9 : f32 to vector<8x256xf32>
      %c0_10 = arith.constant 0 : index
      %c0_11 = arith.constant 0 : index
      %13 = vector.load %arg9[%c0_10, %c0_11] : memref<8x256xf32, #tpu.memory_space<vmem>>, vector<8x256xf32>
      tpu.vector_store %arg9[%c0_10, %c0_11], %12 {strides = array<i32>} : memref<8x256xf32, #tpu.memory_space<vmem>>, vector<8x256xf32>,
    } else {
    }
    %c0 = arith.constant 0 : index
    %c0_1 = arith.constant 0 : index
    %3 = vector.load %arg9[%c0, %c0_1] : memref<8x256xf32, #tpu.memory_space<vmem>>, vector<8x256xf32>
    %c0_2 = arith.constant 0 : index
    %c0_3 = arith.constant 0 : index
    %4 = vector.load %arg3[%c0_2, %c0_3] : memref<8x512xbf16, #tpu.memory_space<vmem>>, vector<8x512xbf16>
    %c0_4 = arith.constant 0 : index
    %c0_5 = arith.constant 0 : index
    %5 = vector.load %arg4[%c0_4, %c0_5] : memref<512x256xbf16, #tpu.memory_space<vmem>>, vector<512x256xbf16>
    %cst = arith.constant dense<0.000000e+00> : vector<8x256xf32>
    %6 = tpu.matmul %4, %5, %cst {dimension_numbers = #tpu.dot_dimension_numbers<[1], [0], [0], [1], [0, 0, 1, 1], [], []>} : vector<8x512xbf16>, vector<512x256xbf16>, vector<8x256xf32> -> vector<8x256xf32>
    %7 = arith.addf %3, %6 : vector<8x256xf32>
    %c0_6 = arith.constant 0 : index
    %c0_7 = arith.constant 0 : index
    %8 = vector.load %arg9[%c0_6, %c0_7] : memref<8x256xf32, #tpu.memory_space<vmem>>, vector<8x256xf32>
    tpu.vector_store %arg9[%c0_6, %c0_7], %7 {strides = array<i32>} : memref<8x256xf32, #tpu.memory_space<vmem>>, vector<8x256xf32>,
    %c8_i32 = arith.constant 8 : i32
    %9 = arith.cmpi eq, %arg2, %c8_i32 : i32
    %10 = arith.extui %9 : i1 to i32
    %c0_i32_8 = arith.constant 0 : i32
    %11 = arith.cmpi ne, %10, %c0_i32_8 : i32
    scf.if %11 {
      %c0_9 = arith.constant 0 : index
      %c0_10 = arith.constant 0 : index
      %12 = vector.load %arg9[%c0_9, %c0_10] : memref<8x256xf32, #tpu.memory_space<vmem>>, vector<8x256xf32>
      %c0_11 = arith.constant 0 : index
      %c0_12 = arith.constant 0 : index
      %13 = vector.load %arg5[%c0_11, %c0_12] : memref<1x256xf32, #tpu.memory_space<vmem>>, vector<1x256xf32>
      %14 = vector.broadcast %13 : vector<1x256xf32> to vector<8x256xf32>
      %15 = arith.mulf %12, %14 : vector<8x256xf32>
      %c0_13 = arith.constant 0 : index
      %c0_14 = arith.constant 0 : index
      %16 = vector.load %arg6[%c0_13, %c0_14] : memref<1x256xf32, #tpu.memory_space<vmem>>, vector<1x256xf32>
      %17 = vector.broadcast %16 : vector<1x256xf32> to vector<8x256xf32>
      %18 = arith.addf %15, %17 : vector<8x256xf32>
      %c0_15 = arith.constant 0 : index
      %c0_16 = arith.constant 0 : index
      %19 = vector.load %arg7[%c0_15, %c0_16] : memref<8x256xbf16, #tpu.memory_space<vmem>>, vector<8x256xbf16>
      %20 = arith.extf %19 : vector<8x256xbf16> to vector<8x256xf32>
      %21 = arith.addf %18, %20 : vector<8x256xf32>
      %cst_17 = arith.constant 0.000000e+00 : f32
      %22 = vector.broadcast %cst_17 : f32 to vector<8x256xf32>
      %23 = arith.maximumf %21, %22 : vector<8x256xf32>
      %24 = arith.truncf %23 : vector<8x256xf32> to vector<8x256xbf16>
      %c0_18 = arith.constant 0 : index
      %c0_19 = arith.constant 0 : index
      %25 = vector.load %arg8[%c0_18, %c0_19] : memref<8x256xbf16, #tpu.memory_space<vmem>>, vector<8x256xbf16>
      tpu.vector_store %arg8[%c0_18, %c0_19], %24 {strides = array<i32>} : memref<8x256xbf16, #tpu.memory_space<vmem>>, vector<8x256xbf16>,
    } else {
    }
    return
  }
  func.func @transform_0(%arg0: i32, %arg1: i32, %arg2: i32) -> (i32, i32) {
    %c0_i32 = arith.constant 0 : i32
    return %arg0, %arg2 : i32, i32
  }
  func.func @transform_1(%arg0: i32, %arg1: i32, %arg2: i32) -> (i32, i32) {
    %c0_i32 = arith.constant 0 : i32
    return %arg2, %arg1 : i32, i32
  }
  func.func @transform_2(%arg0: i32, %arg1: i32, %arg2: i32) -> (i32, i32) {
    %c0_i32 = arith.constant 0 : i32
    %c0_i32_0 = arith.constant 0 : i32
    return %c0_i32, %arg1 : i32, i32
  }
  func.func @transform_3(%arg0: i32, %arg1: i32, %arg2: i32) -> (i32, i32) {
    %c0_i32 = arith.constant 0 : i32
    %c0_i32_0 = arith.constant 0 : i32
    return %c0_i32, %arg1 : i32, i32
  }
  func.func @transform_4(%arg0: i32, %arg1: i32, %arg2: i32) -> (i32, i32) {
    %c0_i32 = arith.constant 0 : i32
    return %arg0, %arg1 : i32, i32
  }
  func.func @transform_5(%arg0: i32, %arg1: i32, %arg2: i32) -> (i32, i32) {
    %c0_i32 = arith.constant 0 : i32
    return %arg0, %arg1 : i32, i32
  }
}

module attributes {stable_mosaic.version = 11 : i64} {
  func.func @kernel(%arg0: i32, %arg1: i32, %arg2: i32, %arg3: memref<8x256xbf16, #tpu.memory_space<vmem>>, %arg4: memref<256x256xbf16, #tpu.memory_space<vmem>>, %arg5: memref<1x256xf32, #tpu.memory_space<vmem>>, %arg6: memref<1x256xf32, #tpu.memory_space<vmem>>, %arg7: memref<8x256xbf16, #tpu.memory_space<vmem>>, %arg8: memref<8x256xf32, #tpu.memory_space<vmem>>) attributes {dimension_semantics = [#tpu.dimension_semantics<parallel>, #tpu.dimension_semantics<parallel>, #tpu.dimension_semantics<arbitrary>], iteration_bounds = array<i64: 1, 2, 1>, scalar_prefetch = 0 : i64, scratch_operands = 1 : i64, tpu.core_type = #tpu.core_type<tc>, window_params = [{transform_indices = @transform_0, window_bounds = array<i64: 8, 256>}, {transform_indices = @transform_1, window_bounds = array<i64: 256, 256>}, {transform_indices = @transform_2, window_bounds = array<i64: 1, 256>}, {transform_indices = @transform_3, window_bounds = array<i64: 1, 256>}, {transform_indices = @transform_4, window_bounds = array<i64: 8, 256>}]} {
    %c0_i32 = arith.constant 0 : i32
    %0 = arith.cmpi eq, %arg2, %c0_i32 : i32
    %1 = arith.extui %0 : i1 to i32
    %c0_i32_0 = arith.constant 0 : i32
    %2 = arith.cmpi ne, %1, %c0_i32_0 : i32
    scf.if %2 {
      %cst_10 = arith.constant 0.000000e+00 : f32
      %12 = vector.broadcast %cst_10 : f32 to vector<8x256xf32>
      %c0_11 = arith.constant 0 : index
      %c0_12 = arith.constant 0 : index
      %13 = vector.load %arg8[%c0_11, %c0_12] : memref<8x256xf32, #tpu.memory_space<vmem>>, vector<8x256xf32>
      tpu.vector_store %arg8[%c0_11, %c0_12], %12 {strides = array<i32>} : memref<8x256xf32, #tpu.memory_space<vmem>>, vector<8x256xf32>,
    } else {
    }
    %c0 = arith.constant 0 : index
    %c0_1 = arith.constant 0 : index
    %3 = vector.load %arg8[%c0, %c0_1] : memref<8x256xf32, #tpu.memory_space<vmem>>, vector<8x256xf32>
    %c0_2 = arith.constant 0 : index
    %c0_3 = arith.constant 0 : index
    %4 = vector.load %arg3[%c0_2, %c0_3] : memref<8x256xbf16, #tpu.memory_space<vmem>>, vector<8x256xbf16>
    %c0_4 = arith.constant 0 : index
    %c0_5 = arith.constant 0 : index
    %5 = vector.load %arg4[%c0_4, %c0_5] : memref<256x256xbf16, #tpu.memory_space<vmem>>, vector<256x256xbf16>
    %cst = arith.constant dense<0.000000e+00> : vector<8x256xf32>
    %6 = tpu.matmul %4, %5, %cst {dimension_numbers = #tpu.dot_dimension_numbers<[1], [0], [0], [1], [0, 0, 1, 1], [], []>} : vector<8x256xbf16>, vector<256x256xbf16>, vector<8x256xf32> -> vector<8x256xf32>
    %7 = arith.addf %3, %6 : vector<8x256xf32>
    %c0_6 = arith.constant 0 : index
    %c0_7 = arith.constant 0 : index
    %8 = vector.load %arg8[%c0_6, %c0_7] : memref<8x256xf32, #tpu.memory_space<vmem>>, vector<8x256xf32>
    tpu.vector_store %arg8[%c0_6, %c0_7], %7 {strides = array<i32>} : memref<8x256xf32, #tpu.memory_space<vmem>>, vector<8x256xf32>,
    %c0_i32_8 = arith.constant 0 : i32
    %9 = arith.cmpi eq, %arg2, %c0_i32_8 : i32
    %10 = arith.extui %9 : i1 to i32
    %c0_i32_9 = arith.constant 0 : i32
    %11 = arith.cmpi ne, %10, %c0_i32_9 : i32
    scf.if %11 {
      %c0_10 = arith.constant 0 : index
      %c0_11 = arith.constant 0 : index
      %12 = vector.load %arg8[%c0_10, %c0_11] : memref<8x256xf32, #tpu.memory_space<vmem>>, vector<8x256xf32>
      %c0_12 = arith.constant 0 : index
      %c0_13 = arith.constant 0 : index
      %13 = vector.load %arg5[%c0_12, %c0_13] : memref<1x256xf32, #tpu.memory_space<vmem>>, vector<1x256xf32>
      %14 = vector.broadcast %13 : vector<1x256xf32> to vector<8x256xf32>
      %15 = arith.mulf %12, %14 : vector<8x256xf32>
      %c0_14 = arith.constant 0 : index
      %c0_15 = arith.constant 0 : index
      %16 = vector.load %arg6[%c0_14, %c0_15] : memref<1x256xf32, #tpu.memory_space<vmem>>, vector<1x256xf32>
      %17 = vector.broadcast %16 : vector<1x256xf32> to vector<8x256xf32>
      %18 = arith.addf %15, %17 : vector<8x256xf32>
      %19 = arith.truncf %18 : vector<8x256xf32> to vector<8x256xbf16>
      %c0_16 = arith.constant 0 : index
      %c0_17 = arith.constant 0 : index
      %20 = vector.load %arg7[%c0_16, %c0_17] : memref<8x256xbf16, #tpu.memory_space<vmem>>, vector<8x256xbf16>
      tpu.vector_store %arg7[%c0_16, %c0_17], %19 {strides = array<i32>} : memref<8x256xbf16, #tpu.memory_space<vmem>>, vector<8x256xbf16>,
    } else {
    }
    return
  }
  func.func @transform_0(%arg0: i32, %arg1: i32, %arg2: i32) -> (i32, i32) {
    %c0_i32 = arith.constant 0 : i32
    return %arg0, %arg2 : i32, i32
  }
  func.func @transform_1(%arg0: i32, %arg1: i32, %arg2: i32) -> (i32, i32) {
    %c0_i32 = arith.constant 0 : i32
    return %arg2, %arg1 : i32, i32
  }
  func.func @transform_2(%arg0: i32, %arg1: i32, %arg2: i32) -> (i32, i32) {
    %c0_i32 = arith.constant 0 : i32
    %c0_i32_0 = arith.constant 0 : i32
    return %c0_i32, %arg1 : i32, i32
  }
  func.func @transform_3(%arg0: i32, %arg1: i32, %arg2: i32) -> (i32, i32) {
    %c0_i32 = arith.constant 0 : i32
    %c0_i32_0 = arith.constant 0 : i32
    return %c0_i32, %arg1 : i32, i32
  }
  func.func @transform_4(%arg0: i32, %arg1: i32, %arg2: i32) -> (i32, i32) {
    %c0_i32 = arith.constant 0 : i32
    return %arg0, %arg1 : i32, i32
  }
}

module attributes {stable_mosaic.version = 11 : i64} {
  func.func @kernel(%arg0: i32, %arg1: i32, %arg2: i32, %arg3: memref<8x512xbf16, #tpu.memory_space<vmem>>, %arg4: memref<512x256xbf16, #tpu.memory_space<vmem>>, %arg5: memref<1x256xf32, #tpu.memory_space<vmem>>, %arg6: memref<1x256xf32, #tpu.memory_space<vmem>>, %arg7: memref<8x256xbf16, #tpu.memory_space<vmem>>, %arg8: memref<8x256xf32, #tpu.memory_space<vmem>>) attributes {dimension_semantics = [#tpu.dimension_semantics<parallel>, #tpu.dimension_semantics<parallel>, #tpu.dimension_semantics<arbitrary>], iteration_bounds = array<i64: 1, 2, 9>, scalar_prefetch = 0 : i64, scratch_operands = 1 : i64, tpu.core_type = #tpu.core_type<tc>, window_params = [{transform_indices = @transform_0, window_bounds = array<i64: 8, 512>}, {transform_indices = @transform_1, window_bounds = array<i64: 512, 256>}, {transform_indices = @transform_2, window_bounds = array<i64: 1, 256>}, {transform_indices = @transform_3, window_bounds = array<i64: 1, 256>}, {transform_indices = @transform_4, window_bounds = array<i64: 8, 256>}]} {
    %c0_i32 = arith.constant 0 : i32
    %0 = arith.cmpi eq, %arg2, %c0_i32 : i32
    %1 = arith.extui %0 : i1 to i32
    %c0_i32_0 = arith.constant 0 : i32
    %2 = arith.cmpi ne, %1, %c0_i32_0 : i32
    scf.if %2 {
      %cst_9 = arith.constant 0.000000e+00 : f32
      %12 = vector.broadcast %cst_9 : f32 to vector<8x256xf32>
      %c0_10 = arith.constant 0 : index
      %c0_11 = arith.constant 0 : index
      %13 = vector.load %arg8[%c0_10, %c0_11] : memref<8x256xf32, #tpu.memory_space<vmem>>, vector<8x256xf32>
      tpu.vector_store %arg8[%c0_10, %c0_11], %12 {strides = array<i32>} : memref<8x256xf32, #tpu.memory_space<vmem>>, vector<8x256xf32>,
    } else {
    }
    %c0 = arith.constant 0 : index
    %c0_1 = arith.constant 0 : index
    %3 = vector.load %arg8[%c0, %c0_1] : memref<8x256xf32, #tpu.memory_space<vmem>>, vector<8x256xf32>
    %c0_2 = arith.constant 0 : index
    %c0_3 = arith.constant 0 : index
    %4 = vector.load %arg3[%c0_2, %c0_3] : memref<8x512xbf16, #tpu.memory_space<vmem>>, vector<8x512xbf16>
    %c0_4 = arith.constant 0 : index
    %c0_5 = arith.constant 0 : index
    %5 = vector.load %arg4[%c0_4, %c0_5] : memref<512x256xbf16, #tpu.memory_space<vmem>>, vector<512x256xbf16>
    %cst = arith.constant dense<0.000000e+00> : vector<8x256xf32>
    %6 = tpu.matmul %4, %5, %cst {dimension_numbers = #tpu.dot_dimension_numbers<[1], [0], [0], [1], [0, 0, 1, 1], [], []>} : vector<8x512xbf16>, vector<512x256xbf16>, vector<8x256xf32> -> vector<8x256xf32>
    %7 = arith.addf %3, %6 : vector<8x256xf32>
    %c0_6 = arith.constant 0 : index
    %c0_7 = arith.constant 0 : index
    %8 = vector.load %arg8[%c0_6, %c0_7] : memref<8x256xf32, #tpu.memory_space<vmem>>, vector<8x256xf32>
    tpu.vector_store %arg8[%c0_6, %c0_7], %7 {strides = array<i32>} : memref<8x256xf32, #tpu.memory_space<vmem>>, vector<8x256xf32>,
    %c8_i32 = arith.constant 8 : i32
    %9 = arith.cmpi eq, %arg2, %c8_i32 : i32
    %10 = arith.extui %9 : i1 to i32
    %c0_i32_8 = arith.constant 0 : i32
    %11 = arith.cmpi ne, %10, %c0_i32_8 : i32
    scf.if %11 {
      %c0_9 = arith.constant 0 : index
      %c0_10 = arith.constant 0 : index
      %12 = vector.load %arg8[%c0_9, %c0_10] : memref<8x256xf32, #tpu.memory_space<vmem>>, vector<8x256xf32>
      %c0_11 = arith.constant 0 : index
      %c0_12 = arith.constant 0 : index
      %13 = vector.load %arg5[%c0_11, %c0_12] : memref<1x256xf32, #tpu.memory_space<vmem>>, vector<1x256xf32>
      %14 = vector.broadcast %13 : vector<1x256xf32> to vector<8x256xf32>
      %15 = arith.mulf %12, %14 : vector<8x256xf32>
      %c0_13 = arith.constant 0 : index
      %c0_14 = arith.constant 0 : index
      %16 = vector.load %arg6[%c0_13, %c0_14] : memref<1x256xf32, #tpu.memory_space<vmem>>, vector<1x256xf32>
      %17 = vector.broadcast %16 : vector<1x256xf32> to vector<8x256xf32>
      %18 = arith.addf %15, %17 : vector<8x256xf32>
      %cst_15 = arith.constant 0.000000e+00 : f32
      %19 = vector.broadcast %cst_15 : f32 to vector<8x256xf32>
      %20 = arith.maximumf %18, %19 : vector<8x256xf32>
      %21 = arith.truncf %20 : vector<8x256xf32> to vector<8x256xbf16>
      %c0_16 = arith.constant 0 : index
      %c0_17 = arith.constant 0 : index
      %22 = vector.load %arg7[%c0_16, %c0_17] : memref<8x256xbf16, #tpu.memory_space<vmem>>, vector<8x256xbf16>
      tpu.vector_store %arg7[%c0_16, %c0_17], %21 {strides = array<i32>} : memref<8x256xbf16, #tpu.memory_space<vmem>>, vector<8x256xbf16>,
    } else {
    }
    return
  }
  func.func @transform_0(%arg0: i32, %arg1: i32, %arg2: i32) -> (i32, i32) {
    %c0_i32 = arith.constant 0 : i32
    return %arg0, %arg2 : i32, i32
  }
  func.func @transform_1(%arg0: i32, %arg1: i32, %arg2: i32) -> (i32, i32) {
    %c0_i32 = arith.constant 0 : i32
    return %arg2, %arg1 : i32, i32
  }
  func.func @transform_2(%arg0: i32, %arg1: i32, %arg2: i32) -> (i32, i32) {
    %c0_i32 = arith.constant 0 : i32
    %c0_i32_0 = arith.constant 0 : i32
    return %c0_i32, %arg1 : i32, i32
  }
  func.func @transform_3(%arg0: i32, %arg1: i32, %arg2: i32) -> (i32, i32) {
    %c0_i32 = arith.constant 0 : i32
    %c0_i32_0 = arith.constant 0 : i32
    return %c0_i32, %arg1 : i32, i32
  }
  func.func @transform_4(%arg0: i32, %arg1: i32, %arg2: i32) -> (i32, i32) {
    %c0_i32 = arith.constant 0 : i32
    return %arg0, %arg1 : i32, i32
  }
}

module attributes {stable_mosaic.version = 11 : i64} {
  func.func @kernel(%arg0: i32, %arg1: i32, %arg2: i32, %arg3: memref<8x512xf32, #tpu.memory_space<vmem>>, %arg4: memref<512x128xf32, #tpu.memory_space<vmem>>, %arg5: memref<1x128xf32, #tpu.memory_space<vmem>>, %arg6: memref<1x128xf32, #tpu.memory_space<vmem>>, %arg7: memref<8x128xf32, #tpu.memory_space<vmem>>, %arg8: memref<8x128xf32, #tpu.memory_space<vmem>>) attributes {dimension_semantics = [#tpu.dimension_semantics<parallel>, #tpu.dimension_semantics<parallel>, #tpu.dimension_semantics<arbitrary>], iteration_bounds = array<i64: 1, 1, 1>, scalar_prefetch = 0 : i64, scratch_operands = 1 : i64, tpu.core_type = #tpu.core_type<tc>, window_params = [{transform_indices = @transform_0, window_bounds = array<i64: 8, 512>}, {transform_indices = @transform_1, window_bounds = array<i64: 512, 128>}, {transform_indices = @transform_2, window_bounds = array<i64: 1, 128>}, {transform_indices = @transform_3, window_bounds = array<i64: 1, 128>}, {transform_indices = @transform_4, window_bounds = array<i64: 8, 128>}]} {
    %c0_i32 = arith.constant 0 : i32
    %0 = arith.cmpi eq, %arg2, %c0_i32 : i32
    %1 = arith.extui %0 : i1 to i32
    %c0_i32_0 = arith.constant 0 : i32
    %2 = arith.cmpi ne, %1, %c0_i32_0 : i32
    scf.if %2 {
      %cst_10 = arith.constant 0.000000e+00 : f32
      %12 = vector.broadcast %cst_10 : f32 to vector<8x128xf32>
      %c0_11 = arith.constant 0 : index
      %c0_12 = arith.constant 0 : index
      %13 = vector.load %arg8[%c0_11, %c0_12] : memref<8x128xf32, #tpu.memory_space<vmem>>, vector<8x128xf32>
      tpu.vector_store %arg8[%c0_11, %c0_12], %12 {strides = array<i32>} : memref<8x128xf32, #tpu.memory_space<vmem>>, vector<8x128xf32>,
    } else {
    }
    %c0 = arith.constant 0 : index
    %c0_1 = arith.constant 0 : index
    %3 = vector.load %arg8[%c0, %c0_1] : memref<8x128xf32, #tpu.memory_space<vmem>>, vector<8x128xf32>
    %c0_2 = arith.constant 0 : index
    %c0_3 = arith.constant 0 : index
    %4 = vector.load %arg3[%c0_2, %c0_3] : memref<8x512xf32, #tpu.memory_space<vmem>>, vector<8x512xf32>
    %c0_4 = arith.constant 0 : index
    %c0_5 = arith.constant 0 : index
    %5 = vector.load %arg4[%c0_4, %c0_5] : memref<512x128xf32, #tpu.memory_space<vmem>>, vector<512x128xf32>
    %cst = arith.constant dense<0.000000e+00> : vector<8x128xf32>
    %6 = tpu.matmul %4, %5, %cst {dimension_numbers = #tpu.dot_dimension_numbers<[1], [0], [0], [1], [0, 0, 1, 1], [], []>} : vector<8x512xf32>, vector<512x128xf32>, vector<8x128xf32> -> vector<8x128xf32>
    %7 = arith.addf %3, %6 : vector<8x128xf32>
    %c0_6 = arith.constant 0 : index
    %c0_7 = arith.constant 0 : index
    %8 = vector.load %arg8[%c0_6, %c0_7] : memref<8x128xf32, #tpu.memory_space<vmem>>, vector<8x128xf32>
    tpu.vector_store %arg8[%c0_6, %c0_7], %7 {strides = array<i32>} : memref<8x128xf32, #tpu.memory_space<vmem>>, vector<8x128xf32>,
    %c0_i32_8 = arith.constant 0 : i32
    %9 = arith.cmpi eq, %arg2, %c0_i32_8 : i32
    %10 = arith.extui %9 : i1 to i32
    %c0_i32_9 = arith.constant 0 : i32
    %11 = arith.cmpi ne, %10, %c0_i32_9 : i32
    scf.if %11 {
      %c0_10 = arith.constant 0 : index
      %c0_11 = arith.constant 0 : index
      %12 = vector.load %arg8[%c0_10, %c0_11] : memref<8x128xf32, #tpu.memory_space<vmem>>, vector<8x128xf32>
      %c0_12 = arith.constant 0 : index
      %c0_13 = arith.constant 0 : index
      %13 = vector.load %arg5[%c0_12, %c0_13] : memref<1x128xf32, #tpu.memory_space<vmem>>, vector<1x128xf32>
      %14 = vector.broadcast %13 : vector<1x128xf32> to vector<8x128xf32>
      %15 = arith.mulf %12, %14 : vector<8x128xf32>
      %c0_14 = arith.constant 0 : index
      %c0_15 = arith.constant 0 : index
      %16 = vector.load %arg6[%c0_14, %c0_15] : memref<1x128xf32, #tpu.memory_space<vmem>>, vector<1x128xf32>
      %17 = vector.broadcast %16 : vector<1x128xf32> to vector<8x128xf32>
      %18 = arith.addf %15, %17 : vector<8x128xf32>
      %c0_16 = arith.constant 0 : index
      %c0_17 = arith.constant 0 : index
      %19 = vector.load %arg7[%c0_16, %c0_17] : memref<8x128xf32, #tpu.memory_space<vmem>>, vector<8x128xf32>
      tpu.vector_store %arg7[%c0_16, %c0_17], %18 {strides = array<i32>} : memref<8x128xf32, #tpu.memory_space<vmem>>, vector<8x128xf32>,
    } else {
    }
    return
  }
  func.func @transform_0(%arg0: i32, %arg1: i32, %arg2: i32) -> (i32, i32) {
    %c0_i32 = arith.constant 0 : i32
    return %arg0, %arg2 : i32, i32
  }
  func.func @transform_1(%arg0: i32, %arg1: i32, %arg2: i32) -> (i32, i32) {
    %c0_i32 = arith.constant 0 : i32
    return %arg2, %arg1 : i32, i32
  }
  func.func @transform_2(%arg0: i32, %arg1: i32, %arg2: i32) -> (i32, i32) {
    %c0_i32 = arith.constant 0 : i32
    %c0_i32_0 = arith.constant 0 : i32
    return %c0_i32, %arg1 : i32, i32
  }
  func.func @transform_3(%arg0: i32, %arg1: i32, %arg2: i32) -> (i32, i32) {
    %c0_i32 = arith.constant 0 : i32
    %c0_i32_0 = arith.constant 0 : i32
    return %c0_i32, %arg1 : i32, i32
  }
  func.func @transform_4(%arg0: i32, %arg1: i32, %arg2: i32) -> (i32, i32) {
    %c0_i32 = arith.constant 0 : i32
    return %arg0, %arg1 : i32, i32
  }
}

</mosaic_0001>

<bundles_post_ra>
// kernel: resnet_forward.21
= control target key start
LH: loop header
LB: loop body
LE: loop exit
PB: predicated region body
PF: predicated region fallthrough
CT: control target
= control target key end

     0   :  { %s1709_s15 = smov 0   ;;  %s1711_s16 = smov 0   ;;  %s1955_s0 = inlined_call_operand.vmem [shape: bf16[512,256], index: 0, kind: input, shape index: {}]   ;;  %s1956_s1 = inlined_call_operand.vmem [shape: bf16[256,128], index: 1, kind: input, shape index: {}]   ;;  %s1957_s2 = inlined_call_operand.vmem [shape: f32[1,128], index: 2, kind: input, shape index: {}]   ;;  %s1958_s3 = inlined_call_operand.vmem [shape: f32[1,128], index: 3, kind: input, shape index: {}]   ;;  %s1959_s4 = inlined_call_operand.vmem [shape: bf16[512,128], index: 4, kind: output, shape index: {}]  }
   0x1   :  { %s1713_s17 = smov 0  }
   0x2 LB: > { %s33_s18 = sadd.s32 1, %s1678_s16  ;;  %p1274_p0 = scmp.ge.s32.totalorder %s1682_s17, 1  ;;  %s1682_s17 = sphi %s1713_s17, %s14_s17   ;;  %s1678_s16 = sphi %s1711_s16, %s1961_s16   ;;  %s1674_s15 = sphi %s1709_s15, %s1960_s15  }
   0x3   : > { %p35_p1 = scmp.ge.s32.totalorder %s33_s18, 2  ;;  %p224_p2 = scmp.lt.s32.totalorder %s1682_s17, 3 }
   0x5   : > { %s1963_s18 = smov (%p35_p1, %s33_s18), 0  ;;  %p225_p3 = pnand %p1274_p0, %p224_p2 }
   0x6   : > { %s1275_s5 = sshll.u32 (!%p225_p3), %s1674_s15, 5 }
   0x7   : > { %228 = sbr.rel (%p225_p3) target bundleno = 308 (0x134), region = 36  ;;  %p274_p4 = scmp.lt.s32.totalorder (!%p225_p3), %s1275_s5, 63 }
   0xc   : > { %v1514_v0 = vld [vmem:[%s1956_s1 + $0x38] sm:$0xff]  ;;  %v1513_v2 = vld [vmem:[%s1956_s1 + $0x30] sm:$0xff]  ;;  %v1512_v4 = vld [vmem:[%s1956_s1 + $0x28] sm:$0xff]  ;;  %s1965_s5 = smov (!%p274_p4, %s1275_s5), 63 }
   0xd   : > { %v1522_v1 = vld [vmem:[%s1956_s1 + $0x78] sm:$0xff]  ;;  %696 = vmatpush.bf16.msra.mxu0 %v1514_v0  ;;  %1618 = vmatpush.bf16.msra.mxu2 %v1514_v0  ;;  %v1521_v3 = vld [vmem:[%s1956_s1 + $0x70] sm:$0xff]  ;;  %v1520_v5 = vld [vmem:[%s1956_s1 + $0x68] sm:$0xff]  ;;  %s1474_s21 = sshll.u32 %s1965_s5, 3  ;;  %s1279_s12 = sshll.u32 %s1965_s5, 2 }
   0xe   : > { %785 = vmatpush.bf16.msra.mxu1 %v1522_v1  ;;  %1626 = vmatpush.bf16.msra.mxu3 %v1522_v1  ;;  %v1511_v6 = vld [vmem:[%s1956_s1 + $0x20] sm:$0xff]  ;;  %v1510_v8 = vld [vmem:[%s1956_s1 + $0x18] sm:$0xff]  ;;  %v1509_v10 = vld [vmem:[%s1956_s1 + $0x10] sm:$0xff]  ;;  %s1775_s26 = scalar_lea.vmem %s1955_s0, %s1474_s21  ;;  %s1869_s15 = scalar_lea.vmem %s1959_s4, %s1279_s12 }
   0xf   : > { %v1519_v7 = vld [vmem:[%s1956_s1 + $0x60] sm:$0xff]  ;;  %v1518_v9 = vld [vmem:[%s1956_s1 + $0x58] sm:$0xff]  ;;  %v1517_v11 = vld [vmem:[%s1956_s1 + $0x50] sm:$0xff] }
  0x10   : > { %v1508_v12 = vld [vmem:[%s1956_s1 + $0x8] sm:$0xff]  ;;  %v1507_v14 = vld [vmem:[%s1956_s1] sm:$0xff]  ;;  %v1290_v28 = vld [vmem:[%s1775_s26 + $0x10] sm:$0xf] }
  0x11   : > { %697 = vmatpush.bf16.msra.mxu0 %v1513_v2  ;;  %1619 = vmatpush.bf16.msra.mxu2 %v1513_v2  ;;  %v1516_v13 = vld [vmem:[%s1956_s1 + $0x48] sm:$0xff]  ;;  %v1515_v15 = vld [vmem:[%s1956_s1 + $0x40] sm:$0xff]  ;;  %v1478_v29 = vld [vmem:[%s1775_s26 + $0x14] sm:$0xf0] }
  0x12   : > { %786 = vmatpush.bf16.msra.mxu1 %v1521_v3  ;;  %1627 = vmatpush.bf16.msra.mxu3 %v1521_v3  ;;  %v1282_v16 = vld [vmem:[%s1775_s26] sm:$0xf]  ;;  %v1476_v17 = vld [vmem:[%s1775_s26 + $0x4] sm:$0xf0]  ;;  %v1475_v20 = vld [vmem:[%s1775_s26 + $0x4] sm:$0xf]  ;;  %v1291_v36 = vor.u32 %v1478_v29, %v1290_v28 }
  0x13   : > { %v1346_v18 = vld [vmem:[%s1775_s26 + $0x80] sm:$0xf]  ;;  %v1492_v19 = vld [vmem:[%s1775_s26 + $0x84] sm:$0xf0]  ;;  %v1284_v21 = vld [vmem:[%s1775_s26 + $0x8] sm:$0xf0]  ;;  %v1283_v24 = vor.u32 %v1476_v17, %v1282_v16 }
  0x14   : > { %v1491_v22 = vld [vmem:[%s1775_s26 + $0x84] sm:$0xf]  ;;  %v1348_v23 = vld [vmem:[%s1775_s26 + $0x88] sm:$0xf0]  ;;  %v1347_v25 = vor.u32 %v1492_v19, %v1346_v18  ;;  %v1287_v26 = vor.u32 %v1475_v20, %v1284_v21  ;;  %v1354_v30 = vld [vmem:[%s1775_s26 + $0x90] sm:$0xf] }
  0x15   : > { %698 = vmatpush.bf16.msra.mxu0 %v1512_v4  ;;  %1620 = vmatpush.bf16.msra.mxu2 %v1512_v4  ;;  %v1351_v27 = vor.u32 %v1491_v22, %v1348_v23  ;;  %v1494_v31 = vld [vmem:[%s1775_s26 + $0x94] sm:$0xf0]  ;;  %v1477_v32 = vld [vmem:[%s1775_s26 + $0x14] sm:$0xf]  ;;  %v1292_v33 = vld [vmem:[%s1775_s26 + $0x18] sm:$0xf0] }
  0x16   : > { %787 = vmatpush.bf16.msra.mxu1 %v1520_v5  ;;  %1628 = vmatpush.bf16.msra.mxu3 %v1520_v5  ;;  %v1493_v34 = vld [vmem:[%s1775_s26 + $0x94] sm:$0xf]  ;;  %v1356_v35 = vld [vmem:[%s1775_s26 + $0x98] sm:$0xf0]  ;;  %v1355_v37 = vor.u32 %v1494_v31, %v1354_v30  ;;  %v1295_v38 = vor.u32 %v1477_v32, %v1292_v33  ;;  %v1298_v40 = vld [vmem:[%s1775_s26 + $0x20] sm:$0xf] }
  0x17   : > { %v1359_v39 = vor.u32 %v1493_v34, %v1356_v35  ;;  %v1480_v41 = vld [vmem:[%s1775_s26 + $0x24] sm:$0xf0]  ;;  %v1362_v42 = vld [vmem:[%s1775_s26 + $0xa0] sm:$0xf]  ;;  %v1479_v44 = vld [vmem:[%s1775_s26 + $0x24] sm:$0xf] }
  0x18   : > { %v1496_v43 = vld [vmem:[%s1775_s26 + $0xa4] sm:$0xf0]  ;;  %v1300_v45 = vld [vmem:[%s1775_s26 + $0x28] sm:$0xf0]  ;;  %v1495_v46 = vld [vmem:[%s1775_s26 + $0xa4] sm:$0xf]  ;;  %v1299_v48 = vor.u32 %v1480_v41, %v1298_v40 }
  0x19   : > { %699 = vmatpush.bf16.msra.mxu0 %v1511_v6  ;;  %1621 = vmatpush.bf16.msra.mxu2 %v1511_v6  ;;  %v1364_v47 = vld [vmem:[%s1775_s26 + $0xa8] sm:$0xf0]  ;;  %v1363_v49 = vor.u32 %v1496_v43, %v1362_v42  ;;  %v1303_v50 = vor.u32 %v1479_v44, %v1300_v45  ;;  %v1306_v52 = vld [vmem:[%s1775_s26 + $0x30] sm:$0xf]  ;;  %v1482_v53 = vld [vmem:[%s1775_s26 + $0x34] sm:$0xf0] }
  0x1a   : > { %788 = vmatpush.bf16.msra.mxu1 %v1519_v7  ;;  %1629 = vmatpush.bf16.msra.mxu3 %v1519_v7  ;;  %v1367_v51 = vor.u32 %v1495_v46, %v1364_v47  ;;  %v1370_v54 = vld [vmem:[%s1775_s26 + $0xb0] sm:$0xf]  ;;  %v1498_v55 = vld [vmem:[%s1775_s26 + $0xb4] sm:$0xf0]  ;;  %v1481_v56 = vld [vmem:[%s1775_s26 + $0x34] sm:$0xf]  ;;  %v1307_v60 = vor.u32 %v1482_v53, %v1306_v52 }
  0x1b   : > { %v1308_v57 = vld [vmem:[%s1775_s26 + $0x38] sm:$0xf0]  ;;  %v1497_v58 = vld [vmem:[%s1775_s26 + $0xb4] sm:$0xf]  ;;  %v1371_v61 = vor.u32 %v1498_v55, %v1370_v54  ;;  %v1314_v0 = vld [vmem:[%s1775_s26 + $0x40] sm:$0xf] }
  0x1c   : > { %v1372_v59 = vld [vmem:[%s1775_s26 + $0xb8] sm:$0xf0]  ;;  %v1311_v62 = vor.u32 %v1481_v56, %v1308_v57  ;;  %v1484_v1 = vld [vmem:[%s1775_s26 + $0x44] sm:$0xf0]  ;;  %v1378_v2 = vld [vmem:[%s1775_s26 + $0xc0] sm:$0xf] }
  0x1d   : > { %700 = vmatpush.bf16.msra.mxu0 %v1510_v8  ;;  %1622 = vmatpush.bf16.msra.mxu2 %v1510_v8  ;;  %v1375_v63 = vor.u32 %v1497_v58, %v1372_v59  ;;  %v1500_v3 = vld [vmem:[%s1775_s26 + $0xc4] sm:$0xf0]  ;;  %v1483_v4 = vld [vmem:[%s1775_s26 + $0x44] sm:$0xf]  ;;  %v1316_v5 = vld [vmem:[%s1775_s26 + $0x48] sm:$0xf0]  ;;  %v1315_v8 = vor.u32 %v1484_v1, %v1314_v0 }
  0x1e   : > { %789 = vmatpush.bf16.msra.mxu1 %v1518_v9  ;;  %1630 = vmatpush.bf16.msra.mxu3 %v1518_v9  ;;  %v1499_v6 = vld [vmem:[%s1775_s26 + $0xc4] sm:$0xf]  ;;  %v1380_v7 = vld [vmem:[%s1775_s26 + $0xc8] sm:$0xf0]  ;;  %v1379_v9 = vor.u32 %v1500_v3, %v1378_v2  ;;  %v1485_v16 = vld [vmem:[%s1775_s26 + $0x54] sm:$0xf] }
  0x1f   : > { %v1324_v17 = vld [vmem:[%s1775_s26 + $0x58] sm:$0xf0]  ;;  %v1501_v18 = vld [vmem:[%s1775_s26 + $0xd4] sm:$0xf]  ;;  %v1487_v28 = vld [vmem:[%s1775_s26 + $0x64] sm:$0xf] }
  0x20   : > { %v1388_v19 = vld [vmem:[%s1775_s26 + $0xd8] sm:$0xf0]  ;;  %v1327_v22 = vor.u32 %v1485_v16, %v1324_v17  ;;  %v1332_v29 = vld [vmem:[%s1775_s26 + $0x68] sm:$0xf0]  ;;  %v1503_v30 = vld [vmem:[%s1775_s26 + $0xe4] sm:$0xf] }
  0x21   : > { %701 = vmatpush.bf16.msra.mxu0 %v1509_v10  ;;  %1623 = vmatpush.bf16.msra.mxu2 %v1509_v10  ;;  %v1319_v10 = vor.u32 %v1483_v4, %v1316_v5  ;;  %v1391_v23 = vor.u32 %v1501_v18, %v1388_v19  ;;  %v1396_v31 = vld [vmem:[%s1775_s26 + $0xe8] sm:$0xf0]  ;;  %v1335_v34 = vor.u32 %v1487_v28, %v1332_v29  ;;  %v1489_v40 = vld [vmem:[%s1775_s26 + $0x74] sm:$0xf]  ;;  %v1340_v41 = vld [vmem:[%s1775_s26 + $0x78] sm:$0xf0] }
  0x22   : > { %790 = vmatpush.bf16.msra.mxu1 %v1517_v11  ;;  %1631 = vmatpush.bf16.msra.mxu3 %v1517_v11  ;;  %v1383_v11 = vor.u32 %v1499_v6, %v1380_v7  ;;  %v1399_v35 = vor.u32 %v1503_v30, %v1396_v31  ;;  %v1505_v42 = vld [vmem:[%s1775_s26 + $0xf4] sm:$0xf]  ;;  %v1404_v43 = vld [vmem:[%s1775_s26 + $0xf8] sm:$0xf0]  ;;  %v1343_v46 = vor.u32 %v1489_v40, %v1340_v41  ;;  %v1859_v55 = vld [vmem:[%s1958_s3] ss:$0 sm:$0xff] }
  0x23   : > { %v1407_v47 = vor.u32 %v1505_v42, %v1404_v43 }
  0x25   : > { %702 = vmatpush.bf16.msra.mxu0 %v1508_v12  ;;  %1624 = vmatpush.bf16.msra.mxu2 %v1508_v12  ;;  %v1322_v12 = vld [vmem:[%s1775_s26 + $0x50] sm:$0xf] }
  0x26   : > { %791 = vmatpush.bf16.msra.mxu1 %v1516_v13  ;;  %1632 = vmatpush.bf16.msra.mxu3 %v1516_v13  ;;  %v1486_v13 = vld [vmem:[%s1775_s26 + $0x54] sm:$0xf0] }
  0x27   : > { %v1323_v20 = vor.u32 %v1486_v13, %v1322_v12 }
  0x29   : > { %703 = vmatpush.bf16.msra.mxu0 %v1507_v14  ;;  %1625 = vmatpush.bf16.msra.mxu2 %v1507_v14  ;;  %v1386_v14 = vld [vmem:[%s1775_s26 + $0xd0] sm:$0xf] }
  0x2a   : > { %792 = vmatpush.bf16.msra.mxu1 %v1515_v15  ;;  %1633 = vmatpush.bf16.msra.mxu3 %v1515_v15  ;;  %v1502_v15 = vld [vmem:[%s1775_s26 + $0xd4] sm:$0xf0] }
  0x2b   : > { %v1387_v21 = vor.u32 %v1502_v15, %v1386_v14 }
  0x2c   : > { %704 = vmatmul.bf16.vlgmr.msra.gmra.mxu0 %v1283_v24  ;;  %744 = vmatmul.bf16.vlgmr.msra.gmra.mxu2 %v1347_v25  ;;  %v1330_v24 = vld [vmem:[%s1775_s26 + $0x60] sm:$0xf]  ;;  %v1488_v25 = vld [vmem:[%s1775_s26 + $0x64] sm:$0xf0] }
  0x2d   : > { %793 = vmatmul.bf16.vlgmr.msra.gmra.mxu1 %v1287_v26  ;;  %833 = vmatmul.bf16.vlgmr.msra.gmra.mxu3 %v1351_v27  ;;  %v1394_v26 = vld [vmem:[%s1775_s26 + $0xe0] sm:$0xf]  ;;  %v1504_v27 = vld [vmem:[%s1775_s26 + $0xe4] sm:$0xf0]  ;;  %v1331_v32 = vor.u32 %v1488_v25, %v1330_v24 }
  0x2e   : > { %v1395_v33 = vor.u32 %v1504_v27, %v1394_v26 }
  0x3c   : > { %709 = vmatmul.bf16.gmra.mxu0 %v1291_v36  ;;  %749 = vmatmul.bf16.gmra.mxu2 %v1355_v37  ;;  %v1338_v36 = vld [vmem:[%s1775_s26 + $0x70] sm:$0xf]  ;;  %v1490_v37 = vld [vmem:[%s1775_s26 + $0x74] sm:$0xf0] }
  0x3d   : > { %798 = vmatmul.bf16.gmra.mxu1 %v1295_v38  ;;  %838 = vmatmul.bf16.gmra.mxu3 %v1359_v39  ;;  %v1402_v38 = vld [vmem:[%s1775_s26 + $0xf0] sm:$0xf]  ;;  %v1506_v39 = vld [vmem:[%s1775_s26 + $0xf4] sm:$0xf0]  ;;  %v1339_v44 = vor.u32 %v1490_v37, %v1338_v36 }
  0x3e   : > { %v1403_v45 = vor.u32 %v1506_v39, %v1402_v38 }
  0x4c   : > { %714 = vmatmul.bf16.gmra.mxu0 %v1299_v48  ;;  %754 = vmatmul.bf16.gmra.mxu2 %v1363_v49 }
  0x4d   : > { %803 = vmatmul.bf16.gmra.mxu1 %v1303_v50  ;;  %843 = vmatmul.bf16.gmra.mxu3 %v1367_v51  ;;  %v1853_v51 = vld [vmem:[%s1957_s2] ss:$0 sm:$0xff] }
  0x5c   : > { %719 = vmatmul.bf16.gmra.mxu0 %v1307_v60  ;;  %759 = vmatmul.bf16.gmra.mxu2 %v1371_v61 }
  0x5d   : > { %808 = vmatmul.bf16.gmra.mxu1 %v1311_v62  ;;  %848 = vmatmul.bf16.gmra.mxu3 %v1375_v63 }
  0x6c   : > { %724 = vmatmul.bf16.gmra.mxu0 %v1315_v8  ;;  %764 = vmatmul.bf16.gmra.mxu2 %v1379_v9 }
  0x6d   : > { %813 = vmatmul.bf16.gmra.mxu1 %v1319_v10  ;;  %853 = vmatmul.bf16.gmra.mxu3 %v1383_v11 }
  0x7c   : > { %729 = vmatmul.bf16.gmra.mxu0 %v1323_v20  ;;  %769 = vmatmul.bf16.gmra.mxu2 %v1387_v21 }
  0x7d   : > { %818 = vmatmul.bf16.gmra.mxu1 %v1327_v22  ;;  %858 = vmatmul.bf16.gmra.mxu3 %v1391_v23 }
  0x8c   : > { %734 = vmatmul.bf16.gmra.mxu0 %v1331_v32  ;;  %774 = vmatmul.bf16.gmra.mxu2 %v1395_v33 }
  0x8d   : > { %823 = vmatmul.bf16.gmra.mxu1 %v1335_v34  ;;  %863 = vmatmul.bf16.gmra.mxu3 %v1399_v35 }
  0x9c   : > { %739 = vmatmul.bf16.gmra.mxu0 %v1339_v44  ;;  %779 = vmatmul.bf16.gmra.mxu2 %v1403_v45 }
  0x9d   : > { %828 = vmatmul.bf16.gmra.mxu1 %v1343_v46  ;;  %868 = vmatmul.bf16.gmra.mxu3 %v1407_v47 }
  0xa9   : > { %v705_v48 = vpop.f32.mrf.mxu0 }
  0xaa   : > { %v794_v49 = vpop.f32.mrf.mxu1 }
  0xab   : > { %v795_v50 = vadd.f32 %v794_v49, %v705_v48 }
  0xad   : > { %v977_v54 = vmul.f32 %v1853_v51, %v795_v50 }
  0xaf   : > { %v745_v52 = vpop.f32.mrf.mxu2  ;;  %v1013_v60 = vadd.f32 %v1859_v55, %v977_v54 }
  0xb0   : > { %v834_v53 = vpop.f32.mrf.mxu3 }
  0xb1   : > { %v707_v56 = vpop.f32.mrf.mxu0  ;;  %v835_v58 = vadd.f32 %v834_v53, %v745_v52  ;;  %v1045_v2 = vmax.f32 %v1013_v60, 0.0 }
  0xb2   : > { %v796_v57 = vpop.f32.mrf.mxu1 }
  0xb3   : > { %v797_v59 = vadd.f32 %v796_v57, %v707_v56  ;;  %v993_v62 = vmul.f32 %v1853_v51, %v835_v58 }
  0xb5   : > { %v978_v61 = vmul.f32 %v1853_v51, %v797_v59  ;;  %v1029_v7 = vadd.f32 %v1859_v55, %v993_v62 }
  0xb7   : > { %v1014_v63 = vadd.f32 %v1859_v55, %v978_v61  ;;  %v747_v0 = vpop.f32.mrf.mxu2  ;;  %v1061_v12 = vmax.f32 %v1029_v7, 0.0 }
  0xb8   : > { %v836_v1 = vpop.f32.mrf.mxu3 }
  0xb9   : > { %v1046_v3 = vmax.f32 %v1014_v63, 0.0  ;;  %v837_v4 = vadd.f32 %v836_v1, %v747_v0  ;;  %v710_v5 = vpop.f32.mrf.mxu0 }
  0xba   : > { %v799_v6 = vpop.f32.mrf.mxu1 }
  0xbb   : > { %v1526_v8 = vpack.c.bf16 %v1046_v3, %v1045_v2  ;;  %v994_v9 = vmul.f32 %v1853_v51, %v837_v4  ;;  %v800_v11 = vadd.f32 %v799_v6, %v710_v5 }
  0xbd   : > { %1527 = vst [vmem:[%s1869_s15] sm:$0xff] %v1526_v8   ;;  %v1030_v10 = vadd.f32 %v1859_v55, %v994_v9  ;;  %v979_v17 = vmul.f32 %v1853_v51, %v800_v11 }
  0xbf   : > { %v1062_v13 = vmax.f32 %v1030_v10, 0.0  ;;  %v750_v14 = vpop.f32.mrf.mxu2  ;;  %v1015_v22 = vadd.f32 %v1859_v55, %v979_v17 }
  0xc0   : > { %v839_v15 = vpop.f32.mrf.mxu3 }
  0xc1   : > { %v1566_v16 = vpack.c.bf16 %v1062_v13, %v1061_v12  ;;  %v712_v18 = vpop.f32.mrf.mxu0  ;;  %v840_v20 = vadd.f32 %v839_v15, %v750_v14  ;;  %v1047_v28 = vmax.f32 %v1015_v22, 0.0 }
  0xc2   : > { %v801_v19 = vpop.f32.mrf.mxu1 }
  0xc3   : > { %1610 = vst [vmem:[%s1869_s15 + $0x40] sm:$0xff] %v1566_v16   ;;  %v802_v21 = vadd.f32 %v801_v19, %v712_v18  ;;  %v995_v24 = vmul.f32 %v1853_v51, %v840_v20 }
  0xc5   : > { %v980_v23 = vmul.f32 %v1853_v51, %v802_v21  ;;  %v1031_v33 = vadd.f32 %v1859_v55, %v995_v24 }
  0xc7   : > { %v1016_v25 = vadd.f32 %v1859_v55, %v980_v23  ;;  %v752_v26 = vpop.f32.mrf.mxu2  ;;  %v1063_v38 = vmax.f32 %v1031_v33, 0.0 }
  0xc8   : > { %v841_v27 = vpop.f32.mrf.mxu3 }
  0xc9   : > { %v1048_v29 = vmax.f32 %v1016_v25, 0.0  ;;  %v842_v30 = vadd.f32 %v841_v27, %v752_v26  ;;  %v715_v31 = vpop.f32.mrf.mxu0 }
  0xca   : > { %v804_v32 = vpop.f32.mrf.mxu1 }
  0xcb   : > { %v1531_v34 = vpack.c.bf16 %v1048_v29, %v1047_v28  ;;  %v996_v35 = vmul.f32 %v1853_v51, %v842_v30  ;;  %v805_v37 = vadd.f32 %v804_v32, %v715_v31 }
  0xcd   : > { %1603 = vst [vmem:[%s1869_s15 + $0x8] sm:$0xff] %v1531_v34   ;;  %v1032_v36 = vadd.f32 %v1859_v55, %v996_v35  ;;  %v981_v43 = vmul.f32 %v1853_v51, %v805_v37 }
  0xcf   : > { %v1064_v39 = vmax.f32 %v1032_v36, 0.0  ;;  %v755_v40 = vpop.f32.mrf.mxu2  ;;  %v1017_v48 = vadd.f32 %v1859_v55, %v981_v43 }
  0xd0   : > { %v844_v41 = vpop.f32.mrf.mxu3 }
  0xd1   : > { %v1571_v42 = vpack.c.bf16 %v1064_v39, %v1063_v38  ;;  %v717_v44 = vpop.f32.mrf.mxu0  ;;  %v845_v46 = vadd.f32 %v844_v41, %v755_v40  ;;  %v1049_v56 = vmax.f32 %v1017_v48, 0.0 }
  0xd2   : > { %v806_v45 = vpop.f32.mrf.mxu1 }
  0xd3   : > { %1611 = vst [vmem:[%s1869_s15 + $0x48] sm:$0xff] %v1571_v42   ;;  %v807_v47 = vadd.f32 %v806_v45, %v717_v44  ;;  %v997_v50 = vmul.f32 %v1853_v51, %v845_v46 }
  0xd5   : > { %v982_v49 = vmul.f32 %v1853_v51, %v807_v47  ;;  %v1033_v61 = vadd.f32 %v1859_v55, %v997_v50 }
  0xd7   : > { %v1018_v52 = vadd.f32 %v1859_v55, %v982_v49  ;;  %v757_v53 = vpop.f32.mrf.mxu2  ;;  %v1065_v2 = vmax.f32 %v1033_v61, 0.0 }
  0xd8   : > { %v846_v54 = vpop.f32.mrf.mxu3 }
  0xd9   : > { %v1050_v57 = vmax.f32 %v1018_v52, 0.0  ;;  %v847_v58 = vadd.f32 %v846_v54, %v757_v53  ;;  %v720_v59 = vpop.f32.mrf.mxu0 }
  0xda   : > { %v809_v60 = vpop.f32.mrf.mxu1 }
  0xdb   : > { %v1536_v62 = vpack.c.bf16 %v1050_v57, %v1049_v56  ;;  %v998_v63 = vmul.f32 %v1853_v51, %v847_v58  ;;  %v810_v1 = vadd.f32 %v809_v60, %v720_v59 }
  0xdd   : > { %1604 = vst [vmem:[%s1869_s15 + $0x10] sm:$0xff] %v1536_v62   ;;  %v1034_v0 = vadd.f32 %v1859_v55, %v998_v63  ;;  %v983_v7 = vmul.f32 %v1853_v51, %v810_v1 }
  0xdf   : > { %v1066_v3 = vmax.f32 %v1034_v0, 0.0  ;;  %v760_v4 = vpop.f32.mrf.mxu2  ;;  %v1019_v12 = vadd.f32 %v1859_v55, %v983_v7 }
  0xe0   : > { %v849_v5 = vpop.f32.mrf.mxu3 }
  0xe1   : > { %v1576_v6 = vpack.c.bf16 %v1066_v3, %v1065_v2  ;;  %v722_v8 = vpop.f32.mrf.mxu0  ;;  %v850_v10 = vadd.f32 %v849_v5, %v760_v4  ;;  %v1051_v18 = vmax.f32 %v1019_v12, 0.0 }
  0xe2   : > { %v811_v9 = vpop.f32.mrf.mxu1 }
  0xe3   : > { %1612 = vst [vmem:[%s1869_s15 + $0x50] sm:$0xff] %v1576_v6   ;;  %v812_v11 = vadd.f32 %v811_v9, %v722_v8  ;;  %v999_v14 = vmul.f32 %v1853_v51, %v850_v10 }
  0xe5   : > { %v984_v13 = vmul.f32 %v1853_v51, %v812_v11  ;;  %v1035_v23 = vadd.f32 %v1859_v55, %v999_v14 }
  0xe7   : > { %v1020_v15 = vadd.f32 %v1859_v55, %v984_v13  ;;  %v762_v16 = vpop.f32.mrf.mxu2  ;;  %v1067_v28 = vmax.f32 %v1035_v23, 0.0 }
  0xe8   : > { %v851_v17 = vpop.f32.mrf.mxu3 }
  0xe9   : > { %v1052_v19 = vmax.f32 %v1020_v15, 0.0  ;;  %v852_v20 = vadd.f32 %v851_v17, %v762_v16  ;;  %v725_v21 = vpop.f32.mrf.mxu0 }
  0xea   : > { %v814_v22 = vpop.f32.mrf.mxu1 }
  0xeb   : > { %v1541_v24 = vpack.c.bf16 %v1052_v19, %v1051_v18  ;;  %v1000_v25 = vmul.f32 %v1853_v51, %v852_v20  ;;  %v815_v27 = vadd.f32 %v814_v22, %v725_v21 }
  0xed   : > { %1605 = vst [vmem:[%s1869_s15 + $0x18] sm:$0xff] %v1541_v24   ;;  %v1036_v26 = vadd.f32 %v1859_v55, %v1000_v25  ;;  %v985_v33 = vmul.f32 %v1853_v51, %v815_v27 }
  0xef   : > { %v1068_v29 = vmax.f32 %v1036_v26, 0.0  ;;  %v765_v30 = vpop.f32.mrf.mxu2  ;;  %v1021_v38 = vadd.f32 %v1859_v55, %v985_v33 }
  0xf0   : > { %v854_v31 = vpop.f32.mrf.mxu3 }
  0xf1   : > { %v1581_v32 = vpack.c.bf16 %v1068_v29, %v1067_v28  ;;  %v727_v34 = vpop.f32.mrf.mxu0  ;;  %v855_v36 = vadd.f32 %v854_v31, %v765_v30  ;;  %v1053_v44 = vmax.f32 %v1021_v38, 0.0 }
  0xf2   : > { %v816_v35 = vpop.f32.mrf.mxu1 }
  0xf3   : > { %1613 = vst [vmem:[%s1869_s15 + $0x58] sm:$0xff] %v1581_v32   ;;  %v817_v37 = vadd.f32 %v816_v35, %v727_v34  ;;  %v1001_v40 = vmul.f32 %v1853_v51, %v855_v36 }
  0xf5   : > { %v986_v39 = vmul.f32 %v1853_v51, %v817_v37  ;;  %v1037_v49 = vadd.f32 %v1859_v55, %v1001_v40 }
  0xf7   : > { %v1022_v41 = vadd.f32 %v1859_v55, %v986_v39  ;;  %v767_v42 = vpop.f32.mrf.mxu2  ;;  %v1069_v56 = vmax.f32 %v1037_v49, 0.0 }
  0xf8   : > { %v856_v43 = vpop.f32.mrf.mxu3 }
  0xf9   : > { %v1054_v45 = vmax.f32 %v1022_v41, 0.0  ;;  %v857_v46 = vadd.f32 %v856_v43, %v767_v42  ;;  %v730_v47 = vpop.f32.mrf.mxu0 }
  0xfa   : > { %v819_v48 = vpop.f32.mrf.mxu1 }
  0xfb   : > { %v1546_v50 = vpack.c.bf16 %v1054_v45, %v1053_v44  ;;  %v1002_v52 = vmul.f32 %v1853_v51, %v857_v46  ;;  %v820_v54 = vadd.f32 %v819_v48, %v730_v47 }
  0xfd   : > { %1606 = vst [vmem:[%s1869_s15 + $0x20] sm:$0xff] %v1546_v50   ;;  %v1038_v53 = vadd.f32 %v1859_v55, %v1002_v52  ;;  %v987_v61 = vmul.f32 %v1853_v51, %v820_v54 }
  0xff   : > { %v1070_v57 = vmax.f32 %v1038_v53, 0.0  ;;  %v770_v58 = vpop.f32.mrf.mxu2  ;;  %v1023_v2 = vadd.f32 %v1859_v55, %v987_v61 }
 0x100   : > { %v859_v59 = vpop.f32.mrf.mxu3 }
 0x101   : > { %v1586_v60 = vpack.c.bf16 %v1070_v57, %v1069_v56  ;;  %v732_v62 = vpop.f32.mrf.mxu0  ;;  %v860_v0 = vadd.f32 %v859_v59, %v770_v58  ;;  %v1055_v8 = vmax.f32 %v1023_v2, 0.0 }
 0x102   : > { %v821_v63 = vpop.f32.mrf.mxu1 }
 0x103   : > { %1614 = vst [vmem:[%s1869_s15 + $0x60] sm:$0xff] %v1586_v60   ;;  %v822_v1 = vadd.f32 %v821_v63, %v732_v62  ;;  %v1003_v4 = vmul.f32 %v1853_v51, %v860_v0 }
 0x105   : > { %v988_v3 = vmul.f32 %v1853_v51, %v822_v1  ;;  %v1039_v13 = vadd.f32 %v1859_v55, %v1003_v4 }
 0x107   : > { %v1024_v5 = vadd.f32 %v1859_v55, %v988_v3  ;;  %v772_v6 = vpop.f32.mrf.mxu2  ;;  %v1071_v18 = vmax.f32 %v1039_v13, 0.0 }
 0x108   : > { %v861_v7 = vpop.f32.mrf.mxu3 }
 0x109   : > { %v1056_v9 = vmax.f32 %v1024_v5, 0.0  ;;  %v862_v10 = vadd.f32 %v861_v7, %v772_v6  ;;  %v735_v11 = vpop.f32.mrf.mxu0 }
 0x10a   : > { %v824_v12 = vpop.f32.mrf.mxu1 }
 0x10b   : > { %v1551_v14 = vpack.c.bf16 %v1056_v9, %v1055_v8  ;;  %v1004_v15 = vmul.f32 %v1853_v51, %v862_v10  ;;  %v825_v17 = vadd.f32 %v824_v12, %v735_v11 }
 0x10d   : > { %1607 = vst [vmem:[%s1869_s15 + $0x28] sm:$0xff] %v1551_v14   ;;  %v1040_v16 = vadd.f32 %v1859_v55, %v1004_v15  ;;  %v989_v23 = vmul.f32 %v1853_v51, %v825_v17 }
 0x10f   : > { %v1072_v19 = vmax.f32 %v1040_v16, 0.0  ;;  %v775_v20 = vpop.f32.mrf.mxu2  ;;  %v1025_v28 = vadd.f32 %v1859_v55, %v989_v23 }
 0x110   : > { %v864_v21 = vpop.f32.mrf.mxu3 }
 0x111   : > { %v1591_v22 = vpack.c.bf16 %v1072_v19, %v1071_v18  ;;  %v737_v24 = vpop.f32.mrf.mxu0  ;;  %v865_v26 = vadd.f32 %v864_v21, %v775_v20  ;;  %v1057_v34 = vmax.f32 %v1025_v28, 0.0 }
 0x112   : > { %v826_v25 = vpop.f32.mrf.mxu1 }
 0x113   : > { %1615 = vst [vmem:[%s1869_s15 + $0x68] sm:$0xff] %v1591_v22   ;;  %v827_v27 = vadd.f32 %v826_v25, %v737_v24  ;;  %v1005_v30 = vmul.f32 %v1853_v51, %v865_v26 }
 0x115   : > { %v990_v29 = vmul.f32 %v1853_v51, %v827_v27  ;;  %v1041_v39 = vadd.f32 %v1859_v55, %v1005_v30 }
 0x117   : > { %v1026_v31 = vadd.f32 %v1859_v55, %v990_v29  ;;  %v777_v32 = vpop.f32.mrf.mxu2  ;;  %v1073_v44 = vmax.f32 %v1041_v39, 0.0 }
 0x118   : > { %v866_v33 = vpop.f32.mrf.mxu3 }
 0x119   : > { %v1058_v35 = vmax.f32 %v1026_v31, 0.0  ;;  %v867_v36 = vadd.f32 %v866_v33, %v777_v32  ;;  %v740_v37 = vpop.f32.mrf.mxu0 }
 0x11a   : > { %v829_v38 = vpop.f32.mrf.mxu1 }
 0x11b   : > { %v1556_v40 = vpack.c.bf16 %v1058_v35, %v1057_v34  ;;  %v1006_v41 = vmul.f32 %v1853_v51, %v867_v36  ;;  %v830_v43 = vadd.f32 %v829_v38, %v740_v37 }
 0x11d   : > { %1608 = vst [vmem:[%s1869_s15 + $0x30] sm:$0xff] %v1556_v40   ;;  %v1042_v42 = vadd.f32 %v1859_v55, %v1006_v41  ;;  %v991_v49 = vmul.f32 %v1853_v51, %v830_v43 }
 0x11f   : > { %v1074_v45 = vmax.f32 %v1042_v42, 0.0  ;;  %v780_v46 = vpop.f32.mrf.mxu2  ;;  %v1027_v56 = vadd.f32 %v1859_v55, %v991_v49 }
 0x120   : > { %v869_v47 = vpop.f32.mrf.mxu3 }
 0x121   : > { %v1596_v48 = vpack.c.bf16 %v1074_v45, %v1073_v44  ;;  %v742_v50 = vpop.f32.mrf.mxu0  ;;  %v870_v53 = vadd.f32 %v869_v47, %v780_v46  ;;  %v1059_v62 = vmax.f32 %v1027_v56, 0.0 }
 0x122   : > { %v831_v52 = vpop.f32.mrf.mxu1 }
 0x123   : > { %1616 = vst [vmem:[%s1869_s15 + $0x70] sm:$0xff] %v1596_v48   ;;  %v832_v54 = vadd.f32 %v831_v52, %v742_v50  ;;  %v1007_v58 = vmul.f32 %v1853_v51, %v870_v53 }
 0x125   : > { %v992_v57 = vmul.f32 %v1853_v51, %v832_v54  ;;  %v1043_v1 = vadd.f32 %v1859_v55, %v1007_v58 }
 0x127   : > { %v1028_v59 = vadd.f32 %v1859_v55, %v992_v57  ;;  %v782_v60 = vpop.f32.mrf.mxu2  ;;  %v1075_v5 = vmax.f32 %v1043_v1, 0.0 }
 0x128   : > { %v871_v61 = vpop.f32.mrf.mxu3 }
 0x129   : > { %v1060_v63 = vmax.f32 %v1028_v59, 0.0  ;;  %v872_v0 = vadd.f32 %v871_v61, %v782_v60 }
 0x12b   : > { %v1561_v2 = vpack.c.bf16 %v1060_v63, %v1059_v62  ;;  %v1008_v3 = vmul.f32 %v1853_v51, %v872_v0 }
 0x12d   : > { %1609 = vst [vmem:[%s1869_s15 + $0x38] sm:$0xff] %v1561_v2   ;;  %v1044_v4 = vadd.f32 %v1859_v55, %v1008_v3 }
 0x12f   : > { %v1076_v6 = vmax.f32 %v1044_v4, 0.0 }
 0x131   : > { %v1601_v7 = vpack.c.bf16 %v1076_v6, %v1075_v5 }
 0x133   : > { %1617 = vst [vmem:[%s1869_s15 + $0x78] sm:$0xff] %v1601_v7  }
 0x134 PF: > { %s14_s17 = sadd.s32 1, %s1682_s17   ;;  %s1960_s15 = smov %s1678_s16 }
 0x135   : > { %p11_p5 = scmp.ge.s32.totalorder %s14_s17, 4   ;;  %s1961_s16 = smov %s1963_s18 }
 0x137   :  { %13 = sbr.rel (!%p11_p5) target bundleno = 2 (0x2), region = 83 }

// kernel: resnet_forward.22
= control target key start
LH: loop header
LB: loop body
LE: loop exit
PB: predicated region body
PF: predicated region fallthrough
CT: control target
= control target key end

     0   :  { %s1657_s15 = smov 0   ;;  %s1659_s16 = smov 0   ;;  %s1968_s0 = inlined_call_operand.vmem [shape: bf16[128,1152], index: 0, kind: input, shape index: {}]   ;;  %s1969_s1 = inlined_call_operand.vmem [shape: bf16[1152,128], index: 1, kind: input, shape index: {}]   ;;  %s1970_s2 = inlined_call_operand.vmem [shape: f32[1,128], index: 2, kind: input, shape index: {}]   ;;  %s1971_s3 = inlined_call_operand.vmem [shape: f32[1,128], index: 3, kind: input, shape index: {}]   ;;  %s1972_s4 = inlined_call_operand.vmem [shape: bf16[128,128], index: 4, kind: output, shape index: {}]  }
   0x1   :  { %s1661_s17 = smov 0   ;;  %s1663_s18 = smov 0  }
   0x2   :  { %s1665_s19 = smov 0  }
   0x3 LB: > { %s26_s20 = sadd.s32 1, %s1625_s18  ;;  %p49_p1 = scmp.ne.s32.totalorder %s1617_s16, %s1613_s15  ;;  %s1629_s19 = sphi %s1665_s19, %s14_s19   ;;  %s1625_s18 = sphi %s1663_s18, %s1976_s18   ;;  %s1621_s17 = sphi %s1661_s17, %s1975_s17   ;;  %s1617_s16 = sphi %s1659_s16, %s1974_s16   ;;  %s1613_s15 = sphi %s1657_s15, %s1973_s15  }
   0x4   : > { %p27_p0 = scmp.ge.s32.totalorder %s26_s20, 3  ;;  %p50_p2 = scmp.eq.s32.totalorder %s1629_s19, 0 }
   0x5   : > { %s42_s22 = sadd.s32 1, %s1617_s16  ;;  %p1192_p5 = scmp.ge.s32.totalorder %s1629_s19, 3 }
   0x6   : > { %s1978_s20 = smov (%p27_p0, %s26_s20), 0  ;;  %p51_p3 = por %p50_p2, %p49_p1 }
   0x7   : > { %s38_s21 = ssub.s32 %s1625_s18, %s1978_s20  ;;  %195 = sbr.rel (%p1192_p5) target bundleno = 49 (0x31), region = 24 }
   0x8   : > { %p40_p4 = scmp.eq.s32.totalorder %s38_s21, 0 }
   0xa   : > { %s1692_s23 = scalar_select %p40_p4, %s1617_s16, %s42_s22  }
   0xc   : > { %198 = sbr.rel (!%p51_p3) target bundleno = 49 (0x31), region = 28  ;;  %s200_s24 = sand.u32 (%p51_p3), 1, %s1617_s16  }
   0xd   : > { %s1426_s25 = smul.u32 (%p51_p3), 12, %s1625_s18 }
   0xe   : > { %s1546_s26 = smul.u32 (%p51_p3), 192, %s200_s24 }
   0xf   : > { %s1700_s29 = scalar_lea.vmem (%p51_p3), %s1968_s0, %s1426_s25 }
  0x10   : > { %v223_v0 = vld [vmem:[%s1700_s29] sm:$0xff] (%p51_p3)  ;;  %v227_v2 = vld [vmem:[%s1700_s29 + $0x48] sm:$0xff] (%p51_p3)  ;;  %s1705_s30 = scalar_lea.vmem (%p51_p3), [#allocation3], %s1546_s26  ;;  %v231_v4 = vld [vmem:[%s1700_s29 + $0x90] sm:$0xff] (%p51_p3) }
  0x11   : > { %v225_v1 = vld [vmem:[%s1700_s29 + $0x24] sm:$0xff]  ;;  %224 = vst [vmem:[%s1705_s30] sm:$0xff] %v223_v0  ;;  %v229_v3 = vld [vmem:[%s1700_s29 + $0x6c] sm:$0xff]  ;;  %v233_v5 = vld [vmem:[%s1700_s29 + $0xb4] sm:$0xff] }
  0x12   : > { %226 = vst [vmem:[%s1705_s30 + $0xc] sm:$0xff] %v225_v1  ;;  %v235_v6 = vld [vmem:[%s1700_s29 + $0xd8] sm:$0xff]  ;;  %v239_v8 = vld [vmem:[%s1700_s29 + $0x120] sm:$0xff]  ;;  %v243_v10 = vld [vmem:[%s1700_s29 + $0x168] sm:$0xff] }
  0x13   : > { %228 = vst [vmem:[%s1705_s30 + $0x18] sm:$0xff] %v227_v2  ;;  %v237_v7 = vld [vmem:[%s1700_s29 + $0xfc] sm:$0xff]  ;;  %v241_v9 = vld [vmem:[%s1700_s29 + $0x144] sm:$0xff]  ;;  %v245_v11 = vld [vmem:[%s1700_s29 + $0x18c] sm:$0xff] }
  0x14   : > { %230 = vst [vmem:[%s1705_s30 + $0x24] sm:$0xff] %v229_v3  ;;  %v247_v12 = vld [vmem:[%s1700_s29 + $0x1b0] sm:$0xff]  ;;  %v251_v14 = vld [vmem:[%s1700_s29 + $0x1f8] sm:$0xff]  ;;  %v1194_v16 = vld [vmem:[%s1700_s29 + $0x8] sm:$0xf] }
  0x15   : > { %232 = vst [vmem:[%s1705_s30 + $0x30] sm:$0xff] %v231_v4  ;;  %v249_v13 = vld [vmem:[%s1700_s29 + $0x1d4] sm:$0xff]  ;;  %v253_v15 = vld [vmem:[%s1700_s29 + $0x21c] sm:$0xff]  ;;  %v1196_v17 = vld [vmem:[%s1700_s29 + $0x2c] sm:$0xf] }
  0x16   : > { %234 = vst [vmem:[%s1705_s30 + $0x3c] sm:$0xff] %v233_v5  ;;  %v1198_v18 = vld [vmem:[%s1700_s29 + $0x50] sm:$0xf]  ;;  %v1200_v19 = vld [vmem:[%s1700_s29 + $0x74] sm:$0xf] }
  0x17   : > { %236 = vst [vmem:[%s1705_s30 + $0x48] sm:$0xff] %v235_v6  ;;  %v1202_v20 = vld [vmem:[%s1700_s29 + $0x98] sm:$0xf]  ;;  %v1204_v21 = vld [vmem:[%s1700_s29 + $0xbc] sm:$0xf] }
  0x18   : > { %238 = vst [vmem:[%s1705_s30 + $0x54] sm:$0xff] %v237_v7  ;;  %v1206_v22 = vld [vmem:[%s1700_s29 + $0xe0] sm:$0xf]  ;;  %v1208_v23 = vld [vmem:[%s1700_s29 + $0x104] sm:$0xf] }
  0x19   : > { %240 = vst [vmem:[%s1705_s30 + $0x60] sm:$0xff] %v239_v8  ;;  %v1210_v24 = vld [vmem:[%s1700_s29 + $0x128] sm:$0xf]  ;;  %v1212_v25 = vld [vmem:[%s1700_s29 + $0x14c] sm:$0xf] }
  0x1a   : > { %242 = vst [vmem:[%s1705_s30 + $0x6c] sm:$0xff] %v241_v9  ;;  %v1214_v26 = vld [vmem:[%s1700_s29 + $0x170] sm:$0xf]  ;;  %v1216_v27 = vld [vmem:[%s1700_s29 + $0x194] sm:$0xf] }
  0x1b   : > { %244 = vst [vmem:[%s1705_s30 + $0x78] sm:$0xff] %v243_v10  ;;  %v1218_v28 = vld [vmem:[%s1700_s29 + $0x1b8] sm:$0xf]  ;;  %v1220_v29 = vld [vmem:[%s1700_s29 + $0x1dc] sm:$0xf] }
  0x1c   : > { %246 = vst [vmem:[%s1705_s30 + $0x84] sm:$0xff] %v245_v11  ;;  %v1222_v30 = vld [vmem:[%s1700_s29 + $0x200] sm:$0xf]  ;;  %v1224_v31 = vld [vmem:[%s1700_s29 + $0x224] sm:$0xf] }
  0x1d   : > { %248 = vst [vmem:[%s1705_s30 + $0x90] sm:$0xff] %v247_v12 }
  0x1e   : > { %250 = vst [vmem:[%s1705_s30 + $0x9c] sm:$0xff] %v249_v13 }
  0x1f   : > { %252 = vst [vmem:[%s1705_s30 + $0xa8] sm:$0xff] %v251_v14 }
  0x20   : > { %254 = vst [vmem:[%s1705_s30 + $0xb4] sm:$0xff] %v253_v15 }
  0x21   : > { %1195 = vst [vmem:[%s1705_s30 + $0x8] sm:$0xf] %v1194_v16 }
  0x22   : > { %1197 = vst [vmem:[%s1705_s30 + $0x14] sm:$0xf] %v1196_v17 }
  0x23   : > { %1199 = vst [vmem:[%s1705_s30 + $0x20] sm:$0xf] %v1198_v18 }
  0x24   : > { %1201 = vst [vmem:[%s1705_s30 + $0x2c] sm:$0xf] %v1200_v19 }
  0x25   : > { %1203 = vst [vmem:[%s1705_s30 + $0x38] sm:$0xf] %v1202_v20 }
  0x26   : > { %1205 = vst [vmem:[%s1705_s30 + $0x44] sm:$0xf] %v1204_v21 }
  0x27   : > { %1207 = vst [vmem:[%s1705_s30 + $0x50] sm:$0xf] %v1206_v22 }
  0x28   : > { %1209 = vst [vmem:[%s1705_s30 + $0x5c] sm:$0xf] %v1208_v23 }
  0x29   : > { %1211 = vst [vmem:[%s1705_s30 + $0x68] sm:$0xf] %v1210_v24 }
  0x2a   : > { %1213 = vst [vmem:[%s1705_s30 + $0x74] sm:$0xf] %v1212_v25 }
  0x2b   : > { %1215 = vst [vmem:[%s1705_s30 + $0x80] sm:$0xf] %v1214_v26 }
  0x2c   : > { %1217 = vst [vmem:[%s1705_s30 + $0x8c] sm:$0xf] %v1216_v27 }
  0x2d   : > { %1219 = vst [vmem:[%s1705_s30 + $0x98] sm:$0xf] %v1218_v28 }
  0x2e   : > { %1221 = vst [vmem:[%s1705_s30 + $0xa4] sm:$0xf] %v1220_v29 }
  0x2f   : > { %1223 = vst [vmem:[%s1705_s30 + $0xb0] sm:$0xf] %v1222_v30 }
  0x30   : > { %1225 = vst [vmem:[%s1705_s30 + $0xbc] sm:$0xf] %v1224_v31 }
  0x31 PF: > { %p1226_p6 = scmp.ge.s32.totalorder %s1629_s19, 1  ;;  %p311_p7 = scmp.lt.s32.totalorder %s1629_s19, 4 }
  0x33   : > { %p312_p8 = pnand %p1226_p6, %p311_p7 }
  0x34   : > { %s318_s5 = sand.u32 (!%p312_p8), 1, %s1613_s15   ;;  %s362_s6 = smul.u32 (!%p312_p8), 48, %s1621_s17 }
  0x35   : > { %315 = sbr.rel (%p312_p8) target bundleno = 360 (0x168), region = 58  ;;  %p1228_p10 = scmp.ne.s32.totalorder (!%p312_p8), %s1621_s17, 0 }
  0x36   : > { %s1547_s7 = smul.u32 (!%p312_p8), 192, %s318_s5  ;;  %p363_p9 = scmp.lt.s32.totalorder (!%p312_p8), %s362_s6, 143 }
  0x38   : > { %s1777_s12 = scalar_lea.vmem (!%p312_p8), [#allocation3], %s1547_s7 }
  0x3a   : > { %s1980_s6 = smov (!%p363_p9, %s362_s6), 143  ;;  %389 = sbr.rel (%p1228_p10) target bundleno = 80 (0x50), region = 66 }
  0x3b   : > { %s1227_s8 = sshll.u32 %s1980_s6, 2 }
  0x3c   : > { %s1775_s11 = scalar_lea.vmem %s1969_s1, %s1227_s8 }
  0x3f   : > { %v1631_v32 = vmov 0.0  }
  0x40   : > { %390 = vst [vmem:[#allocation2 + $0x30] sm:$0xff] %v1631_v32 }
  0x41   : > { %391 = vst [vmem:[#allocation2] sm:$0xff] %v1631_v32 }
  0x42   : > { %392 = vst [vmem:[#allocation2 + $0x58] sm:$0xff] %v1631_v32 }
  0x43   : > { %393 = vst [vmem:[#allocation2 + $0x18] sm:$0xff] %v1631_v32 }
  0x44   : > { %394 = vst [vmem:[#allocation2 + $0x50] sm:$0xff] %v1631_v32 }
  0x45   : > { %395 = vst [vmem:[#allocation2 + $0x68] sm:$0xff] %v1631_v32 }
  0x46   : > { %396 = vst [vmem:[#allocation2 + $0x8] sm:$0xff] %v1631_v32 }
  0x47   : > { %397 = vst [vmem:[#allocation2 + $0x48] sm:$0xff] %v1631_v32 }
  0x48   : > { %398 = vst [vmem:[#allocation2 + $0x40] sm:$0xff] %v1631_v32 }
  0x49   : > { %399 = vst [vmem:[#allocation2 + $0x20] sm:$0xff] %v1631_v32 }
  0x4a   : > { %400 = vst [vmem:[#allocation2 + $0x10] sm:$0xff] %v1631_v32 }
  0x4b   : > { %401 = vst [vmem:[#allocation2 + $0x38] sm:$0xff] %v1631_v32 }
  0x4c   : > { %402 = vst [vmem:[#allocation2 + $0x60] sm:$0xff] %v1631_v32 }
  0x4d   : > { %403 = vst [vmem:[#allocation2 + $0x70] sm:$0xff] %v1631_v32 }
  0x4e   : > { %404 = vst [vmem:[#allocation2 + $0x78] sm:$0xff] %v1631_v32 }
  0x4f   : > { %405 = vst [vmem:[#allocation2 + $0x28] sm:$0xff] %v1631_v32 }
  0x50 PF: > { %v1458_v33 = vld [vmem:[%s1775_s11 + $0x38] sm:$0xff]  ;;  %v1457_v36 = vld [vmem:[%s1775_s11 + $0x30] sm:$0xff]  ;;  %v1456_v39 = vld [vmem:[%s1775_s11 + $0x28] sm:$0xff]  ;;  %p1421_p11 = scmp.ne.s32.totalorder %s1621_s17, 2 }
  0x51   : > { %v1782_v34 = vld [vmem:[%s1775_s11 + $0x78] sm:$0xff]  ;;  %774 = vmatpush.bf16.msra.mxu0 %v1458_v33  ;;  %1522 = vmatpush.bf16.msra.mxu3 %v1458_v33  ;;  %v1791_v37 = vld [vmem:[%s1775_s11 + $0x70] sm:$0xff]  ;;  %v1464_v40 = vld [vmem:[%s1775_s11 + $0x68] sm:$0xff] }
  0x52   : > { %v1785_v35 = vld [vmem:[%s1775_s11 + $0xb8] sm:$0xff]  ;;  %823 = vmatpush.bf16.msra.mxu1 %v1782_v34  ;;  %v1794_v38 = vld [vmem:[%s1775_s11 + $0xb0] sm:$0xff]  ;;  %v1801_v41 = vld [vmem:[%s1775_s11 + $0xa8] sm:$0xff] }
  0x53   : > { %872 = vmatpush.bf16.msra.mxu2 %v1785_v35  ;;  %v1455_v42 = vld [vmem:[%s1775_s11 + $0x20] sm:$0xff]  ;;  %v1454_v45 = vld [vmem:[%s1775_s11 + $0x18] sm:$0xff]  ;;  %v1453_v48 = vld [vmem:[%s1775_s11 + $0x10] sm:$0xff] }
  0x54   : > { %v1463_v43 = vld [vmem:[%s1775_s11 + $0x60] sm:$0xff]  ;;  %v1462_v46 = vld [vmem:[%s1775_s11 + $0x58] sm:$0xff]  ;;  %v1461_v49 = vld [vmem:[%s1775_s11 + $0x50] sm:$0xff] }
  0x55   : > { %775 = vmatpush.bf16.msra.mxu0 %v1457_v36  ;;  %1523 = vmatpush.bf16.msra.mxu3 %v1457_v36  ;;  %v1807_v44 = vld [vmem:[%s1775_s11 + $0xa0] sm:$0xff]  ;;  %v1813_v47 = vld [vmem:[%s1775_s11 + $0x98] sm:$0xff]  ;;  %v1819_v50 = vld [vmem:[%s1775_s11 + $0x90] sm:$0xff] }
  0x56   : > { %824 = vmatpush.bf16.msra.mxu1 %v1791_v37  ;;  %v1452_v51 = vld [vmem:[%s1775_s11 + $0x8] sm:$0xff]  ;;  %v1451_v54 = vld [vmem:[%s1775_s11] sm:$0xff]  ;;  %v1303_v59 = vld [vmem:[%s1777_s12 + $0x90] sm:$0xf] }
  0x57   : > { %873 = vmatpush.bf16.msra.mxu2 %v1794_v38  ;;  %v1460_v52 = vld [vmem:[%s1775_s11 + $0x48] sm:$0xff]  ;;  %v1459_v55 = vld [vmem:[%s1775_s11 + $0x40] sm:$0xff]  ;;  %v1446_v60 = vld [vmem:[%s1777_s12 + $0x98] sm:$0xf0] }
  0x58   : > { %v1825_v53 = vld [vmem:[%s1775_s11 + $0x88] sm:$0xff]  ;;  %v1830_v56 = vld [vmem:[%s1775_s11 + $0x80] sm:$0xff]  ;;  %v1233_v62 = vld [vmem:[%s1777_s12 + $0xc] sm:$0xf0]  ;;  %v1304_v2 = vor.u32 %v1446_v60, %v1303_v59 }
  0x59   : > { %776 = vmatpush.bf16.msra.mxu0 %v1456_v39  ;;  %1524 = vmatpush.bf16.msra.mxu3 %v1456_v39  ;;  %v1231_v57 = vld [vmem:[%s1777_s12] sm:$0xf]  ;;  %v1428_v58 = vld [vmem:[%s1777_s12 + $0x8] sm:$0xf0]  ;;  %v1427_v61 = vld [vmem:[%s1777_s12 + $0x4] sm:$0xf] }
  0x5a   : > { %825 = vmatpush.bf16.msra.mxu1 %v1464_v40  ;;  %v1239_v63 = vld [vmem:[%s1777_s12 + $0x8] sm:$0xf]  ;;  %v1429_v0 = vld [vmem:[%s1777_s12 + $0x10] sm:$0xf0]  ;;  %v1232_v1 = vor.u32 %v1428_v58, %v1231_v57  ;;  %v1236_v3 = vor.u32 %v1427_v61, %v1233_v62  ;;  %v1243_v5 = vld [vmem:[%s1777_s12 + $0x18] sm:$0xf] }
  0x5b   : > { %874 = vmatpush.bf16.msra.mxu2 %v1801_v41  ;;  %v1240_v4 = vor.u32 %v1429_v0, %v1239_v63  ;;  %v1431_v6 = vld [vmem:[%s1777_s12 + $0x20] sm:$0xf0]  ;;  %v1315_v7 = vld [vmem:[%s1777_s12 + $0xa8] sm:$0xf]  ;;  %v1449_v8 = vld [vmem:[%s1777_s12 + $0xb0] sm:$0xf0] }
  0x5c   : > { %v1430_v9 = vld [vmem:[%s1777_s12 + $0x1c] sm:$0xf]  ;;  %v1245_v10 = vld [vmem:[%s1777_s12 + $0x24] sm:$0xf0]  ;;  %v1251_v11 = vld [vmem:[%s1777_s12 + $0x20] sm:$0xf]  ;;  %v1244_v13 = vor.u32 %v1431_v6, %v1243_v5  ;;  %v1316_v14 = vor.u32 %v1449_v8, %v1315_v7 }
  0x5d   : > { %777 = vmatpush.bf16.msra.mxu0 %v1455_v42  ;;  %1525 = vmatpush.bf16.msra.mxu3 %v1455_v42  ;;  %v1432_v12 = vld [vmem:[%s1777_s12 + $0x28] sm:$0xf0]  ;;  %v1248_v15 = vor.u32 %v1430_v9, %v1245_v10  ;;  %v1255_v17 = vld [vmem:[%s1777_s12 + $0x30] sm:$0xf]  ;;  %v1434_v18 = vld [vmem:[%s1777_s12 + $0x38] sm:$0xf0] }
  0x5e   : > { %826 = vmatpush.bf16.msra.mxu1 %v1463_v43  ;;  %v1252_v16 = vor.u32 %v1432_v12, %v1251_v11  ;;  %v1433_v19 = vld [vmem:[%s1777_s12 + $0x34] sm:$0xf]  ;;  %v1305_v21 = vld [vmem:[%s1777_s12 + $0x9c] sm:$0xf0]  ;;  %v1263_v23 = vld [vmem:[%s1777_s12 + $0x38] sm:$0xf]  ;;  %v1256_v25 = vor.u32 %v1434_v18, %v1255_v17 }
  0x5f   : > { %875 = vmatpush.bf16.msra.mxu2 %v1807_v44  ;;  %v1445_v20 = vld [vmem:[%s1777_s12 + $0x94] sm:$0xf]  ;;  %v1257_v22 = vld [vmem:[%s1777_s12 + $0x3c] sm:$0xf0]  ;;  %v1435_v24 = vld [vmem:[%s1777_s12 + $0x40] sm:$0xf0] }
  0x60   : > { %v1308_v26 = vor.u32 %v1445_v20, %v1305_v21  ;;  %v1260_v27 = vor.u32 %v1433_v19, %v1257_v22  ;;  %v1264_v28 = vor.u32 %v1435_v24, %v1263_v23  ;;  %v1267_v29 = vld [vmem:[%s1777_s12 + $0x48] sm:$0xf]  ;;  %v1437_v30 = vld [vmem:[%s1777_s12 + $0x50] sm:$0xf0]  ;;  %v1436_v31 = vld [vmem:[%s1777_s12 + $0x4c] sm:$0xf] }
  0x61   : > { %778 = vmatpush.bf16.msra.mxu0 %v1454_v45  ;;  %1526 = vmatpush.bf16.msra.mxu3 %v1454_v45  ;;  %v1448_v32 = vld [vmem:[%s1777_s12 + $0xac] sm:$0xf]  ;;  %v1317_v33 = vld [vmem:[%s1777_s12 + $0xb4] sm:$0xf0]  ;;  %v1438_v36 = vld [vmem:[%s1777_s12 + $0x58] sm:$0xf0] }
  0x62   : > { %827 = vmatpush.bf16.msra.mxu1 %v1462_v46  ;;  %v1320_v39 = vor.u32 %v1448_v32, %v1317_v33  ;;  %v1440_v42 = vld [vmem:[%s1777_s12 + $0x68] sm:$0xf0]  ;;  %v1447_v45 = vld [vmem:[%s1777_s12 + $0xa0] sm:$0xf0]  ;;  %v1323_v57 = vld [vmem:[%s1777_s12 + $0xb0] sm:$0xf] }
  0x63   : > { %876 = vmatpush.bf16.msra.mxu2 %v1813_v47  ;;  %v1293_v58 = vld [vmem:[%s1777_s12 + $0x84] sm:$0xf0]  ;;  %v1299_v59 = vld [vmem:[%s1777_s12 + $0x80] sm:$0xf]  ;;  %v1444_v60 = vld [vmem:[%s1777_s12 + $0x88] sm:$0xf0] }
  0x64   : > { %v1300_v0 = vor.u32 %v1444_v60, %v1299_v59  ;;  %v406_v5 = vld [vmem:[#allocation2 + $0x30] sm:$0xff]  ;;  %v408_v21 = vld [vmem:[#allocation2 + $0x58] sm:$0xff] }
  0x65   : > { %779 = vmatpush.bf16.msra.mxu0 %v1453_v48  ;;  %1527 = vmatpush.bf16.msra.mxu3 %v1453_v48  ;;  %v1441_v48 = vld [vmem:[%s1777_s12 + $0x70] sm:$0xf0] }
  0x66   : > { %828 = vmatpush.bf16.msra.mxu1 %v1461_v49 }
  0x67   : > { %877 = vmatpush.bf16.msra.mxu2 %v1819_v50 }
  0x69   : > { %780 = vmatpush.bf16.msra.mxu0 %v1452_v51  ;;  %1528 = vmatpush.bf16.msra.mxu3 %v1452_v51 }
  0x6a   : > { %829 = vmatpush.bf16.msra.mxu1 %v1460_v52 }
  0x6b   : > { %878 = vmatpush.bf16.msra.mxu2 %v1825_v53 }
  0x6d   : > { %781 = vmatpush.bf16.msra.mxu0 %v1451_v54  ;;  %1529 = vmatpush.bf16.msra.mxu3 %v1451_v54  ;;  %v1443_v54 = vld [vmem:[%s1777_s12 + $0x80] sm:$0xf0] }
  0x6e   : > { %830 = vmatpush.bf16.msra.mxu1 %v1459_v55 }
  0x6f   : > { %879 = vmatpush.bf16.msra.mxu2 %v1830_v56 }
  0x70   : > { %782 = vmatmul.bf16.vlgmr.msra.gmra.mxu0 %v1232_v1  ;;  %812 = vmatmul.bf16.vlgmr.msra.gmra.mxu3 %v1304_v2 }
  0x71   : > { %1530 = vmatpush.bf16.msrb.mxu3 %v1782_v34  ;;  %831 = vmatmul.bf16.vlgmr.msra.gmra.mxu1 %v1236_v3  ;;  %v1269_v34 = vld [vmem:[%s1777_s12 + $0x54] sm:$0xf0] }
  0x72   : > { %880 = vmatmul.bf16.vlgmr.msra.gmra.mxu2 %v1240_v4 }
  0x75   : > { %1531 = vmatpush.bf16.msrb.mxu3 %v1791_v37  ;;  %v1268_v37 = vor.u32 %v1437_v30, %v1267_v29  ;;  %v409_v29 = vld [vmem:[#allocation2 + $0x18] sm:$0xff] }
  0x79   : > { %1532 = vmatpush.bf16.msrb.mxu3 %v1464_v40 }
  0x7d   : > { %1533 = vmatpush.bf16.msrb.mxu3 %v1463_v43  ;;  %v1439_v43 = vld [vmem:[%s1777_s12 + $0x64] sm:$0xf] }
  0x80   : > { %787 = vmatmul.bf16.gmra.mxu0 %v1244_v13  ;;  %817 = vmatmul.bf16.gmra.mxu3 %v1316_v14  ;;  %v407_v13 = vld [vmem:[#allocation2] sm:$0xff] }
  0x81   : > { %1534 = vmatpush.bf16.msrb.mxu3 %v1462_v46  ;;  %836 = vmatmul.bf16.gmra.mxu1 %v1248_v15  ;;  %v1281_v46 = vld [vmem:[%s1777_s12 + $0x6c] sm:$0xf0] }
  0x82   : > { %885 = vmatmul.bf16.gmra.mxu2 %v1252_v16  ;;  %v1284_v51 = vor.u32 %v1439_v43, %v1281_v46 }
  0x85   : > { %1535 = vmatpush.bf16.msrb.mxu3 %v1461_v49 }
  0x89   : > { %1536 = vmatpush.bf16.msrb.mxu3 %v1460_v52 }
  0x8d   : > { %1537 = vmatpush.bf16.msrb.mxu3 %v1459_v55  ;;  %v1442_v55 = vld [vmem:[%s1777_s12 + $0x7c] sm:$0xf] }
  0x8e   : > { %v1296_v63 = vor.u32 %v1442_v55, %v1293_v58 }
  0x90   : > { %792 = vmatmul.bf16.gmra.mxu0 %v1256_v25  ;;  %861 = vmatmul.bf16.vlgmr.msrb.gmra.mxu3 %v1308_v26 }
  0x91   : > { %1538 = vmatpush.bf16.msra.mxu3 %v1785_v35  ;;  %841 = vmatmul.bf16.gmra.mxu1 %v1260_v27  ;;  %v1275_v35 = vld [vmem:[%s1777_s12 + $0x50] sm:$0xf] }
  0x92   : > { %890 = vmatmul.bf16.gmra.mxu2 %v1264_v28  ;;  %v1276_v40 = vor.u32 %v1438_v36, %v1275_v35 }
  0x95   : > { %1539 = vmatpush.bf16.msra.mxu3 %v1794_v38  ;;  %v1272_v38 = vor.u32 %v1436_v31, %v1269_v34 }
  0x99   : > { %1540 = vmatpush.bf16.msra.mxu3 %v1801_v41  ;;  %v1279_v41 = vld [vmem:[%s1777_s12 + $0x60] sm:$0xf] }
  0x9a   : > { %v1280_v49 = vor.u32 %v1440_v42, %v1279_v41 }
  0x9d   : > { %1541 = vmatpush.bf16.msra.mxu3 %v1807_v44  ;;  %v1311_v44 = vld [vmem:[%s1777_s12 + $0x98] sm:$0xf] }
  0xa0   : > { %797 = vmatmul.bf16.gmra.mxu0 %v1268_v37  ;;  %866 = vmatmul.bf16.gmra.mxu3 %v1320_v39  ;;  %v410_v37 = vld [vmem:[#allocation2 + $0x50] sm:$0xff] }
  0xa1   : > { %1542 = vmatpush.bf16.msra.mxu3 %v1813_v47  ;;  %846 = vmatmul.bf16.gmra.mxu1 %v1272_v38  ;;  %v1287_v47 = vld [vmem:[%s1777_s12 + $0x68] sm:$0xf] }
  0xa2   : > { %895 = vmatmul.bf16.gmra.mxu2 %v1276_v40  ;;  %v1288_v52 = vor.u32 %v1441_v48, %v1287_v47 }
  0xa5   : > { %1543 = vmatpush.bf16.msra.mxu3 %v1819_v50  ;;  %v1312_v50 = vor.u32 %v1447_v45, %v1311_v44  ;;  %v411_v45 = vld [vmem:[#allocation2 + $0x68] sm:$0xff] }
  0xa9   : > { %1544 = vmatpush.bf16.msra.mxu3 %v1825_v53  ;;  %v1291_v53 = vld [vmem:[%s1777_s12 + $0x78] sm:$0xf] }
  0xaa   : > { %v1292_v61 = vor.u32 %v1443_v54, %v1291_v53  ;;  %v412_v53 = vld [vmem:[#allocation2 + $0x8] sm:$0xff] }
  0xad   : > { %1545 = vmatpush.bf16.msra.mxu3 %v1830_v56  ;;  %v1450_v56 = vld [vmem:[%s1777_s12 + $0xb8] sm:$0xf0] }
  0xae   : > { %v1324_v62 = vor.u32 %v1450_v56, %v1323_v57 }
  0xb0   : > { %802 = vmatmul.bf16.gmra.mxu0 %v1280_v49  ;;  %910 = vmatmul.bf16.vlgmr.msra.gmra.mxu3 %v1312_v50 }
  0xb1   : > { %851 = vmatmul.bf16.gmra.mxu1 %v1284_v51 }
  0xb2   : > { %900 = vmatmul.bf16.gmra.mxu2 %v1288_v52 }
  0xc0   : > { %807 = vmatmul.bf16.gmra.mxu0 %v1292_v61  ;;  %915 = vmatmul.bf16.gmra.mxu3 %v1324_v62  ;;  %v413_v61 = vld [vmem:[#allocation2 + $0x48] sm:$0xff] }
  0xc1   : > { %856 = vmatmul.bf16.gmra.mxu1 %v1296_v63 }
  0xc2   : > { %905 = vmatmul.bf16.gmra.mxu2 %v1300_v0 }
  0xed   : > { %v783_v1 = vpop.f32.mrf.mxu0 }
  0xee   : > { %v832_v2 = vpop.f32.mrf.mxu1 }
  0xef   : > { %v833_v3 = vadd.f32 %v832_v2, %v783_v1 }
  0xf3   : > { %v1892_v4 = vpop.f32.mrf.mxu3 }
  0xf5   : > { %v881_v6 = vpop.f32.mrf.mxu2  ;;  %v785_v8 = vpop.f32.mrf.mxu0 }
  0xf6   : > { %v882_v7 = vadd.f32 %v881_v6, %v833_v3  ;;  %v834_v9 = vpop.f32.mrf.mxu1  ;;  %v418_v6 = vld [vmem:[#allocation2 + $0x60] sm:$0xff] }
  0xf7   : > { %v835_v11 = vadd.f32 %v834_v9, %v785_v8  ;;  %v414_v8 = vld [vmem:[#allocation2 + $0x40] sm:$0xff] }
  0xf8   : > { %v921_v10 = vadd.f32 %v882_v7, %v406_v5 }
  0xfa   : > { %937 = vst [vmem:[#allocation2 + $0x30] sm:$0xff] %v921_v10 }
  0xfb   : > { %v1894_v12 = vpop.f32.mrf.mxu3 }
  0xfd   : > { %v883_v14 = vpop.f32.mrf.mxu2  ;;  %v788_v16 = vpop.f32.mrf.mxu0 }
  0xfe   : > { %v884_v15 = vadd.f32 %v883_v14, %v835_v11  ;;  %v837_v17 = vpop.f32.mrf.mxu1 }
  0xff   : > { %v838_v19 = vadd.f32 %v837_v17, %v788_v16 }
 0x100   : > { %v922_v18 = vadd.f32 %v884_v15, %v407_v13 }
 0x102   : > { %938 = vst [vmem:[#allocation2] sm:$0xff] %v922_v18 }
 0x103   : > { %v1896_v20 = vpop.f32.mrf.mxu3 }
 0x105   : > { %v886_v22 = vpop.f32.mrf.mxu2  ;;  %v790_v24 = vpop.f32.mrf.mxu0 }
 0x106   : > { %v887_v23 = vadd.f32 %v886_v22, %v838_v19  ;;  %v839_v25 = vpop.f32.mrf.mxu1  ;;  %v419_v19 = vld [vmem:[#allocation2 + $0x70] sm:$0xff]  ;;  %v415_v22 = vld [vmem:[#allocation2 + $0x20] sm:$0xff] }
 0x107   : > { %v840_v27 = vadd.f32 %v839_v25, %v790_v24 }
 0x108   : > { %v923_v26 = vadd.f32 %v887_v23, %v408_v21 }
 0x10a   : > { %939 = vst [vmem:[#allocation2 + $0x58] sm:$0xff] %v923_v26 }
 0x10b   : > { %v1898_v28 = vpop.f32.mrf.mxu3 }
 0x10d   : > { %v888_v30 = vpop.f32.mrf.mxu2  ;;  %v793_v32 = vpop.f32.mrf.mxu0 }
 0x10e   : > { %v889_v31 = vadd.f32 %v888_v30, %v840_v27  ;;  %v842_v33 = vpop.f32.mrf.mxu1 }
 0x10f   : > { %v843_v35 = vadd.f32 %v842_v33, %v793_v32  ;;  %v420_v32 = vld [vmem:[#allocation2 + $0x78] sm:$0xff] }
 0x110   : > { %v924_v34 = vadd.f32 %v889_v31, %v409_v29 }
 0x112   : > { %940 = vst [vmem:[#allocation2 + $0x18] sm:$0xff] %v924_v34  ;;  %v416_v34 = vld [vmem:[#allocation2 + $0x10] sm:$0xff] }
 0x113   : > { %v862_v36 = vpop.f32.mrf.mxu3 }
 0x114   : > { %v863_v5 = vadd.f32 %v862_v36, %v1892_v4 }
 0x115   : > { %v891_v39 = vpop.f32.mrf.mxu2  ;;  %v795_v40 = vpop.f32.mrf.mxu0 }
 0x116   : > { %v892_v38 = vadd.f32 %v891_v39, %v843_v35  ;;  %v844_v41 = vpop.f32.mrf.mxu1 }
 0x117   : > { %v845_v43 = vadd.f32 %v844_v41, %v795_v40 }
 0x118   : > { %v925_v42 = vadd.f32 %v892_v38, %v410_v37 }
 0x11a   : > { %941 = vst [vmem:[#allocation2 + $0x50] sm:$0xff] %v925_v42 }
 0x11b   : > { %v864_v44 = vpop.f32.mrf.mxu3 }
 0x11c   : > { %v865_v17 = vadd.f32 %v864_v44, %v1894_v12 }
 0x11d   : > { %v893_v46 = vpop.f32.mrf.mxu2  ;;  %v798_v48 = vpop.f32.mrf.mxu0 }
 0x11e   : > { %v894_v47 = vadd.f32 %v893_v46, %v845_v43  ;;  %v847_v49 = vpop.f32.mrf.mxu1  ;;  %v421_v43 = vld [vmem:[#allocation2 + $0x28] sm:$0xff] }
 0x11f   : > { %v848_v51 = vadd.f32 %v847_v49, %v798_v48 }
 0x120   : > { %v926_v50 = vadd.f32 %v894_v47, %v411_v45  ;;  %v417_v45 = vld [vmem:[#allocation2 + $0x38] sm:$0xff] }
 0x122   : > { %942 = vst [vmem:[#allocation2 + $0x68] sm:$0xff] %v926_v50 }
 0x123   : > { %v867_v52 = vpop.f32.mrf.mxu3 }
 0x124   : > { %v868_v31 = vadd.f32 %v867_v52, %v1896_v20 }
 0x125   : > { %v896_v54 = vpop.f32.mrf.mxu2  ;;  %v800_v57 = vpop.f32.mrf.mxu0 }
 0x126   : > { %v897_v55 = vadd.f32 %v896_v54, %v848_v51  ;;  %v849_v56 = vpop.f32.mrf.mxu1 }
 0x127   : > { %v850_v59 = vadd.f32 %v849_v56, %v800_v57 }
 0x128   : > { %v927_v58 = vadd.f32 %v897_v55, %v412_v53 }
 0x12a   : > { %943 = vst [vmem:[#allocation2 + $0x8] sm:$0xff] %v927_v58 }
 0x12b   : > { %v869_v60 = vpop.f32.mrf.mxu3 }
 0x12c   : > { %v870_v41 = vadd.f32 %v869_v60, %v1898_v28 }
 0x12d   : > { %v898_v62 = vpop.f32.mrf.mxu2  ;;  %v803_v0 = vpop.f32.mrf.mxu0 }
 0x12e   : > { %v899_v63 = vadd.f32 %v898_v62, %v850_v59  ;;  %v852_v1 = vpop.f32.mrf.mxu1 }
 0x12f   : > { %v853_v3 = vadd.f32 %v852_v1, %v803_v0 }
 0x130   : > { %v928_v2 = vadd.f32 %v899_v63, %v413_v61 }
 0x132   : > { %944 = vst [vmem:[#allocation2 + $0x48] sm:$0xff] %v928_v2 }
 0x133   : > { %v911_v7 = vpop.f32.mrf.mxu3 }
 0x134   : > { %v912_v10 = vadd.f32 %v911_v7, %v863_v5 }
 0x135   : > { %v901_v9 = vpop.f32.mrf.mxu2  ;;  %v805_v13 = vpop.f32.mrf.mxu0 }
 0x136   : > { %v902_v11 = vadd.f32 %v901_v9, %v853_v3  ;;  %v933_v14 = vadd.f32 %v912_v10, %v418_v6  ;;  %v854_v15 = vpop.f32.mrf.mxu1 }
 0x137   : > { %v855_v18 = vadd.f32 %v854_v15, %v805_v13 }
 0x138   : > { %v929_v16 = vadd.f32 %v902_v11, %v414_v8  ;;  %949 = vst [vmem:[#allocation2 + $0x60] sm:$0xff] %v933_v14 }
 0x13a   : > { %945 = vst [vmem:[#allocation2 + $0x40] sm:$0xff] %v929_v16 }
 0x13b   : > { %v913_v21 = vpop.f32.mrf.mxu3 }
 0x13c   : > { %v914_v4 = vadd.f32 %v913_v21, %v865_v17 }
 0x13d   : > { %v903_v23 = vpop.f32.mrf.mxu2  ;;  %v808_v26 = vpop.f32.mrf.mxu0 }
 0x13e   : > { %v904_v24 = vadd.f32 %v903_v23, %v855_v18  ;;  %v934_v25 = vadd.f32 %v914_v4, %v419_v19  ;;  %v857_v27 = vpop.f32.mrf.mxu1 }
 0x13f   : > { %v858_v30 = vadd.f32 %v857_v27, %v808_v26 }
 0x140   : > { %v930_v29 = vadd.f32 %v904_v24, %v415_v22  ;;  %950 = vst [vmem:[#allocation2 + $0x70] sm:$0xff] %v934_v25 }
 0x142   : > { %946 = vst [vmem:[#allocation2 + $0x20] sm:$0xff] %v930_v29 }
 0x143   : > { %v916_v33 = vpop.f32.mrf.mxu3 }
 0x144   : > { %v917_v35 = vadd.f32 %v916_v33, %v868_v31 }
 0x145   : > { %v906_v12 = vpop.f32.mrf.mxu2  ;;  %v810_v38 = vpop.f32.mrf.mxu0 }
 0x146   : > { %v907_v36 = vadd.f32 %v906_v12, %v858_v30  ;;  %v935_v37 = vadd.f32 %v917_v35, %v420_v32  ;;  %v859_v40 = vpop.f32.mrf.mxu1 }
 0x147   : > { %v860_v42 = vadd.f32 %v859_v40, %v810_v38 }
 0x148   : > { %v931_v39 = vadd.f32 %v907_v36, %v416_v34  ;;  %951 = vst [vmem:[#allocation2 + $0x78] sm:$0xff] %v935_v37 }
 0x14a   : > { %947 = vst [vmem:[#allocation2 + $0x10] sm:$0xff] %v931_v39 }
 0x14b   : > { %v918_v44 = vpop.f32.mrf.mxu3 }
 0x14c   : > { %v919_v20 = vadd.f32 %v918_v44, %v870_v41 }
 0x14d   : > { %v908_v46 = vpop.f32.mrf.mxu2 }
 0x14e   : > { %v909_v47 = vadd.f32 %v908_v46, %v860_v42  ;;  %v936_v48 = vadd.f32 %v919_v20, %v421_v43  ;;  %956 = sbr.rel (%p1421_p11) target bundleno = 360 (0x168), region = 70 }
 0x150   : > { %v932_v49 = vadd.f32 %v909_v47, %v417_v45  ;;  %952 = vst [vmem:[#allocation2 + $0x28] sm:$0xff] %v936_v48 }
 0x152   : > { %948 = vst [vmem:[#allocation2 + $0x38] sm:$0xff] %v932_v49 }
 0x153   : > { %v957_v50 = vld [vmem:[#allocation2 + $0x30] sm:$0xff]  ;;  %v958_v51 = vld [vmem:[#allocation2] sm:$0xff]  ;;  %v959_v53 = vld [vmem:[#allocation2 + $0x58] sm:$0xff] }
 0x154   : > { %v1589_v28 = vld [vmem:[%s1970_s2] ss:$0 sm:$0xff]  ;;  %v960_v54 = vld [vmem:[#allocation2 + $0x18] sm:$0xff]  ;;  %v961_v55 = vld [vmem:[#allocation2 + $0x50] sm:$0xff] }
 0x155   : > { %v1911_v52 = vld [vmem:[%s1971_s3] ss:$0 sm:$0xff]  ;;  %v977_v57 = vmul.f32 %v1589_v28, %v957_v50  ;;  %v978_v56 = vmul.f32 %v1589_v28, %v958_v51  ;;  %v979_v58 = vmul.f32 %v1589_v28, %v959_v53  ;;  %v980_v59 = vmul.f32 %v1589_v28, %v960_v54  ;;  %v962_v60 = vld [vmem:[#allocation2 + $0x68] sm:$0xff]  ;;  %v967_v19 = vld [vmem:[#allocation2 + $0x10] sm:$0xff] }
 0x156   : > { %v963_v61 = vld [vmem:[#allocation2 + $0x8] sm:$0xff]  ;;  %v981_v63 = vmul.f32 %v1589_v28, %v961_v55  ;;  %v982_v0 = vmul.f32 %v1589_v28, %v962_v60  ;;  %v965_v13 = vld [vmem:[#allocation2 + $0x40] sm:$0xff]  ;;  %v970_v26 = vld [vmem:[#allocation2 + $0x70] sm:$0xff]  ;;  %v987_v35 = vmul.f32 %v1589_v28, %v967_v19 }
 0x157   : > { %v964_v62 = vld [vmem:[#allocation2 + $0x48] sm:$0xff]  ;;  %v983_v1 = vmul.f32 %v1589_v28, %v963_v61  ;;  %v997_v3 = vadd.f32 %v1911_v52, %v977_v57  ;;  %v998_v5 = vadd.f32 %v1911_v52, %v978_v56  ;;  %v999_v6 = vadd.f32 %v1911_v52, %v979_v58  ;;  %v966_v14 = vld [vmem:[#allocation2 + $0x20] sm:$0xff]  ;;  %v971_v32 = vld [vmem:[#allocation2 + $0x78] sm:$0xff] }
 0x158   : > { %v984_v2 = vmul.f32 %v1589_v28, %v964_v62  ;;  %v1000_v7 = vadd.f32 %v1911_v52, %v980_v59  ;;  %v1001_v8 = vadd.f32 %v1911_v52, %v981_v63  ;;  %v1002_v9 = vadd.f32 %v1911_v52, %v982_v0  ;;  %v969_v25 = vld [vmem:[#allocation2 + $0x60] sm:$0xff]  ;;  %v972_v33 = vld [vmem:[#allocation2 + $0x28] sm:$0xff] }
 0x159   : > { %v1003_v10 = vadd.f32 %v1911_v52, %v983_v1  ;;  %v1013_v15 = vmax.f32 %v997_v3, 0.0  ;;  %v1014_v16 = vmax.f32 %v998_v5, 0.0  ;;  %v1015_v17 = vmax.f32 %v999_v6, 0.0  ;;  %v968_v21 = vld [vmem:[#allocation2 + $0x38] sm:$0xff] }
 0x15a   : > { %v1004_v11 = vadd.f32 %v1911_v52, %v984_v2  ;;  %v1016_v18 = vmax.f32 %v1000_v7, 0.0  ;;  %v1017_v22 = vmax.f32 %v1001_v8, 0.0  ;;  %v1018_v23 = vmax.f32 %v1002_v9, 0.0 }
 0x15b   : > { %v1019_v4 = vmax.f32 %v1003_v10, 0.0  ;;  %v1478_v27 = vpack.c.bf16 %v1014_v16, %v1013_v15  ;;  %v985_v30 = vmul.f32 %v1589_v28, %v965_v13  ;;  %v986_v31 = vmul.f32 %v1589_v28, %v966_v14 }
 0x15c   : > { %v1020_v24 = vmax.f32 %v1004_v11, 0.0  ;;  %v1483_v29 = vpack.c.bf16 %v1016_v18, %v1015_v17  ;;  %v1488_v34 = vpack.c.bf16 %v1018_v23, %v1017_v22  ;;  %v988_v36 = vmul.f32 %v1589_v28, %v968_v21 }
 0x15d   : > { %1479 = vst [vmem:[%s1972_s4] sm:$0xff] %v1478_v27   ;;  %v1005_v37 = vadd.f32 %v1911_v52, %v985_v30  ;;  %v1006_v39 = vadd.f32 %v1911_v52, %v986_v31  ;;  %v989_v38 = vmul.f32 %v1589_v28, %v969_v25  ;;  %v990_v40 = vmul.f32 %v1589_v28, %v970_v26 }
 0x15e   : > { %v1493_v12 = vpack.c.bf16 %v1020_v24, %v1019_v4  ;;  %1515 = vst [vmem:[%s1972_s4 + $0x8] sm:$0xff] %v1483_v29   ;;  %v1007_v41 = vadd.f32 %v1911_v52, %v987_v35  ;;  %v1008_v42 = vadd.f32 %v1911_v52, %v988_v36  ;;  %v991_v43 = vmul.f32 %v1589_v28, %v971_v32 }
 0x15f   : > { %v992_v44 = vmul.f32 %v1589_v28, %v972_v33  ;;  %1516 = vst [vmem:[%s1972_s4 + $0x10] sm:$0xff] %v1488_v34   ;;  %v1021_v45 = vmax.f32 %v1005_v37, 0.0  ;;  %v1022_v46 = vmax.f32 %v1006_v39, 0.0  ;;  %v1009_v20 = vadd.f32 %v1911_v52, %v989_v38 }
 0x160   : > { %v1010_v47 = vadd.f32 %v1911_v52, %v990_v40  ;;  %1517 = vst [vmem:[%s1972_s4 + $0x18] sm:$0xff] %v1493_v12   ;;  %v1023_v48 = vmax.f32 %v1007_v41, 0.0  ;;  %v1024_v49 = vmax.f32 %v1008_v42, 0.0  ;;  %v1011_v50 = vadd.f32 %v1911_v52, %v991_v43 }
 0x161   : > { %v1012_v51 = vadd.f32 %v1911_v52, %v992_v44  ;;  %v1498_v28 = vpack.c.bf16 %v1022_v46, %v1021_v45  ;;  %v1025_v53 = vmax.f32 %v1009_v20, 0.0 }
 0x162   : > { %v1026_v54 = vmax.f32 %v1010_v47, 0.0  ;;  %v1503_v55 = vpack.c.bf16 %v1024_v49, %v1023_v48  ;;  %v1027_v57 = vmax.f32 %v1011_v50, 0.0 }
 0x163   : > { %v1028_v56 = vmax.f32 %v1012_v51, 0.0  ;;  %1518 = vst [vmem:[%s1972_s4 + $0x20] sm:$0xff] %v1498_v28  }
 0x164   : > { %v1508_v58 = vpack.c.bf16 %v1026_v54, %v1025_v53  ;;  %1519 = vst [vmem:[%s1972_s4 + $0x28] sm:$0xff] %v1503_v55  }
 0x165   : > { %v1513_v59 = vpack.c.bf16 %v1028_v56, %v1027_v57 }
 0x166   : > { %1520 = vst [vmem:[%s1972_s4 + $0x30] sm:$0xff] %v1508_v58  }
 0x167   : > { %1521 = vst [vmem:[%s1972_s4 + $0x38] sm:$0xff] %v1513_v59  }
 0x168 PF: > { %s14_s19 = sadd.s32 1, %s1629_s19   ;;  %s1973_s15 = smov %s1617_s16 }
 0x169   : > { %p11_p12 = scmp.ge.s32.totalorder %s14_s19, 5   ;;  %s1974_s16 = smov %s1692_s23 }
 0x16a   : > { %s1975_s17 = smov %s1625_s18  ;;  %s1976_s18 = smov %s1978_s20 }
 0x16b   :  { %13 = sbr.rel (!%p11_p12) target bundleno = 3 (0x3), region = 120 }

// kernel: resnet_forward.24
= control target key start
LH: loop header
LB: loop body
LE: loop exit
PB: predicated region body
PF: predicated region fallthrough
CT: control target
= control target key end

     0   :  { %9 = vsyncpa [#allocation5], 0  ;;  %s2104_s0 = inlined_call_operand.vmem [shape: bf16[128,1152], index: 0, kind: input, shape index: {}]   ;;  %s2105_s1 = inlined_call_operand.vmem [shape: bf16[1152,128], index: 1, kind: input, shape index: {}]   ;;  %s2106_s2 = inlined_call_operand.hbm [shape: f32[1,128], index: 2, kind: input, shape index: {}]   ;;  %s2107_s3 = inlined_call_operand.hbm [shape: f32[1,128], index: 3, kind: input, shape index: {}]   ;;  %s2108_s4 = inlined_call_operand.vmem [shape: bf16[128,128], index: 4, kind: output, shape index: {}]  }
   0x1   :  { %10 = vsyncpa [#allocation7], 0  ;;  %s1764_s15 = smov 0   ;;  %s1766_s16 = smov 0  }
   0x2   :  { %s1768_s17 = smov 0   ;;  %s1770_s18 = smov 0  }
   0x3   :  { %s1772_s19 = smov 0  }
   0x4 LB: > { %s1202_s20 = sadd.s32 4294967295, %s1734_s19   ;;  %s28_s21 = sadd.s32 1, %s1730_s18  ;;  %s1734_s19 = sphi %s1772_s19, %s16_s19   ;;  %s1730_s18 = sphi %s1770_s18, %s2115_s18   ;;  %s1726_s17 = sphi %s1768_s17, %s2114_s17   ;;  %s1722_s16 = sphi %s1766_s16, %s2113_s16   ;;  %s1718_s15 = sphi %s1764_s15, %s2112_s15  }
   0x5   : > { %p29_p0 = scmp.ge.s32.totalorder %s28_s21, 3  ;;  %s44_s22 = sadd.s32 1, %s1722_s16 }
   0x6   : > { %p51_p1 = scmp.ne.s32.totalorder %s1722_s16, %s1718_s15  ;;  %p52_p2 = scmp.eq.s32.totalorder %s1734_s19, 0 }
   0x7   : > { %s2117_s21 = smov (%p29_p0, %s28_s21), 0  ;;  %p1203_p4 = scmp.ge.s32.totalorder %s1734_s19, 1 }
   0x8   : > { %p1797_p3 = por %p52_p2, %p51_p1  ;;  %s40_s24 = ssub.s32 %s1730_s18, %s2117_s21 }
   0x9   : > { %p176_p5 = scmp.lt.s32.totalorder %s1734_s19, 4  ;;  %p42_p6 = scmp.eq.s32.totalorder %s40_s24, 0 }
   0xa   : > { %p1809_p8 = scmp.eq.s32.totalorder %s1202_s20, 0  ;;  %s189_s30 = sshll.u32 %s2106_s2, 4  ;;  %s190_s30 = int_to_ptr.hbm [resolvable:$true] %s189_s30 }
   0xb   : > { %p1805_p7 = pnand %p1203_p4, %p176_p5  ;;  %s1736_s5 = smov [#allocation4]  }
   0xc   : > { %s1814_s27 = scalar_select %p42_p6, %s1722_s16, %s44_s22  }
   0xd   : > { %p1572_p9 = pneg %p1805_p7  ;;  %s191_s6 = sshll.u32 %s1736_s5, 4  ;;  %s192_s6 = int_to_ptr.vmem [resolvable:$true] %s191_s6 }
   0xe   : > { %s202_s9 = sshll.u32 %s2107_s3, 4  ;;  %s1737_s10 = smov [#allocation6]   ;;  %s203_s9 = int_to_ptr.hbm [resolvable:$true] %s202_s9 }
   0xf   : > { %p1573_p10 = pnand %p1809_p8, %p1572_p9  ;;  %s204_s11 = sshll.u32 %s1737_s10, 4  ;;  %s205_s11 = int_to_ptr.vmem [resolvable:$true] %s204_s11 }
  0x10   : > { %p1206_p11 = scmp.ge.s32.totalorder %s1734_s19, 3 }
  0x11   : > { %1575 = dma.hbm_to_vmem [thread:$0]  (!%p1573_p10), %s190_s30, 16, %s192_s6, [#allocation5]  }
  0x12   : > { %1578 = dma.hbm_to_vmem [thread:$0]  (!%p1573_p10), %s203_s9, 16, %s205_s11, [#allocation7]  }
  0x13   : > { %211 = sbr.rel (%p1206_p11) target bundleno = 61 (0x3d), region = 24 }
  0x18   : > { %214 = sbr.rel (!%p1797_p3) target bundleno = 61 (0x3d), region = 28  ;;  %s216_s12 = sand.u32 (%p1797_p3), 1, %s1722_s16  }
  0x19   : > { %s1442_s13 = smul.u32 (%p1797_p3), 12, %s1730_s18 }
  0x1a   : > { %s1562_s14 = smul.u32 (%p1797_p3), 192, %s216_s12 }
  0x1b   : > { %s1834_s24 = scalar_lea.vmem (%p1797_p3), %s2104_s0, %s1442_s13 }
  0x1c   : > { %v239_v0 = vld [vmem:[%s1834_s24] sm:$0xff] (%p1797_p3)  ;;  %v243_v2 = vld [vmem:[%s1834_s24 + $0x48] sm:$0xff] (%p1797_p3)  ;;  %s1839_s23 = scalar_lea.vmem (%p1797_p3), [#allocation3], %s1562_s14  ;;  %v247_v4 = vld [vmem:[%s1834_s24 + $0x90] sm:$0xff] (%p1797_p3) }
  0x1d   : > { %v241_v1 = vld [vmem:[%s1834_s24 + $0x24] sm:$0xff]  ;;  %240 = vst [vmem:[%s1839_s23] sm:$0xff] %v239_v0  ;;  %v245_v3 = vld [vmem:[%s1834_s24 + $0x6c] sm:$0xff]  ;;  %v249_v5 = vld [vmem:[%s1834_s24 + $0xb4] sm:$0xff] }
  0x1e   : > { %242 = vst [vmem:[%s1839_s23 + $0xc] sm:$0xff] %v241_v1  ;;  %v251_v6 = vld [vmem:[%s1834_s24 + $0xd8] sm:$0xff]  ;;  %v255_v8 = vld [vmem:[%s1834_s24 + $0x120] sm:$0xff]  ;;  %v259_v10 = vld [vmem:[%s1834_s24 + $0x168] sm:$0xff] }
  0x1f   : > { %244 = vst [vmem:[%s1839_s23 + $0x18] sm:$0xff] %v243_v2  ;;  %v253_v7 = vld [vmem:[%s1834_s24 + $0xfc] sm:$0xff]  ;;  %v257_v9 = vld [vmem:[%s1834_s24 + $0x144] sm:$0xff]  ;;  %v261_v11 = vld [vmem:[%s1834_s24 + $0x18c] sm:$0xff] }
  0x20   : > { %246 = vst [vmem:[%s1839_s23 + $0x24] sm:$0xff] %v245_v3  ;;  %v263_v12 = vld [vmem:[%s1834_s24 + $0x1b0] sm:$0xff]  ;;  %v267_v14 = vld [vmem:[%s1834_s24 + $0x1f8] sm:$0xff]  ;;  %v1208_v16 = vld [vmem:[%s1834_s24 + $0x8] sm:$0xf] }
  0x21   : > { %248 = vst [vmem:[%s1839_s23 + $0x30] sm:$0xff] %v247_v4  ;;  %v265_v13 = vld [vmem:[%s1834_s24 + $0x1d4] sm:$0xff]  ;;  %v269_v15 = vld [vmem:[%s1834_s24 + $0x21c] sm:$0xff]  ;;  %v1210_v17 = vld [vmem:[%s1834_s24 + $0x2c] sm:$0xf] }
  0x22   : > { %250 = vst [vmem:[%s1839_s23 + $0x3c] sm:$0xff] %v249_v5  ;;  %v1212_v18 = vld [vmem:[%s1834_s24 + $0x50] sm:$0xf]  ;;  %v1214_v19 = vld [vmem:[%s1834_s24 + $0x74] sm:$0xf] }
  0x23   : > { %252 = vst [vmem:[%s1839_s23 + $0x48] sm:$0xff] %v251_v6  ;;  %v1216_v20 = vld [vmem:[%s1834_s24 + $0x98] sm:$0xf]  ;;  %v1218_v21 = vld [vmem:[%s1834_s24 + $0xbc] sm:$0xf] }
  0x24   : > { %254 = vst [vmem:[%s1839_s23 + $0x54] sm:$0xff] %v253_v7  ;;  %v1220_v22 = vld [vmem:[%s1834_s24 + $0xe0] sm:$0xf]  ;;  %v1222_v23 = vld [vmem:[%s1834_s24 + $0x104] sm:$0xf] }
  0x25   : > { %256 = vst [vmem:[%s1839_s23 + $0x60] sm:$0xff] %v255_v8  ;;  %v1224_v24 = vld [vmem:[%s1834_s24 + $0x128] sm:$0xf]  ;;  %v1226_v25 = vld [vmem:[%s1834_s24 + $0x14c] sm:$0xf] }
  0x26   : > { %258 = vst [vmem:[%s1839_s23 + $0x6c] sm:$0xff] %v257_v9  ;;  %v1228_v26 = vld [vmem:[%s1834_s24 + $0x170] sm:$0xf]  ;;  %v1230_v27 = vld [vmem:[%s1834_s24 + $0x194] sm:$0xf] }
  0x27   : > { %260 = vst [vmem:[%s1839_s23 + $0x78] sm:$0xff] %v259_v10  ;;  %v1232_v28 = vld [vmem:[%s1834_s24 + $0x1b8] sm:$0xf]  ;;  %v1234_v29 = vld [vmem:[%s1834_s24 + $0x1dc] sm:$0xf] }
  0x28   : > { %262 = vst [vmem:[%s1839_s23 + $0x84] sm:$0xff] %v261_v11  ;;  %v1236_v30 = vld [vmem:[%s1834_s24 + $0x200] sm:$0xf]  ;;  %v1238_v31 = vld [vmem:[%s1834_s24 + $0x224] sm:$0xf] }
  0x29   : > { %264 = vst [vmem:[%s1839_s23 + $0x90] sm:$0xff] %v263_v12 }
  0x2a   : > { %266 = vst [vmem:[%s1839_s23 + $0x9c] sm:$0xff] %v265_v13 }
  0x2b   : > { %268 = vst [vmem:[%s1839_s23 + $0xa8] sm:$0xff] %v267_v14 }
  0x2c   : > { %270 = vst [vmem:[%s1839_s23 + $0xb4] sm:$0xff] %v269_v15 }
  0x2d   : > { %1209 = vst [vmem:[%s1839_s23 + $0x8] sm:$0xf] %v1208_v16 }
  0x2e   : > { %1211 = vst [vmem:[%s1839_s23 + $0x14] sm:$0xf] %v1210_v17 }
  0x2f   : > { %1213 = vst [vmem:[%s1839_s23 + $0x20] sm:$0xf] %v1212_v18 }
  0x30   : > { %1215 = vst [vmem:[%s1839_s23 + $0x2c] sm:$0xf] %v1214_v19 }
  0x31   : > { %1217 = vst [vmem:[%s1839_s23 + $0x38] sm:$0xf] %v1216_v20 }
  0x32   : > { %1219 = vst [vmem:[%s1839_s23 + $0x44] sm:$0xf] %v1218_v21 }
  0x33   : > { %1221 = vst [vmem:[%s1839_s23 + $0x50] sm:$0xf] %v1220_v22 }
  0x34   : > { %1223 = vst [vmem:[%s1839_s23 + $0x5c] sm:$0xf] %v1222_v23 }
  0x35   : > { %1225 = vst [vmem:[%s1839_s23 + $0x68] sm:$0xf] %v1224_v24 }
  0x36   : > { %1227 = vst [vmem:[%s1839_s23 + $0x74] sm:$0xf] %v1226_v25 }
  0x37   : > { %1229 = vst [vmem:[%s1839_s23 + $0x80] sm:$0xf] %v1228_v26 }
  0x38   : > { %1231 = vst [vmem:[%s1839_s23 + $0x8c] sm:$0xf] %v1230_v27 }
  0x39   : > { %1233 = vst [vmem:[%s1839_s23 + $0x98] sm:$0xf] %v1232_v28 }
  0x3a   : > { %1235 = vst [vmem:[%s1839_s23 + $0xa4] sm:$0xf] %v1234_v29 }
  0x3b   : > { %1237 = vst [vmem:[%s1839_s23 + $0xb0] sm:$0xf] %v1236_v30 }
  0x3c   : > { %1239 = vst [vmem:[%s1839_s23 + $0xbc] sm:$0xf] %v1238_v31 }
  0x3d PF: > { %331 = sbr.rel (%p1805_p7) target bundleno = 373 (0x175), region = 58  ;;  %s334_s28 = sand.u32 (!%p1805_p7), 1, %s1718_s15  }
  0x3e   : > { %s1563_s29 = smul.u32 (!%p1805_p7), 192, %s334_s28 }
  0x40   : > { %s1905_s30 = scalar_lea.vmem (!%p1805_p7), [#allocation3], %s1563_s29 }
  0x42   : > { %1709 = dma.done.wait (%p1809_p8), [#allocation5], 16  }
  0x43   : > { %1711 = vsyncadd (%p1809_p8), [#allocation5], 4294967280 }
  0x44   : > { %1713 = dma.done.wait (%p1809_p8), [#allocation7], 16  }
  0x45   : > { %1715 = vsyncadd (%p1809_p8), [#allocation7], 4294967280  ;;  %s382_s25 = smul.u32 48, %s1726_s17  ;;  %p1244_p13 = scmp.ne.s32.totalorder %s1726_s17, 0 }
  0x47   : > { %p383_p12 = scmp.lt.s32.totalorder %s382_s25, 143  ;;  %403 = sbr.rel (%p1244_p13) target bundleno = 93 (0x5d), region = 74 }
  0x49   : > { %s2119_s25 = smov (!%p383_p12, %s382_s25), 143 }
  0x4a   : > { %s1243_s5 = sshll.u32 %s2119_s25, 2 }
  0x4b   : > { %s1919_s7 = scalar_lea.vmem %s2105_s1, %s1243_s5 }
  0x4c   : > { %v1738_v32 = vmov 0.0  }
  0x4d   : > { %404 = vst [vmem:[#allocation2 + $0x30] sm:$0xff] %v1738_v32 }
  0x4e   : > { %405 = vst [vmem:[#allocation2] sm:$0xff] %v1738_v32 }
  0x4f   : > { %406 = vst [vmem:[#allocation2 + $0x58] sm:$0xff] %v1738_v32 }
  0x50   : > { %407 = vst [vmem:[#allocation2 + $0x18] sm:$0xff] %v1738_v32 }
  0x51   : > { %408 = vst [vmem:[#allocation2 + $0x50] sm:$0xff] %v1738_v32 }
  0x52   : > { %409 = vst [vmem:[#allocation2 + $0x68] sm:$0xff] %v1738_v32 }
  0x53   : > { %410 = vst [vmem:[#allocation2 + $0x8] sm:$0xff] %v1738_v32 }
  0x54   : > { %411 = vst [vmem:[#allocation2 + $0x48] sm:$0xff] %v1738_v32 }
  0x55   : > { %412 = vst [vmem:[#allocation2 + $0x40] sm:$0xff] %v1738_v32 }
  0x56   : > { %413 = vst [vmem:[#allocation2 + $0x20] sm:$0xff] %v1738_v32 }
  0x57   : > { %414 = vst [vmem:[#allocation2 + $0x10] sm:$0xff] %v1738_v32 }
  0x58   : > { %415 = vst [vmem:[#allocation2 + $0x38] sm:$0xff] %v1738_v32 }
  0x59   : > { %416 = vst [vmem:[#allocation2 + $0x60] sm:$0xff] %v1738_v32 }
  0x5a   : > { %417 = vst [vmem:[#allocation2 + $0x70] sm:$0xff] %v1738_v32 }
  0x5b   : > { %418 = vst [vmem:[#allocation2 + $0x78] sm:$0xff] %v1738_v32 }
  0x5c   : > { %419 = vst [vmem:[#allocation2 + $0x28] sm:$0xff] %v1738_v32 }
  0x5d PF: > { %v1474_v33 = vld [vmem:[%s1919_s7 + $0x38] sm:$0xff]  ;;  %v1473_v36 = vld [vmem:[%s1919_s7 + $0x30] sm:$0xff]  ;;  %v1472_v39 = vld [vmem:[%s1919_s7 + $0x28] sm:$0xff]  ;;  %p1437_p0 = scmp.ne.s32.totalorder %s1726_s17, 2 }
  0x5e   : > { %v1924_v34 = vld [vmem:[%s1919_s7 + $0x78] sm:$0xff]  ;;  %788 = vmatpush.bf16.msra.mxu0 %v1474_v33  ;;  %1538 = vmatpush.bf16.msra.mxu3 %v1474_v33  ;;  %v1933_v37 = vld [vmem:[%s1919_s7 + $0x70] sm:$0xff]  ;;  %v1480_v40 = vld [vmem:[%s1919_s7 + $0x68] sm:$0xff] }
  0x5f   : > { %v1927_v35 = vld [vmem:[%s1919_s7 + $0xb8] sm:$0xff]  ;;  %837 = vmatpush.bf16.msra.mxu1 %v1924_v34  ;;  %v1936_v38 = vld [vmem:[%s1919_s7 + $0xb0] sm:$0xff]  ;;  %v1943_v41 = vld [vmem:[%s1919_s7 + $0xa8] sm:$0xff] }
  0x60   : > { %886 = vmatpush.bf16.msra.mxu2 %v1927_v35  ;;  %v1471_v42 = vld [vmem:[%s1919_s7 + $0x20] sm:$0xff]  ;;  %v1470_v45 = vld [vmem:[%s1919_s7 + $0x18] sm:$0xff]  ;;  %v1469_v48 = vld [vmem:[%s1919_s7 + $0x10] sm:$0xff] }
  0x61   : > { %v1479_v43 = vld [vmem:[%s1919_s7 + $0x60] sm:$0xff]  ;;  %v1478_v46 = vld [vmem:[%s1919_s7 + $0x58] sm:$0xff]  ;;  %v1477_v49 = vld [vmem:[%s1919_s7 + $0x50] sm:$0xff] }
  0x62   : > { %789 = vmatpush.bf16.msra.mxu0 %v1473_v36  ;;  %1539 = vmatpush.bf16.msra.mxu3 %v1473_v36  ;;  %v1949_v44 = vld [vmem:[%s1919_s7 + $0xa0] sm:$0xff]  ;;  %v1955_v47 = vld [vmem:[%s1919_s7 + $0x98] sm:$0xff]  ;;  %v1961_v50 = vld [vmem:[%s1919_s7 + $0x90] sm:$0xff] }
  0x63   : > { %838 = vmatpush.bf16.msra.mxu1 %v1933_v37  ;;  %v1468_v51 = vld [vmem:[%s1919_s7 + $0x8] sm:$0xff]  ;;  %v1467_v54 = vld [vmem:[%s1919_s7] sm:$0xff]  ;;  %v1319_v59 = vld [vmem:[%s1905_s30 + $0x90] sm:$0xf] }
  0x64   : > { %887 = vmatpush.bf16.msra.mxu2 %v1936_v38  ;;  %v1476_v52 = vld [vmem:[%s1919_s7 + $0x48] sm:$0xff]  ;;  %v1475_v55 = vld [vmem:[%s1919_s7 + $0x40] sm:$0xff]  ;;  %v1462_v60 = vld [vmem:[%s1905_s30 + $0x98] sm:$0xf0] }
  0x65   : > { %v1967_v53 = vld [vmem:[%s1919_s7 + $0x88] sm:$0xff]  ;;  %v1972_v56 = vld [vmem:[%s1919_s7 + $0x80] sm:$0xff]  ;;  %v1249_v62 = vld [vmem:[%s1905_s30 + $0xc] sm:$0xf0]  ;;  %v1320_v2 = vor.u32 %v1462_v60, %v1319_v59 }
  0x66   : > { %790 = vmatpush.bf16.msra.mxu0 %v1472_v39  ;;  %1540 = vmatpush.bf16.msra.mxu3 %v1472_v39  ;;  %v1247_v57 = vld [vmem:[%s1905_s30] sm:$0xf]  ;;  %v1444_v58 = vld [vmem:[%s1905_s30 + $0x8] sm:$0xf0]  ;;  %v1443_v61 = vld [vmem:[%s1905_s30 + $0x4] sm:$0xf] }
  0x67   : > { %839 = vmatpush.bf16.msra.mxu1 %v1480_v40  ;;  %v1255_v63 = vld [vmem:[%s1905_s30 + $0x8] sm:$0xf]  ;;  %v1445_v0 = vld [vmem:[%s1905_s30 + $0x10] sm:$0xf0]  ;;  %v1248_v1 = vor.u32 %v1444_v58, %v1247_v57  ;;  %v1252_v3 = vor.u32 %v1443_v61, %v1249_v62  ;;  %v1259_v5 = vld [vmem:[%s1905_s30 + $0x18] sm:$0xf] }
  0x68   : > { %888 = vmatpush.bf16.msra.mxu2 %v1943_v41  ;;  %v1256_v4 = vor.u32 %v1445_v0, %v1255_v63  ;;  %v1447_v6 = vld [vmem:[%s1905_s30 + $0x20] sm:$0xf0]  ;;  %v1331_v7 = vld [vmem:[%s1905_s30 + $0xa8] sm:$0xf]  ;;  %v1465_v8 = vld [vmem:[%s1905_s30 + $0xb0] sm:$0xf0] }
  0x69   : > { %v1446_v9 = vld [vmem:[%s1905_s30 + $0x1c] sm:$0xf]  ;;  %v1261_v10 = vld [vmem:[%s1905_s30 + $0x24] sm:$0xf0]  ;;  %v1267_v11 = vld [vmem:[%s1905_s30 + $0x20] sm:$0xf]  ;;  %v1260_v13 = vor.u32 %v1447_v6, %v1259_v5  ;;  %v1332_v14 = vor.u32 %v1465_v8, %v1331_v7 }
  0x6a   : > { %791 = vmatpush.bf16.msra.mxu0 %v1471_v42  ;;  %1541 = vmatpush.bf16.msra.mxu3 %v1471_v42  ;;  %v1448_v12 = vld [vmem:[%s1905_s30 + $0x28] sm:$0xf0]  ;;  %v1264_v15 = vor.u32 %v1446_v9, %v1261_v10  ;;  %v1271_v17 = vld [vmem:[%s1905_s30 + $0x30] sm:$0xf]  ;;  %v1450_v18 = vld [vmem:[%s1905_s30 + $0x38] sm:$0xf0] }
  0x6b   : > { %840 = vmatpush.bf16.msra.mxu1 %v1479_v43  ;;  %v1268_v16 = vor.u32 %v1448_v12, %v1267_v11  ;;  %v1449_v19 = vld [vmem:[%s1905_s30 + $0x34] sm:$0xf]  ;;  %v1321_v21 = vld [vmem:[%s1905_s30 + $0x9c] sm:$0xf0]  ;;  %v1279_v23 = vld [vmem:[%s1905_s30 + $0x38] sm:$0xf]  ;;  %v1272_v25 = vor.u32 %v1450_v18, %v1271_v17 }
  0x6c   : > { %889 = vmatpush.bf16.msra.mxu2 %v1949_v44  ;;  %v1461_v20 = vld [vmem:[%s1905_s30 + $0x94] sm:$0xf]  ;;  %v1273_v22 = vld [vmem:[%s1905_s30 + $0x3c] sm:$0xf0]  ;;  %v1451_v24 = vld [vmem:[%s1905_s30 + $0x40] sm:$0xf0] }
  0x6d   : > { %v1324_v26 = vor.u32 %v1461_v20, %v1321_v21  ;;  %v1276_v27 = vor.u32 %v1449_v19, %v1273_v22  ;;  %v1280_v28 = vor.u32 %v1451_v24, %v1279_v23  ;;  %v1283_v29 = vld [vmem:[%s1905_s30 + $0x48] sm:$0xf]  ;;  %v1453_v30 = vld [vmem:[%s1905_s30 + $0x50] sm:$0xf0]  ;;  %v1452_v31 = vld [vmem:[%s1905_s30 + $0x4c] sm:$0xf] }
  0x6e   : > { %792 = vmatpush.bf16.msra.mxu0 %v1470_v45  ;;  %1542 = vmatpush.bf16.msra.mxu3 %v1470_v45  ;;  %v1464_v32 = vld [vmem:[%s1905_s30 + $0xac] sm:$0xf]  ;;  %v1333_v33 = vld [vmem:[%s1905_s30 + $0xb4] sm:$0xf0]  ;;  %v1454_v36 = vld [vmem:[%s1905_s30 + $0x58] sm:$0xf0] }
  0x6f   : > { %841 = vmatpush.bf16.msra.mxu1 %v1478_v46  ;;  %v1336_v39 = vor.u32 %v1464_v32, %v1333_v33  ;;  %v1456_v42 = vld [vmem:[%s1905_s30 + $0x68] sm:$0xf0]  ;;  %v1463_v45 = vld [vmem:[%s1905_s30 + $0xa0] sm:$0xf0]  ;;  %v1339_v57 = vld [vmem:[%s1905_s30 + $0xb0] sm:$0xf] }
  0x70   : > { %890 = vmatpush.bf16.msra.mxu2 %v1955_v47  ;;  %v1309_v58 = vld [vmem:[%s1905_s30 + $0x84] sm:$0xf0]  ;;  %v1315_v59 = vld [vmem:[%s1905_s30 + $0x80] sm:$0xf]  ;;  %v1460_v60 = vld [vmem:[%s1905_s30 + $0x88] sm:$0xf0] }
  0x71   : > { %v1316_v0 = vor.u32 %v1460_v60, %v1315_v59  ;;  %v420_v5 = vld [vmem:[#allocation2 + $0x30] sm:$0xff]  ;;  %v422_v21 = vld [vmem:[#allocation2 + $0x58] sm:$0xff] }
  0x72   : > { %793 = vmatpush.bf16.msra.mxu0 %v1469_v48  ;;  %1543 = vmatpush.bf16.msra.mxu3 %v1469_v48  ;;  %v1457_v48 = vld [vmem:[%s1905_s30 + $0x70] sm:$0xf0] }
  0x73   : > { %842 = vmatpush.bf16.msra.mxu1 %v1477_v49 }
  0x74   : > { %891 = vmatpush.bf16.msra.mxu2 %v1961_v50 }
  0x76   : > { %794 = vmatpush.bf16.msra.mxu0 %v1468_v51  ;;  %1544 = vmatpush.bf16.msra.mxu3 %v1468_v51 }
  0x77   : > { %843 = vmatpush.bf16.msra.mxu1 %v1476_v52 }
  0x78   : > { %892 = vmatpush.bf16.msra.mxu2 %v1967_v53 }
  0x7a   : > { %795 = vmatpush.bf16.msra.mxu0 %v1467_v54  ;;  %1545 = vmatpush.bf16.msra.mxu3 %v1467_v54  ;;  %v1459_v54 = vld [vmem:[%s1905_s30 + $0x80] sm:$0xf0] }
  0x7b   : > { %844 = vmatpush.bf16.msra.mxu1 %v1475_v55 }
  0x7c   : > { %893 = vmatpush.bf16.msra.mxu2 %v1972_v56 }
  0x7d   : > { %796 = vmatmul.bf16.vlgmr.msra.gmra.mxu0 %v1248_v1  ;;  %826 = vmatmul.bf16.vlgmr.msra.gmra.mxu3 %v1320_v2 }
  0x7e   : > { %1546 = vmatpush.bf16.msrb.mxu3 %v1924_v34  ;;  %845 = vmatmul.bf16.vlgmr.msra.gmra.mxu1 %v1252_v3  ;;  %v1285_v34 = vld [vmem:[%s1905_s30 + $0x54] sm:$0xf0] }
  0x7f   : > { %894 = vmatmul.bf16.vlgmr.msra.gmra.mxu2 %v1256_v4 }
  0x82   : > { %1547 = vmatpush.bf16.msrb.mxu3 %v1933_v37  ;;  %v1284_v37 = vor.u32 %v1453_v30, %v1283_v29  ;;  %v423_v29 = vld [vmem:[#allocation2 + $0x18] sm:$0xff] }
  0x86   : > { %1548 = vmatpush.bf16.msrb.mxu3 %v1480_v40 }
  0x8a   : > { %1549 = vmatpush.bf16.msrb.mxu3 %v1479_v43  ;;  %v1455_v43 = vld [vmem:[%s1905_s30 + $0x64] sm:$0xf] }
  0x8d   : > { %801 = vmatmul.bf16.gmra.mxu0 %v1260_v13  ;;  %831 = vmatmul.bf16.gmra.mxu3 %v1332_v14  ;;  %v421_v13 = vld [vmem:[#allocation2] sm:$0xff] }
  0x8e   : > { %1550 = vmatpush.bf16.msrb.mxu3 %v1478_v46  ;;  %850 = vmatmul.bf16.gmra.mxu1 %v1264_v15  ;;  %v1297_v46 = vld [vmem:[%s1905_s30 + $0x6c] sm:$0xf0] }
  0x8f   : > { %899 = vmatmul.bf16.gmra.mxu2 %v1268_v16  ;;  %v1300_v51 = vor.u32 %v1455_v43, %v1297_v46 }
  0x92   : > { %1551 = vmatpush.bf16.msrb.mxu3 %v1477_v49 }
  0x96   : > { %1552 = vmatpush.bf16.msrb.mxu3 %v1476_v52 }
  0x9a   : > { %1553 = vmatpush.bf16.msrb.mxu3 %v1475_v55  ;;  %v1458_v55 = vld [vmem:[%s1905_s30 + $0x7c] sm:$0xf] }
  0x9b   : > { %v1312_v63 = vor.u32 %v1458_v55, %v1309_v58 }
  0x9d   : > { %806 = vmatmul.bf16.gmra.mxu0 %v1272_v25  ;;  %875 = vmatmul.bf16.vlgmr.msrb.gmra.mxu3 %v1324_v26 }
  0x9e   : > { %1554 = vmatpush.bf16.msra.mxu3 %v1927_v35  ;;  %855 = vmatmul.bf16.gmra.mxu1 %v1276_v27  ;;  %v1291_v35 = vld [vmem:[%s1905_s30 + $0x50] sm:$0xf] }
  0x9f   : > { %904 = vmatmul.bf16.gmra.mxu2 %v1280_v28  ;;  %v1292_v40 = vor.u32 %v1454_v36, %v1291_v35 }
  0xa2   : > { %1555 = vmatpush.bf16.msra.mxu3 %v1936_v38  ;;  %v1288_v38 = vor.u32 %v1452_v31, %v1285_v34 }
  0xa6   : > { %1556 = vmatpush.bf16.msra.mxu3 %v1943_v41  ;;  %v1295_v41 = vld [vmem:[%s1905_s30 + $0x60] sm:$0xf] }
  0xa7   : > { %v1296_v49 = vor.u32 %v1456_v42, %v1295_v41 }
  0xaa   : > { %1557 = vmatpush.bf16.msra.mxu3 %v1949_v44  ;;  %v1327_v44 = vld [vmem:[%s1905_s30 + $0x98] sm:$0xf] }
  0xad   : > { %811 = vmatmul.bf16.gmra.mxu0 %v1284_v37  ;;  %880 = vmatmul.bf16.gmra.mxu3 %v1336_v39  ;;  %v424_v37 = vld [vmem:[#allocation2 + $0x50] sm:$0xff] }
  0xae   : > { %1558 = vmatpush.bf16.msra.mxu3 %v1955_v47  ;;  %860 = vmatmul.bf16.gmra.mxu1 %v1288_v38  ;;  %v1303_v47 = vld [vmem:[%s1905_s30 + $0x68] sm:$0xf] }
  0xaf   : > { %909 = vmatmul.bf16.gmra.mxu2 %v1292_v40  ;;  %v1304_v52 = vor.u32 %v1457_v48, %v1303_v47 }
  0xb2   : > { %1559 = vmatpush.bf16.msra.mxu3 %v1961_v50  ;;  %v1328_v50 = vor.u32 %v1463_v45, %v1327_v44  ;;  %v425_v45 = vld [vmem:[#allocation2 + $0x68] sm:$0xff] }
  0xb6   : > { %1560 = vmatpush.bf16.msra.mxu3 %v1967_v53  ;;  %v1307_v53 = vld [vmem:[%s1905_s30 + $0x78] sm:$0xf] }
  0xb7   : > { %v1308_v61 = vor.u32 %v1459_v54, %v1307_v53  ;;  %v426_v53 = vld [vmem:[#allocation2 + $0x8] sm:$0xff] }
  0xba   : > { %1561 = vmatpush.bf16.msra.mxu3 %v1972_v56  ;;  %v1466_v56 = vld [vmem:[%s1905_s30 + $0xb8] sm:$0xf0] }
  0xbb   : > { %v1340_v62 = vor.u32 %v1466_v56, %v1339_v57 }
  0xbd   : > { %816 = vmatmul.bf16.gmra.mxu0 %v1296_v49  ;;  %924 = vmatmul.bf16.vlgmr.msra.gmra.mxu3 %v1328_v50 }
  0xbe   : > { %865 = vmatmul.bf16.gmra.mxu1 %v1300_v51 }
  0xbf   : > { %914 = vmatmul.bf16.gmra.mxu2 %v1304_v52 }
  0xcd   : > { %821 = vmatmul.bf16.gmra.mxu0 %v1308_v61  ;;  %929 = vmatmul.bf16.gmra.mxu3 %v1340_v62  ;;  %v427_v61 = vld [vmem:[#allocation2 + $0x48] sm:$0xff] }
  0xce   : > { %870 = vmatmul.bf16.gmra.mxu1 %v1312_v63 }
  0xcf   : > { %919 = vmatmul.bf16.gmra.mxu2 %v1316_v0 }
  0xfa   : > { %v797_v1 = vpop.f32.mrf.mxu0 }
  0xfb   : > { %v846_v2 = vpop.f32.mrf.mxu1 }
  0xfc   : > { %v847_v3 = vadd.f32 %v846_v2, %v797_v1 }
 0x100   : > { %v2034_v4 = vpop.f32.mrf.mxu3 }
 0x102   : > { %v895_v6 = vpop.f32.mrf.mxu2  ;;  %v799_v8 = vpop.f32.mrf.mxu0 }
 0x103   : > { %v896_v7 = vadd.f32 %v895_v6, %v847_v3  ;;  %v848_v9 = vpop.f32.mrf.mxu1  ;;  %v432_v6 = vld [vmem:[#allocation2 + $0x60] sm:$0xff] }
 0x104   : > { %v849_v11 = vadd.f32 %v848_v9, %v799_v8  ;;  %v428_v8 = vld [vmem:[#allocation2 + $0x40] sm:$0xff] }
 0x105   : > { %v935_v10 = vadd.f32 %v896_v7, %v420_v5 }
 0x107   : > { %951 = vst [vmem:[#allocation2 + $0x30] sm:$0xff] %v935_v10 }
 0x108   : > { %v2036_v12 = vpop.f32.mrf.mxu3 }
 0x10a   : > { %v897_v14 = vpop.f32.mrf.mxu2  ;;  %v802_v16 = vpop.f32.mrf.mxu0 }
 0x10b   : > { %v898_v15 = vadd.f32 %v897_v14, %v849_v11  ;;  %v851_v17 = vpop.f32.mrf.mxu1 }
 0x10c   : > { %v852_v19 = vadd.f32 %v851_v17, %v802_v16 }
 0x10d   : > { %v936_v18 = vadd.f32 %v898_v15, %v421_v13 }
 0x10f   : > { %952 = vst [vmem:[#allocation2] sm:$0xff] %v936_v18 }
 0x110   : > { %v2038_v20 = vpop.f32.mrf.mxu3 }
 0x112   : > { %v900_v22 = vpop.f32.mrf.mxu2  ;;  %v804_v24 = vpop.f32.mrf.mxu0 }
 0x113   : > { %v901_v23 = vadd.f32 %v900_v22, %v852_v19  ;;  %v853_v25 = vpop.f32.mrf.mxu1  ;;  %v433_v19 = vld [vmem:[#allocation2 + $0x70] sm:$0xff]  ;;  %v429_v22 = vld [vmem:[#allocation2 + $0x20] sm:$0xff] }
 0x114   : > { %v854_v27 = vadd.f32 %v853_v25, %v804_v24 }
 0x115   : > { %v937_v26 = vadd.f32 %v901_v23, %v422_v21 }
 0x117   : > { %953 = vst [vmem:[#allocation2 + $0x58] sm:$0xff] %v937_v26 }
 0x118   : > { %v2040_v28 = vpop.f32.mrf.mxu3 }
 0x11a   : > { %v902_v30 = vpop.f32.mrf.mxu2  ;;  %v807_v32 = vpop.f32.mrf.mxu0 }
 0x11b   : > { %v903_v31 = vadd.f32 %v902_v30, %v854_v27  ;;  %v856_v33 = vpop.f32.mrf.mxu1 }
 0x11c   : > { %v857_v35 = vadd.f32 %v856_v33, %v807_v32  ;;  %v434_v32 = vld [vmem:[#allocation2 + $0x78] sm:$0xff] }
 0x11d   : > { %v938_v34 = vadd.f32 %v903_v31, %v423_v29 }
 0x11f   : > { %954 = vst [vmem:[#allocation2 + $0x18] sm:$0xff] %v938_v34  ;;  %v430_v34 = vld [vmem:[#allocation2 + $0x10] sm:$0xff] }
 0x120   : > { %v876_v36 = vpop.f32.mrf.mxu3 }
 0x121   : > { %v877_v5 = vadd.f32 %v876_v36, %v2034_v4 }
 0x122   : > { %v905_v39 = vpop.f32.mrf.mxu2  ;;  %v809_v40 = vpop.f32.mrf.mxu0 }
 0x123   : > { %v906_v38 = vadd.f32 %v905_v39, %v857_v35  ;;  %v858_v41 = vpop.f32.mrf.mxu1 }
 0x124   : > { %v859_v43 = vadd.f32 %v858_v41, %v809_v40 }
 0x125   : > { %v939_v42 = vadd.f32 %v906_v38, %v424_v37 }
 0x127   : > { %955 = vst [vmem:[#allocation2 + $0x50] sm:$0xff] %v939_v42 }
 0x128   : > { %v878_v44 = vpop.f32.mrf.mxu3 }
 0x129   : > { %v879_v17 = vadd.f32 %v878_v44, %v2036_v12 }
 0x12a   : > { %v907_v46 = vpop.f32.mrf.mxu2  ;;  %v812_v48 = vpop.f32.mrf.mxu0 }
 0x12b   : > { %v908_v47 = vadd.f32 %v907_v46, %v859_v43  ;;  %v861_v49 = vpop.f32.mrf.mxu1  ;;  %v435_v43 = vld [vmem:[#allocation2 + $0x28] sm:$0xff] }
 0x12c   : > { %v862_v51 = vadd.f32 %v861_v49, %v812_v48 }
 0x12d   : > { %v940_v50 = vadd.f32 %v908_v47, %v425_v45  ;;  %v431_v45 = vld [vmem:[#allocation2 + $0x38] sm:$0xff] }
 0x12f   : > { %956 = vst [vmem:[#allocation2 + $0x68] sm:$0xff] %v940_v50 }
 0x130   : > { %v881_v52 = vpop.f32.mrf.mxu3 }
 0x131   : > { %v882_v31 = vadd.f32 %v881_v52, %v2038_v20 }
 0x132   : > { %v910_v54 = vpop.f32.mrf.mxu2  ;;  %v814_v57 = vpop.f32.mrf.mxu0 }
 0x133   : > { %v911_v55 = vadd.f32 %v910_v54, %v862_v51  ;;  %v863_v56 = vpop.f32.mrf.mxu1 }
 0x134   : > { %v864_v59 = vadd.f32 %v863_v56, %v814_v57 }
 0x135   : > { %v941_v58 = vadd.f32 %v911_v55, %v426_v53 }
 0x137   : > { %957 = vst [vmem:[#allocation2 + $0x8] sm:$0xff] %v941_v58 }
 0x138   : > { %v883_v60 = vpop.f32.mrf.mxu3 }
 0x139   : > { %v884_v41 = vadd.f32 %v883_v60, %v2040_v28 }
 0x13a   : > { %v912_v62 = vpop.f32.mrf.mxu2  ;;  %v817_v0 = vpop.f32.mrf.mxu0 }
 0x13b   : > { %v913_v63 = vadd.f32 %v912_v62, %v864_v59  ;;  %v866_v1 = vpop.f32.mrf.mxu1 }
 0x13c   : > { %v867_v3 = vadd.f32 %v866_v1, %v817_v0 }
 0x13d   : > { %v942_v2 = vadd.f32 %v913_v63, %v427_v61 }
 0x13f   : > { %958 = vst [vmem:[#allocation2 + $0x48] sm:$0xff] %v942_v2 }
 0x140   : > { %v925_v7 = vpop.f32.mrf.mxu3 }
 0x141   : > { %v926_v10 = vadd.f32 %v925_v7, %v877_v5 }
 0x142   : > { %v915_v9 = vpop.f32.mrf.mxu2  ;;  %v819_v13 = vpop.f32.mrf.mxu0 }
 0x143   : > { %v916_v11 = vadd.f32 %v915_v9, %v867_v3  ;;  %v947_v14 = vadd.f32 %v926_v10, %v432_v6  ;;  %v868_v15 = vpop.f32.mrf.mxu1 }
 0x144   : > { %v869_v18 = vadd.f32 %v868_v15, %v819_v13 }
 0x145   : > { %v943_v16 = vadd.f32 %v916_v11, %v428_v8  ;;  %963 = vst [vmem:[#allocation2 + $0x60] sm:$0xff] %v947_v14 }
 0x147   : > { %959 = vst [vmem:[#allocation2 + $0x40] sm:$0xff] %v943_v16 }
 0x148   : > { %v927_v21 = vpop.f32.mrf.mxu3 }
 0x149   : > { %v928_v4 = vadd.f32 %v927_v21, %v879_v17 }
 0x14a   : > { %v917_v23 = vpop.f32.mrf.mxu2  ;;  %v822_v26 = vpop.f32.mrf.mxu0 }
 0x14b   : > { %v918_v24 = vadd.f32 %v917_v23, %v869_v18  ;;  %v948_v25 = vadd.f32 %v928_v4, %v433_v19  ;;  %v871_v27 = vpop.f32.mrf.mxu1 }
 0x14c   : > { %v872_v30 = vadd.f32 %v871_v27, %v822_v26 }
 0x14d   : > { %v944_v29 = vadd.f32 %v918_v24, %v429_v22  ;;  %964 = vst [vmem:[#allocation2 + $0x70] sm:$0xff] %v948_v25 }
 0x14f   : > { %960 = vst [vmem:[#allocation2 + $0x20] sm:$0xff] %v944_v29 }
 0x150   : > { %v930_v33 = vpop.f32.mrf.mxu3 }
 0x151   : > { %v931_v35 = vadd.f32 %v930_v33, %v882_v31 }
 0x152   : > { %v920_v12 = vpop.f32.mrf.mxu2  ;;  %v824_v38 = vpop.f32.mrf.mxu0 }
 0x153   : > { %v921_v36 = vadd.f32 %v920_v12, %v872_v30  ;;  %v949_v37 = vadd.f32 %v931_v35, %v434_v32  ;;  %v873_v40 = vpop.f32.mrf.mxu1 }
 0x154   : > { %v874_v42 = vadd.f32 %v873_v40, %v824_v38 }
 0x155   : > { %v945_v39 = vadd.f32 %v921_v36, %v430_v34  ;;  %965 = vst [vmem:[#allocation2 + $0x78] sm:$0xff] %v949_v37 }
 0x157   : > { %961 = vst [vmem:[#allocation2 + $0x10] sm:$0xff] %v945_v39 }
 0x158   : > { %v932_v44 = vpop.f32.mrf.mxu3 }
 0x159   : > { %v933_v20 = vadd.f32 %v932_v44, %v884_v41 }
 0x15a   : > { %v922_v46 = vpop.f32.mrf.mxu2 }
 0x15b   : > { %v923_v47 = vadd.f32 %v922_v46, %v874_v42  ;;  %v950_v48 = vadd.f32 %v933_v20, %v435_v43  ;;  %970 = sbr.rel (%p1437_p0) target bundleno = 373 (0x175), region = 78 }
 0x15d   : > { %v946_v49 = vadd.f32 %v923_v47, %v431_v45  ;;  %966 = vst [vmem:[#allocation2 + $0x28] sm:$0xff] %v950_v48 }
 0x15f   : > { %962 = vst [vmem:[#allocation2 + $0x38] sm:$0xff] %v946_v49 }
 0x160   : > { %v971_v50 = vld [vmem:[#allocation2 + $0x30] sm:$0xff]  ;;  %v972_v51 = vld [vmem:[#allocation2] sm:$0xff]  ;;  %v973_v28 = vld [vmem:[#allocation2 + $0x58] sm:$0xff] }
 0x161   : > { %v1626_v52 = vld [vmem:[#allocation4] ss:$0 sm:$0xff]  ;;  %v2047_v53 = vld [vmem:[#allocation6] ss:$0 sm:$0xff]  ;;  %v974_v54 = vld [vmem:[#allocation2 + $0x18] sm:$0xff] }
 0x162   : > { %v975_v55 = vld [vmem:[#allocation2 + $0x50] sm:$0xff]  ;;  %v991_v57 = vmul.f32 %v1626_v52, %v971_v50  ;;  %v992_v56 = vmul.f32 %v1626_v52, %v972_v51  ;;  %v993_v58 = vmul.f32 %v1626_v52, %v973_v28  ;;  %v994_v59 = vmul.f32 %v1626_v52, %v974_v54  ;;  %v976_v60 = vld [vmem:[#allocation2 + $0x68] sm:$0xff]  ;;  %v979_v13 = vld [vmem:[#allocation2 + $0x40] sm:$0xff] }
 0x163   : > { %v977_v61 = vld [vmem:[#allocation2 + $0x8] sm:$0xff]  ;;  %v995_v63 = vmul.f32 %v1626_v52, %v975_v55  ;;  %v996_v0 = vmul.f32 %v1626_v52, %v976_v60  ;;  %v980_v14 = vld [vmem:[#allocation2 + $0x20] sm:$0xff]  ;;  %v981_v19 = vld [vmem:[#allocation2 + $0x10] sm:$0xff]  ;;  %v999_v30 = vmul.f32 %v1626_v52, %v979_v13 }
 0x164   : > { %v978_v62 = vld [vmem:[#allocation2 + $0x48] sm:$0xff]  ;;  %v997_v1 = vmul.f32 %v1626_v52, %v977_v61  ;;  %v1011_v3 = vadd.f32 %v2047_v53, %v991_v57  ;;  %v1012_v5 = vadd.f32 %v2047_v53, %v992_v56  ;;  %v1013_v6 = vadd.f32 %v2047_v53, %v993_v58  ;;  %v983_v25 = vld [vmem:[#allocation2 + $0x60] sm:$0xff]  ;;  %v984_v26 = vld [vmem:[#allocation2 + $0x70] sm:$0xff] }
 0x165   : > { %v998_v2 = vmul.f32 %v1626_v52, %v978_v62  ;;  %v1014_v7 = vadd.f32 %v2047_v53, %v994_v59  ;;  %v1015_v8 = vadd.f32 %v2047_v53, %v995_v63  ;;  %v1016_v9 = vadd.f32 %v2047_v53, %v996_v0  ;;  %v985_v32 = vld [vmem:[#allocation2 + $0x78] sm:$0xff]  ;;  %v986_v33 = vld [vmem:[#allocation2 + $0x28] sm:$0xff] }
 0x166   : > { %v1017_v10 = vadd.f32 %v2047_v53, %v997_v1  ;;  %v1027_v15 = vmax.f32 %v1011_v3, 0.0  ;;  %v1028_v16 = vmax.f32 %v1012_v5, 0.0  ;;  %v1029_v17 = vmax.f32 %v1013_v6, 0.0  ;;  %v982_v21 = vld [vmem:[#allocation2 + $0x38] sm:$0xff] }
 0x167   : > { %v1018_v11 = vadd.f32 %v2047_v53, %v998_v2  ;;  %v1030_v18 = vmax.f32 %v1014_v7, 0.0  ;;  %v1031_v22 = vmax.f32 %v1015_v8, 0.0  ;;  %v1032_v23 = vmax.f32 %v1016_v9, 0.0 }
 0x168   : > { %v1033_v4 = vmax.f32 %v1017_v10, 0.0  ;;  %v1494_v27 = vpack.c.bf16 %v1028_v16, %v1027_v15  ;;  %v1000_v31 = vmul.f32 %v1626_v52, %v980_v14  ;;  %v1001_v35 = vmul.f32 %v1626_v52, %v981_v19 }
 0x169   : > { %v1034_v24 = vmax.f32 %v1018_v11, 0.0  ;;  %v1499_v29 = vpack.c.bf16 %v1030_v18, %v1029_v17  ;;  %v1504_v34 = vpack.c.bf16 %v1032_v23, %v1031_v22  ;;  %v1002_v36 = vmul.f32 %v1626_v52, %v982_v21 }
 0x16a   : > { %1495 = vst [vmem:[%s2108_s4] sm:$0xff] %v1494_v27   ;;  %v1019_v37 = vadd.f32 %v2047_v53, %v999_v30  ;;  %v1020_v39 = vadd.f32 %v2047_v53, %v1000_v31  ;;  %v1003_v38 = vmul.f32 %v1626_v52, %v983_v25  ;;  %v1004_v40 = vmul.f32 %v1626_v52, %v984_v26 }
 0x16b   : > { %v1509_v12 = vpack.c.bf16 %v1034_v24, %v1033_v4  ;;  %1531 = vst [vmem:[%s2108_s4 + $0x8] sm:$0xff] %v1499_v29   ;;  %v1021_v41 = vadd.f32 %v2047_v53, %v1001_v35  ;;  %v1022_v42 = vadd.f32 %v2047_v53, %v1002_v36  ;;  %v1005_v43 = vmul.f32 %v1626_v52, %v985_v32 }
 0x16c   : > { %v1006_v44 = vmul.f32 %v1626_v52, %v986_v33  ;;  %1532 = vst [vmem:[%s2108_s4 + $0x10] sm:$0xff] %v1504_v34   ;;  %v1035_v45 = vmax.f32 %v1019_v37, 0.0  ;;  %v1036_v46 = vmax.f32 %v1020_v39, 0.0  ;;  %v1023_v20 = vadd.f32 %v2047_v53, %v1003_v38 }
 0x16d   : > { %v1024_v47 = vadd.f32 %v2047_v53, %v1004_v40  ;;  %1533 = vst [vmem:[%s2108_s4 + $0x18] sm:$0xff] %v1509_v12   ;;  %v1037_v48 = vmax.f32 %v1021_v41, 0.0  ;;  %v1038_v49 = vmax.f32 %v1022_v42, 0.0  ;;  %v1025_v50 = vadd.f32 %v2047_v53, %v1005_v43 }
 0x16e   : > { %v1026_v51 = vadd.f32 %v2047_v53, %v1006_v44  ;;  %v1514_v52 = vpack.c.bf16 %v1036_v46, %v1035_v45  ;;  %v1039_v28 = vmax.f32 %v1023_v20, 0.0 }
 0x16f   : > { %v1040_v54 = vmax.f32 %v1024_v47, 0.0  ;;  %v1519_v55 = vpack.c.bf16 %v1038_v49, %v1037_v48  ;;  %v1041_v57 = vmax.f32 %v1025_v50, 0.0 }
 0x170   : > { %v1042_v56 = vmax.f32 %v1026_v51, 0.0  ;;  %1534 = vst [vmem:[%s2108_s4 + $0x20] sm:$0xff] %v1514_v52  }
 0x171   : > { %v1524_v58 = vpack.c.bf16 %v1040_v54, %v1039_v28  ;;  %1535 = vst [vmem:[%s2108_s4 + $0x28] sm:$0xff] %v1519_v55  }
 0x172   : > { %v1529_v59 = vpack.c.bf16 %v1042_v56, %v1041_v57 }
 0x173   : > { %1536 = vst [vmem:[%s2108_s4 + $0x30] sm:$0xff] %v1524_v58  }
 0x174   : > { %1537 = vst [vmem:[%s2108_s4 + $0x38] sm:$0xff] %v1529_v59  }
 0x175 PF: > { %s16_s19 = sadd.s32 1, %s1734_s19   ;;  %s2112_s15 = smov %s1722_s16 }
 0x176   : > { %p13_p1 = scmp.ge.s32.totalorder %s16_s19, 5   ;;  %s2113_s16 = smov %s1814_s27 }
 0x177   : > { %s2114_s17 = smov %s1730_s18  ;;  %s2115_s18 = smov %s2117_s21 }
 0x178   :  { %15 = sbr.rel (!%p13_p1) target bundleno = 4 (0x4), region = 125 }
 0x17d   :  { %1103 = vsyncpa [#allocation5], 1 }
 0x17e   :  { %1105 = vsyncpa [#allocation5 + $0x1], 1 }
 0x17f   :  { %1106 = vsyncpa [#allocation7], 1 }

// kernel: resnet_forward.23
= control target key start
LH: loop header
LB: loop body
LE: loop exit
PB: predicated region body
PF: predicated region fallthrough
CT: control target
= control target key end

     0   :  { %10 = vsyncpa [#allocation5], 0  ;;  %s2317_s0 = inlined_call_operand.vmem [shape: bf16[128,1152], index: 0, kind: input, shape index: {}]   ;;  %s2318_s1 = inlined_call_operand.vmem [shape: bf16[1152,128], index: 1, kind: input, shape index: {}]   ;;  %s2319_s2 = inlined_call_operand.hbm [shape: f32[1,128], index: 2, kind: input, shape index: {}]   ;;  %s2320_s3 = inlined_call_operand.hbm [shape: f32[1,128], index: 3, kind: input, shape index: {}]   ;;  %s2321_s4 = inlined_call_operand.vmem [shape: bf16[128,128], index: 4, kind: input, shape index: {}]   ;;  %s2322_s5 = inlined_call_operand.vmem [shape: bf16[128,128], index: 5, kind: output, shape index: {}]  }
   0x1   :  { %11 = vsyncpa [#allocation7], 0  ;;  %s1935_s18 = smov 0   ;;  %s1937_s19 = smov 0  }
   0x2   :  { %s1939_s20 = smov 0   ;;  %s1941_s21 = smov 0  }
   0x3   :  { %s1943_s22 = smov 0  }
   0x4 LB: > { %s1328_s23 = sadd.s32 4294967295, %s1900_s22   ;;  %s29_s24 = sadd.s32 1, %s1896_s21  ;;  %s1900_s22 = sphi %s1943_s22, %s17_s22   ;;  %s1896_s21 = sphi %s1941_s21, %s2329_s21   ;;  %s1892_s20 = sphi %s1939_s20, %s2328_s20   ;;  %s1888_s19 = sphi %s1937_s19, %s2327_s19   ;;  %s1884_s18 = sphi %s1935_s18, %s2326_s18  }
   0x5   : > { %p30_p0 = scmp.ge.s32.totalorder %s29_s24, 3  ;;  %s45_s25 = sadd.s32 1, %s1888_s19 }
   0x6   : > { %p52_p1 = scmp.ne.s32.totalorder %s1888_s19, %s1884_s18  ;;  %p53_p2 = scmp.eq.s32.totalorder %s1900_s22, 0 }
   0x7   : > { %s2331_s24 = smov (%p30_p0, %s29_s24), 0  ;;  %p1329_p4 = scmp.ge.s32.totalorder %s1900_s22, 1 }
   0x8   : > { %p1968_p3 = por %p53_p2, %p52_p1  ;;  %s41_s27 = ssub.s32 %s1896_s21, %s2331_s24 }
   0x9   : > { %p205_p5 = scmp.lt.s32.totalorder %s1900_s22, 4  ;;  %p43_p6 = scmp.eq.s32.totalorder %s41_s27, 0 }
   0xa   : > { %p1980_p8 = scmp.eq.s32.totalorder %s1328_s23, 0  ;;  %s218_s8 = sshll.u32 %s2319_s2, 4  ;;  %s219_s8 = int_to_ptr.hbm [resolvable:$true] %s218_s8 }
   0xb   : > { %p1976_p7 = pnand %p1329_p4, %p205_p5  ;;  %s1902_s9 = smov [#allocation4]  }
   0xc   : > { %s1985_s30 = scalar_select %p43_p6, %s1888_s19, %s45_s25  }
   0xd   : > { %p1738_p9 = pneg %p1976_p7  ;;  %s220_s10 = sshll.u32 %s1902_s9, 4  ;;  %s221_s10 = int_to_ptr.vmem [resolvable:$true] %s220_s10 }
   0xe   : > { %s231_s13 = sshll.u32 %s2320_s3, 4  ;;  %s1903_s14 = smov [#allocation6]   ;;  %s232_s13 = int_to_ptr.hbm [resolvable:$true] %s231_s13 }
   0xf   : > { %p1739_p10 = pnand %p1980_p8, %p1738_p9  ;;  %s233_s15 = sshll.u32 %s1903_s14, 4  ;;  %s234_s15 = int_to_ptr.vmem [resolvable:$true] %s233_s15 }
  0x10   : > { %p1333_p11 = scmp.ge.s32.totalorder %s1900_s22, 3 }
  0x11   : > { %1741 = dma.hbm_to_vmem [thread:$0]  (!%p1739_p10), %s219_s8, 16, %s221_s10, [#allocation5]  }
  0x12   : > { %1744 = dma.hbm_to_vmem [thread:$0]  (!%p1739_p10), %s232_s13, 16, %s234_s15, [#allocation7]  }
  0x13   : > { %252 = sbr.rel (%p1333_p11) target bundleno = 61 (0x3d), region = 28 }
  0x18   : > { %255 = sbr.rel (!%p1968_p3) target bundleno = 61 (0x3d), region = 32  ;;  %s257_s16 = sand.u32 (%p1968_p3), 1, %s1888_s19  }
  0x19   : > { %s1569_s17 = smul.u32 (%p1968_p3), 12, %s1896_s21 }
  0x1a   : > { %s1728_s23 = smul.u32 (%p1968_p3), 192, %s257_s16 }
  0x1b   : > { %s2005_s6 = scalar_lea.vmem (%p1968_p3), %s2317_s0, %s1569_s17 }
  0x1c   : > { %v280_v0 = vld [vmem:[%s2005_s6] sm:$0xff] (%p1968_p3)  ;;  %v284_v2 = vld [vmem:[%s2005_s6 + $0x48] sm:$0xff] (%p1968_p3)  ;;  %s2010_s26 = scalar_lea.vmem (%p1968_p3), [#allocation3], %s1728_s23  ;;  %v288_v4 = vld [vmem:[%s2005_s6 + $0x90] sm:$0xff] (%p1968_p3) }
  0x1d   : > { %v282_v1 = vld [vmem:[%s2005_s6 + $0x24] sm:$0xff]  ;;  %281 = vst [vmem:[%s2010_s26] sm:$0xff] %v280_v0  ;;  %v286_v3 = vld [vmem:[%s2005_s6 + $0x6c] sm:$0xff]  ;;  %v290_v5 = vld [vmem:[%s2005_s6 + $0xb4] sm:$0xff] }
  0x1e   : > { %283 = vst [vmem:[%s2010_s26 + $0xc] sm:$0xff] %v282_v1  ;;  %v292_v6 = vld [vmem:[%s2005_s6 + $0xd8] sm:$0xff]  ;;  %v296_v8 = vld [vmem:[%s2005_s6 + $0x120] sm:$0xff]  ;;  %v300_v10 = vld [vmem:[%s2005_s6 + $0x168] sm:$0xff] }
  0x1f   : > { %285 = vst [vmem:[%s2010_s26 + $0x18] sm:$0xff] %v284_v2  ;;  %v294_v7 = vld [vmem:[%s2005_s6 + $0xfc] sm:$0xff]  ;;  %v298_v9 = vld [vmem:[%s2005_s6 + $0x144] sm:$0xff]  ;;  %v302_v11 = vld [vmem:[%s2005_s6 + $0x18c] sm:$0xff] }
  0x20   : > { %287 = vst [vmem:[%s2010_s26 + $0x24] sm:$0xff] %v286_v3  ;;  %v304_v12 = vld [vmem:[%s2005_s6 + $0x1b0] sm:$0xff]  ;;  %v308_v14 = vld [vmem:[%s2005_s6 + $0x1f8] sm:$0xff]  ;;  %v1335_v16 = vld [vmem:[%s2005_s6 + $0x8] sm:$0xf] }
  0x21   : > { %289 = vst [vmem:[%s2010_s26 + $0x30] sm:$0xff] %v288_v4  ;;  %v306_v13 = vld [vmem:[%s2005_s6 + $0x1d4] sm:$0xff]  ;;  %v310_v15 = vld [vmem:[%s2005_s6 + $0x21c] sm:$0xff]  ;;  %v1337_v17 = vld [vmem:[%s2005_s6 + $0x2c] sm:$0xf] }
  0x22   : > { %291 = vst [vmem:[%s2010_s26 + $0x3c] sm:$0xff] %v290_v5  ;;  %v1339_v18 = vld [vmem:[%s2005_s6 + $0x50] sm:$0xf]  ;;  %v1341_v19 = vld [vmem:[%s2005_s6 + $0x74] sm:$0xf] }
  0x23   : > { %293 = vst [vmem:[%s2010_s26 + $0x48] sm:$0xff] %v292_v6  ;;  %v1343_v20 = vld [vmem:[%s2005_s6 + $0x98] sm:$0xf]  ;;  %v1345_v21 = vld [vmem:[%s2005_s6 + $0xbc] sm:$0xf] }
  0x24   : > { %295 = vst [vmem:[%s2010_s26 + $0x54] sm:$0xff] %v294_v7  ;;  %v1347_v22 = vld [vmem:[%s2005_s6 + $0xe0] sm:$0xf]  ;;  %v1349_v23 = vld [vmem:[%s2005_s6 + $0x104] sm:$0xf] }
  0x25   : > { %297 = vst [vmem:[%s2010_s26 + $0x60] sm:$0xff] %v296_v8  ;;  %v1351_v24 = vld [vmem:[%s2005_s6 + $0x128] sm:$0xf]  ;;  %v1353_v25 = vld [vmem:[%s2005_s6 + $0x14c] sm:$0xf] }
  0x26   : > { %299 = vst [vmem:[%s2010_s26 + $0x6c] sm:$0xff] %v298_v9  ;;  %v1355_v26 = vld [vmem:[%s2005_s6 + $0x170] sm:$0xf]  ;;  %v1357_v27 = vld [vmem:[%s2005_s6 + $0x194] sm:$0xf] }
  0x27   : > { %301 = vst [vmem:[%s2010_s26 + $0x78] sm:$0xff] %v300_v10  ;;  %v1359_v28 = vld [vmem:[%s2005_s6 + $0x1b8] sm:$0xf]  ;;  %v1361_v29 = vld [vmem:[%s2005_s6 + $0x1dc] sm:$0xf] }
  0x28   : > { %303 = vst [vmem:[%s2010_s26 + $0x84] sm:$0xff] %v302_v11  ;;  %v1363_v30 = vld [vmem:[%s2005_s6 + $0x200] sm:$0xf]  ;;  %v1365_v31 = vld [vmem:[%s2005_s6 + $0x224] sm:$0xf] }
  0x29   : > { %305 = vst [vmem:[%s2010_s26 + $0x90] sm:$0xff] %v304_v12 }
  0x2a   : > { %307 = vst [vmem:[%s2010_s26 + $0x9c] sm:$0xff] %v306_v13 }
  0x2b   : > { %309 = vst [vmem:[%s2010_s26 + $0xa8] sm:$0xff] %v308_v14 }
  0x2c   : > { %311 = vst [vmem:[%s2010_s26 + $0xb4] sm:$0xff] %v310_v15 }
  0x2d   : > { %1336 = vst [vmem:[%s2010_s26 + $0x8] sm:$0xf] %v1335_v16 }
  0x2e   : > { %1338 = vst [vmem:[%s2010_s26 + $0x14] sm:$0xf] %v1337_v17 }
  0x2f   : > { %1340 = vst [vmem:[%s2010_s26 + $0x20] sm:$0xf] %v1339_v18 }
  0x30   : > { %1342 = vst [vmem:[%s2010_s26 + $0x2c] sm:$0xf] %v1341_v19 }
  0x31   : > { %1344 = vst [vmem:[%s2010_s26 + $0x38] sm:$0xf] %v1343_v20 }
  0x32   : > { %1346 = vst [vmem:[%s2010_s26 + $0x44] sm:$0xf] %v1345_v21 }
  0x33   : > { %1348 = vst [vmem:[%s2010_s26 + $0x50] sm:$0xf] %v1347_v22 }
  0x34   : > { %1350 = vst [vmem:[%s2010_s26 + $0x5c] sm:$0xf] %v1349_v23 }
  0x35   : > { %1352 = vst [vmem:[%s2010_s26 + $0x68] sm:$0xf] %v1351_v24 }
  0x36   : > { %1354 = vst [vmem:[%s2010_s26 + $0x74] sm:$0xf] %v1353_v25 }
  0x37   : > { %1356 = vst [vmem:[%s2010_s26 + $0x80] sm:$0xf] %v1355_v26 }
  0x38   : > { %1358 = vst [vmem:[%s2010_s26 + $0x8c] sm:$0xf] %v1357_v27 }
  0x39   : > { %1360 = vst [vmem:[%s2010_s26 + $0x98] sm:$0xf] %v1359_v28 }
  0x3a   : > { %1362 = vst [vmem:[%s2010_s26 + $0xa4] sm:$0xf] %v1361_v29 }
  0x3b   : > { %1364 = vst [vmem:[%s2010_s26 + $0xb0] sm:$0xf] %v1363_v30 }
  0x3c   : > { %1366 = vst [vmem:[%s2010_s26 + $0xbc] sm:$0xf] %v1365_v31 }
  0x3d PF: > { %372 = sbr.rel (%p1976_p7) target bundleno = 382 (0x17e), region = 62  ;;  %s375_s7 = sand.u32 (!%p1976_p7), 1, %s1884_s18  }
  0x3e   : > { %s1729_s8 = smul.u32 (!%p1976_p7), 192, %s375_s7 }
  0x40   : > { %s2076_s9 = scalar_lea.vmem (!%p1976_p7), [#allocation3], %s1729_s8 }
  0x42   : > { %1875 = dma.done.wait (%p1980_p8), [#allocation5], 16  }
  0x43   : > { %1877 = vsyncadd (%p1980_p8), [#allocation5], 4294967280 }
  0x44   : > { %1879 = dma.done.wait (%p1980_p8), [#allocation7], 16  }
  0x45   : > { %1881 = vsyncadd (%p1980_p8), [#allocation7], 4294967280  ;;  %s433_s28 = smul.u32 48, %s1892_s20  ;;  %p1371_p13 = scmp.ne.s32.totalorder %s1892_s20, 0 }
  0x47   : > { %p434_p12 = scmp.lt.s32.totalorder %s433_s28, 143  ;;  %463 = sbr.rel (%p1371_p13) target bundleno = 93 (0x5d), region = 78 }
  0x49   : > { %s2333_s28 = smov (!%p434_p12, %s433_s28), 143 }
  0x4a   : > { %s1370_s10 = sshll.u32 %s2333_s28, 2 }
  0x4b   : > { %s2090_s12 = scalar_lea.vmem %s2318_s1, %s1370_s10 }
  0x4c   : > { %v1904_v32 = vmov 0.0  }
  0x4d   : > { %464 = vst [vmem:[#allocation2 + $0x30] sm:$0xff] %v1904_v32 }
  0x4e   : > { %465 = vst [vmem:[#allocation2] sm:$0xff] %v1904_v32 }
  0x4f   : > { %466 = vst [vmem:[#allocation2 + $0x58] sm:$0xff] %v1904_v32 }
  0x50   : > { %467 = vst [vmem:[#allocation2 + $0x18] sm:$0xff] %v1904_v32 }
  0x51   : > { %468 = vst [vmem:[#allocation2 + $0x50] sm:$0xff] %v1904_v32 }
  0x52   : > { %469 = vst [vmem:[#allocation2 + $0x68] sm:$0xff] %v1904_v32 }
  0x53   : > { %470 = vst [vmem:[#allocation2 + $0x8] sm:$0xff] %v1904_v32 }
  0x54   : > { %471 = vst [vmem:[#allocation2 + $0x48] sm:$0xff] %v1904_v32 }
  0x55   : > { %472 = vst [vmem:[#allocation2 + $0x40] sm:$0xff] %v1904_v32 }
  0x56   : > { %473 = vst [vmem:[#allocation2 + $0x20] sm:$0xff] %v1904_v32 }
  0x57   : > { %474 = vst [vmem:[#allocation2 + $0x10] sm:$0xff] %v1904_v32 }
  0x58   : > { %475 = vst [vmem:[#allocation2 + $0x38] sm:$0xff] %v1904_v32 }
  0x59   : > { %476 = vst [vmem:[#allocation2 + $0x60] sm:$0xff] %v1904_v32 }
  0x5a   : > { %477 = vst [vmem:[#allocation2 + $0x70] sm:$0xff] %v1904_v32 }
  0x5b   : > { %478 = vst [vmem:[#allocation2 + $0x78] sm:$0xff] %v1904_v32 }
  0x5c   : > { %479 = vst [vmem:[#allocation2 + $0x28] sm:$0xff] %v1904_v32 }
  0x5d PF: > { %v1601_v33 = vld [vmem:[%s2090_s12 + $0x38] sm:$0xff]  ;;  %v1600_v36 = vld [vmem:[%s2090_s12 + $0x30] sm:$0xff]  ;;  %v1599_v39 = vld [vmem:[%s2090_s12 + $0x28] sm:$0xff]  ;;  %p1564_p0 = scmp.ne.s32.totalorder %s1892_s20, 2 }
  0x5e   : > { %v2095_v34 = vld [vmem:[%s2090_s12 + $0x78] sm:$0xff]  ;;  %848 = vmatpush.bf16.msra.mxu0 %v1601_v33  ;;  %1704 = vmatpush.bf16.msra.mxu3 %v1601_v33  ;;  %v2104_v37 = vld [vmem:[%s2090_s12 + $0x70] sm:$0xff]  ;;  %v1607_v40 = vld [vmem:[%s2090_s12 + $0x68] sm:$0xff] }
  0x5f   : > { %v2098_v35 = vld [vmem:[%s2090_s12 + $0xb8] sm:$0xff]  ;;  %897 = vmatpush.bf16.msra.mxu1 %v2095_v34  ;;  %v2107_v38 = vld [vmem:[%s2090_s12 + $0xb0] sm:$0xff]  ;;  %v2114_v41 = vld [vmem:[%s2090_s12 + $0xa8] sm:$0xff] }
  0x60   : > { %946 = vmatpush.bf16.msra.mxu2 %v2098_v35  ;;  %v1598_v42 = vld [vmem:[%s2090_s12 + $0x20] sm:$0xff]  ;;  %v1597_v45 = vld [vmem:[%s2090_s12 + $0x18] sm:$0xff]  ;;  %v1596_v48 = vld [vmem:[%s2090_s12 + $0x10] sm:$0xff] }
  0x61   : > { %v1606_v43 = vld [vmem:[%s2090_s12 + $0x60] sm:$0xff]  ;;  %v1605_v46 = vld [vmem:[%s2090_s12 + $0x58] sm:$0xff]  ;;  %v1604_v49 = vld [vmem:[%s2090_s12 + $0x50] sm:$0xff] }
  0x62   : > { %849 = vmatpush.bf16.msra.mxu0 %v1600_v36  ;;  %1705 = vmatpush.bf16.msra.mxu3 %v1600_v36  ;;  %v2120_v44 = vld [vmem:[%s2090_s12 + $0xa0] sm:$0xff]  ;;  %v2126_v47 = vld [vmem:[%s2090_s12 + $0x98] sm:$0xff]  ;;  %v2132_v50 = vld [vmem:[%s2090_s12 + $0x90] sm:$0xff] }
  0x63   : > { %898 = vmatpush.bf16.msra.mxu1 %v2104_v37  ;;  %v1595_v51 = vld [vmem:[%s2090_s12 + $0x8] sm:$0xff]  ;;  %v1594_v54 = vld [vmem:[%s2090_s12] sm:$0xff]  ;;  %v1446_v59 = vld [vmem:[%s2076_s9 + $0x90] sm:$0xf] }
  0x64   : > { %947 = vmatpush.bf16.msra.mxu2 %v2107_v38  ;;  %v1603_v52 = vld [vmem:[%s2090_s12 + $0x48] sm:$0xff]  ;;  %v1602_v55 = vld [vmem:[%s2090_s12 + $0x40] sm:$0xff]  ;;  %v1589_v60 = vld [vmem:[%s2076_s9 + $0x98] sm:$0xf0] }
  0x65   : > { %v2138_v53 = vld [vmem:[%s2090_s12 + $0x88] sm:$0xff]  ;;  %v2143_v56 = vld [vmem:[%s2090_s12 + $0x80] sm:$0xff]  ;;  %v1376_v62 = vld [vmem:[%s2076_s9 + $0xc] sm:$0xf0]  ;;  %v1447_v2 = vor.u32 %v1589_v60, %v1446_v59 }
  0x66   : > { %850 = vmatpush.bf16.msra.mxu0 %v1599_v39  ;;  %1706 = vmatpush.bf16.msra.mxu3 %v1599_v39  ;;  %v1374_v57 = vld [vmem:[%s2076_s9] sm:$0xf]  ;;  %v1571_v58 = vld [vmem:[%s2076_s9 + $0x8] sm:$0xf0]  ;;  %v1570_v61 = vld [vmem:[%s2076_s9 + $0x4] sm:$0xf] }
  0x67   : > { %899 = vmatpush.bf16.msra.mxu1 %v1607_v40  ;;  %v1382_v63 = vld [vmem:[%s2076_s9 + $0x8] sm:$0xf]  ;;  %v1572_v0 = vld [vmem:[%s2076_s9 + $0x10] sm:$0xf0]  ;;  %v1375_v1 = vor.u32 %v1571_v58, %v1374_v57  ;;  %v1379_v3 = vor.u32 %v1570_v61, %v1376_v62  ;;  %v1386_v5 = vld [vmem:[%s2076_s9 + $0x18] sm:$0xf] }
  0x68   : > { %948 = vmatpush.bf16.msra.mxu2 %v2114_v41  ;;  %v1383_v4 = vor.u32 %v1572_v0, %v1382_v63  ;;  %v1574_v6 = vld [vmem:[%s2076_s9 + $0x20] sm:$0xf0]  ;;  %v1458_v7 = vld [vmem:[%s2076_s9 + $0xa8] sm:$0xf]  ;;  %v1592_v8 = vld [vmem:[%s2076_s9 + $0xb0] sm:$0xf0] }
  0x69   : > { %v1573_v9 = vld [vmem:[%s2076_s9 + $0x1c] sm:$0xf]  ;;  %v1388_v10 = vld [vmem:[%s2076_s9 + $0x24] sm:$0xf0]  ;;  %v1394_v11 = vld [vmem:[%s2076_s9 + $0x20] sm:$0xf]  ;;  %v1387_v13 = vor.u32 %v1574_v6, %v1386_v5  ;;  %v1459_v14 = vor.u32 %v1592_v8, %v1458_v7 }
  0x6a   : > { %851 = vmatpush.bf16.msra.mxu0 %v1598_v42  ;;  %1707 = vmatpush.bf16.msra.mxu3 %v1598_v42  ;;  %v1575_v12 = vld [vmem:[%s2076_s9 + $0x28] sm:$0xf0]  ;;  %v1391_v15 = vor.u32 %v1573_v9, %v1388_v10  ;;  %v1398_v17 = vld [vmem:[%s2076_s9 + $0x30] sm:$0xf]  ;;  %v1577_v18 = vld [vmem:[%s2076_s9 + $0x38] sm:$0xf0] }
  0x6b   : > { %900 = vmatpush.bf16.msra.mxu1 %v1606_v43  ;;  %v1395_v16 = vor.u32 %v1575_v12, %v1394_v11  ;;  %v1576_v19 = vld [vmem:[%s2076_s9 + $0x34] sm:$0xf]  ;;  %v1448_v21 = vld [vmem:[%s2076_s9 + $0x9c] sm:$0xf0]  ;;  %v1406_v23 = vld [vmem:[%s2076_s9 + $0x38] sm:$0xf]  ;;  %v1399_v25 = vor.u32 %v1577_v18, %v1398_v17 }
  0x6c   : > { %949 = vmatpush.bf16.msra.mxu2 %v2120_v44  ;;  %v1588_v20 = vld [vmem:[%s2076_s9 + $0x94] sm:$0xf]  ;;  %v1400_v22 = vld [vmem:[%s2076_s9 + $0x3c] sm:$0xf0]  ;;  %v1578_v24 = vld [vmem:[%s2076_s9 + $0x40] sm:$0xf0] }
  0x6d   : > { %v1451_v26 = vor.u32 %v1588_v20, %v1448_v21  ;;  %v1403_v27 = vor.u32 %v1576_v19, %v1400_v22  ;;  %v1407_v28 = vor.u32 %v1578_v24, %v1406_v23  ;;  %v1410_v29 = vld [vmem:[%s2076_s9 + $0x48] sm:$0xf]  ;;  %v1580_v30 = vld [vmem:[%s2076_s9 + $0x50] sm:$0xf0]  ;;  %v1579_v31 = vld [vmem:[%s2076_s9 + $0x4c] sm:$0xf] }
  0x6e   : > { %852 = vmatpush.bf16.msra.mxu0 %v1597_v45  ;;  %1708 = vmatpush.bf16.msra.mxu3 %v1597_v45  ;;  %v1591_v32 = vld [vmem:[%s2076_s9 + $0xac] sm:$0xf]  ;;  %v1460_v33 = vld [vmem:[%s2076_s9 + $0xb4] sm:$0xf0]  ;;  %v1581_v36 = vld [vmem:[%s2076_s9 + $0x58] sm:$0xf0] }
  0x6f   : > { %901 = vmatpush.bf16.msra.mxu1 %v1605_v46  ;;  %v1463_v39 = vor.u32 %v1591_v32, %v1460_v33  ;;  %v1583_v42 = vld [vmem:[%s2076_s9 + $0x68] sm:$0xf0]  ;;  %v1590_v45 = vld [vmem:[%s2076_s9 + $0xa0] sm:$0xf0]  ;;  %v1466_v57 = vld [vmem:[%s2076_s9 + $0xb0] sm:$0xf] }
  0x70   : > { %950 = vmatpush.bf16.msra.mxu2 %v2126_v47  ;;  %v1436_v58 = vld [vmem:[%s2076_s9 + $0x84] sm:$0xf0]  ;;  %v1442_v59 = vld [vmem:[%s2076_s9 + $0x80] sm:$0xf]  ;;  %v1587_v60 = vld [vmem:[%s2076_s9 + $0x88] sm:$0xf0] }
  0x71   : > { %v1443_v0 = vor.u32 %v1587_v60, %v1442_v59  ;;  %v480_v5 = vld [vmem:[#allocation2 + $0x30] sm:$0xff]  ;;  %v482_v21 = vld [vmem:[#allocation2 + $0x58] sm:$0xff] }
  0x72   : > { %853 = vmatpush.bf16.msra.mxu0 %v1596_v48  ;;  %1709 = vmatpush.bf16.msra.mxu3 %v1596_v48  ;;  %v1584_v48 = vld [vmem:[%s2076_s9 + $0x70] sm:$0xf0] }
  0x73   : > { %902 = vmatpush.bf16.msra.mxu1 %v1604_v49 }
  0x74   : > { %951 = vmatpush.bf16.msra.mxu2 %v2132_v50 }
  0x76   : > { %854 = vmatpush.bf16.msra.mxu0 %v1595_v51  ;;  %1710 = vmatpush.bf16.msra.mxu3 %v1595_v51 }
  0x77   : > { %903 = vmatpush.bf16.msra.mxu1 %v1603_v52 }
  0x78   : > { %952 = vmatpush.bf16.msra.mxu2 %v2138_v53 }
  0x7a   : > { %855 = vmatpush.bf16.msra.mxu0 %v1594_v54  ;;  %1711 = vmatpush.bf16.msra.mxu3 %v1594_v54  ;;  %v1586_v54 = vld [vmem:[%s2076_s9 + $0x80] sm:$0xf0] }
  0x7b   : > { %904 = vmatpush.bf16.msra.mxu1 %v1602_v55 }
  0x7c   : > { %953 = vmatpush.bf16.msra.mxu2 %v2143_v56 }
  0x7d   : > { %856 = vmatmul.bf16.vlgmr.msra.gmra.mxu0 %v1375_v1  ;;  %886 = vmatmul.bf16.vlgmr.msra.gmra.mxu3 %v1447_v2 }
  0x7e   : > { %1712 = vmatpush.bf16.msrb.mxu3 %v2095_v34  ;;  %905 = vmatmul.bf16.vlgmr.msra.gmra.mxu1 %v1379_v3  ;;  %v1412_v34 = vld [vmem:[%s2076_s9 + $0x54] sm:$0xf0] }
  0x7f   : > { %954 = vmatmul.bf16.vlgmr.msra.gmra.mxu2 %v1383_v4 }
  0x82   : > { %1713 = vmatpush.bf16.msrb.mxu3 %v2104_v37  ;;  %v1411_v37 = vor.u32 %v1580_v30, %v1410_v29  ;;  %v483_v29 = vld [vmem:[#allocation2 + $0x18] sm:$0xff] }
  0x86   : > { %1714 = vmatpush.bf16.msrb.mxu3 %v1607_v40 }
  0x8a   : > { %1715 = vmatpush.bf16.msrb.mxu3 %v1606_v43  ;;  %v1582_v43 = vld [vmem:[%s2076_s9 + $0x64] sm:$0xf] }
  0x8d   : > { %861 = vmatmul.bf16.gmra.mxu0 %v1387_v13  ;;  %891 = vmatmul.bf16.gmra.mxu3 %v1459_v14  ;;  %v481_v13 = vld [vmem:[#allocation2] sm:$0xff] }
  0x8e   : > { %1716 = vmatpush.bf16.msrb.mxu3 %v1605_v46  ;;  %910 = vmatmul.bf16.gmra.mxu1 %v1391_v15  ;;  %v1424_v46 = vld [vmem:[%s2076_s9 + $0x6c] sm:$0xf0] }
  0x8f   : > { %959 = vmatmul.bf16.gmra.mxu2 %v1395_v16  ;;  %v1427_v51 = vor.u32 %v1582_v43, %v1424_v46 }
  0x92   : > { %1717 = vmatpush.bf16.msrb.mxu3 %v1604_v49 }
  0x96   : > { %1718 = vmatpush.bf16.msrb.mxu3 %v1603_v52 }
  0x9a   : > { %1719 = vmatpush.bf16.msrb.mxu3 %v1602_v55  ;;  %v1585_v55 = vld [vmem:[%s2076_s9 + $0x7c] sm:$0xf] }
  0x9b   : > { %v1439_v63 = vor.u32 %v1585_v55, %v1436_v58 }
  0x9d   : > { %866 = vmatmul.bf16.gmra.mxu0 %v1399_v25  ;;  %935 = vmatmul.bf16.vlgmr.msrb.gmra.mxu3 %v1451_v26 }
  0x9e   : > { %1720 = vmatpush.bf16.msra.mxu3 %v2098_v35  ;;  %915 = vmatmul.bf16.gmra.mxu1 %v1403_v27  ;;  %v1418_v35 = vld [vmem:[%s2076_s9 + $0x50] sm:$0xf] }
  0x9f   : > { %964 = vmatmul.bf16.gmra.mxu2 %v1407_v28  ;;  %v1419_v40 = vor.u32 %v1581_v36, %v1418_v35 }
  0xa2   : > { %1721 = vmatpush.bf16.msra.mxu3 %v2107_v38  ;;  %v1415_v38 = vor.u32 %v1579_v31, %v1412_v34 }
  0xa6   : > { %1722 = vmatpush.bf16.msra.mxu3 %v2114_v41  ;;  %v1422_v41 = vld [vmem:[%s2076_s9 + $0x60] sm:$0xf] }
  0xa7   : > { %v1423_v49 = vor.u32 %v1583_v42, %v1422_v41 }
  0xaa   : > { %1723 = vmatpush.bf16.msra.mxu3 %v2120_v44  ;;  %v1454_v44 = vld [vmem:[%s2076_s9 + $0x98] sm:$0xf] }
  0xad   : > { %871 = vmatmul.bf16.gmra.mxu0 %v1411_v37  ;;  %940 = vmatmul.bf16.gmra.mxu3 %v1463_v39  ;;  %v484_v37 = vld [vmem:[#allocation2 + $0x50] sm:$0xff] }
  0xae   : > { %1724 = vmatpush.bf16.msra.mxu3 %v2126_v47  ;;  %920 = vmatmul.bf16.gmra.mxu1 %v1415_v38  ;;  %v1430_v47 = vld [vmem:[%s2076_s9 + $0x68] sm:$0xf] }
  0xaf   : > { %969 = vmatmul.bf16.gmra.mxu2 %v1419_v40  ;;  %v1431_v52 = vor.u32 %v1584_v48, %v1430_v47 }
  0xb2   : > { %1725 = vmatpush.bf16.msra.mxu3 %v2132_v50  ;;  %v1455_v50 = vor.u32 %v1590_v45, %v1454_v44  ;;  %v485_v45 = vld [vmem:[#allocation2 + $0x68] sm:$0xff] }
  0xb6   : > { %1726 = vmatpush.bf16.msra.mxu3 %v2138_v53  ;;  %v1434_v53 = vld [vmem:[%s2076_s9 + $0x78] sm:$0xf] }
  0xb7   : > { %v1435_v61 = vor.u32 %v1586_v54, %v1434_v53  ;;  %v486_v53 = vld [vmem:[#allocation2 + $0x8] sm:$0xff] }
  0xba   : > { %1727 = vmatpush.bf16.msra.mxu3 %v2143_v56  ;;  %v1593_v56 = vld [vmem:[%s2076_s9 + $0xb8] sm:$0xf0] }
  0xbb   : > { %v1467_v62 = vor.u32 %v1593_v56, %v1466_v57 }
  0xbd   : > { %876 = vmatmul.bf16.gmra.mxu0 %v1423_v49  ;;  %984 = vmatmul.bf16.vlgmr.msra.gmra.mxu3 %v1455_v50 }
  0xbe   : > { %925 = vmatmul.bf16.gmra.mxu1 %v1427_v51 }
  0xbf   : > { %974 = vmatmul.bf16.gmra.mxu2 %v1431_v52 }
  0xcd   : > { %881 = vmatmul.bf16.gmra.mxu0 %v1435_v61  ;;  %989 = vmatmul.bf16.gmra.mxu3 %v1467_v62  ;;  %v487_v61 = vld [vmem:[#allocation2 + $0x48] sm:$0xff] }
  0xce   : > { %930 = vmatmul.bf16.gmra.mxu1 %v1439_v63 }
  0xcf   : > { %979 = vmatmul.bf16.gmra.mxu2 %v1443_v0 }
  0xfa   : > { %v857_v1 = vpop.f32.mrf.mxu0 }
  0xfb   : > { %v906_v2 = vpop.f32.mrf.mxu1 }
  0xfc   : > { %v907_v3 = vadd.f32 %v906_v2, %v857_v1 }
 0x100   : > { %v2205_v4 = vpop.f32.mrf.mxu3 }
 0x102   : > { %v955_v6 = vpop.f32.mrf.mxu2  ;;  %v859_v8 = vpop.f32.mrf.mxu0 }
 0x103   : > { %v956_v7 = vadd.f32 %v955_v6, %v907_v3  ;;  %v908_v9 = vpop.f32.mrf.mxu1  ;;  %v492_v6 = vld [vmem:[#allocation2 + $0x60] sm:$0xff] }
 0x104   : > { %v909_v11 = vadd.f32 %v908_v9, %v859_v8  ;;  %v488_v8 = vld [vmem:[#allocation2 + $0x40] sm:$0xff] }
 0x105   : > { %v995_v10 = vadd.f32 %v956_v7, %v480_v5 }
 0x107   : > { %1011 = vst [vmem:[#allocation2 + $0x30] sm:$0xff] %v995_v10 }
 0x108   : > { %v2207_v12 = vpop.f32.mrf.mxu3 }
 0x10a   : > { %v957_v14 = vpop.f32.mrf.mxu2  ;;  %v862_v16 = vpop.f32.mrf.mxu0 }
 0x10b   : > { %v958_v15 = vadd.f32 %v957_v14, %v909_v11  ;;  %v911_v17 = vpop.f32.mrf.mxu1 }
 0x10c   : > { %v912_v19 = vadd.f32 %v911_v17, %v862_v16 }
 0x10d   : > { %v996_v18 = vadd.f32 %v958_v15, %v481_v13 }
 0x10f   : > { %1012 = vst [vmem:[#allocation2] sm:$0xff] %v996_v18 }
 0x110   : > { %v2209_v20 = vpop.f32.mrf.mxu3 }
 0x112   : > { %v960_v22 = vpop.f32.mrf.mxu2  ;;  %v864_v24 = vpop.f32.mrf.mxu0 }
 0x113   : > { %v961_v23 = vadd.f32 %v960_v22, %v912_v19  ;;  %v913_v25 = vpop.f32.mrf.mxu1  ;;  %v493_v19 = vld [vmem:[#allocation2 + $0x70] sm:$0xff]  ;;  %v489_v22 = vld [vmem:[#allocation2 + $0x20] sm:$0xff] }
 0x114   : > { %v914_v27 = vadd.f32 %v913_v25, %v864_v24 }
 0x115   : > { %v997_v26 = vadd.f32 %v961_v23, %v482_v21 }
 0x117   : > { %1013 = vst [vmem:[#allocation2 + $0x58] sm:$0xff] %v997_v26 }
 0x118   : > { %v2211_v28 = vpop.f32.mrf.mxu3 }
 0x11a   : > { %v962_v30 = vpop.f32.mrf.mxu2  ;;  %v867_v32 = vpop.f32.mrf.mxu0 }
 0x11b   : > { %v963_v31 = vadd.f32 %v962_v30, %v914_v27  ;;  %v916_v33 = vpop.f32.mrf.mxu1 }
 0x11c   : > { %v917_v35 = vadd.f32 %v916_v33, %v867_v32  ;;  %v494_v32 = vld [vmem:[#allocation2 + $0x78] sm:$0xff] }
 0x11d   : > { %v998_v34 = vadd.f32 %v963_v31, %v483_v29 }
 0x11f   : > { %1014 = vst [vmem:[#allocation2 + $0x18] sm:$0xff] %v998_v34  ;;  %v490_v34 = vld [vmem:[#allocation2 + $0x10] sm:$0xff] }
 0x120   : > { %v936_v36 = vpop.f32.mrf.mxu3 }
 0x121   : > { %v937_v5 = vadd.f32 %v936_v36, %v2205_v4 }
 0x122   : > { %v965_v39 = vpop.f32.mrf.mxu2  ;;  %v869_v40 = vpop.f32.mrf.mxu0 }
 0x123   : > { %v966_v38 = vadd.f32 %v965_v39, %v917_v35  ;;  %v918_v41 = vpop.f32.mrf.mxu1 }
 0x124   : > { %v919_v43 = vadd.f32 %v918_v41, %v869_v40 }
 0x125   : > { %v999_v42 = vadd.f32 %v966_v38, %v484_v37 }
 0x127   : > { %1015 = vst [vmem:[#allocation2 + $0x50] sm:$0xff] %v999_v42 }
 0x128   : > { %v938_v44 = vpop.f32.mrf.mxu3 }
 0x129   : > { %v939_v17 = vadd.f32 %v938_v44, %v2207_v12 }
 0x12a   : > { %v967_v46 = vpop.f32.mrf.mxu2  ;;  %v872_v48 = vpop.f32.mrf.mxu0 }
 0x12b   : > { %v968_v47 = vadd.f32 %v967_v46, %v919_v43  ;;  %v921_v49 = vpop.f32.mrf.mxu1  ;;  %v495_v43 = vld [vmem:[#allocation2 + $0x28] sm:$0xff] }
 0x12c   : > { %v922_v51 = vadd.f32 %v921_v49, %v872_v48 }
 0x12d   : > { %v1000_v50 = vadd.f32 %v968_v47, %v485_v45  ;;  %v491_v45 = vld [vmem:[#allocation2 + $0x38] sm:$0xff] }
 0x12f   : > { %1016 = vst [vmem:[#allocation2 + $0x68] sm:$0xff] %v1000_v50 }
 0x130   : > { %v941_v52 = vpop.f32.mrf.mxu3 }
 0x131   : > { %v942_v31 = vadd.f32 %v941_v52, %v2209_v20 }
 0x132   : > { %v970_v54 = vpop.f32.mrf.mxu2  ;;  %v874_v57 = vpop.f32.mrf.mxu0 }
 0x133   : > { %v971_v55 = vadd.f32 %v970_v54, %v922_v51  ;;  %v923_v56 = vpop.f32.mrf.mxu1 }
 0x134   : > { %v924_v59 = vadd.f32 %v923_v56, %v874_v57 }
 0x135   : > { %v1001_v58 = vadd.f32 %v971_v55, %v486_v53 }
 0x137   : > { %1017 = vst [vmem:[#allocation2 + $0x8] sm:$0xff] %v1001_v58 }
 0x138   : > { %v943_v60 = vpop.f32.mrf.mxu3 }
 0x139   : > { %v944_v41 = vadd.f32 %v943_v60, %v2211_v28 }
 0x13a   : > { %v972_v62 = vpop.f32.mrf.mxu2  ;;  %v877_v0 = vpop.f32.mrf.mxu0 }
 0x13b   : > { %v973_v63 = vadd.f32 %v972_v62, %v924_v59  ;;  %v926_v1 = vpop.f32.mrf.mxu1 }
 0x13c   : > { %v927_v3 = vadd.f32 %v926_v1, %v877_v0 }
 0x13d   : > { %v1002_v2 = vadd.f32 %v973_v63, %v487_v61 }
 0x13f   : > { %1018 = vst [vmem:[#allocation2 + $0x48] sm:$0xff] %v1002_v2 }
 0x140   : > { %v985_v7 = vpop.f32.mrf.mxu3 }
 0x141   : > { %v986_v10 = vadd.f32 %v985_v7, %v937_v5 }
 0x142   : > { %v975_v9 = vpop.f32.mrf.mxu2  ;;  %v879_v13 = vpop.f32.mrf.mxu0 }
 0x143   : > { %v976_v11 = vadd.f32 %v975_v9, %v927_v3  ;;  %v1007_v14 = vadd.f32 %v986_v10, %v492_v6  ;;  %v928_v15 = vpop.f32.mrf.mxu1 }
 0x144   : > { %v929_v18 = vadd.f32 %v928_v15, %v879_v13 }
 0x145   : > { %v1003_v16 = vadd.f32 %v976_v11, %v488_v8  ;;  %1023 = vst [vmem:[#allocation2 + $0x60] sm:$0xff] %v1007_v14 }
 0x147   : > { %1019 = vst [vmem:[#allocation2 + $0x40] sm:$0xff] %v1003_v16 }
 0x148   : > { %v987_v21 = vpop.f32.mrf.mxu3 }
 0x149   : > { %v988_v4 = vadd.f32 %v987_v21, %v939_v17 }
 0x14a   : > { %v977_v23 = vpop.f32.mrf.mxu2  ;;  %v882_v26 = vpop.f32.mrf.mxu0 }
 0x14b   : > { %v978_v24 = vadd.f32 %v977_v23, %v929_v18  ;;  %v1008_v25 = vadd.f32 %v988_v4, %v493_v19  ;;  %v931_v27 = vpop.f32.mrf.mxu1 }
 0x14c   : > { %v932_v30 = vadd.f32 %v931_v27, %v882_v26 }
 0x14d   : > { %v1004_v29 = vadd.f32 %v978_v24, %v489_v22  ;;  %1024 = vst [vmem:[#allocation2 + $0x70] sm:$0xff] %v1008_v25 }
 0x14f   : > { %1020 = vst [vmem:[#allocation2 + $0x20] sm:$0xff] %v1004_v29 }
 0x150   : > { %v990_v33 = vpop.f32.mrf.mxu3 }
 0x151   : > { %v991_v35 = vadd.f32 %v990_v33, %v942_v31 }
 0x152   : > { %v980_v12 = vpop.f32.mrf.mxu2  ;;  %v884_v38 = vpop.f32.mrf.mxu0 }
 0x153   : > { %v981_v36 = vadd.f32 %v980_v12, %v932_v30  ;;  %v1009_v37 = vadd.f32 %v991_v35, %v494_v32  ;;  %v933_v40 = vpop.f32.mrf.mxu1 }
 0x154   : > { %v934_v42 = vadd.f32 %v933_v40, %v884_v38 }
 0x155   : > { %v1005_v39 = vadd.f32 %v981_v36, %v490_v34  ;;  %1025 = vst [vmem:[#allocation2 + $0x78] sm:$0xff] %v1009_v37 }
 0x157   : > { %1021 = vst [vmem:[#allocation2 + $0x10] sm:$0xff] %v1005_v39 }
 0x158   : > { %v992_v44 = vpop.f32.mrf.mxu3 }
 0x159   : > { %v993_v20 = vadd.f32 %v992_v44, %v944_v41 }
 0x15a   : > { %v982_v46 = vpop.f32.mrf.mxu2 }
 0x15b   : > { %v983_v47 = vadd.f32 %v982_v46, %v934_v42  ;;  %v1010_v48 = vadd.f32 %v993_v20, %v495_v43  ;;  %1030 = sbr.rel (%p1564_p0) target bundleno = 382 (0x17e), region = 82 }
 0x15d   : > { %v1006_v49 = vadd.f32 %v983_v47, %v491_v45  ;;  %1026 = vst [vmem:[#allocation2 + $0x28] sm:$0xff] %v1010_v48 }
 0x15f   : > { %1022 = vst [vmem:[#allocation2 + $0x38] sm:$0xff] %v1006_v49 }
 0x160   : > { %v1031_v50 = vld [vmem:[#allocation2 + $0x30] sm:$0xff]  ;;  %v1032_v51 = vld [vmem:[#allocation2] sm:$0xff]  ;;  %v1033_v54 = vld [vmem:[#allocation2 + $0x58] sm:$0xff] }
 0x161   : > { %v2218_v52 = vld [vmem:[#allocation4] ss:$0 sm:$0xff]  ;;  %v2220_v53 = vld [vmem:[#allocation6] ss:$0 sm:$0xff]  ;;  %v1034_v55 = vld [vmem:[#allocation2 + $0x18] sm:$0xff] }
 0x162   : > { %v1619_v28 = vld [vmem:[%s2321_s4] sm:$0xff]   ;;  %v1051_v57 = vmul.f32 %v2218_v52, %v1031_v50  ;;  %v1052_v56 = vmul.f32 %v2218_v52, %v1032_v51  ;;  %v1690_v60 = vld [vmem:[%s2321_s4 + $0x8] sm:$0xff]   ;;  %v1035_v61 = vld [vmem:[#allocation2 + $0x50] sm:$0xff]  ;;  %v1053_v63 = vmul.f32 %v2218_v52, %v1033_v54  ;;  %v1054_v0 = vmul.f32 %v2218_v52, %v1034_v55 }
 0x163   : > { %v1620_v58 = vunpack.c.l.bf16 %v1619_v28  ;;  %v1621_v59 = vunpack.c.h.bf16 %v1619_v28  ;;  %v1036_v62 = vld [vmem:[#allocation2 + $0x68] sm:$0xff]  ;;  %v1624_v1 = vunpack.c.l.bf16 %v1690_v60  ;;  %v1625_v2 = vunpack.c.h.bf16 %v1690_v60  ;;  %v1691_v3 = vld [vmem:[%s2321_s4 + $0x10] sm:$0xff]   ;;  %v1692_v24 = vld [vmem:[%s2321_s4 + $0x18] sm:$0xff]  }
 0x164   : > { %v1071_v5 = vadd.f32 %v2220_v53, %v1051_v57  ;;  %v1072_v6 = vadd.f32 %v2220_v53, %v1052_v56  ;;  %v1055_v7 = vmul.f32 %v2218_v52, %v1035_v61  ;;  %v1056_v8 = vmul.f32 %v2218_v52, %v1036_v62  ;;  %v1037_v9 = vld [vmem:[#allocation2 + $0x8] sm:$0xff]  ;;  %v1039_v30 = vld [vmem:[#allocation2 + $0x40] sm:$0xff]  ;;  %v1041_v40 = vld [vmem:[#allocation2 + $0x10] sm:$0xff] }
 0x165   : > { %v1038_v10 = vld [vmem:[#allocation2 + $0x48] sm:$0xff]  ;;  %v1073_v11 = vadd.f32 %v2220_v53, %v1053_v63  ;;  %v1074_v13 = vadd.f32 %v2220_v53, %v1054_v0  ;;  %v1628_v14 = vunpack.c.l.bf16 %v1691_v3  ;;  %v1629_v15 = vunpack.c.h.bf16 %v1691_v3  ;;  %v1040_v31 = vld [vmem:[#allocation2 + $0x20] sm:$0xff]  ;;  %v1044_v57 = vld [vmem:[#allocation2 + $0x70] sm:$0xff] }
 0x166   : > { %v1119_v16 = vadd.f32 %v1620_v58, %v1071_v5  ;;  %v1120_v17 = vadd.f32 %v1621_v59, %v1072_v6  ;;  %v1075_v18 = vadd.f32 %v2220_v53, %v1055_v7  ;;  %v1076_v19 = vadd.f32 %v2220_v53, %v1056_v8  ;;  %v1693_v35 = vld [vmem:[%s2321_s4 + $0x20] sm:$0xff]   ;;  %v1042_v45 = vld [vmem:[#allocation2 + $0x38] sm:$0xff]  ;;  %v1694_v46 = vld [vmem:[%s2321_s4 + $0x28] sm:$0xff]  }
 0x167   : > { %v1121_v21 = vadd.f32 %v1624_v1, %v1073_v11  ;;  %v1122_v22 = vadd.f32 %v1625_v2, %v1074_v13  ;;  %v1057_v23 = vmul.f32 %v2218_v52, %v1037_v9  ;;  %v1058_v4 = vmul.f32 %v2218_v52, %v1038_v10  ;;  %v1043_v55 = vld [vmem:[#allocation2 + $0x60] sm:$0xff]  ;;  %v1695_v56 = vld [vmem:[%s2321_s4 + $0x30] sm:$0xff]   ;;  %v1045_v7 = vld [vmem:[#allocation2 + $0x78] sm:$0xff] }
 0x168   : > { %v1135_v25 = vmax.f32 %v1119_v16, 0.0  ;;  %v1136_v26 = vmax.f32 %v1120_v17, 0.0  ;;  %v1123_v27 = vadd.f32 %v1628_v14, %v1075_v18  ;;  %v1124_v29 = vadd.f32 %v1629_v15, %v1076_v19  ;;  %v1046_v8 = vld [vmem:[#allocation2 + $0x28] sm:$0xff]  ;;  %v1696_v14 = vld [vmem:[%s2321_s4 + $0x38] sm:$0xff]  }
 0x169   : > { %v1137_v32 = vmax.f32 %v1121_v21, 0.0  ;;  %v1138_v33 = vmax.f32 %v1122_v22, 0.0  ;;  %v1077_v34 = vadd.f32 %v2220_v53, %v1057_v23  ;;  %v1078_v12 = vadd.f32 %v2220_v53, %v1058_v4 }
 0x16a   : > { %v1653_v36 = vpack.c.bf16 %v1136_v26, %v1135_v25  ;;  %v1139_v37 = vmax.f32 %v1123_v27, 0.0  ;;  %v1140_v39 = vmax.f32 %v1124_v29, 0.0  ;;  %v1632_v38 = vunpack.c.l.bf16 %v1692_v24 }
 0x16b   : > { %v1658_v41 = vpack.c.bf16 %v1138_v33, %v1137_v32  ;;  %v1633_v42 = vunpack.c.h.bf16 %v1692_v24  ;;  %v1059_v43 = vmul.f32 %v2218_v52, %v1039_v30  ;;  %v1060_v44 = vmul.f32 %v2218_v52, %v1040_v31 }
 0x16c   : > { %1654 = vst [vmem:[%s2322_s5] sm:$0xff] %v1653_v36   ;;  %v1663_v20 = vpack.c.bf16 %v1140_v39, %v1139_v37  ;;  %v1125_v47 = vadd.f32 %v1632_v38, %v1077_v34  ;;  %v1636_v48 = vunpack.c.l.bf16 %v1693_v35  ;;  %v1637_v49 = vunpack.c.h.bf16 %v1693_v35 }
 0x16d   : > { %1697 = vst [vmem:[%s2322_s5 + $0x8] sm:$0xff] %v1658_v41   ;;  %v1126_v50 = vadd.f32 %v1633_v42, %v1078_v12  ;;  %v1079_v51 = vadd.f32 %v2220_v53, %v1059_v43  ;;  %v1080_v28 = vadd.f32 %v2220_v53, %v1060_v44  ;;  %v1061_v54 = vmul.f32 %v2218_v52, %v1041_v40 }
 0x16e   : > { %1698 = vst [vmem:[%s2322_s5 + $0x10] sm:$0xff] %v1663_v20   ;;  %v1141_v58 = vmax.f32 %v1125_v47, 0.0  ;;  %v1062_v59 = vmul.f32 %v2218_v52, %v1042_v45  ;;  %v1640_v60 = vunpack.c.l.bf16 %v1694_v46  ;;  %v1641_v61 = vunpack.c.h.bf16 %v1694_v46 }
 0x16f   : > { %v1142_v62 = vmax.f32 %v1126_v50, 0.0  ;;  %v1127_v63 = vadd.f32 %v1636_v48, %v1079_v51  ;;  %v1128_v0 = vadd.f32 %v1637_v49, %v1080_v28  ;;  %v1081_v1 = vadd.f32 %v2220_v53, %v1061_v54 }
 0x170   : > { %v1082_v2 = vadd.f32 %v2220_v53, %v1062_v59  ;;  %v1063_v3 = vmul.f32 %v2218_v52, %v1043_v55  ;;  %v1064_v5 = vmul.f32 %v2218_v52, %v1044_v57  ;;  %v1644_v6 = vunpack.c.l.bf16 %v1695_v56 }
 0x171   : > { %v1668_v9 = vpack.c.bf16 %v1142_v62, %v1141_v58  ;;  %v1143_v10 = vmax.f32 %v1127_v63, 0.0  ;;  %v1144_v11 = vmax.f32 %v1128_v0, 0.0  ;;  %v1129_v13 = vadd.f32 %v1640_v60, %v1081_v1 }
 0x172   : > { %v1130_v15 = vadd.f32 %v1641_v61, %v1082_v2  ;;  %v1083_v16 = vadd.f32 %v2220_v53, %v1063_v3  ;;  %v1084_v17 = vadd.f32 %v2220_v53, %v1064_v5  ;;  %v1645_v18 = vunpack.c.h.bf16 %v1695_v56 }
 0x173   : > { %1699 = vst [vmem:[%s2322_s5 + $0x18] sm:$0xff] %v1668_v9   ;;  %v1673_v19 = vpack.c.bf16 %v1144_v11, %v1143_v10  ;;  %v1145_v21 = vmax.f32 %v1129_v13, 0.0  ;;  %v1065_v22 = vmul.f32 %v2218_v52, %v1045_v7  ;;  %v1066_v23 = vmul.f32 %v2218_v52, %v1046_v8 }
 0x174   : > { %v1146_v4 = vmax.f32 %v1130_v15, 0.0  ;;  %v1131_v24 = vadd.f32 %v1644_v6, %v1083_v16  ;;  %v1132_v25 = vadd.f32 %v1645_v18, %v1084_v17  ;;  %v1648_v26 = vunpack.c.l.bf16 %v1696_v14 }
 0x175   : > { %1700 = vst [vmem:[%s2322_s5 + $0x20] sm:$0xff] %v1673_v19   ;;  %v1085_v27 = vadd.f32 %v2220_v53, %v1065_v22  ;;  %v1086_v29 = vadd.f32 %v2220_v53, %v1066_v23  ;;  %v1649_v30 = vunpack.c.h.bf16 %v1696_v14 }
 0x176   : > { %v1678_v31 = vpack.c.bf16 %v1146_v4, %v1145_v21  ;;  %v1147_v32 = vmax.f32 %v1131_v24, 0.0  ;;  %v1148_v33 = vmax.f32 %v1132_v25, 0.0 }
 0x177   : > { %v1133_v34 = vadd.f32 %v1648_v26, %v1085_v27  ;;  %v1134_v12 = vadd.f32 %v1649_v30, %v1086_v29 }
 0x178   : > { %1701 = vst [vmem:[%s2322_s5 + $0x28] sm:$0xff] %v1678_v31   ;;  %v1683_v52 = vpack.c.bf16 %v1148_v33, %v1147_v32 }
 0x179   : > { %v1149_v35 = vmax.f32 %v1133_v34, 0.0  ;;  %v1150_v36 = vmax.f32 %v1134_v12, 0.0 }
 0x17a   : > { %1702 = vst [vmem:[%s2322_s5 + $0x30] sm:$0xff] %v1683_v52  }
 0x17b   : > { %v1688_v37 = vpack.c.bf16 %v1150_v36, %v1149_v35 }
 0x17d   : > { %1703 = vst [vmem:[%s2322_s5 + $0x38] sm:$0xff] %v1688_v37  }
 0x17e PF: > { %s17_s22 = sadd.s32 1, %s1900_s22   ;;  %s2326_s18 = smov %s1888_s19 }
 0x17f   : > { %p14_p1 = scmp.ge.s32.totalorder %s17_s22, 5   ;;  %s2327_s19 = smov %s1985_s30 }
 0x180   : > { %s2328_s20 = smov %s1896_s21  ;;  %s2329_s21 = smov %s2331_s24 }
 0x181   :  { %16 = sbr.rel (!%p14_p1) target bundleno = 4 (0x4), region = 132 }
 0x186   :  { %1211 = vsyncpa [#allocation5], 1 }
 0x187   :  { %1213 = vsyncpa [#allocation5 + $0x1], 1 }
 0x188   :  { %1214 = vsyncpa [#allocation7], 1 }

// kernel: resnet_forward.27
= control target key start
LH: loop header
LB: loop body
LE: loop exit
PB: predicated region body
PF: predicated region fallthrough
CT: control target
= control target key end

     0   :  { %9 = vsyncpa [#allocation5], 0  ;;  %s1368_s0 = inlined_call_operand.vmem [shape: bf16[32,1152], index: 0, kind: input, shape index: {}]   ;;  %s1369_s1 = inlined_call_operand.vmem [shape: bf16[1152,128], index: 1, kind: input, shape index: {}]   ;;  %s1370_s2 = inlined_call_operand.hbm [shape: f32[1,128], index: 2, kind: input, shape index: {}]   ;;  %s1371_s3 = inlined_call_operand.hbm [shape: f32[1,128], index: 3, kind: input, shape index: {}]   ;;  %s1372_s4 = inlined_call_operand.vmem [shape: bf16[32,128], index: 4, kind: output, shape index: {}]  }
   0x1   :  { %10 = vsyncpa [#allocation7], 0  ;;  %s1220_s15 = smov 0   ;;  %s1222_s16 = smov 0  }
   0x2   :  { %s1224_s17 = smov 0   ;;  %s1226_s18 = smov 0  }
   0x3   :  { %s1228_s19 = smov 0  }
   0x4 LB: > { %s824_s20 = sadd.s32 4294967295, %s1190_s19   ;;  %s28_s21 = sadd.s32 1, %s1186_s18  ;;  %s1190_s19 = sphi %s1228_s19, %s16_s19   ;;  %s1186_s18 = sphi %s1226_s18, %s1379_s18   ;;  %s1182_s17 = sphi %s1224_s17, %s1378_s17   ;;  %s1178_s16 = sphi %s1222_s16, %s1377_s16   ;;  %s1174_s15 = sphi %s1220_s15, %s1376_s15  }
   0x5   : > { %p29_p0 = scmp.ge.s32.totalorder %s28_s21, 3  ;;  %s44_s22 = sadd.s32 1, %s1178_s16 }
   0x6   : > { %p51_p1 = scmp.ne.s32.totalorder %s1178_s16, %s1174_s15  ;;  %p52_p2 = scmp.eq.s32.totalorder %s1190_s19, 0 }
   0x7   : > { %s1381_s21 = smov (%p29_p0, %s28_s21), 0  ;;  %p825_p4 = scmp.ge.s32.totalorder %s1190_s19, 1 }
   0x8   : > { %p1253_p3 = por %p52_p2, %p51_p1  ;;  %s40_s24 = ssub.s32 %s1186_s18, %s1381_s21 }
   0x9   : > { %p176_p5 = scmp.lt.s32.totalorder %s1190_s19, 4  ;;  %p42_p6 = scmp.eq.s32.totalorder %s40_s24, 0 }
   0xa   : > { %p1265_p8 = scmp.eq.s32.totalorder %s824_s20, 0  ;;  %s189_s30 = sshll.u32 %s1370_s2, 4  ;;  %s190_s30 = int_to_ptr.hbm [resolvable:$true] %s189_s30 }
   0xb   : > { %p1261_p7 = pnand %p825_p4, %p176_p5  ;;  %s1192_s5 = smov [#allocation4]  }
   0xc   : > { %s1270_s27 = scalar_select %p42_p6, %s1178_s16, %s44_s22  }
   0xd   : > { %p1028_p9 = pneg %p1261_p7  ;;  %s191_s6 = sshll.u32 %s1192_s5, 4  ;;  %s192_s6 = int_to_ptr.vmem [resolvable:$true] %s191_s6 }
   0xe   : > { %s202_s9 = sshll.u32 %s1371_s3, 4  ;;  %s1193_s10 = smov [#allocation6]   ;;  %s203_s9 = int_to_ptr.hbm [resolvable:$true] %s202_s9 }
   0xf   : > { %p1029_p10 = pnand %p1265_p8, %p1028_p9  ;;  %s204_s11 = sshll.u32 %s1193_s10, 4  ;;  %s205_s11 = int_to_ptr.vmem [resolvable:$true] %s204_s11 }
  0x10   : > { %p828_p11 = scmp.ge.s32.totalorder %s1190_s19, 3 }
  0x11   : > { %1031 = dma.hbm_to_vmem [thread:$0]  (!%p1029_p10), %s190_s30, 16, %s192_s6, [#allocation5]  }
  0x12   : > { %1034 = dma.hbm_to_vmem [thread:$0]  (!%p1029_p10), %s203_s9, 16, %s205_s11, [#allocation7]  }
  0x13   : > { %211 = sbr.rel (%p828_p11) target bundleno = 37 (0x25), region = 24 }
  0x18   : > { %214 = sbr.rel (!%p1253_p3) target bundleno = 37 (0x25), region = 28  ;;  %s216_s12 = sand.u32 (%p1253_p3), 1, %s1178_s16  }
  0x19   : > { %s968_s13 = smul.u32 (%p1253_p3), 12, %s1186_s18 }
  0x1a   : > { %s1018_s14 = smul.u32 (%p1253_p3), 48, %s216_s12 }
  0x1b   : > { %s224_s24 = scalar_lea.vmem (%p1253_p3), %s1368_s0, %s968_s13 }
  0x1c   : > { %v239_v0 = vld [vmem:[%s224_s24] sm:$0xff] (%p1253_p3)  ;;  %v243_v2 = vld [vmem:[%s224_s24 + $0x48] sm:$0xff] (%p1253_p3)  ;;  %s218_s28 = scalar_lea.vmem (%p1253_p3), [#allocation3], %s1018_s14  ;;  %v834_v6 = vld [vmem:[%s224_s24 + $0x50] sm:$0xf] (%p1253_p3) }
  0x1d   : > { %v241_v1 = vld [vmem:[%s224_s24 + $0x24] sm:$0xff]  ;;  %240 = vst [vmem:[%s218_s28] sm:$0xff] %v239_v0  ;;  %v245_v3 = vld [vmem:[%s224_s24 + $0x6c] sm:$0xff]  ;;  %v836_v7 = vld [vmem:[%s224_s24 + $0x74] sm:$0xf] }
  0x1e   : > { %242 = vst [vmem:[%s218_s28 + $0xc] sm:$0xff] %v241_v1  ;;  %v830_v4 = vld [vmem:[%s224_s24 + $0x8] sm:$0xf]  ;;  %v832_v5 = vld [vmem:[%s224_s24 + $0x2c] sm:$0xf] }
  0x1f   : > { %244 = vst [vmem:[%s218_s28 + $0x18] sm:$0xff] %v243_v2 }
  0x20   : > { %246 = vst [vmem:[%s218_s28 + $0x24] sm:$0xff] %v245_v3 }
  0x21   : > { %831 = vst [vmem:[%s218_s28 + $0x8] sm:$0xf] %v830_v4 }
  0x22   : > { %833 = vst [vmem:[%s218_s28 + $0x14] sm:$0xf] %v832_v5 }
  0x23   : > { %835 = vst [vmem:[%s218_s28 + $0x20] sm:$0xf] %v834_v6 }
  0x24   : > { %837 = vst [vmem:[%s218_s28 + $0x2c] sm:$0xf] %v836_v7 }
  0x25 PF: > { %283 = sbr.rel (%p1261_p7) target bundleno = 268 (0x10c), region = 58  ;;  %s286_s23 = sand.u32 (!%p1261_p7), 1, %s1174_s15  }
  0x26   : > { %s1019_s29 = smul.u32 (!%p1261_p7), 48, %s286_s23 }
  0x28   : > { %s1293_s30 = scalar_lea.vmem (!%p1261_p7), [#allocation3], %s1019_s29 }
  0x2a   : > { %1165 = dma.done.wait (%p1265_p8), [#allocation5], 16  }
  0x2b   : > { %1167 = vsyncadd (%p1265_p8), [#allocation5], 4294967280 }
  0x2c   : > { %1169 = dma.done.wait (%p1265_p8), [#allocation7], 16  }
  0x2d   : > { %1171 = vsyncadd (%p1265_p8), [#allocation7], 4294967280  ;;  %s334_s25 = smul.u32 48, %s1182_s17  ;;  %p842_p13 = scmp.ne.s32.totalorder %s1182_s17, 0 }
  0x2f   : > { %p335_p12 = scmp.lt.s32.totalorder %s334_s25, 143  ;;  %355 = sbr.rel (%p842_p13) target bundleno = 57 (0x39), region = 74 }
  0x31   : > { %s1383_s25 = smov (!%p335_p12, %s334_s25), 143 }
  0x32   : > { %s841_s5 = sshll.u32 %s1383_s25, 2 }
  0x33   : > { %s1307_s7 = scalar_lea.vmem %s1369_s1, %s841_s5 }
  0x34   : > { %v1194_v8 = vmov 0.0  }
  0x35   : > { %356 = vst [vmem:[#allocation2 + $0x10] sm:$0xff] %v1194_v8 }
  0x36   : > { %357 = vst [vmem:[#allocation2] sm:$0xff] %v1194_v8 }
  0x37   : > { %358 = vst [vmem:[#allocation2 + $0x18] sm:$0xff] %v1194_v8 }
  0x38   : > { %359 = vst [vmem:[#allocation2 + $0x8] sm:$0xff] %v1194_v8 }
  0x39 PF: > { %v982_v9 = vld [vmem:[%s1307_s7 + $0x38] sm:$0xff]  ;;  %v981_v12 = vld [vmem:[%s1307_s7 + $0x30] sm:$0xff]  ;;  %v980_v15 = vld [vmem:[%s1307_s7 + $0x28] sm:$0xff]  ;;  %p963_p0 = scmp.ne.s32.totalorder %s1182_s17, 2 }
  0x3a   : > { %v990_v10 = vld [vmem:[%s1307_s7 + $0x78] sm:$0xff]  ;;  %596 = vmatpush.bf16.msra.mxu0 %v982_v9  ;;  %v989_v13 = vld [vmem:[%s1307_s7 + $0x70] sm:$0xff]  ;;  %1010 = vmatpush.bf16.msra.mxu3 %v982_v9  ;;  %v988_v16 = vld [vmem:[%s1307_s7 + $0x68] sm:$0xff] }
  0x3b   : > { %v998_v11 = vld [vmem:[%s1307_s7 + $0xb8] sm:$0xff]  ;;  %615 = vmatpush.bf16.msra.mxu1 %v990_v10  ;;  %v997_v14 = vld [vmem:[%s1307_s7 + $0xb0] sm:$0xff]  ;;  %v996_v17 = vld [vmem:[%s1307_s7 + $0xa8] sm:$0xff] }
  0x3c   : > { %634 = vmatpush.bf16.msra.mxu2 %v998_v11  ;;  %v979_v18 = vld [vmem:[%s1307_s7 + $0x20] sm:$0xff]  ;;  %v978_v21 = vld [vmem:[%s1307_s7 + $0x18] sm:$0xff]  ;;  %v977_v24 = vld [vmem:[%s1307_s7 + $0x10] sm:$0xff] }
  0x3d   : > { %v987_v19 = vld [vmem:[%s1307_s7 + $0x60] sm:$0xff]  ;;  %v986_v22 = vld [vmem:[%s1307_s7 + $0x58] sm:$0xff]  ;;  %v985_v25 = vld [vmem:[%s1307_s7 + $0x50] sm:$0xff] }
  0x3e   : > { %597 = vmatpush.bf16.msra.mxu0 %v981_v12  ;;  %1011 = vmatpush.bf16.msra.mxu3 %v981_v12  ;;  %v995_v20 = vld [vmem:[%s1307_s7 + $0xa0] sm:$0xff]  ;;  %v994_v23 = vld [vmem:[%s1307_s7 + $0x98] sm:$0xff]  ;;  %v993_v26 = vld [vmem:[%s1307_s7 + $0x90] sm:$0xff] }
  0x3f   : > { %616 = vmatpush.bf16.msra.mxu1 %v989_v13  ;;  %v976_v27 = vld [vmem:[%s1307_s7 + $0x8] sm:$0xff]  ;;  %v975_v30 = vld [vmem:[%s1307_s7] sm:$0xff]  ;;  %v360_v54 = vld [vmem:[#allocation2 + $0x10] sm:$0xff] }
  0x40   : > { %635 = vmatpush.bf16.msra.mxu2 %v997_v14  ;;  %v984_v28 = vld [vmem:[%s1307_s7 + $0x48] sm:$0xff]  ;;  %v983_v31 = vld [vmem:[%s1307_s7 + $0x40] sm:$0xff]  ;;  %v362_v4 = vld [vmem:[#allocation2 + $0x18] sm:$0xff] }
  0x41   : > { %v992_v29 = vld [vmem:[%s1307_s7 + $0x88] sm:$0xff]  ;;  %v991_v32 = vld [vmem:[%s1307_s7 + $0x80] sm:$0xff] }
  0x42   : > { %598 = vmatpush.bf16.msra.mxu0 %v980_v15  ;;  %1012 = vmatpush.bf16.msra.mxu3 %v980_v15  ;;  %v845_v33 = vld [vmem:[%s1293_s30] sm:$0xf]  ;;  %v970_v34 = vld [vmem:[%s1293_s30 + $0x8] sm:$0xf0]  ;;  %v969_v35 = vld [vmem:[%s1293_s30 + $0x4] sm:$0xf] }
  0x43   : > { %617 = vmatpush.bf16.msra.mxu1 %v988_v16  ;;  %v847_v36 = vld [vmem:[%s1293_s30 + $0xc] sm:$0xf0]  ;;  %v853_v37 = vld [vmem:[%s1293_s30 + $0x8] sm:$0xf]  ;;  %v971_v38 = vld [vmem:[%s1293_s30 + $0x10] sm:$0xf0]  ;;  %v846_v41 = vor.u32 %v970_v34, %v845_v33 }
  0x44   : > { %636 = vmatpush.bf16.msra.mxu2 %v996_v17  ;;  %v857_v39 = vld [vmem:[%s1293_s30 + $0x18] sm:$0xf]  ;;  %v973_v40 = vld [vmem:[%s1293_s30 + $0x20] sm:$0xf0]  ;;  %v850_v42 = vor.u32 %v969_v35, %v847_v36  ;;  %v854_v43 = vor.u32 %v971_v38, %v853_v37  ;;  %v972_v45 = vld [vmem:[%s1293_s30 + $0x1c] sm:$0xf] }
  0x45   : > { %v858_v44 = vor.u32 %v973_v40, %v857_v39  ;;  %v859_v46 = vld [vmem:[%s1293_s30 + $0x24] sm:$0xf0]  ;;  %v865_v47 = vld [vmem:[%s1293_s30 + $0x20] sm:$0xf]  ;;  %v974_v48 = vld [vmem:[%s1293_s30 + $0x28] sm:$0xf0] }
  0x46   : > { %599 = vmatpush.bf16.msra.mxu0 %v979_v18  ;;  %1013 = vmatpush.bf16.msra.mxu3 %v979_v18  ;;  %v862_v49 = vor.u32 %v972_v45, %v859_v46  ;;  %v866_v50 = vor.u32 %v974_v48, %v865_v47  ;;  %v361_v61 = vld [vmem:[#allocation2] sm:$0xff]  ;;  %v363_v11 = vld [vmem:[#allocation2 + $0x8] sm:$0xff] }
  0x47   : > { %618 = vmatpush.bf16.msra.mxu1 %v987_v19 }
  0x48   : > { %637 = vmatpush.bf16.msra.mxu2 %v995_v20 }
  0x4a   : > { %600 = vmatpush.bf16.msra.mxu0 %v978_v21  ;;  %1014 = vmatpush.bf16.msra.mxu3 %v978_v21 }
  0x4b   : > { %619 = vmatpush.bf16.msra.mxu1 %v986_v22 }
  0x4c   : > { %638 = vmatpush.bf16.msra.mxu2 %v994_v23 }
  0x4e   : > { %601 = vmatpush.bf16.msra.mxu0 %v977_v24  ;;  %1015 = vmatpush.bf16.msra.mxu3 %v977_v24 }
  0x4f   : > { %620 = vmatpush.bf16.msra.mxu1 %v985_v25 }
  0x50   : > { %639 = vmatpush.bf16.msra.mxu2 %v993_v26 }
  0x52   : > { %602 = vmatpush.bf16.msra.mxu0 %v976_v27  ;;  %1016 = vmatpush.bf16.msra.mxu3 %v976_v27 }
  0x53   : > { %621 = vmatpush.bf16.msra.mxu1 %v984_v28 }
  0x54   : > { %640 = vmatpush.bf16.msra.mxu2 %v992_v29 }
  0x56   : > { %603 = vmatpush.bf16.msra.mxu0 %v975_v30  ;;  %1017 = vmatpush.bf16.msra.mxu3 %v975_v30 }
  0x57   : > { %622 = vmatpush.bf16.msra.mxu1 %v983_v31 }
  0x58   : > { %641 = vmatpush.bf16.msra.mxu2 %v991_v32 }
  0x59   : > { %604 = vmatmul.bf16.vlgmr.msra.gmra.mxu0 %v846_v41  ;;  %609 = vmatmul.bf16.vlgmr.msra.gmra.mxu3 %v858_v44 }
  0x5a   : > { %623 = vmatmul.bf16.vlgmr.msra.gmra.mxu1 %v850_v42 }
  0x5b   : > { %642 = vmatmul.bf16.vlgmr.msra.gmra.mxu2 %v854_v43 }
  0x6a   : > { %628 = vmatmul.bf16.gmra.mxu1 %v862_v49 }
  0x6b   : > { %647 = vmatmul.bf16.gmra.mxu2 %v866_v50 }
  0xd6   : > { %v605_v52 = vpop.f32.mrf.mxu0 }
  0xd7   : > { %v624_v51 = vpop.f32.mrf.mxu1 }
  0xd8   : > { %v625_v53 = vadd.f32 %v624_v51, %v605_v52 }
  0xdc   : > { %v610_v2 = vpop.f32.mrf.mxu3 }
  0xde   : > { %v643_v55 = vpop.f32.mrf.mxu2  ;;  %v607_v59 = vpop.f32.mrf.mxu0 }
  0xdf   : > { %v644_v56 = vadd.f32 %v643_v55, %v625_v53  ;;  %v626_v57 = vpop.f32.mrf.mxu1 }
  0xe0   : > { %v627_v60 = vadd.f32 %v626_v57, %v607_v59 }
  0xe1   : > { %v653_v58 = vadd.f32 %v644_v56, %v360_v54 }
  0xe3   : > { %657 = vst [vmem:[#allocation2 + $0x10] sm:$0xff] %v653_v58 }
  0xe4   : > { %v612_v9 = vpop.f32.mrf.mxu3 }
  0xe6   : > { %v645_v62 = vpop.f32.mrf.mxu2 }
  0xe7   : > { %v646_v63 = vadd.f32 %v645_v62, %v627_v60  ;;  %v629_v0 = vpop.f32.mrf.mxu1 }
  0xe8   : > { %v630_v3 = vadd.f32 %v629_v0, %v610_v2 }
  0xe9   : > { %v654_v1 = vadd.f32 %v646_v63, %v361_v61 }
  0xeb   : > { %658 = vst [vmem:[#allocation2] sm:$0xff] %v654_v1 }
  0xee   : > { %v648_v5 = vpop.f32.mrf.mxu2 }
  0xef   : > { %v649_v6 = vadd.f32 %v648_v5, %v630_v3  ;;  %v631_v8 = vpop.f32.mrf.mxu1 }
  0xf0   : > { %v632_v10 = vadd.f32 %v631_v8, %v612_v9 }
  0xf1   : > { %v655_v7 = vadd.f32 %v649_v6, %v362_v4 }
  0xf3   : > { %659 = vst [vmem:[#allocation2 + $0x18] sm:$0xff] %v655_v7 }
  0xf6   : > { %v650_v12 = vpop.f32.mrf.mxu2 }
  0xf7   : > { %v651_v13 = vadd.f32 %v650_v12, %v632_v10  ;;  %664 = sbr.rel (%p963_p0) target bundleno = 268 (0x10c), region = 78 }
  0xf9   : > { %v656_v14 = vadd.f32 %v651_v13, %v363_v11 }
  0xfb   : > { %660 = vst [vmem:[#allocation2 + $0x8] sm:$0xff] %v656_v14 }
  0xfc   : > { %v665_v15 = vld [vmem:[#allocation2 + $0x10] sm:$0xff]  ;;  %v666_v16 = vld [vmem:[#allocation2] sm:$0xff]  ;;  %v667_v19 = vld [vmem:[#allocation2 + $0x18] sm:$0xff] }
  0xfd   : > { %v1082_v17 = vld [vmem:[#allocation4] ss:$0 sm:$0xff]  ;;  %v1083_v18 = vld [vmem:[#allocation6] ss:$0 sm:$0xff] }
  0xfe   : > { %v673_v21 = vmul.f32 %v1082_v17, %v665_v15  ;;  %v674_v22 = vmul.f32 %v1082_v17, %v666_v16  ;;  %v675_v23 = vmul.f32 %v1082_v17, %v667_v19 }
 0x100   : > { %v681_v25 = vadd.f32 %v1083_v18, %v673_v21  ;;  %v682_v26 = vadd.f32 %v1083_v18, %v674_v22  ;;  %v683_v27 = vadd.f32 %v1083_v18, %v675_v23 }
 0x102   : > { %v668_v20 = vld [vmem:[#allocation2 + $0x8] sm:$0xff]  ;;  %v685_v29 = vmax.f32 %v681_v25, 0.0  ;;  %v686_v30 = vmax.f32 %v682_v26, 0.0  ;;  %v687_v31 = vmax.f32 %v683_v27, 0.0 }
 0x103   : > { %v676_v24 = vmul.f32 %v1082_v17, %v668_v20 }
 0x104   : > { %v1002_v33 = vpack.c.bf16 %v686_v30, %v685_v29 }
 0x105   : > { %v684_v28 = vadd.f32 %v1083_v18, %v676_v24 }
 0x106   : > { %1003 = vst [vmem:[%s1372_s4] sm:$0xff] %v1002_v33  }
 0x107   : > { %v688_v32 = vmax.f32 %v684_v28, 0.0 }
 0x109   : > { %v1007_v34 = vpack.c.bf16 %v688_v32, %v687_v31 }
 0x10b   : > { %1009 = vst [vmem:[%s1372_s4 + $0x8] sm:$0xff] %v1007_v34  }
 0x10c PF: > { %s16_s19 = sadd.s32 1, %s1190_s19   ;;  %s1376_s15 = smov %s1178_s16 }
 0x10d   : > { %p13_p1 = scmp.ge.s32.totalorder %s16_s19, 5   ;;  %s1377_s16 = smov %s1270_s27 }
 0x10e   : > { %s1378_s17 = smov %s1186_s18  ;;  %s1379_s18 = smov %s1381_s21 }
 0x10f   :  { %15 = sbr.rel (!%p13_p1) target bundleno = 4 (0x4), region = 125 }
 0x114   :  { %725 = vsyncpa [#allocation5], 1 }
 0x115   :  { %727 = vsyncpa [#allocation5 + $0x1], 1 }
 0x116   :  { %728 = vsyncpa [#allocation7], 1 }

// kernel: resnet_forward.26
= control target key start
LH: loop header
LB: loop body
LE: loop exit
PB: predicated region body
PF: predicated region fallthrough
CT: control target
= control target key end

     0   :  { %9 = vsyncpa [#allocation4], 0  ;;  %s395_s0 = inlined_call_operand.vmem [shape: bf16[32,128], index: 0, kind: input, shape index: {}]   ;;  %s396_s1 = inlined_call_operand.vmem [shape: bf16[128,128], index: 1, kind: input, shape index: {}]   ;;  %s397_s2 = inlined_call_operand.hbm [shape: f32[1,128], index: 2, kind: input, shape index: {}]   ;;  %s398_s3 = inlined_call_operand.hbm [shape: f32[1,128], index: 3, kind: input, shape index: {}]   ;;  %s399_s4 = inlined_call_operand.vmem [shape: bf16[32,128], index: 4, kind: output, shape index: {}]  }
   0x1   :  { %s20_s17 = sshll.u32 %s397_s2, 4  ;;  %s21_s17 = int_to_ptr.hbm [resolvable:$true] %s20_s17 }
   0x2   :  { %10 = vsyncpa [#allocation6], 0  ;;  %s326_s18 = smov [#allocation3]   ;;  %s31_s22 = sshll.u32 %s398_s3, 4  ;;  %s32_s22 = int_to_ptr.hbm [resolvable:$true] %s31_s22 }
   0x3   :  { %s22_s19 = sshll.u32 %s326_s18, 4  ;;  %s327_s23 = smov [#allocation5]   ;;  %s23_s19 = int_to_ptr.vmem [resolvable:$true] %s22_s19 }
   0x4   :  { %25 = dma.hbm_to_vmem [thread:$0]  %s21_s17, 16, %s23_s19, [#allocation4]  }
   0x5   :  { %s33_s24 = sshll.u32 %s327_s23, 4  ;;  %s34_s24 = int_to_ptr.vmem [resolvable:$true] %s33_s24 }
   0x6   :  { %36 = dma.hbm_to_vmem [thread:$0]  %s32_s22, 16, %s34_s24, [#allocation6]  }
   0x7   :  { %322 = dma.done.wait [#allocation4], 16  }
   0x8   :  { %323 = vsyncadd [#allocation4], 4294967280 }
   0x9   :  { %324 = dma.done.wait [#allocation6], 16  }
   0xa   :  { %325 = vsyncadd [#allocation6], 4294967280  ;;  %v250_v0 = vld [vmem:[%s396_s1 + $0x38] sm:$0xff]  ;;  %v249_v1 = vld [vmem:[%s396_s1 + $0x30] sm:$0xff] }
   0xb   :  { %137 = vmatpush.bf16.msra.mxu0 %v250_v0  ;;  %262 = vmatpush.bf16.msra.mxu1 %v250_v0  ;;  %v248_v2 = vld [vmem:[%s396_s1 + $0x28] sm:$0xff]  ;;  %v247_v3 = vld [vmem:[%s396_s1 + $0x20] sm:$0xff]  ;;  %v246_v4 = vld [vmem:[%s396_s1 + $0x18] sm:$0xff] }
   0xc   :  { %v245_v5 = vld [vmem:[%s396_s1 + $0x10] sm:$0xff]  ;;  %v244_v6 = vld [vmem:[%s396_s1 + $0x8] sm:$0xff]  ;;  %v243_v7 = vld [vmem:[%s396_s1] sm:$0xff] }
   0xd   :  { %v241_v8 = vld [vmem:[%s395_s0] sm:$0xff]  ;;  %v242_v9 = vld [vmem:[%s395_s0 + $0x8] sm:$0xff] }
   0xe   :  { %v272_v12 = vld [vmem:[#allocation3] ss:$0 sm:$0xff]  ;;  %v273_v14 = vld [vmem:[#allocation5] ss:$0 sm:$0xff] }
   0xf   :  { %138 = vmatpush.bf16.msra.mxu0 %v249_v1  ;;  %263 = vmatpush.bf16.msra.mxu1 %v249_v1 }
  0x13   :  { %139 = vmatpush.bf16.msra.mxu0 %v248_v2  ;;  %264 = vmatpush.bf16.msra.mxu1 %v248_v2 }
  0x17   :  { %140 = vmatpush.bf16.msra.mxu0 %v247_v3  ;;  %265 = vmatpush.bf16.msra.mxu1 %v247_v3 }
  0x1b   :  { %141 = vmatpush.bf16.msra.mxu0 %v246_v4  ;;  %266 = vmatpush.bf16.msra.mxu1 %v246_v4 }
  0x1f   :  { %142 = vmatpush.bf16.msra.mxu0 %v245_v5  ;;  %267 = vmatpush.bf16.msra.mxu1 %v245_v5 }
  0x23   :  { %143 = vmatpush.bf16.msra.mxu0 %v244_v6  ;;  %268 = vmatpush.bf16.msra.mxu1 %v244_v6 }
  0x27   :  { %144 = vmatpush.bf16.msra.mxu0 %v243_v7  ;;  %269 = vmatpush.bf16.msra.mxu1 %v243_v7 }
  0x2a   :  { %145 = vmatmul.bf16.vlgmr.msra.gmra.mxu0 %v241_v8  ;;  %150 = vmatmul.bf16.vlgmr.msra.gmra.mxu1 %v242_v9 }
  0xa7   :  { %v146_v10 = vpop.f32.mrf.mxu0  ;;  %v151_v11 = vpop.f32.mrf.mxu1 }
  0xa8   :  { %v175_v13 = vmul.f32 %v272_v12, %v146_v10  ;;  %v177_v15 = vmul.f32 %v272_v12, %v151_v11 }
  0xaa   :  { %v183_v20 = vadd.f32 %v273_v14, %v175_v13  ;;  %v185_v21 = vadd.f32 %v273_v14, %v177_v15 }
  0xaf   :  { %v148_v16 = vpop.f32.mrf.mxu0  ;;  %v153_v17 = vpop.f32.mrf.mxu1 }
  0xb0   :  { %v176_v18 = vmul.f32 %v272_v12, %v148_v16  ;;  %v178_v19 = vmul.f32 %v272_v12, %v153_v17 }
  0xb2   :  { %v184_v22 = vadd.f32 %v273_v14, %v176_v18  ;;  %v186_v23 = vadd.f32 %v273_v14, %v178_v19 }
  0xb4   :  { %v254_v24 = vpack.c.bf16 %v184_v22, %v183_v20  ;;  %v259_v25 = vpack.c.bf16 %v186_v23, %v185_v21 }
  0xb6   :  { %255 = vst [vmem:[%s399_s4] sm:$0xff] %v254_v24  }
  0xb7   :  { %261 = vst [vmem:[%s399_s4 + $0x8] sm:$0xff] %v259_v25  }
  0xb8   :  { %199 = vsyncpa [#allocation4], 1 }
  0xb9   :  { %200 = vsyncpa [#allocation6], 1 }

// kernel: resnet_forward.28
= control target key start
LH: loop header
LB: loop body
LE: loop exit
PB: predicated region body
PF: predicated region fallthrough
CT: control target
= control target key end

     0   :  { %10 = vsyncpa [#allocation5], 0  ;;  %s1479_s0 = inlined_call_operand.vmem [shape: bf16[32,1152], index: 0, kind: input, shape index: {}]   ;;  %s1480_s1 = inlined_call_operand.vmem [shape: bf16[1152,128], index: 1, kind: input, shape index: {}]   ;;  %s1481_s2 = inlined_call_operand.hbm [shape: f32[1,128], index: 2, kind: input, shape index: {}]   ;;  %s1482_s3 = inlined_call_operand.hbm [shape: f32[1,128], index: 3, kind: input, shape index: {}]   ;;  %s1483_s4 = inlined_call_operand.vmem [shape: bf16[32,128], index: 4, kind: input, shape index: {}]   ;;  %s1484_s5 = inlined_call_operand.vmem [shape: bf16[32,128], index: 5, kind: output, shape index: {}]  }
   0x1   :  { %11 = vsyncpa [#allocation7], 0  ;;  %s1325_s18 = smov 0   ;;  %s1327_s19 = smov 0  }
   0x2   :  { %s1329_s20 = smov 0   ;;  %s1331_s21 = smov 0  }
   0x3   :  { %s1333_s22 = smov 0  }
   0x4 LB: > { %s914_s23 = sadd.s32 4294967295, %s1290_s22   ;;  %s29_s24 = sadd.s32 1, %s1286_s21  ;;  %s1290_s22 = sphi %s1333_s22, %s17_s22   ;;  %s1286_s21 = sphi %s1331_s21, %s1491_s21   ;;  %s1282_s20 = sphi %s1329_s20, %s1490_s20   ;;  %s1278_s19 = sphi %s1327_s19, %s1489_s19   ;;  %s1274_s18 = sphi %s1325_s18, %s1488_s18  }
   0x5   : > { %p30_p0 = scmp.ge.s32.totalorder %s29_s24, 3  ;;  %s45_s25 = sadd.s32 1, %s1278_s19 }
   0x6   : > { %p52_p1 = scmp.ne.s32.totalorder %s1278_s19, %s1274_s18  ;;  %p53_p2 = scmp.eq.s32.totalorder %s1290_s22, 0 }
   0x7   : > { %s1493_s24 = smov (%p30_p0, %s29_s24), 0  ;;  %p915_p4 = scmp.ge.s32.totalorder %s1290_s22, 1 }
   0x8   : > { %p1358_p3 = por %p53_p2, %p52_p1  ;;  %s41_s27 = ssub.s32 %s1286_s21, %s1493_s24 }
   0x9   : > { %p205_p5 = scmp.lt.s32.totalorder %s1290_s22, 4  ;;  %p43_p6 = scmp.eq.s32.totalorder %s41_s27, 0 }
   0xa   : > { %p1370_p8 = scmp.eq.s32.totalorder %s914_s23, 0  ;;  %s218_s8 = sshll.u32 %s1481_s2, 4  ;;  %s219_s8 = int_to_ptr.hbm [resolvable:$true] %s218_s8 }
   0xb   : > { %p1366_p7 = pnand %p915_p4, %p205_p5  ;;  %s1292_s9 = smov [#allocation4]  }
   0xc   : > { %s1375_s30 = scalar_select %p43_p6, %s1278_s19, %s45_s25  }
   0xd   : > { %p1128_p9 = pneg %p1366_p7  ;;  %s220_s10 = sshll.u32 %s1292_s9, 4  ;;  %s221_s10 = int_to_ptr.vmem [resolvable:$true] %s220_s10 }
   0xe   : > { %s231_s13 = sshll.u32 %s1482_s3, 4  ;;  %s1293_s14 = smov [#allocation6]   ;;  %s232_s13 = int_to_ptr.hbm [resolvable:$true] %s231_s13 }
   0xf   : > { %p1129_p10 = pnand %p1370_p8, %p1128_p9  ;;  %s233_s15 = sshll.u32 %s1293_s14, 4  ;;  %s234_s15 = int_to_ptr.vmem [resolvable:$true] %s233_s15 }
  0x10   : > { %p919_p11 = scmp.ge.s32.totalorder %s1290_s22, 3 }
  0x11   : > { %1131 = dma.hbm_to_vmem [thread:$0]  (!%p1129_p10), %s219_s8, 16, %s221_s10, [#allocation5]  }
  0x12   : > { %1134 = dma.hbm_to_vmem [thread:$0]  (!%p1129_p10), %s232_s13, 16, %s234_s15, [#allocation7]  }
  0x13   : > { %252 = sbr.rel (%p919_p11) target bundleno = 37 (0x25), region = 28 }
  0x18   : > { %255 = sbr.rel (!%p1358_p3) target bundleno = 37 (0x25), region = 32  ;;  %s257_s16 = sand.u32 (%p1358_p3), 1, %s1278_s19  }
  0x19   : > { %s1059_s17 = smul.u32 (%p1358_p3), 12, %s1286_s21 }
  0x1a   : > { %s1118_s23 = smul.u32 (%p1358_p3), 48, %s257_s16 }
  0x1b   : > { %s265_s6 = scalar_lea.vmem (%p1358_p3), %s1479_s0, %s1059_s17 }
  0x1c   : > { %v280_v0 = vld [vmem:[%s265_s6] sm:$0xff] (%p1358_p3)  ;;  %v284_v2 = vld [vmem:[%s265_s6 + $0x48] sm:$0xff] (%p1358_p3)  ;;  %s259_s7 = scalar_lea.vmem (%p1358_p3), [#allocation3], %s1118_s23  ;;  %v925_v6 = vld [vmem:[%s265_s6 + $0x50] sm:$0xf] (%p1358_p3) }
  0x1d   : > { %v282_v1 = vld [vmem:[%s265_s6 + $0x24] sm:$0xff]  ;;  %281 = vst [vmem:[%s259_s7] sm:$0xff] %v280_v0  ;;  %v286_v3 = vld [vmem:[%s265_s6 + $0x6c] sm:$0xff]  ;;  %v927_v7 = vld [vmem:[%s265_s6 + $0x74] sm:$0xf] }
  0x1e   : > { %283 = vst [vmem:[%s259_s7 + $0xc] sm:$0xff] %v282_v1  ;;  %v921_v4 = vld [vmem:[%s265_s6 + $0x8] sm:$0xf]  ;;  %v923_v5 = vld [vmem:[%s265_s6 + $0x2c] sm:$0xf] }
  0x1f   : > { %285 = vst [vmem:[%s259_s7 + $0x18] sm:$0xff] %v284_v2 }
  0x20   : > { %287 = vst [vmem:[%s259_s7 + $0x24] sm:$0xff] %v286_v3 }
  0x21   : > { %922 = vst [vmem:[%s259_s7 + $0x8] sm:$0xf] %v921_v4 }
  0x22   : > { %924 = vst [vmem:[%s259_s7 + $0x14] sm:$0xf] %v923_v5 }
  0x23   : > { %926 = vst [vmem:[%s259_s7 + $0x20] sm:$0xf] %v925_v6 }
  0x24   : > { %928 = vst [vmem:[%s259_s7 + $0x2c] sm:$0xf] %v927_v7 }
  0x25 PF: > { %324 = sbr.rel (%p1366_p7) target bundleno = 270 (0x10e), region = 62  ;;  %s327_s26 = sand.u32 (!%p1366_p7), 1, %s1274_s18  }
  0x26   : > { %s1119_s8 = smul.u32 (!%p1366_p7), 48, %s327_s26 }
  0x28   : > { %s1398_s9 = scalar_lea.vmem (!%p1366_p7), [#allocation3], %s1119_s8 }
  0x2a   : > { %1265 = dma.done.wait (%p1370_p8), [#allocation5], 16  }
  0x2b   : > { %1267 = vsyncadd (%p1370_p8), [#allocation5], 4294967280 }
  0x2c   : > { %1269 = dma.done.wait (%p1370_p8), [#allocation7], 16  }
  0x2d   : > { %1271 = vsyncadd (%p1370_p8), [#allocation7], 4294967280  ;;  %s385_s28 = smul.u32 48, %s1282_s20  ;;  %p933_p13 = scmp.ne.s32.totalorder %s1282_s20, 0 }
  0x2f   : > { %p386_p12 = scmp.lt.s32.totalorder %s385_s28, 143  ;;  %415 = sbr.rel (%p933_p13) target bundleno = 57 (0x39), region = 78 }
  0x31   : > { %s1495_s28 = smov (!%p386_p12, %s385_s28), 143 }
  0x32   : > { %s932_s10 = sshll.u32 %s1495_s28, 2 }
  0x33   : > { %s1412_s12 = scalar_lea.vmem %s1480_s1, %s932_s10 }
  0x34   : > { %v1294_v8 = vmov 0.0  }
  0x35   : > { %416 = vst [vmem:[#allocation2 + $0x10] sm:$0xff] %v1294_v8 }
  0x36   : > { %417 = vst [vmem:[#allocation2] sm:$0xff] %v1294_v8 }
  0x37   : > { %418 = vst [vmem:[#allocation2 + $0x18] sm:$0xff] %v1294_v8 }
  0x38   : > { %419 = vst [vmem:[#allocation2 + $0x8] sm:$0xff] %v1294_v8 }
  0x39 PF: > { %v1073_v9 = vld [vmem:[%s1412_s12 + $0x38] sm:$0xff]  ;;  %v1072_v12 = vld [vmem:[%s1412_s12 + $0x30] sm:$0xff]  ;;  %v1071_v15 = vld [vmem:[%s1412_s12 + $0x28] sm:$0xff]  ;;  %p1054_p0 = scmp.ne.s32.totalorder %s1282_s20, 2 }
  0x3a   : > { %v1081_v10 = vld [vmem:[%s1412_s12 + $0x78] sm:$0xff]  ;;  %656 = vmatpush.bf16.msra.mxu0 %v1073_v9  ;;  %v1080_v13 = vld [vmem:[%s1412_s12 + $0x70] sm:$0xff]  ;;  %1110 = vmatpush.bf16.msra.mxu3 %v1073_v9  ;;  %v1079_v16 = vld [vmem:[%s1412_s12 + $0x68] sm:$0xff] }
  0x3b   : > { %v1089_v11 = vld [vmem:[%s1412_s12 + $0xb8] sm:$0xff]  ;;  %675 = vmatpush.bf16.msra.mxu1 %v1081_v10  ;;  %v1088_v14 = vld [vmem:[%s1412_s12 + $0xb0] sm:$0xff]  ;;  %v1087_v17 = vld [vmem:[%s1412_s12 + $0xa8] sm:$0xff] }
  0x3c   : > { %694 = vmatpush.bf16.msra.mxu2 %v1089_v11  ;;  %v1070_v18 = vld [vmem:[%s1412_s12 + $0x20] sm:$0xff]  ;;  %v1069_v21 = vld [vmem:[%s1412_s12 + $0x18] sm:$0xff]  ;;  %v1068_v24 = vld [vmem:[%s1412_s12 + $0x10] sm:$0xff] }
  0x3d   : > { %v1078_v19 = vld [vmem:[%s1412_s12 + $0x60] sm:$0xff]  ;;  %v1077_v22 = vld [vmem:[%s1412_s12 + $0x58] sm:$0xff]  ;;  %v1076_v25 = vld [vmem:[%s1412_s12 + $0x50] sm:$0xff] }
  0x3e   : > { %657 = vmatpush.bf16.msra.mxu0 %v1072_v12  ;;  %1111 = vmatpush.bf16.msra.mxu3 %v1072_v12  ;;  %v1086_v20 = vld [vmem:[%s1412_s12 + $0xa0] sm:$0xff]  ;;  %v1085_v23 = vld [vmem:[%s1412_s12 + $0x98] sm:$0xff]  ;;  %v1084_v26 = vld [vmem:[%s1412_s12 + $0x90] sm:$0xff] }
  0x3f   : > { %676 = vmatpush.bf16.msra.mxu1 %v1080_v13  ;;  %v1067_v27 = vld [vmem:[%s1412_s12 + $0x8] sm:$0xff]  ;;  %v1066_v30 = vld [vmem:[%s1412_s12] sm:$0xff]  ;;  %v420_v54 = vld [vmem:[#allocation2 + $0x10] sm:$0xff] }
  0x40   : > { %695 = vmatpush.bf16.msra.mxu2 %v1088_v14  ;;  %v1075_v28 = vld [vmem:[%s1412_s12 + $0x48] sm:$0xff]  ;;  %v1074_v31 = vld [vmem:[%s1412_s12 + $0x40] sm:$0xff]  ;;  %v422_v4 = vld [vmem:[#allocation2 + $0x18] sm:$0xff] }
  0x41   : > { %v1083_v29 = vld [vmem:[%s1412_s12 + $0x88] sm:$0xff]  ;;  %v1082_v32 = vld [vmem:[%s1412_s12 + $0x80] sm:$0xff] }
  0x42   : > { %658 = vmatpush.bf16.msra.mxu0 %v1071_v15  ;;  %1112 = vmatpush.bf16.msra.mxu3 %v1071_v15  ;;  %v936_v33 = vld [vmem:[%s1398_s9] sm:$0xf]  ;;  %v1061_v34 = vld [vmem:[%s1398_s9 + $0x8] sm:$0xf0]  ;;  %v1060_v35 = vld [vmem:[%s1398_s9 + $0x4] sm:$0xf] }
  0x43   : > { %677 = vmatpush.bf16.msra.mxu1 %v1079_v16  ;;  %v938_v36 = vld [vmem:[%s1398_s9 + $0xc] sm:$0xf0]  ;;  %v944_v37 = vld [vmem:[%s1398_s9 + $0x8] sm:$0xf]  ;;  %v1062_v38 = vld [vmem:[%s1398_s9 + $0x10] sm:$0xf0]  ;;  %v937_v41 = vor.u32 %v1061_v34, %v936_v33 }
  0x44   : > { %696 = vmatpush.bf16.msra.mxu2 %v1087_v17  ;;  %v948_v39 = vld [vmem:[%s1398_s9 + $0x18] sm:$0xf]  ;;  %v1064_v40 = vld [vmem:[%s1398_s9 + $0x20] sm:$0xf0]  ;;  %v941_v42 = vor.u32 %v1060_v35, %v938_v36  ;;  %v945_v43 = vor.u32 %v1062_v38, %v944_v37  ;;  %v1063_v45 = vld [vmem:[%s1398_s9 + $0x1c] sm:$0xf] }
  0x45   : > { %v949_v44 = vor.u32 %v1064_v40, %v948_v39  ;;  %v950_v46 = vld [vmem:[%s1398_s9 + $0x24] sm:$0xf0]  ;;  %v956_v47 = vld [vmem:[%s1398_s9 + $0x20] sm:$0xf]  ;;  %v1065_v48 = vld [vmem:[%s1398_s9 + $0x28] sm:$0xf0] }
  0x46   : > { %659 = vmatpush.bf16.msra.mxu0 %v1070_v18  ;;  %1113 = vmatpush.bf16.msra.mxu3 %v1070_v18  ;;  %v953_v49 = vor.u32 %v1063_v45, %v950_v46  ;;  %v957_v50 = vor.u32 %v1065_v48, %v956_v47  ;;  %v421_v61 = vld [vmem:[#allocation2] sm:$0xff]  ;;  %v423_v11 = vld [vmem:[#allocation2 + $0x8] sm:$0xff] }
  0x47   : > { %678 = vmatpush.bf16.msra.mxu1 %v1078_v19 }
  0x48   : > { %697 = vmatpush.bf16.msra.mxu2 %v1086_v20 }
  0x4a   : > { %660 = vmatpush.bf16.msra.mxu0 %v1069_v21  ;;  %1114 = vmatpush.bf16.msra.mxu3 %v1069_v21 }
  0x4b   : > { %679 = vmatpush.bf16.msra.mxu1 %v1077_v22 }
  0x4c   : > { %698 = vmatpush.bf16.msra.mxu2 %v1085_v23 }
  0x4e   : > { %661 = vmatpush.bf16.msra.mxu0 %v1068_v24  ;;  %1115 = vmatpush.bf16.msra.mxu3 %v1068_v24 }
  0x4f   : > { %680 = vmatpush.bf16.msra.mxu1 %v1076_v25 }
  0x50   : > { %699 = vmatpush.bf16.msra.mxu2 %v1084_v26 }
  0x52   : > { %662 = vmatpush.bf16.msra.mxu0 %v1067_v27  ;;  %1116 = vmatpush.bf16.msra.mxu3 %v1067_v27 }
  0x53   : > { %681 = vmatpush.bf16.msra.mxu1 %v1075_v28 }
  0x54   : > { %700 = vmatpush.bf16.msra.mxu2 %v1083_v29 }
  0x56   : > { %663 = vmatpush.bf16.msra.mxu0 %v1066_v30  ;;  %1117 = vmatpush.bf16.msra.mxu3 %v1066_v30 }
  0x57   : > { %682 = vmatpush.bf16.msra.mxu1 %v1074_v31 }
  0x58   : > { %701 = vmatpush.bf16.msra.mxu2 %v1082_v32 }
  0x59   : > { %664 = vmatmul.bf16.vlgmr.msra.gmra.mxu0 %v937_v41  ;;  %669 = vmatmul.bf16.vlgmr.msra.gmra.mxu3 %v949_v44 }
  0x5a   : > { %683 = vmatmul.bf16.vlgmr.msra.gmra.mxu1 %v941_v42 }
  0x5b   : > { %702 = vmatmul.bf16.vlgmr.msra.gmra.mxu2 %v945_v43 }
  0x6a   : > { %688 = vmatmul.bf16.gmra.mxu1 %v953_v49 }
  0x6b   : > { %707 = vmatmul.bf16.gmra.mxu2 %v957_v50 }
  0xd6   : > { %v665_v52 = vpop.f32.mrf.mxu0 }
  0xd7   : > { %v684_v51 = vpop.f32.mrf.mxu1 }
  0xd8   : > { %v685_v53 = vadd.f32 %v684_v51, %v665_v52 }
  0xdc   : > { %v670_v2 = vpop.f32.mrf.mxu3 }
  0xde   : > { %v703_v55 = vpop.f32.mrf.mxu2  ;;  %v667_v59 = vpop.f32.mrf.mxu0 }
  0xdf   : > { %v704_v56 = vadd.f32 %v703_v55, %v685_v53  ;;  %v686_v57 = vpop.f32.mrf.mxu1 }
  0xe0   : > { %v687_v60 = vadd.f32 %v686_v57, %v667_v59 }
  0xe1   : > { %v713_v58 = vadd.f32 %v704_v56, %v420_v54 }
  0xe3   : > { %717 = vst [vmem:[#allocation2 + $0x10] sm:$0xff] %v713_v58 }
  0xe4   : > { %v672_v9 = vpop.f32.mrf.mxu3 }
  0xe6   : > { %v705_v62 = vpop.f32.mrf.mxu2 }
  0xe7   : > { %v706_v63 = vadd.f32 %v705_v62, %v687_v60  ;;  %v689_v0 = vpop.f32.mrf.mxu1 }
  0xe8   : > { %v690_v3 = vadd.f32 %v689_v0, %v670_v2 }
  0xe9   : > { %v714_v1 = vadd.f32 %v706_v63, %v421_v61 }
  0xeb   : > { %718 = vst [vmem:[#allocation2] sm:$0xff] %v714_v1 }
  0xee   : > { %v708_v5 = vpop.f32.mrf.mxu2 }
  0xef   : > { %v709_v6 = vadd.f32 %v708_v5, %v690_v3  ;;  %v691_v8 = vpop.f32.mrf.mxu1 }
  0xf0   : > { %v692_v10 = vadd.f32 %v691_v8, %v672_v9 }
  0xf1   : > { %v715_v7 = vadd.f32 %v709_v6, %v422_v4 }
  0xf3   : > { %719 = vst [vmem:[#allocation2 + $0x18] sm:$0xff] %v715_v7 }
  0xf6   : > { %v710_v12 = vpop.f32.mrf.mxu2 }
  0xf7   : > { %v711_v13 = vadd.f32 %v710_v12, %v692_v10  ;;  %724 = sbr.rel (%p1054_p0) target bundleno = 270 (0x10e), region = 82 }
  0xf9   : > { %v716_v14 = vadd.f32 %v711_v13, %v423_v11 }
  0xfb   : > { %720 = vst [vmem:[#allocation2 + $0x8] sm:$0xff] %v716_v14 }
  0xfc   : > { %v725_v15 = vld [vmem:[#allocation2 + $0x10] sm:$0xff]  ;;  %v726_v16 = vld [vmem:[#allocation2] sm:$0xff]  ;;  %v727_v20 = vld [vmem:[#allocation2 + $0x18] sm:$0xff] }
  0xfd   : > { %v1182_v17 = vld [vmem:[#allocation4] ss:$0 sm:$0xff]  ;;  %v1183_v18 = vld [vmem:[#allocation6] ss:$0 sm:$0xff]  ;;  %v1108_v26 = vld [vmem:[%s1483_s4 + $0x8] sm:$0xff]  }
  0xfe   : > { %v1091_v19 = vld [vmem:[%s1483_s4] sm:$0xff]   ;;  %v733_v22 = vmul.f32 %v1182_v17, %v725_v15  ;;  %v734_v23 = vmul.f32 %v1182_v17, %v726_v16  ;;  %v735_v27 = vmul.f32 %v1182_v17, %v727_v20  ;;  %v1096_v29 = vunpack.c.l.bf16 %v1108_v26 }
  0xff   : > { %v1092_v24 = vunpack.c.l.bf16 %v1091_v19  ;;  %v1093_v25 = vunpack.c.h.bf16 %v1091_v19  ;;  %v1097_v30 = vunpack.c.h.bf16 %v1108_v26 }
 0x100   : > { %v741_v31 = vadd.f32 %v1183_v18, %v733_v22  ;;  %v742_v32 = vadd.f32 %v1183_v18, %v734_v23  ;;  %v743_v33 = vadd.f32 %v1183_v18, %v735_v27 }
 0x102   : > { %v728_v21 = vld [vmem:[#allocation2 + $0x8] sm:$0xff]  ;;  %v753_v35 = vadd.f32 %v1092_v24, %v741_v31  ;;  %v754_v36 = vadd.f32 %v1093_v25, %v742_v32  ;;  %v755_v37 = vadd.f32 %v1096_v29, %v743_v33 }
 0x103   : > { %v736_v28 = vmul.f32 %v1182_v17, %v728_v21 }
 0x104   : > { %v757_v39 = vmax.f32 %v753_v35, 0.0  ;;  %v758_v40 = vmax.f32 %v754_v36, 0.0  ;;  %v759_v41 = vmax.f32 %v755_v37, 0.0 }
 0x105   : > { %v744_v34 = vadd.f32 %v1183_v18, %v736_v28 }
 0x106   : > { %v1101_v43 = vpack.c.bf16 %v758_v40, %v757_v39 }
 0x107   : > { %v756_v38 = vadd.f32 %v1097_v30, %v744_v34 }
 0x108   : > { %1102 = vst [vmem:[%s1484_s5] sm:$0xff] %v1101_v43  }
 0x109   : > { %v760_v42 = vmax.f32 %v756_v38, 0.0 }
 0x10b   : > { %v1106_v44 = vpack.c.bf16 %v760_v42, %v759_v41 }
 0x10d   : > { %1109 = vst [vmem:[%s1484_s5 + $0x8] sm:$0xff] %v1106_v44  }
 0x10e PF: > { %s17_s22 = sadd.s32 1, %s1290_s22   ;;  %s1488_s18 = smov %s1278_s19 }
 0x10f   : > { %p14_p1 = scmp.ge.s32.totalorder %s17_s22, 5   ;;  %s1489_s19 = smov %s1375_s30 }
 0x110   : > { %s1490_s20 = smov %s1286_s21  ;;  %s1491_s21 = smov %s1493_s24 }
 0x111   :  { %16 = sbr.rel (!%p14_p1) target bundleno = 4 (0x4), region = 132 }
 0x116   :  { %797 = vsyncpa [#allocation5], 1 }
 0x117   :  { %799 = vsyncpa [#allocation5 + $0x1], 1 }
 0x118   :  { %800 = vsyncpa [#allocation7], 1 }

// kernel: resnet_forward.32
= control target key start
LH: loop header
LB: loop body
LE: loop exit
PB: predicated region body
PF: predicated region fallthrough
CT: control target
= control target key end

     0   :  { %9 = vsyncpa [#allocation4], 0  ;;  %s1480_s0 = inlined_call_operand.vmem [shape: bf16[8,1152], index: 0, kind: input, shape index: {}]   ;;  %s1481_s1 = inlined_call_operand.vmem [shape: bf16[1152,256], index: 1, kind: input, shape index: {}]   ;;  %s1482_s2 = inlined_call_operand.hbm [shape: f32[1,256], index: 2, kind: input, shape index: {}]   ;;  %s1483_s3 = inlined_call_operand.hbm [shape: f32[1,256], index: 3, kind: input, shape index: {}]   ;;  %s1484_s4 = inlined_call_operand.vmem [shape: bf16[8,256], index: 4, kind: output, shape index: {}]  }
   0x1   :  { %10 = vsyncpa [#allocation6], 0  ;;  %s1303_s15 = smov 0   ;;  %s1305_s16 = smov 0  }
   0x2   :  { %s1307_s17 = smov 0  }
   0x3 LB: > { %s879_s18 = sadd.s32 4294967295, %s1273_s17   ;;  %s28_s19 = sadd.s32 1, %s1269_s16  ;;  %s1273_s17 = sphi %s1307_s17, %s16_s17   ;;  %s1269_s16 = sphi %s1305_s16, %s1488_s16   ;;  %s1265_s15 = sphi %s1303_s15, %s1487_s15  }
   0x4   : > { %p29_p0 = scmp.ge.s32.totalorder %s28_s19, 3  ;;  %p880_p1 = scmp.ge.s32.totalorder %s1273_s17, 1 }
   0x5   : > { %p176_p2 = scmp.lt.s32.totalorder %s1273_s17, 4  ;;  %p1328_p4 = scmp.eq.s32.totalorder %s879_s18, 0 }
   0x6   : > { %s1490_s19 = smov (%p29_p0, %s28_s19), 0  ;;  %s190_s24 = sshll.u32 %s1482_s2, 4  ;;  %s191_s24 = int_to_ptr.hbm [resolvable:$true] %s190_s24 }
   0x7   : > { %p1324_p3 = pnand %p880_p1, %p176_p2  ;;  %s1275_s25 = smov [#allocation3]  }
   0x8   : > { %s192_s26 = sshll.u32 %s1275_s25, 4  ;;  %s204_s29 = sshll.u32 %s1483_s3, 4  ;;  %s193_s26 = int_to_ptr.vmem [resolvable:$true] %s192_s26  ;;  %s205_s29 = int_to_ptr.hbm [resolvable:$true] %s204_s29 }
   0x9   : > { %p1145_p5 = pneg %p1324_p3  ;;  %s1276_s30 = smov [#allocation5]  }
   0xa   : > { %s206_s5 = sshll.u32 %s1276_s30, 4  ;;  %247 = sbr.rel (%p1324_p3) target bundleno = 244 (0xf4), region = 36  ;;  %s207_s5 = int_to_ptr.vmem [resolvable:$true] %s206_s5 }
   0xb   : > { %p1146_p6 = pnand %p1328_p4, %p1145_p5 }
   0xd   : > { %1148 = dma.hbm_to_vmem [thread:$0]  (!%p1146_p6), %s191_s24, 32, %s193_s26, [#allocation4]  }
   0xe   : > { %1151 = dma.hbm_to_vmem [thread:$0]  (!%p1146_p6), %s205_s29, 32, %s207_s5, [#allocation6]  }
   0xf   : > { %1256 = dma.done.wait (%p1328_p4), [#allocation4], 32  }
  0x10   : > { %1258 = vsyncadd (%p1328_p4), [#allocation4], 4294967264 }
  0x11   : > { %1260 = dma.done.wait (%p1328_p4), [#allocation6], 32  }
  0x12   : > { %1262 = vsyncadd (%p1328_p4), [#allocation6], 4294967264  ;;  %s297_s6 = smul.u32 3, %s1265_s15  ;;  %p890_p9 = scmp.ne.s32.totalorder %s1265_s15, 0 }
  0x13   : > { %s307_s7 = smul.u32 48, %s1265_s15 }
  0x14   : > { %p300_p7 = scmp.lt.s32.totalorder %s297_s6, 8 }
  0x15   : > { %p309_p8 = scmp.lt.s32.totalorder %s307_s7, 143  ;;  %334 = sbr.rel (%p890_p9) target bundleno = 29 (0x1d), region = 48 }
  0x16   : > { %s1492_s6 = smov (!%p300_p7, %s297_s6), 8 }
  0x17   : > { %s1494_s7 = smov (!%p309_p8, %s307_s7), 143  ;;  %s887_s8 = sshll.u32 %s1492_s6, 2 }
  0x18   : > { %s1357_s11 = scalar_lea.vmem %s1480_s0, %s887_s8  ;;  %s1088_s12 = sshll.u32 %s1494_s7, 3 }
  0x19   : > { %s1362_s18 = scalar_lea.vmem %s1481_s1, %s1088_s12 }
  0x1a   : > { %v1277_v0 = vmov 0.0  }
  0x1b   : > { %335 = vst [vmem:[#allocation2] sm:$0xff] %v1277_v0 }
  0x1c   : > { %336 = vst [vmem:[#allocation2 + $0x8] sm:$0xff] %v1277_v0 }
  0x1d PF: > { %v949_v1 = vld [vmem:[%s1362_s18 + $0x70] sm:$0xf]  ;;  %v1104_v2 = vld [vmem:[%s1362_s18 + $0x74] sm:$0xf0]  ;;  %v941_v6 = vld [vmem:[%s1362_s18 + $0x60] sm:$0xf] }
  0x1e   : > { %v1013_v3 = vld [vmem:[%s1362_s18 + $0xf0] sm:$0xf]  ;;  %v950_v4 = vor.u32 %v1104_v2, %v949_v1  ;;  %v1120_v5 = vld [vmem:[%s1362_s18 + $0xf4] sm:$0xf0]  ;;  %v1102_v7 = vld [vmem:[%s1362_s18 + $0x64] sm:$0xf0] }
  0x1f   : > { %v1014_v8 = vor.u32 %v1120_v5, %v1013_v3  ;;  %v1005_v9 = vld [vmem:[%s1362_s18 + $0xe0] sm:$0xf]  ;;  %v1118_v10 = vld [vmem:[%s1362_s18 + $0xe4] sm:$0xf0]  ;;  %v942_v11 = vor.u32 %v1102_v7, %v941_v6  ;;  %v933_v12 = vld [vmem:[%s1362_s18 + $0x50] sm:$0xf] }
  0x20   : > { %640 = vmatpush.bf16.msra.mxu0 %v950_v4  ;;  %v1006_v13 = vor.u32 %v1118_v10, %v1005_v9  ;;  %v1100_v14 = vld [vmem:[%s1362_s18 + $0x54] sm:$0xf0]  ;;  %v1077_v15 = vld [vmem:[%s1362_s18 + $0x170] sm:$0xf]  ;;  %v1069_v20 = vld [vmem:[%s1362_s18 + $0x160] sm:$0xf] }
  0x21   : > { %653 = vmatpush.bf16.msra.mxu1 %v1014_v8  ;;  %v1136_v16 = vld [vmem:[%s1362_s18 + $0x174] sm:$0xf0]  ;;  %v997_v17 = vld [vmem:[%s1362_s18 + $0xd0] sm:$0xf]  ;;  %v1134_v21 = vld [vmem:[%s1362_s18 + $0x164] sm:$0xf0]  ;;  %v934_v23 = vor.u32 %v1100_v14, %v933_v12 }
  0x22   : > { %v1116_v18 = vld [vmem:[%s1362_s18 + $0xd4] sm:$0xf0]  ;;  %v1078_v19 = vor.u32 %v1136_v16, %v1077_v15  ;;  %v1103_v22 = vld [vmem:[%s1362_s18 + $0x74] sm:$0xf]  ;;  %v925_v24 = vld [vmem:[%s1362_s18 + $0x40] sm:$0xf]  ;;  %v1070_v26 = vor.u32 %v1134_v21, %v1069_v20 }
  0x23   : > { %v1098_v25 = vld [vmem:[%s1362_s18 + $0x44] sm:$0xf0]  ;;  %v951_v27 = vld [vmem:[%s1362_s18 + $0x78] sm:$0xf0]  ;;  %v998_v28 = vor.u32 %v1116_v18, %v997_v17  ;;  %v989_v29 = vld [vmem:[%s1362_s18 + $0xc0] sm:$0xf] }
  0x24   : > { %641 = vmatpush.bf16.msra.mxu0 %v942_v11  ;;  %666 = vmatpush.bf16.msra.mxu2 %v1078_v19  ;;  %v1114_v30 = vld [vmem:[%s1362_s18 + $0xc4] sm:$0xf0]  ;;  %v954_v31 = vor.u32 %v1103_v22, %v951_v27  ;;  %v1061_v32 = vld [vmem:[%s1362_s18 + $0x150] sm:$0xf]  ;;  %v1132_v33 = vld [vmem:[%s1362_s18 + $0x154] sm:$0xf0]  ;;  %v926_v37 = vor.u32 %v1098_v25, %v925_v24 }
  0x25   : > { %654 = vmatpush.bf16.msra.mxu1 %v1006_v13  ;;  %v1101_v34 = vld [vmem:[%s1362_s18 + $0x64] sm:$0xf]  ;;  %v943_v35 = vld [vmem:[%s1362_s18 + $0x68] sm:$0xf0]  ;;  %v917_v38 = vld [vmem:[%s1362_s18 + $0x30] sm:$0xf]  ;;  %v1062_v40 = vor.u32 %v1132_v33, %v1061_v32  ;;  %v990_v42 = vor.u32 %v1114_v30, %v989_v29 }
  0x26   : > { %679 = vmatpush.bf16.msra.mxu3 %v954_v31  ;;  %v946_v36 = vor.u32 %v1101_v34, %v943_v35  ;;  %v1096_v39 = vld [vmem:[%s1362_s18 + $0x34] sm:$0xf0]  ;;  %v1053_v41 = vld [vmem:[%s1362_s18 + $0x140] sm:$0xf]  ;;  %v1130_v43 = vld [vmem:[%s1362_s18 + $0x144] sm:$0xf0] }
  0x27   : > { %v1099_v44 = vld [vmem:[%s1362_s18 + $0x54] sm:$0xf]  ;;  %v935_v45 = vld [vmem:[%s1362_s18 + $0x58] sm:$0xf0]  ;;  %v981_v46 = vld [vmem:[%s1362_s18 + $0xb0] sm:$0xf]  ;;  %v918_v49 = vor.u32 %v1096_v39, %v917_v38  ;;  %v1054_v51 = vor.u32 %v1130_v43, %v1053_v41 }
  0x28   : > { %642 = vmatpush.bf16.msra.mxu0 %v934_v23  ;;  %667 = vmatpush.bf16.msra.mxu2 %v1070_v26  ;;  %v1112_v47 = vld [vmem:[%s1362_s18 + $0xb4] sm:$0xf0]  ;;  %v938_v48 = vor.u32 %v1099_v44, %v935_v45  ;;  %v909_v50 = vld [vmem:[%s1362_s18 + $0x20] sm:$0xf]  ;;  %v1097_v52 = vld [vmem:[%s1362_s18 + $0x44] sm:$0xf] }
  0x29   : > { %655 = vmatpush.bf16.msra.mxu1 %v998_v28  ;;  %v927_v53 = vld [vmem:[%s1362_s18 + $0x48] sm:$0xf0]  ;;  %v982_v54 = vor.u32 %v1112_v47, %v981_v46  ;;  %v1094_v55 = vld [vmem:[%s1362_s18 + $0x24] sm:$0xf0]  ;;  %v1045_v56 = vld [vmem:[%s1362_s18 + $0x130] sm:$0xf] }
  0x2a   : > { %680 = vmatpush.bf16.msra.mxu3 %v946_v36  ;;  %v1128_v57 = vld [vmem:[%s1362_s18 + $0x134] sm:$0xf0]  ;;  %v973_v58 = vld [vmem:[%s1362_s18 + $0xa0] sm:$0xf]  ;;  %v1110_v59 = vld [vmem:[%s1362_s18 + $0xa4] sm:$0xf0]  ;;  %v930_v60 = vor.u32 %v1097_v52, %v927_v53  ;;  %v910_v61 = vor.u32 %v1094_v55, %v909_v50 }
  0x2b   : > { %v901_v62 = vld [vmem:[%s1362_s18 + $0x10] sm:$0xf]  ;;  %v1046_v63 = vor.u32 %v1128_v57, %v1045_v56  ;;  %v1095_v0 = vld [vmem:[%s1362_s18 + $0x34] sm:$0xf]  ;;  %v919_v1 = vld [vmem:[%s1362_s18 + $0x38] sm:$0xf0]  ;;  %v974_v2 = vor.u32 %v1110_v59, %v973_v58 }
  0x2c   : > { %643 = vmatpush.bf16.msra.mxu0 %v926_v37  ;;  %668 = vmatpush.bf16.msra.mxu2 %v1062_v40  ;;  %v1092_v3 = vld [vmem:[%s1362_s18 + $0x14] sm:$0xf0]  ;;  %v1037_v4 = vld [vmem:[%s1362_s18 + $0x120] sm:$0xf]  ;;  %v1126_v5 = vld [vmem:[%s1362_s18 + $0x124] sm:$0xf0]  ;;  %v922_v10 = vor.u32 %v1095_v0, %v919_v1 }
  0x2d   : > { %656 = vmatpush.bf16.msra.mxu1 %v990_v42  ;;  %v965_v6 = vld [vmem:[%s1362_s18 + $0x90] sm:$0xf]  ;;  %v1108_v7 = vld [vmem:[%s1362_s18 + $0x94] sm:$0xf0]  ;;  %v893_v8 = vld [vmem:[%s1362_s18] sm:$0xf]  ;;  %v902_v11 = vor.u32 %v1092_v3, %v901_v62  ;;  %v1038_v12 = vor.u32 %v1126_v5, %v1037_v4 }
  0x2e   : > { %681 = vmatpush.bf16.msra.mxu3 %v938_v48  ;;  %v1090_v9 = vld [vmem:[%s1362_s18 + $0x4] sm:$0xf0]  ;;  %v1093_v13 = vld [vmem:[%s1362_s18 + $0x24] sm:$0xf]  ;;  %v911_v14 = vld [vmem:[%s1362_s18 + $0x28] sm:$0xf0]  ;;  %v966_v16 = vor.u32 %v1108_v7, %v965_v6 }
  0x2f   : > { %v339_v15 = vld [vmem:[%s1357_s11] sm:$0xff]  ;;  %v1029_v18 = vld [vmem:[%s1362_s18 + $0x110] sm:$0xf]  ;;  %v1124_v19 = vld [vmem:[%s1362_s18 + $0x114] sm:$0xf0]  ;;  %v914_v25 = vor.u32 %v1093_v13, %v911_v14  ;;  %v894_v27 = vor.u32 %v1090_v9, %v893_v8  ;;  %p1083_p10 = scmp.ne.s32.totalorder %s1265_s15, 2 }
  0x30   : > { %644 = vmatpush.bf16.msra.mxu0 %v918_v49  ;;  %669 = vmatpush.bf16.msra.mxu2 %v1054_v51  ;;  %v957_v17 = vld [vmem:[%s1362_s18 + $0x80] sm:$0xf]  ;;  %v1106_v20 = vld [vmem:[%s1362_s18 + $0x84] sm:$0xf0]  ;;  %v1119_v21 = vld [vmem:[%s1362_s18 + $0xf4] sm:$0xf]  ;;  %v391_v26 = vunpack.c.l.b16 %v339_v15  ;;  %v1030_v28 = vor.u32 %v1124_v19, %v1029_v18  ;;  %v392_v29 = vunpack.c.h.b16 %v339_v15 }
  0x31   : > { %657 = vmatpush.bf16.msra.mxu1 %v982_v54  ;;  %v1015_v22 = vld [vmem:[%s1362_s18 + $0xf8] sm:$0xf0]  ;;  %v1135_v23 = vld [vmem:[%s1362_s18 + $0x174] sm:$0xf]  ;;  %v340_v32 = vld [vmem:[%s1357_s11 + $0x8] sm:$0xf]  ;;  %v958_v33 = vor.u32 %v1106_v20, %v957_v17 }
  0x32   : > { %682 = vmatpush.bf16.msra.mxu3 %v930_v60  ;;  %v1079_v24 = vld [vmem:[%s1362_s18 + $0x178] sm:$0xf0]  ;;  %v1091_v30 = vld [vmem:[%s1362_s18 + $0x14] sm:$0xf]  ;;  %v1018_v34 = vor.u32 %v1119_v21, %v1015_v22  ;;  %v1021_v35 = vld [vmem:[%s1362_s18 + $0x100] sm:$0xf]  ;;  %v394_v42 = vpack.c.b16 %v391_v26, %v391_v26  ;;  %v393_v44 = vunpack.c.l.b16 %v340_v32  ;;  %v1437_v45 = vpack.c.b16 %v392_v29, %v392_v29 }
  0x33   : > { %v903_v31 = vld [vmem:[%s1362_s18 + $0x18] sm:$0xf0]  ;;  %v1122_v36 = vld [vmem:[%s1362_s18 + $0x104] sm:$0xf0]  ;;  %v1082_v37 = vor.u32 %v1135_v23, %v1079_v24  ;;  %v1117_v38 = vld [vmem:[%s1362_s18 + $0xe4] sm:$0xf] }
  0x34   : > { %645 = vmatpush.bf16.msra.mxu0 %v910_v61  ;;  %670 = vmatpush.bf16.msra.mxu2 %v1046_v63  ;;  %v1007_v39 = vld [vmem:[%s1362_s18 + $0xe8] sm:$0xf0]  ;;  %v1133_v40 = vld [vmem:[%s1362_s18 + $0x164] sm:$0xf]  ;;  %v906_v43 = vor.u32 %v1091_v30, %v903_v31  ;;  %v1022_v46 = vor.u32 %v1122_v36, %v1021_v35  ;;  %v1115_v51 = vld [vmem:[%s1362_s18 + $0xd4] sm:$0xf]  ;;  %v396_v55 = vpack.c.b16 %v393_v44, %v393_v44 }
  0x35   : > { %658 = vmatpush.bf16.msra.mxu1 %v974_v2  ;;  %v1071_v41 = vld [vmem:[%s1362_s18 + $0x168] sm:$0xf0]  ;;  %v1089_v47 = vld [vmem:[%s1362_s18 + $0x4] sm:$0xf]  ;;  %v1010_v49 = vor.u32 %v1117_v38, %v1007_v39  ;;  %v999_v52 = vld [vmem:[%s1362_s18 + $0xd8] sm:$0xf0] }
  0x36   : > { %683 = vmatpush.bf16.msra.mxu3 %v922_v10  ;;  %v895_v48 = vld [vmem:[%s1362_s18 + $0x8] sm:$0xf0]  ;;  %v1074_v50 = vor.u32 %v1133_v40, %v1071_v41  ;;  %v1131_v53 = vld [vmem:[%s1362_s18 + $0x154] sm:$0xf]  ;;  %v1063_v54 = vld [vmem:[%s1362_s18 + $0x158] sm:$0xf0]  ;;  %v1002_v57 = vor.u32 %v1115_v51, %v999_v52 }
  0x37   : > { %v898_v56 = vor.u32 %v1089_v47, %v895_v48  ;;  %v1066_v58 = vor.u32 %v1131_v53, %v1063_v54  ;;  %v1113_v59 = vld [vmem:[%s1362_s18 + $0xc4] sm:$0xf]  ;;  %v991_v60 = vld [vmem:[%s1362_s18 + $0xc8] sm:$0xf0]  ;;  %v1111_v1 = vld [vmem:[%s1362_s18 + $0xb4] sm:$0xf] }
  0x38   : > { %646 = vmatpush.bf16.msra.mxu0 %v902_v11  ;;  %671 = vmatpush.bf16.msra.mxu2 %v1038_v12  ;;  %v1129_v61 = vld [vmem:[%s1362_s18 + $0x144] sm:$0xf]  ;;  %v1055_v62 = vld [vmem:[%s1362_s18 + $0x148] sm:$0xf0]  ;;  %v994_v63 = vor.u32 %v1113_v59, %v991_v60  ;;  %v983_v2 = vld [vmem:[%s1362_s18 + $0xb8] sm:$0xf0] }
  0x39   : > { %659 = vmatpush.bf16.msra.mxu1 %v966_v16  ;;  %v1058_v0 = vor.u32 %v1129_v61, %v1055_v62  ;;  %v1127_v3 = vld [vmem:[%s1362_s18 + $0x134] sm:$0xf]  ;;  %v1047_v4 = vld [vmem:[%s1362_s18 + $0x138] sm:$0xf0]  ;;  %v986_v5 = vor.u32 %v1111_v1, %v983_v2  ;;  %v1109_v7 = vld [vmem:[%s1362_s18 + $0xa4] sm:$0xf] }
  0x3a   : > { %684 = vmatpush.bf16.msra.mxu3 %v914_v25  ;;  %v1050_v6 = vor.u32 %v1127_v3, %v1047_v4  ;;  %v975_v8 = vld [vmem:[%s1362_s18 + $0xa8] sm:$0xf0]  ;;  %v1125_v9 = vld [vmem:[%s1362_s18 + $0x124] sm:$0xf]  ;;  %v1107_v13 = vld [vmem:[%s1362_s18 + $0x94] sm:$0xf] }
  0x3b   : > { %v1039_v10 = vld [vmem:[%s1362_s18 + $0x128] sm:$0xf0]  ;;  %v978_v11 = vor.u32 %v1109_v7, %v975_v8  ;;  %v967_v14 = vld [vmem:[%s1362_s18 + $0x98] sm:$0xf0]  ;;  %v1123_v15 = vld [vmem:[%s1362_s18 + $0x114] sm:$0xf] }
  0x3c   : > { %647 = vmatpush.bf16.msra.mxu0 %v894_v27  ;;  %672 = vmatpush.bf16.msra.mxu2 %v1030_v28  ;;  %v1042_v12 = vor.u32 %v1125_v9, %v1039_v10  ;;  %v1031_v16 = vld [vmem:[%s1362_s18 + $0x118] sm:$0xf0]  ;;  %v970_v17 = vor.u32 %v1107_v13, %v967_v14  ;;  %v1105_v19 = vld [vmem:[%s1362_s18 + $0x84] sm:$0xf]  ;;  %v959_v20 = vld [vmem:[%s1362_s18 + $0x88] sm:$0xf0] }
  0x3d   : > { %660 = vmatpush.bf16.msra.mxu1 %v958_v33  ;;  %v1034_v18 = vor.u32 %v1123_v15, %v1031_v16  ;;  %v1121_v21 = vld [vmem:[%s1362_s18 + $0x104] sm:$0xf]  ;;  %v1023_v22 = vld [vmem:[%s1362_s18 + $0x108] sm:$0xf0]  ;;  %v962_v23 = vor.u32 %v1105_v19, %v959_v20 }
  0x3e   : > { %685 = vmatpush.bf16.msra.mxu3 %v906_v43  ;;  %v1026_v24 = vor.u32 %v1121_v21, %v1023_v22  ;;  %v337_v30 = vld [vmem:[#allocation2] sm:$0xff]  ;;  %v338_v40 = vld [vmem:[#allocation2 + $0x8] sm:$0xff] }
  0x3f   : > { %648 = vmatmul.bf16.vlgmr.msra.gmra.mxu0 %v394_v42 }
  0x40   : > { %692 = vmatpush.bf16.msrb.mxu0 %v1018_v34  ;;  %661 = vmatmul.bf16.vlgmr.msra.gmra.mxu1 %v1437_v45 }
  0x41   : > { %705 = vmatpush.bf16.msrb.mxu1 %v1082_v37  ;;  %673 = vmatpush.bf16.msra.mxu2 %v1022_v46 }
  0x42   : > { %686 = vmatpush.bf16.msra.mxu3 %v898_v56 }
  0x44   : > { %693 = vmatpush.bf16.msrb.mxu0 %v1010_v49  ;;  %674 = vmatmul.bf16.vlgmr.msra.gmra.mxu2 %v396_v55 }
  0x45   : > { %706 = vmatpush.bf16.msrb.mxu1 %v1074_v50  ;;  %687 = vmatmul.bf16.vlgmr.msra.gmra.mxu3 %v394_v42 }
  0x48   : > { %694 = vmatpush.bf16.msrb.mxu0 %v1002_v57 }
  0x49   : > { %707 = vmatpush.bf16.msrb.mxu1 %v1066_v58 }
  0x4c   : > { %695 = vmatpush.bf16.msrb.mxu0 %v994_v63 }
  0x4d   : > { %708 = vmatpush.bf16.msrb.mxu1 %v1058_v0 }
  0x50   : > { %696 = vmatpush.bf16.msrb.mxu0 %v986_v5 }
  0x51   : > { %709 = vmatpush.bf16.msrb.mxu1 %v1050_v6 }
  0x54   : > { %697 = vmatpush.bf16.msrb.mxu0 %v978_v11 }
  0x55   : > { %710 = vmatpush.bf16.msrb.mxu1 %v1042_v12 }
  0x58   : > { %698 = vmatpush.bf16.msrb.mxu0 %v970_v17 }
  0x59   : > { %711 = vmatpush.bf16.msrb.mxu1 %v1034_v18 }
  0x5c   : > { %699 = vmatpush.bf16.msrb.mxu0 %v962_v23 }
  0x5d   : > { %712 = vmatpush.bf16.msrb.mxu1 %v1026_v24 }
  0x5f   : > { %700 = vmatmul.bf16.vlgmr.msrb.gmra.mxu0 %v1437_v45 }
  0x60   : > { %713 = vmatmul.bf16.vlgmr.msrb.gmra.mxu1 %v396_v55 }
  0xbc   : > { %v649_v25 = vpop.f32.mrf.mxu0 }
  0xbd   : > { %v662_v26 = vpop.f32.mrf.mxu1 }
  0xbe   : > { %v663_v27 = vadd.f32 %v662_v26, %v649_v25 }
  0xc4   : > { %v651_v28 = vpop.f32.mrf.mxu0 }
  0xc5   : > { %v664_v29 = vpop.f32.mrf.mxu1 }
  0xc7   : > { %v675_v31 = vpop.f32.mrf.mxu2 }
  0xc8   : > { %v676_v32 = vadd.f32 %v675_v31, %v663_v27  ;;  %v688_v34 = vpop.f32.mrf.mxu3 }
  0xca   : > { %v718_v33 = vadd.f32 %v676_v32, %v337_v30 }
  0xcc   : > { %720 = vst [vmem:[#allocation2] sm:$0xff] %v718_v33 }
  0xcf   : > { %v677_v35 = vpop.f32.mrf.mxu2 }
  0xd0   : > { %v690_v36 = vpop.f32.mrf.mxu3 }
  0xdc   : > { %v701_v37 = vpop.f32.mrf.mxu0 }
  0xdd   : > { %v702_v38 = vadd.f32 %v701_v37, %v688_v34  ;;  %v714_v39 = vpop.f32.mrf.mxu1 }
  0xdf   : > { %v715_v41 = vadd.f32 %v714_v39, %v702_v38 }
  0xe1   : > { %v719_v42 = vadd.f32 %v715_v41, %v338_v40  ;;  %725 = sbr.rel (%p1083_p10) target bundleno = 244 (0xf4), region = 52 }
  0xe3   : > { %721 = vst [vmem:[#allocation2 + $0x8] sm:$0xff] %v719_v42 }
  0xe4   : > { %v703_v43 = vpop.f32.mrf.mxu0 }
  0xe5   : > { %v716_v44 = vpop.f32.mrf.mxu1 }
  0xe6   : > { %v726_v45 = vld [vmem:[#allocation2] sm:$0xff]  ;;  %v728_v47 = vld [vmem:[#allocation3] sm:$0x3]  ;;  %v736_v50 = vld [vmem:[#allocation5] sm:$0x3] }
  0xe7   : > { %v730_v48 = vperm.slane %v728_v47, 0  ;;  %v731_v49 = vperm.slane %v728_v47, 1  ;;  %v738_v51 = vperm.slane %v736_v50, 0  ;;  %v739_v52 = vperm.slane %v736_v50, 1 }
  0xe9   : > { %v734_v53 = vmul.f32 %v730_v48, %v726_v45 }
  0xea   : > { %v727_v46 = vld [vmem:[#allocation2 + $0x8] sm:$0xff] }
  0xeb   : > { %v735_v54 = vmul.f32 %v731_v49, %v727_v46  ;;  %v742_v55 = vadd.f32 %v738_v51, %v734_v53 }
  0xed   : > { %v743_v56 = vadd.f32 %v739_v52, %v735_v54  ;;  %v744_v57 = vmax.f32 %v742_v55, 0.0 }
  0xef   : > { %v745_v58 = vmax.f32 %v743_v56, 0.0 }
  0xf1   : > { %v746_v59 = vpack.c.bf16 %v745_v58, %v744_v57 }
  0xf3   : > { %747 = vst [vmem:[%s1484_s4] sm:$0xff] %v746_v59 }
  0xf4 PF: > { %s16_s17 = sadd.s32 1, %s1273_s17   ;;  %s1487_s15 = smov %s1269_s16 }
  0xf5   : > { %p13_p11 = scmp.ge.s32.totalorder %s16_s17, 5   ;;  %s1488_s16 = smov %s1490_s19 }
  0xf7   :  { %15 = sbr.rel (!%p13_p11) target bundleno = 3 (0x3), region = 88 }
  0xfc   :  { %778 = vsyncpa [#allocation4], 1 }
  0xfd   :  { %780 = vsyncpa [#allocation4 + $0x1], 1 }
  0xfe   :  { %781 = vsyncpa [#allocation6], 1 }

// kernel: resnet_forward.31
= control target key start
LH: loop header
LB: loop body
LE: loop exit
PB: predicated region body
PF: predicated region fallthrough
CT: control target
= control target key end

     0   :  { %9 = vsyncpa [#allocation4], 0  ;;  %s478_s0 = inlined_call_operand.vmem [shape: bf16[8,128], index: 0, kind: input, shape index: {}]   ;;  %s479_s1 = inlined_call_operand.vmem [shape: bf16[128,256], index: 1, kind: input, shape index: {}]   ;;  %s480_s2 = inlined_call_operand.hbm [shape: f32[1,256], index: 2, kind: input, shape index: {}]   ;;  %s481_s3 = inlined_call_operand.hbm [shape: f32[1,256], index: 3, kind: input, shape index: {}]   ;;  %s482_s4 = inlined_call_operand.vmem [shape: bf16[8,256], index: 4, kind: output, shape index: {}]  }
   0x1   :  { %s20_s17 = sshll.u32 %s480_s2, 4  ;;  %s21_s17 = int_to_ptr.hbm [resolvable:$true] %s20_s17 }
   0x2   :  { %10 = vsyncpa [#allocation6], 0  ;;  %s343_s18 = smov [#allocation3]   ;;  %s31_s22 = sshll.u32 %s481_s3, 4  ;;  %s32_s22 = int_to_ptr.hbm [resolvable:$true] %s31_s22 }
   0x3   :  { %s22_s19 = sshll.u32 %s343_s18, 4  ;;  %s344_s23 = smov [#allocation5]   ;;  %s23_s19 = int_to_ptr.vmem [resolvable:$true] %s22_s19 }
   0x4   :  { %25 = dma.hbm_to_vmem [thread:$0]  %s21_s17, 32, %s23_s19, [#allocation4]  }
   0x5   :  { %s33_s24 = sshll.u32 %s344_s23, 4  ;;  %s34_s24 = int_to_ptr.vmem [resolvable:$true] %s33_s24 }
   0x6   :  { %36 = dma.hbm_to_vmem [thread:$0]  %s32_s22, 32, %s34_s24, [#allocation6]  }
   0x7   :  { %339 = dma.done.wait [#allocation4], 32  }
   0x8   :  { %340 = vsyncadd [#allocation4], 4294967264 }
   0x9   :  { %341 = dma.done.wait [#allocation6], 32  }
   0xa   :  { %342 = vsyncadd [#allocation6], 4294967264  ;;  %v267_v0 = vld [vmem:[%s479_s1 + $0x70] sm:$0xf]  ;;  %v288_v1 = vld [vmem:[%s479_s1 + $0x74] sm:$0xf0] }
   0xb   :  { %v287_v2 = vld [vmem:[%s479_s1 + $0x74] sm:$0xf]  ;;  %v268_v3 = vor.u32 %v288_v1, %v267_v0  ;;  %v269_v4 = vld [vmem:[%s479_s1 + $0x78] sm:$0xf0]  ;;  %v259_v5 = vld [vmem:[%s479_s1 + $0x60] sm:$0xf] }
   0xc   :  { %v286_v6 = vld [vmem:[%s479_s1 + $0x64] sm:$0xf0]  ;;  %v272_v7 = vor.u32 %v287_v2, %v269_v4  ;;  %v285_v8 = vld [vmem:[%s479_s1 + $0x64] sm:$0xf]  ;;  %v261_v9 = vld [vmem:[%s479_s1 + $0x68] sm:$0xf0] }
   0xd   :  { %150 = vmatpush.bf16.msra.mxu0 %v268_v3  ;;  %v260_v10 = vor.u32 %v286_v6, %v259_v5  ;;  %v264_v11 = vor.u32 %v285_v8, %v261_v9  ;;  %v251_v12 = vld [vmem:[%s479_s1 + $0x50] sm:$0xf]  ;;  %v284_v13 = vld [vmem:[%s479_s1 + $0x54] sm:$0xf0]  ;;  %v283_v14 = vld [vmem:[%s479_s1 + $0x54] sm:$0xf] }
   0xe   :  { %163 = vmatpush.bf16.msra.mxu1 %v272_v7  ;;  %v253_v15 = vld [vmem:[%s479_s1 + $0x58] sm:$0xf0]  ;;  %v252_v16 = vor.u32 %v284_v13, %v251_v12  ;;  %v243_v18 = vld [vmem:[%s479_s1 + $0x40] sm:$0xf]  ;;  %v282_v19 = vld [vmem:[%s479_s1 + $0x44] sm:$0xf0] }
   0xf   :  { %v256_v17 = vor.u32 %v283_v14, %v253_v15  ;;  %v281_v20 = vld [vmem:[%s479_s1 + $0x44] sm:$0xf]  ;;  %v245_v21 = vld [vmem:[%s479_s1 + $0x48] sm:$0xf0]  ;;  %v244_v22 = vor.u32 %v282_v19, %v243_v18  ;;  %v235_v24 = vld [vmem:[%s479_s1 + $0x30] sm:$0xf] }
  0x10   :  { %v248_v23 = vor.u32 %v281_v20, %v245_v21  ;;  %v280_v25 = vld [vmem:[%s479_s1 + $0x34] sm:$0xf0]  ;;  %v279_v26 = vld [vmem:[%s479_s1 + $0x34] sm:$0xf]  ;;  %v237_v27 = vld [vmem:[%s479_s1 + $0x38] sm:$0xf0] }
  0x11   :  { %151 = vmatpush.bf16.msra.mxu0 %v260_v10  ;;  %v236_v28 = vor.u32 %v280_v25, %v235_v24  ;;  %v240_v29 = vor.u32 %v279_v26, %v237_v27  ;;  %v227_v30 = vld [vmem:[%s479_s1 + $0x20] sm:$0xf]  ;;  %v278_v31 = vld [vmem:[%s479_s1 + $0x24] sm:$0xf0]  ;;  %v277_v32 = vld [vmem:[%s479_s1 + $0x24] sm:$0xf] }
  0x12   :  { %164 = vmatpush.bf16.msra.mxu1 %v264_v11  ;;  %v229_v33 = vld [vmem:[%s479_s1 + $0x28] sm:$0xf0]  ;;  %v228_v34 = vor.u32 %v278_v31, %v227_v30  ;;  %v219_v36 = vld [vmem:[%s479_s1 + $0x10] sm:$0xf]  ;;  %v276_v37 = vld [vmem:[%s479_s1 + $0x14] sm:$0xf0] }
  0x13   :  { %v232_v35 = vor.u32 %v277_v32, %v229_v33  ;;  %v275_v38 = vld [vmem:[%s479_s1 + $0x14] sm:$0xf]  ;;  %v221_v39 = vld [vmem:[%s479_s1 + $0x18] sm:$0xf0]  ;;  %v220_v40 = vor.u32 %v276_v37, %v219_v36  ;;  %v211_v42 = vld [vmem:[%s479_s1] sm:$0xf] }
  0x14   :  { %v224_v41 = vor.u32 %v275_v38, %v221_v39  ;;  %v274_v43 = vld [vmem:[%s479_s1 + $0x4] sm:$0xf0]  ;;  %v273_v44 = vld [vmem:[%s479_s1 + $0x4] sm:$0xf]  ;;  %v213_v45 = vld [vmem:[%s479_s1 + $0x8] sm:$0xf0] }
  0x15   :  { %152 = vmatpush.bf16.msra.mxu0 %v252_v16  ;;  %v212_v46 = vor.u32 %v274_v43, %v211_v42  ;;  %v216_v47 = vor.u32 %v273_v44, %v213_v45  ;;  %v53_v48 = vld [vmem:[%s478_s0] sm:$0xf] }
  0x16   :  { %165 = vmatpush.bf16.msra.mxu1 %v256_v17  ;;  %v185_v49 = vld [vmem:[#allocation3] sm:$0x3]  ;;  %v193_v50 = vld [vmem:[#allocation5] sm:$0x3] }
  0x17   :  { %v187_v51 = vperm.slane %v185_v49, 0  ;;  %v188_v52 = vperm.slane %v185_v49, 1  ;;  %v195_v53 = vperm.slane %v193_v50, 0  ;;  %v196_v55 = vperm.slane %v193_v50, 1 }
  0x19   :  { %153 = vmatpush.bf16.msra.mxu0 %v244_v22 }
  0x1a   :  { %166 = vmatpush.bf16.msra.mxu1 %v248_v23 }
  0x1d   :  { %154 = vmatpush.bf16.msra.mxu0 %v236_v28 }
  0x1e   :  { %167 = vmatpush.bf16.msra.mxu1 %v240_v29 }
  0x21   :  { %155 = vmatpush.bf16.msra.mxu0 %v228_v34 }
  0x22   :  { %168 = vmatpush.bf16.msra.mxu1 %v232_v35 }
  0x25   :  { %156 = vmatpush.bf16.msra.mxu0 %v220_v40 }
  0x26   :  { %169 = vmatpush.bf16.msra.mxu1 %v224_v41 }
  0x29   :  { %157 = vmatpush.bf16.msra.mxu0 %v212_v46 }
  0x2a   :  { %170 = vmatpush.bf16.msra.mxu1 %v216_v47 }
  0x2c   :  { %158 = vmatmul.bf16.vlgmr.msra.gmra.mxu0 %v53_v48 }
  0x2d   :  { %171 = vmatmul.bf16.vlgmr.msra.gmra.mxu1 %v53_v48 }
  0xa9   :  { %v159_v54 = vpop.f32.mrf.mxu0 }
  0xaa   :  { %v191_v56 = vmul.f32 %v187_v51, %v159_v54  ;;  %v172_v57 = vpop.f32.mrf.mxu1 }
  0xab   :  { %v192_v58 = vmul.f32 %v188_v52, %v172_v57 }
  0xac   :  { %v199_v59 = vadd.f32 %v195_v53, %v191_v56 }
  0xad   :  { %v200_v60 = vadd.f32 %v196_v55, %v192_v58 }
  0xaf   :  { %v201_v61 = vpack.c.bf16 %v200_v60, %v199_v59 }
  0xb1   :  { %202 = vst [vmem:[%s482_s4] sm:$0xff] %v201_v61  ;;  %v161_v62 = vpop.f32.mrf.mxu0 }
  0xb2   :  { %v174_v63 = vpop.f32.mrf.mxu1 }
  0xb3   :  { %207 = vsyncpa [#allocation4], 1 }
  0xb4   :  { %208 = vsyncpa [#allocation6], 1 }

// kernel: resnet_forward.33
= control target key start
LH: loop header
LB: loop body
LE: loop exit
PB: predicated region body
PF: predicated region fallthrough
CT: control target
= control target key end

     0   :  { %10 = vsyncpa [#allocation4], 0  ;;  %s1578_s0 = inlined_call_operand.vmem [shape: bf16[8,2304], index: 0, kind: input, shape index: {}]   ;;  %s1579_s1 = inlined_call_operand.vmem [shape: bf16[2304,256], index: 1, kind: input, shape index: {}]   ;;  %s1580_s2 = inlined_call_operand.hbm [shape: f32[1,256], index: 2, kind: input, shape index: {}]   ;;  %s1581_s3 = inlined_call_operand.hbm [shape: f32[1,256], index: 3, kind: input, shape index: {}]   ;;  %s1582_s4 = inlined_call_operand.vmem [shape: bf16[8,256], index: 4, kind: input, shape index: {}]   ;;  %s1583_s5 = inlined_call_operand.vmem [shape: bf16[8,256], index: 5, kind: output, shape index: {}]  }
   0x1   :  { %11 = vsyncpa [#allocation6], 0  ;;  %s1398_s18 = smov 0   ;;  %s1400_s19 = smov 0  }
   0x2   :  { %s1402_s20 = smov 0  }
   0x3 LB: > { %s968_s21 = sadd.s32 4294967295, %s1363_s20   ;;  %s29_s22 = sadd.s32 1, %s1359_s19  ;;  %s1363_s20 = sphi %s1402_s20, %s17_s20   ;;  %s1359_s19 = sphi %s1400_s19, %s1587_s19   ;;  %s1355_s18 = sphi %s1398_s18, %s1586_s18  }
   0x4   : > { %p30_p0 = scmp.ge.s32.totalorder %s29_s22, 6  ;;  %p969_p1 = scmp.ge.s32.totalorder %s1363_s20, 1 }
   0x5   : > { %p205_p2 = scmp.lt.s32.totalorder %s1363_s20, 7  ;;  %p1423_p4 = scmp.eq.s32.totalorder %s968_s21, 0 }
   0x6   : > { %s1589_s22 = smov (%p30_p0, %s29_s22), 0  ;;  %s219_s27 = sshll.u32 %s1580_s2, 4  ;;  %s220_s27 = int_to_ptr.hbm [resolvable:$true] %s219_s27 }
   0x7   : > { %p1419_p3 = pnand %p969_p1, %p205_p2  ;;  %s1365_s28 = smov [#allocation3]  }
   0x8   : > { %s221_s29 = sshll.u32 %s1365_s28, 4  ;;  %s233_s7 = sshll.u32 %s1581_s3, 4  ;;  %s222_s29 = int_to_ptr.vmem [resolvable:$true] %s221_s29  ;;  %s234_s7 = int_to_ptr.hbm [resolvable:$true] %s233_s7 }
   0x9   : > { %p1235_p5 = pneg %p1419_p3  ;;  %s1366_s8 = smov [#allocation5]  }
   0xa   : > { %s235_s9 = sshll.u32 %s1366_s8, 4  ;;  %289 = sbr.rel (%p1419_p3) target bundleno = 246 (0xf6), region = 40  ;;  %s236_s9 = int_to_ptr.vmem [resolvable:$true] %s235_s9 }
   0xb   : > { %p1236_p6 = pnand %p1423_p4, %p1235_p5 }
   0xd   : > { %1238 = dma.hbm_to_vmem [thread:$0]  (!%p1236_p6), %s220_s27, 32, %s222_s29, [#allocation4]  }
   0xe   : > { %1241 = dma.hbm_to_vmem [thread:$0]  (!%p1236_p6), %s234_s7, 32, %s236_s9, [#allocation6]  }
   0xf   : > { %1346 = dma.done.wait (%p1423_p4), [#allocation4], 32  }
  0x10   : > { %1348 = vsyncadd (%p1423_p4), [#allocation4], 4294967264 }
  0x11   : > { %1350 = dma.done.wait (%p1423_p4), [#allocation6], 32  }
  0x12   : > { %1352 = vsyncadd (%p1423_p4), [#allocation6], 4294967264  ;;  %s350_s10 = smul.u32 3, %s1355_s18  ;;  %p980_p9 = scmp.ne.s32.totalorder %s1355_s18, 0 }
  0x13   : > { %s360_s11 = smul.u32 48, %s1355_s18 }
  0x14   : > { %p353_p7 = scmp.lt.s32.totalorder %s350_s10, 17 }
  0x15   : > { %p362_p8 = scmp.lt.s32.totalorder %s360_s11, 287  ;;  %397 = sbr.rel (%p980_p9) target bundleno = 29 (0x1d), region = 52 }
  0x16   : > { %s1591_s10 = smov (!%p353_p7, %s350_s10), 17 }
  0x17   : > { %s1593_s11 = smov (!%p362_p8, %s360_s11), 287  ;;  %s977_s12 = sshll.u32 %s1591_s10, 2 }
  0x18   : > { %s1452_s15 = scalar_lea.vmem %s1578_s0, %s977_s12  ;;  %s1178_s16 = sshll.u32 %s1593_s11, 3 }
  0x19   : > { %s1457_s23 = scalar_lea.vmem %s1579_s1, %s1178_s16 }
  0x1a   : > { %v1367_v0 = vmov 0.0  }
  0x1b   : > { %398 = vst [vmem:[#allocation2] sm:$0xff] %v1367_v0 }
  0x1c   : > { %399 = vst [vmem:[#allocation2 + $0x8] sm:$0xff] %v1367_v0 }
  0x1d PF: > { %v1039_v1 = vld [vmem:[%s1457_s23 + $0x70] sm:$0xf]  ;;  %v1194_v2 = vld [vmem:[%s1457_s23 + $0x74] sm:$0xf0]  ;;  %v1031_v6 = vld [vmem:[%s1457_s23 + $0x60] sm:$0xf] }
  0x1e   : > { %v1103_v3 = vld [vmem:[%s1457_s23 + $0xf0] sm:$0xf]  ;;  %v1040_v4 = vor.u32 %v1194_v2, %v1039_v1  ;;  %v1210_v5 = vld [vmem:[%s1457_s23 + $0xf4] sm:$0xf0]  ;;  %v1192_v7 = vld [vmem:[%s1457_s23 + $0x64] sm:$0xf0] }
  0x1f   : > { %v1104_v8 = vor.u32 %v1210_v5, %v1103_v3  ;;  %v1095_v9 = vld [vmem:[%s1457_s23 + $0xe0] sm:$0xf]  ;;  %v1208_v10 = vld [vmem:[%s1457_s23 + $0xe4] sm:$0xf0]  ;;  %v1032_v11 = vor.u32 %v1192_v7, %v1031_v6  ;;  %v1023_v12 = vld [vmem:[%s1457_s23 + $0x50] sm:$0xf] }
  0x20   : > { %703 = vmatpush.bf16.msra.mxu0 %v1040_v4  ;;  %v1096_v13 = vor.u32 %v1208_v10, %v1095_v9  ;;  %v1190_v14 = vld [vmem:[%s1457_s23 + $0x54] sm:$0xf0]  ;;  %v1167_v15 = vld [vmem:[%s1457_s23 + $0x170] sm:$0xf]  ;;  %v1159_v20 = vld [vmem:[%s1457_s23 + $0x160] sm:$0xf] }
  0x21   : > { %716 = vmatpush.bf16.msra.mxu1 %v1104_v8  ;;  %v1226_v16 = vld [vmem:[%s1457_s23 + $0x174] sm:$0xf0]  ;;  %v1087_v17 = vld [vmem:[%s1457_s23 + $0xd0] sm:$0xf]  ;;  %v1224_v21 = vld [vmem:[%s1457_s23 + $0x164] sm:$0xf0]  ;;  %v1024_v23 = vor.u32 %v1190_v14, %v1023_v12 }
  0x22   : > { %v1206_v18 = vld [vmem:[%s1457_s23 + $0xd4] sm:$0xf0]  ;;  %v1168_v19 = vor.u32 %v1226_v16, %v1167_v15  ;;  %v1193_v22 = vld [vmem:[%s1457_s23 + $0x74] sm:$0xf]  ;;  %v1015_v24 = vld [vmem:[%s1457_s23 + $0x40] sm:$0xf]  ;;  %v1160_v26 = vor.u32 %v1224_v21, %v1159_v20 }
  0x23   : > { %v1188_v25 = vld [vmem:[%s1457_s23 + $0x44] sm:$0xf0]  ;;  %v1041_v27 = vld [vmem:[%s1457_s23 + $0x78] sm:$0xf0]  ;;  %v1088_v28 = vor.u32 %v1206_v18, %v1087_v17  ;;  %v1079_v29 = vld [vmem:[%s1457_s23 + $0xc0] sm:$0xf] }
  0x24   : > { %704 = vmatpush.bf16.msra.mxu0 %v1032_v11  ;;  %729 = vmatpush.bf16.msra.mxu2 %v1168_v19  ;;  %v1204_v30 = vld [vmem:[%s1457_s23 + $0xc4] sm:$0xf0]  ;;  %v1044_v31 = vor.u32 %v1193_v22, %v1041_v27  ;;  %v1151_v32 = vld [vmem:[%s1457_s23 + $0x150] sm:$0xf]  ;;  %v1222_v33 = vld [vmem:[%s1457_s23 + $0x154] sm:$0xf0]  ;;  %v1016_v37 = vor.u32 %v1188_v25, %v1015_v24 }
  0x25   : > { %717 = vmatpush.bf16.msra.mxu1 %v1096_v13  ;;  %v1191_v34 = vld [vmem:[%s1457_s23 + $0x64] sm:$0xf]  ;;  %v1033_v35 = vld [vmem:[%s1457_s23 + $0x68] sm:$0xf0]  ;;  %v1007_v38 = vld [vmem:[%s1457_s23 + $0x30] sm:$0xf]  ;;  %v1152_v40 = vor.u32 %v1222_v33, %v1151_v32  ;;  %v1080_v42 = vor.u32 %v1204_v30, %v1079_v29 }
  0x26   : > { %742 = vmatpush.bf16.msra.mxu3 %v1044_v31  ;;  %v1036_v36 = vor.u32 %v1191_v34, %v1033_v35  ;;  %v1186_v39 = vld [vmem:[%s1457_s23 + $0x34] sm:$0xf0]  ;;  %v1143_v41 = vld [vmem:[%s1457_s23 + $0x140] sm:$0xf]  ;;  %v1220_v43 = vld [vmem:[%s1457_s23 + $0x144] sm:$0xf0] }
  0x27   : > { %v1189_v44 = vld [vmem:[%s1457_s23 + $0x54] sm:$0xf]  ;;  %v1025_v45 = vld [vmem:[%s1457_s23 + $0x58] sm:$0xf0]  ;;  %v1071_v46 = vld [vmem:[%s1457_s23 + $0xb0] sm:$0xf]  ;;  %v1008_v49 = vor.u32 %v1186_v39, %v1007_v38  ;;  %v1144_v51 = vor.u32 %v1220_v43, %v1143_v41 }
  0x28   : > { %705 = vmatpush.bf16.msra.mxu0 %v1024_v23  ;;  %730 = vmatpush.bf16.msra.mxu2 %v1160_v26  ;;  %v1202_v47 = vld [vmem:[%s1457_s23 + $0xb4] sm:$0xf0]  ;;  %v1028_v48 = vor.u32 %v1189_v44, %v1025_v45  ;;  %v999_v50 = vld [vmem:[%s1457_s23 + $0x20] sm:$0xf]  ;;  %v1187_v52 = vld [vmem:[%s1457_s23 + $0x44] sm:$0xf] }
  0x29   : > { %718 = vmatpush.bf16.msra.mxu1 %v1088_v28  ;;  %v1017_v53 = vld [vmem:[%s1457_s23 + $0x48] sm:$0xf0]  ;;  %v1072_v54 = vor.u32 %v1202_v47, %v1071_v46  ;;  %v1184_v55 = vld [vmem:[%s1457_s23 + $0x24] sm:$0xf0]  ;;  %v1135_v56 = vld [vmem:[%s1457_s23 + $0x130] sm:$0xf] }
  0x2a   : > { %743 = vmatpush.bf16.msra.mxu3 %v1036_v36  ;;  %v1218_v57 = vld [vmem:[%s1457_s23 + $0x134] sm:$0xf0]  ;;  %v1063_v58 = vld [vmem:[%s1457_s23 + $0xa0] sm:$0xf]  ;;  %v1200_v59 = vld [vmem:[%s1457_s23 + $0xa4] sm:$0xf0]  ;;  %v1020_v60 = vor.u32 %v1187_v52, %v1017_v53  ;;  %v1000_v61 = vor.u32 %v1184_v55, %v999_v50 }
  0x2b   : > { %v991_v62 = vld [vmem:[%s1457_s23 + $0x10] sm:$0xf]  ;;  %v1136_v63 = vor.u32 %v1218_v57, %v1135_v56  ;;  %v1185_v0 = vld [vmem:[%s1457_s23 + $0x34] sm:$0xf]  ;;  %v1009_v1 = vld [vmem:[%s1457_s23 + $0x38] sm:$0xf0]  ;;  %v1064_v2 = vor.u32 %v1200_v59, %v1063_v58 }
  0x2c   : > { %706 = vmatpush.bf16.msra.mxu0 %v1016_v37  ;;  %731 = vmatpush.bf16.msra.mxu2 %v1152_v40  ;;  %v1182_v3 = vld [vmem:[%s1457_s23 + $0x14] sm:$0xf0]  ;;  %v1127_v4 = vld [vmem:[%s1457_s23 + $0x120] sm:$0xf]  ;;  %v1216_v5 = vld [vmem:[%s1457_s23 + $0x124] sm:$0xf0]  ;;  %v1012_v10 = vor.u32 %v1185_v0, %v1009_v1 }
  0x2d   : > { %719 = vmatpush.bf16.msra.mxu1 %v1080_v42  ;;  %v1055_v6 = vld [vmem:[%s1457_s23 + $0x90] sm:$0xf]  ;;  %v1198_v7 = vld [vmem:[%s1457_s23 + $0x94] sm:$0xf0]  ;;  %v983_v8 = vld [vmem:[%s1457_s23] sm:$0xf]  ;;  %v992_v11 = vor.u32 %v1182_v3, %v991_v62  ;;  %v1128_v12 = vor.u32 %v1216_v5, %v1127_v4 }
  0x2e   : > { %744 = vmatpush.bf16.msra.mxu3 %v1028_v48  ;;  %v1180_v9 = vld [vmem:[%s1457_s23 + $0x4] sm:$0xf0]  ;;  %v1183_v13 = vld [vmem:[%s1457_s23 + $0x24] sm:$0xf]  ;;  %v1001_v14 = vld [vmem:[%s1457_s23 + $0x28] sm:$0xf0]  ;;  %v1056_v16 = vor.u32 %v1198_v7, %v1055_v6 }
  0x2f   : > { %v402_v15 = vld [vmem:[%s1452_s15] sm:$0xff]  ;;  %v1119_v18 = vld [vmem:[%s1457_s23 + $0x110] sm:$0xf]  ;;  %v1214_v19 = vld [vmem:[%s1457_s23 + $0x114] sm:$0xf0]  ;;  %v1004_v25 = vor.u32 %v1183_v13, %v1001_v14  ;;  %v984_v27 = vor.u32 %v1180_v9, %v983_v8  ;;  %p1173_p10 = scmp.ne.s32.totalorder %s1355_s18, 5 }
  0x30   : > { %707 = vmatpush.bf16.msra.mxu0 %v1008_v49  ;;  %732 = vmatpush.bf16.msra.mxu2 %v1144_v51  ;;  %v1047_v17 = vld [vmem:[%s1457_s23 + $0x80] sm:$0xf]  ;;  %v1196_v20 = vld [vmem:[%s1457_s23 + $0x84] sm:$0xf0]  ;;  %v1209_v21 = vld [vmem:[%s1457_s23 + $0xf4] sm:$0xf]  ;;  %v454_v26 = vunpack.c.l.b16 %v402_v15  ;;  %v1120_v28 = vor.u32 %v1214_v19, %v1119_v18  ;;  %v455_v29 = vunpack.c.h.b16 %v402_v15 }
  0x31   : > { %720 = vmatpush.bf16.msra.mxu1 %v1072_v54  ;;  %v1105_v22 = vld [vmem:[%s1457_s23 + $0xf8] sm:$0xf0]  ;;  %v1225_v23 = vld [vmem:[%s1457_s23 + $0x174] sm:$0xf]  ;;  %v403_v32 = vld [vmem:[%s1452_s15 + $0x8] sm:$0xf]  ;;  %v1048_v33 = vor.u32 %v1196_v20, %v1047_v17 }
  0x32   : > { %745 = vmatpush.bf16.msra.mxu3 %v1020_v60  ;;  %v1169_v24 = vld [vmem:[%s1457_s23 + $0x178] sm:$0xf0]  ;;  %v1181_v30 = vld [vmem:[%s1457_s23 + $0x14] sm:$0xf]  ;;  %v1108_v34 = vor.u32 %v1209_v21, %v1105_v22  ;;  %v1111_v35 = vld [vmem:[%s1457_s23 + $0x100] sm:$0xf]  ;;  %v457_v42 = vpack.c.b16 %v454_v26, %v454_v26  ;;  %v456_v44 = vunpack.c.l.b16 %v403_v32  ;;  %v1532_v45 = vpack.c.b16 %v455_v29, %v455_v29 }
  0x33   : > { %v993_v31 = vld [vmem:[%s1457_s23 + $0x18] sm:$0xf0]  ;;  %v1212_v36 = vld [vmem:[%s1457_s23 + $0x104] sm:$0xf0]  ;;  %v1172_v37 = vor.u32 %v1225_v23, %v1169_v24  ;;  %v1207_v38 = vld [vmem:[%s1457_s23 + $0xe4] sm:$0xf] }
  0x34   : > { %708 = vmatpush.bf16.msra.mxu0 %v1000_v61  ;;  %733 = vmatpush.bf16.msra.mxu2 %v1136_v63  ;;  %v1097_v39 = vld [vmem:[%s1457_s23 + $0xe8] sm:$0xf0]  ;;  %v1223_v40 = vld [vmem:[%s1457_s23 + $0x164] sm:$0xf]  ;;  %v996_v43 = vor.u32 %v1181_v30, %v993_v31  ;;  %v1112_v46 = vor.u32 %v1212_v36, %v1111_v35  ;;  %v1205_v51 = vld [vmem:[%s1457_s23 + $0xd4] sm:$0xf]  ;;  %v459_v55 = vpack.c.b16 %v456_v44, %v456_v44 }
  0x35   : > { %721 = vmatpush.bf16.msra.mxu1 %v1064_v2  ;;  %v1161_v41 = vld [vmem:[%s1457_s23 + $0x168] sm:$0xf0]  ;;  %v1179_v47 = vld [vmem:[%s1457_s23 + $0x4] sm:$0xf]  ;;  %v1100_v49 = vor.u32 %v1207_v38, %v1097_v39  ;;  %v1089_v52 = vld [vmem:[%s1457_s23 + $0xd8] sm:$0xf0] }
  0x36   : > { %746 = vmatpush.bf16.msra.mxu3 %v1012_v10  ;;  %v985_v48 = vld [vmem:[%s1457_s23 + $0x8] sm:$0xf0]  ;;  %v1164_v50 = vor.u32 %v1223_v40, %v1161_v41  ;;  %v1221_v53 = vld [vmem:[%s1457_s23 + $0x154] sm:$0xf]  ;;  %v1153_v54 = vld [vmem:[%s1457_s23 + $0x158] sm:$0xf0]  ;;  %v1092_v57 = vor.u32 %v1205_v51, %v1089_v52 }
  0x37   : > { %v988_v56 = vor.u32 %v1179_v47, %v985_v48  ;;  %v1156_v58 = vor.u32 %v1221_v53, %v1153_v54  ;;  %v1203_v59 = vld [vmem:[%s1457_s23 + $0xc4] sm:$0xf]  ;;  %v1081_v60 = vld [vmem:[%s1457_s23 + $0xc8] sm:$0xf0]  ;;  %v1201_v1 = vld [vmem:[%s1457_s23 + $0xb4] sm:$0xf] }
  0x38   : > { %709 = vmatpush.bf16.msra.mxu0 %v992_v11  ;;  %734 = vmatpush.bf16.msra.mxu2 %v1128_v12  ;;  %v1219_v61 = vld [vmem:[%s1457_s23 + $0x144] sm:$0xf]  ;;  %v1145_v62 = vld [vmem:[%s1457_s23 + $0x148] sm:$0xf0]  ;;  %v1084_v63 = vor.u32 %v1203_v59, %v1081_v60  ;;  %v1073_v2 = vld [vmem:[%s1457_s23 + $0xb8] sm:$0xf0] }
  0x39   : > { %722 = vmatpush.bf16.msra.mxu1 %v1056_v16  ;;  %v1148_v0 = vor.u32 %v1219_v61, %v1145_v62  ;;  %v1217_v3 = vld [vmem:[%s1457_s23 + $0x134] sm:$0xf]  ;;  %v1137_v4 = vld [vmem:[%s1457_s23 + $0x138] sm:$0xf0]  ;;  %v1076_v5 = vor.u32 %v1201_v1, %v1073_v2  ;;  %v1199_v7 = vld [vmem:[%s1457_s23 + $0xa4] sm:$0xf] }
  0x3a   : > { %747 = vmatpush.bf16.msra.mxu3 %v1004_v25  ;;  %v1140_v6 = vor.u32 %v1217_v3, %v1137_v4  ;;  %v1065_v8 = vld [vmem:[%s1457_s23 + $0xa8] sm:$0xf0]  ;;  %v1215_v9 = vld [vmem:[%s1457_s23 + $0x124] sm:$0xf]  ;;  %v1197_v13 = vld [vmem:[%s1457_s23 + $0x94] sm:$0xf] }
  0x3b   : > { %v1129_v10 = vld [vmem:[%s1457_s23 + $0x128] sm:$0xf0]  ;;  %v1068_v11 = vor.u32 %v1199_v7, %v1065_v8  ;;  %v1057_v14 = vld [vmem:[%s1457_s23 + $0x98] sm:$0xf0]  ;;  %v1213_v15 = vld [vmem:[%s1457_s23 + $0x114] sm:$0xf] }
  0x3c   : > { %710 = vmatpush.bf16.msra.mxu0 %v984_v27  ;;  %735 = vmatpush.bf16.msra.mxu2 %v1120_v28  ;;  %v1132_v12 = vor.u32 %v1215_v9, %v1129_v10  ;;  %v1121_v16 = vld [vmem:[%s1457_s23 + $0x118] sm:$0xf0]  ;;  %v1060_v17 = vor.u32 %v1197_v13, %v1057_v14  ;;  %v1195_v19 = vld [vmem:[%s1457_s23 + $0x84] sm:$0xf]  ;;  %v1049_v20 = vld [vmem:[%s1457_s23 + $0x88] sm:$0xf0] }
  0x3d   : > { %723 = vmatpush.bf16.msra.mxu1 %v1048_v33  ;;  %v1124_v18 = vor.u32 %v1213_v15, %v1121_v16  ;;  %v1211_v21 = vld [vmem:[%s1457_s23 + $0x104] sm:$0xf]  ;;  %v1113_v22 = vld [vmem:[%s1457_s23 + $0x108] sm:$0xf0]  ;;  %v1052_v23 = vor.u32 %v1195_v19, %v1049_v20 }
  0x3e   : > { %748 = vmatpush.bf16.msra.mxu3 %v996_v43  ;;  %v1116_v24 = vor.u32 %v1211_v21, %v1113_v22  ;;  %v400_v30 = vld [vmem:[#allocation2] sm:$0xff]  ;;  %v401_v40 = vld [vmem:[#allocation2 + $0x8] sm:$0xff] }
  0x3f   : > { %711 = vmatmul.bf16.vlgmr.msra.gmra.mxu0 %v457_v42 }
  0x40   : > { %755 = vmatpush.bf16.msrb.mxu0 %v1108_v34  ;;  %724 = vmatmul.bf16.vlgmr.msra.gmra.mxu1 %v1532_v45 }
  0x41   : > { %768 = vmatpush.bf16.msrb.mxu1 %v1172_v37  ;;  %736 = vmatpush.bf16.msra.mxu2 %v1112_v46 }
  0x42   : > { %749 = vmatpush.bf16.msra.mxu3 %v988_v56 }
  0x44   : > { %756 = vmatpush.bf16.msrb.mxu0 %v1100_v49  ;;  %737 = vmatmul.bf16.vlgmr.msra.gmra.mxu2 %v459_v55 }
  0x45   : > { %769 = vmatpush.bf16.msrb.mxu1 %v1164_v50  ;;  %750 = vmatmul.bf16.vlgmr.msra.gmra.mxu3 %v457_v42 }
  0x48   : > { %757 = vmatpush.bf16.msrb.mxu0 %v1092_v57 }
  0x49   : > { %770 = vmatpush.bf16.msrb.mxu1 %v1156_v58 }
  0x4c   : > { %758 = vmatpush.bf16.msrb.mxu0 %v1084_v63 }
  0x4d   : > { %771 = vmatpush.bf16.msrb.mxu1 %v1148_v0 }
  0x50   : > { %759 = vmatpush.bf16.msrb.mxu0 %v1076_v5 }
  0x51   : > { %772 = vmatpush.bf16.msrb.mxu1 %v1140_v6 }
  0x54   : > { %760 = vmatpush.bf16.msrb.mxu0 %v1068_v11 }
  0x55   : > { %773 = vmatpush.bf16.msrb.mxu1 %v1132_v12 }
  0x58   : > { %761 = vmatpush.bf16.msrb.mxu0 %v1060_v17 }
  0x59   : > { %774 = vmatpush.bf16.msrb.mxu1 %v1124_v18 }
  0x5c   : > { %762 = vmatpush.bf16.msrb.mxu0 %v1052_v23 }
  0x5d   : > { %775 = vmatpush.bf16.msrb.mxu1 %v1116_v24 }
  0x5f   : > { %763 = vmatmul.bf16.vlgmr.msrb.gmra.mxu0 %v1532_v45 }
  0x60   : > { %776 = vmatmul.bf16.vlgmr.msrb.gmra.mxu1 %v459_v55 }
  0xbc   : > { %v712_v25 = vpop.f32.mrf.mxu0 }
  0xbd   : > { %v725_v26 = vpop.f32.mrf.mxu1 }
  0xbe   : > { %v726_v27 = vadd.f32 %v725_v26, %v712_v25 }
  0xc4   : > { %v714_v28 = vpop.f32.mrf.mxu0 }
  0xc5   : > { %v727_v29 = vpop.f32.mrf.mxu1 }
  0xc7   : > { %v738_v31 = vpop.f32.mrf.mxu2 }
  0xc8   : > { %v739_v32 = vadd.f32 %v738_v31, %v726_v27  ;;  %v751_v34 = vpop.f32.mrf.mxu3 }
  0xca   : > { %v781_v33 = vadd.f32 %v739_v32, %v400_v30 }
  0xcc   : > { %783 = vst [vmem:[#allocation2] sm:$0xff] %v781_v33 }
  0xcf   : > { %v740_v35 = vpop.f32.mrf.mxu2 }
  0xd0   : > { %v753_v36 = vpop.f32.mrf.mxu3 }
  0xdc   : > { %v764_v37 = vpop.f32.mrf.mxu0 }
  0xdd   : > { %v765_v38 = vadd.f32 %v764_v37, %v751_v34  ;;  %v777_v39 = vpop.f32.mrf.mxu1 }
  0xdf   : > { %v778_v41 = vadd.f32 %v777_v39, %v765_v38 }
  0xe1   : > { %v782_v42 = vadd.f32 %v778_v41, %v401_v40  ;;  %788 = sbr.rel (%p1173_p10) target bundleno = 246 (0xf6), region = 56 }
  0xe3   : > { %784 = vst [vmem:[#allocation2 + $0x8] sm:$0xff] %v782_v42 }
  0xe4   : > { %v766_v43 = vpop.f32.mrf.mxu0 }
  0xe5   : > { %v779_v44 = vpop.f32.mrf.mxu1 }
  0xe6   : > { %v789_v45 = vld [vmem:[#allocation2] sm:$0xff]  ;;  %v791_v47 = vld [vmem:[#allocation3] sm:$0x3]  ;;  %v799_v50 = vld [vmem:[#allocation5] sm:$0x3] }
  0xe7   : > { %v793_v48 = vperm.slane %v791_v47, 0  ;;  %v794_v49 = vperm.slane %v791_v47, 1  ;;  %v807_v51 = vld [vmem:[%s1582_s4] sm:$0xff]  ;;  %v801_v52 = vperm.slane %v799_v50, 0  ;;  %v802_v53 = vperm.slane %v799_v50, 1 }
  0xe8   : > { %v808_v56 = vunpack.c.l.bf16 %v807_v51  ;;  %v809_v57 = vunpack.c.h.bf16 %v807_v51 }
  0xe9   : > { %v797_v54 = vmul.f32 %v793_v48, %v789_v45 }
  0xea   : > { %v790_v46 = vld [vmem:[#allocation2 + $0x8] sm:$0xff] }
  0xeb   : > { %v798_v55 = vmul.f32 %v794_v49, %v790_v46  ;;  %v805_v58 = vadd.f32 %v801_v52, %v797_v54 }
  0xed   : > { %v806_v59 = vadd.f32 %v802_v53, %v798_v55  ;;  %v810_v60 = vadd.f32 %v808_v56, %v805_v58 }
  0xef   : > { %v811_v61 = vadd.f32 %v809_v57, %v806_v59  ;;  %v812_v62 = vmax.f32 %v810_v60, 0.0 }
  0xf1   : > { %v813_v63 = vmax.f32 %v811_v61, 0.0 }
  0xf3   : > { %v814_v0 = vpack.c.bf16 %v813_v63, %v812_v62 }
  0xf5   : > { %815 = vst [vmem:[%s1583_s5] sm:$0xff] %v814_v0 }
  0xf6 PF: > { %s17_s20 = sadd.s32 1, %s1363_s20   ;;  %s1586_s18 = smov %s1359_s19 }
  0xf7   : > { %p14_p11 = scmp.ge.s32.totalorder %s17_s20, 8   ;;  %s1587_s19 = smov %s1589_s22 }
  0xf9   :  { %16 = sbr.rel (!%p14_p11) target bundleno = 3 (0x3), region = 95 }
  0xfe   :  { %846 = vsyncpa [#allocation4], 1 }
  0xff   :  { %848 = vsyncpa [#allocation4 + $0x1], 1 }
 0x100   :  { %849 = vsyncpa [#allocation6], 1 }

// kernel: resnet_forward.34
= control target key start
LH: loop header
LB: loop body
LE: loop exit
PB: predicated region body
PF: predicated region fallthrough
CT: control target
= control target key end

     0   :  { %9 = vsyncpa [#allocation4], 0  ;;  %s1480_s0 = inlined_call_operand.vmem [shape: bf16[8,2304], index: 0, kind: input, shape index: {}]   ;;  %s1481_s1 = inlined_call_operand.vmem [shape: bf16[2304,256], index: 1, kind: input, shape index: {}]   ;;  %s1482_s2 = inlined_call_operand.hbm [shape: f32[1,256], index: 2, kind: input, shape index: {}]   ;;  %s1483_s3 = inlined_call_operand.hbm [shape: f32[1,256], index: 3, kind: input, shape index: {}]   ;;  %s1484_s4 = inlined_call_operand.vmem [shape: bf16[8,256], index: 4, kind: output, shape index: {}]  }
   0x1   :  { %10 = vsyncpa [#allocation6], 0  ;;  %s1303_s15 = smov 0   ;;  %s1305_s16 = smov 0  }
   0x2   :  { %s1307_s17 = smov 0  }
   0x3 LB: > { %s879_s18 = sadd.s32 4294967295, %s1273_s17   ;;  %s28_s19 = sadd.s32 1, %s1269_s16  ;;  %s1273_s17 = sphi %s1307_s17, %s16_s17   ;;  %s1269_s16 = sphi %s1305_s16, %s1488_s16   ;;  %s1265_s15 = sphi %s1303_s15, %s1487_s15  }
   0x4   : > { %p29_p0 = scmp.ge.s32.totalorder %s28_s19, 6  ;;  %p880_p1 = scmp.ge.s32.totalorder %s1273_s17, 1 }
   0x5   : > { %p176_p2 = scmp.lt.s32.totalorder %s1273_s17, 7  ;;  %p1328_p4 = scmp.eq.s32.totalorder %s879_s18, 0 }
   0x6   : > { %s1490_s19 = smov (%p29_p0, %s28_s19), 0  ;;  %s190_s24 = sshll.u32 %s1482_s2, 4  ;;  %s191_s24 = int_to_ptr.hbm [resolvable:$true] %s190_s24 }
   0x7   : > { %p1324_p3 = pnand %p880_p1, %p176_p2  ;;  %s1275_s25 = smov [#allocation3]  }
   0x8   : > { %s192_s26 = sshll.u32 %s1275_s25, 4  ;;  %s204_s29 = sshll.u32 %s1483_s3, 4  ;;  %s193_s26 = int_to_ptr.vmem [resolvable:$true] %s192_s26  ;;  %s205_s29 = int_to_ptr.hbm [resolvable:$true] %s204_s29 }
   0x9   : > { %p1145_p5 = pneg %p1324_p3  ;;  %s1276_s30 = smov [#allocation5]  }
   0xa   : > { %s206_s5 = sshll.u32 %s1276_s30, 4  ;;  %247 = sbr.rel (%p1324_p3) target bundleno = 244 (0xf4), region = 36  ;;  %s207_s5 = int_to_ptr.vmem [resolvable:$true] %s206_s5 }
   0xb   : > { %p1146_p6 = pnand %p1328_p4, %p1145_p5 }
   0xd   : > { %1148 = dma.hbm_to_vmem [thread:$0]  (!%p1146_p6), %s191_s24, 32, %s193_s26, [#allocation4]  }
   0xe   : > { %1151 = dma.hbm_to_vmem [thread:$0]  (!%p1146_p6), %s205_s29, 32, %s207_s5, [#allocation6]  }
   0xf   : > { %1256 = dma.done.wait (%p1328_p4), [#allocation4], 32  }
  0x10   : > { %1258 = vsyncadd (%p1328_p4), [#allocation4], 4294967264 }
  0x11   : > { %1260 = dma.done.wait (%p1328_p4), [#allocation6], 32  }
  0x12   : > { %1262 = vsyncadd (%p1328_p4), [#allocation6], 4294967264  ;;  %s297_s6 = smul.u32 3, %s1265_s15  ;;  %p890_p9 = scmp.ne.s32.totalorder %s1265_s15, 0 }
  0x13   : > { %s307_s7 = smul.u32 48, %s1265_s15 }
  0x14   : > { %p300_p7 = scmp.lt.s32.totalorder %s297_s6, 17 }
  0x15   : > { %p309_p8 = scmp.lt.s32.totalorder %s307_s7, 287  ;;  %334 = sbr.rel (%p890_p9) target bundleno = 29 (0x1d), region = 48 }
  0x16   : > { %s1492_s6 = smov (!%p300_p7, %s297_s6), 17 }
  0x17   : > { %s1494_s7 = smov (!%p309_p8, %s307_s7), 287  ;;  %s887_s8 = sshll.u32 %s1492_s6, 2 }
  0x18   : > { %s1357_s11 = scalar_lea.vmem %s1480_s0, %s887_s8  ;;  %s1088_s12 = sshll.u32 %s1494_s7, 3 }
  0x19   : > { %s1362_s18 = scalar_lea.vmem %s1481_s1, %s1088_s12 }
  0x1a   : > { %v1277_v0 = vmov 0.0  }
  0x1b   : > { %335 = vst [vmem:[#allocation2] sm:$0xff] %v1277_v0 }
  0x1c   : > { %336 = vst [vmem:[#allocation2 + $0x8] sm:$0xff] %v1277_v0 }
  0x1d PF: > { %v949_v1 = vld [vmem:[%s1362_s18 + $0x70] sm:$0xf]  ;;  %v1104_v2 = vld [vmem:[%s1362_s18 + $0x74] sm:$0xf0]  ;;  %v941_v6 = vld [vmem:[%s1362_s18 + $0x60] sm:$0xf] }
  0x1e   : > { %v1013_v3 = vld [vmem:[%s1362_s18 + $0xf0] sm:$0xf]  ;;  %v950_v4 = vor.u32 %v1104_v2, %v949_v1  ;;  %v1120_v5 = vld [vmem:[%s1362_s18 + $0xf4] sm:$0xf0]  ;;  %v1102_v7 = vld [vmem:[%s1362_s18 + $0x64] sm:$0xf0] }
  0x1f   : > { %v1014_v8 = vor.u32 %v1120_v5, %v1013_v3  ;;  %v1005_v9 = vld [vmem:[%s1362_s18 + $0xe0] sm:$0xf]  ;;  %v1118_v10 = vld [vmem:[%s1362_s18 + $0xe4] sm:$0xf0]  ;;  %v942_v11 = vor.u32 %v1102_v7, %v941_v6  ;;  %v933_v12 = vld [vmem:[%s1362_s18 + $0x50] sm:$0xf] }
  0x20   : > { %640 = vmatpush.bf16.msra.mxu0 %v950_v4  ;;  %v1006_v13 = vor.u32 %v1118_v10, %v1005_v9  ;;  %v1100_v14 = vld [vmem:[%s1362_s18 + $0x54] sm:$0xf0]  ;;  %v1077_v15 = vld [vmem:[%s1362_s18 + $0x170] sm:$0xf]  ;;  %v1069_v20 = vld [vmem:[%s1362_s18 + $0x160] sm:$0xf] }
  0x21   : > { %653 = vmatpush.bf16.msra.mxu1 %v1014_v8  ;;  %v1136_v16 = vld [vmem:[%s1362_s18 + $0x174] sm:$0xf0]  ;;  %v997_v17 = vld [vmem:[%s1362_s18 + $0xd0] sm:$0xf]  ;;  %v1134_v21 = vld [vmem:[%s1362_s18 + $0x164] sm:$0xf0]  ;;  %v934_v23 = vor.u32 %v1100_v14, %v933_v12 }
  0x22   : > { %v1116_v18 = vld [vmem:[%s1362_s18 + $0xd4] sm:$0xf0]  ;;  %v1078_v19 = vor.u32 %v1136_v16, %v1077_v15  ;;  %v1103_v22 = vld [vmem:[%s1362_s18 + $0x74] sm:$0xf]  ;;  %v925_v24 = vld [vmem:[%s1362_s18 + $0x40] sm:$0xf]  ;;  %v1070_v26 = vor.u32 %v1134_v21, %v1069_v20 }
  0x23   : > { %v1098_v25 = vld [vmem:[%s1362_s18 + $0x44] sm:$0xf0]  ;;  %v951_v27 = vld [vmem:[%s1362_s18 + $0x78] sm:$0xf0]  ;;  %v998_v28 = vor.u32 %v1116_v18, %v997_v17  ;;  %v989_v29 = vld [vmem:[%s1362_s18 + $0xc0] sm:$0xf] }
  0x24   : > { %641 = vmatpush.bf16.msra.mxu0 %v942_v11  ;;  %666 = vmatpush.bf16.msra.mxu2 %v1078_v19  ;;  %v1114_v30 = vld [vmem:[%s1362_s18 + $0xc4] sm:$0xf0]  ;;  %v954_v31 = vor.u32 %v1103_v22, %v951_v27  ;;  %v1061_v32 = vld [vmem:[%s1362_s18 + $0x150] sm:$0xf]  ;;  %v1132_v33 = vld [vmem:[%s1362_s18 + $0x154] sm:$0xf0]  ;;  %v926_v37 = vor.u32 %v1098_v25, %v925_v24 }
  0x25   : > { %654 = vmatpush.bf16.msra.mxu1 %v1006_v13  ;;  %v1101_v34 = vld [vmem:[%s1362_s18 + $0x64] sm:$0xf]  ;;  %v943_v35 = vld [vmem:[%s1362_s18 + $0x68] sm:$0xf0]  ;;  %v917_v38 = vld [vmem:[%s1362_s18 + $0x30] sm:$0xf]  ;;  %v1062_v40 = vor.u32 %v1132_v33, %v1061_v32  ;;  %v990_v42 = vor.u32 %v1114_v30, %v989_v29 }
  0x26   : > { %679 = vmatpush.bf16.msra.mxu3 %v954_v31  ;;  %v946_v36 = vor.u32 %v1101_v34, %v943_v35  ;;  %v1096_v39 = vld [vmem:[%s1362_s18 + $0x34] sm:$0xf0]  ;;  %v1053_v41 = vld [vmem:[%s1362_s18 + $0x140] sm:$0xf]  ;;  %v1130_v43 = vld [vmem:[%s1362_s18 + $0x144] sm:$0xf0] }
  0x27   : > { %v1099_v44 = vld [vmem:[%s1362_s18 + $0x54] sm:$0xf]  ;;  %v935_v45 = vld [vmem:[%s1362_s18 + $0x58] sm:$0xf0]  ;;  %v981_v46 = vld [vmem:[%s1362_s18 + $0xb0] sm:$0xf]  ;;  %v918_v49 = vor.u32 %v1096_v39, %v917_v38  ;;  %v1054_v51 = vor.u32 %v1130_v43, %v1053_v41 }
  0x28   : > { %642 = vmatpush.bf16.msra.mxu0 %v934_v23  ;;  %667 = vmatpush.bf16.msra.mxu2 %v1070_v26  ;;  %v1112_v47 = vld [vmem:[%s1362_s18 + $0xb4] sm:$0xf0]  ;;  %v938_v48 = vor.u32 %v1099_v44, %v935_v45  ;;  %v909_v50 = vld [vmem:[%s1362_s18 + $0x20] sm:$0xf]  ;;  %v1097_v52 = vld [vmem:[%s1362_s18 + $0x44] sm:$0xf] }
  0x29   : > { %655 = vmatpush.bf16.msra.mxu1 %v998_v28  ;;  %v927_v53 = vld [vmem:[%s1362_s18 + $0x48] sm:$0xf0]  ;;  %v982_v54 = vor.u32 %v1112_v47, %v981_v46  ;;  %v1094_v55 = vld [vmem:[%s1362_s18 + $0x24] sm:$0xf0]  ;;  %v1045_v56 = vld [vmem:[%s1362_s18 + $0x130] sm:$0xf] }
  0x2a   : > { %680 = vmatpush.bf16.msra.mxu3 %v946_v36  ;;  %v1128_v57 = vld [vmem:[%s1362_s18 + $0x134] sm:$0xf0]  ;;  %v973_v58 = vld [vmem:[%s1362_s18 + $0xa0] sm:$0xf]  ;;  %v1110_v59 = vld [vmem:[%s1362_s18 + $0xa4] sm:$0xf0]  ;;  %v930_v60 = vor.u32 %v1097_v52, %v927_v53  ;;  %v910_v61 = vor.u32 %v1094_v55, %v909_v50 }
  0x2b   : > { %v901_v62 = vld [vmem:[%s1362_s18 + $0x10] sm:$0xf]  ;;  %v1046_v63 = vor.u32 %v1128_v57, %v1045_v56  ;;  %v1095_v0 = vld [vmem:[%s1362_s18 + $0x34] sm:$0xf]  ;;  %v919_v1 = vld [vmem:[%s1362_s18 + $0x38] sm:$0xf0]  ;;  %v974_v2 = vor.u32 %v1110_v59, %v973_v58 }
  0x2c   : > { %643 = vmatpush.bf16.msra.mxu0 %v926_v37  ;;  %668 = vmatpush.bf16.msra.mxu2 %v1062_v40  ;;  %v1092_v3 = vld [vmem:[%s1362_s18 + $0x14] sm:$0xf0]  ;;  %v1037_v4 = vld [vmem:[%s1362_s18 + $0x120] sm:$0xf]  ;;  %v1126_v5 = vld [vmem:[%s1362_s18 + $0x124] sm:$0xf0]  ;;  %v922_v10 = vor.u32 %v1095_v0, %v919_v1 }
  0x2d   : > { %656 = vmatpush.bf16.msra.mxu1 %v990_v42  ;;  %v965_v6 = vld [vmem:[%s1362_s18 + $0x90] sm:$0xf]  ;;  %v1108_v7 = vld [vmem:[%s1362_s18 + $0x94] sm:$0xf0]  ;;  %v893_v8 = vld [vmem:[%s1362_s18] sm:$0xf]  ;;  %v902_v11 = vor.u32 %v1092_v3, %v901_v62  ;;  %v1038_v12 = vor.u32 %v1126_v5, %v1037_v4 }
  0x2e   : > { %681 = vmatpush.bf16.msra.mxu3 %v938_v48  ;;  %v1090_v9 = vld [vmem:[%s1362_s18 + $0x4] sm:$0xf0]  ;;  %v1093_v13 = vld [vmem:[%s1362_s18 + $0x24] sm:$0xf]  ;;  %v911_v14 = vld [vmem:[%s1362_s18 + $0x28] sm:$0xf0]  ;;  %v966_v16 = vor.u32 %v1108_v7, %v965_v6 }
  0x2f   : > { %v339_v15 = vld [vmem:[%s1357_s11] sm:$0xff]  ;;  %v1029_v18 = vld [vmem:[%s1362_s18 + $0x110] sm:$0xf]  ;;  %v1124_v19 = vld [vmem:[%s1362_s18 + $0x114] sm:$0xf0]  ;;  %v914_v25 = vor.u32 %v1093_v13, %v911_v14  ;;  %v894_v27 = vor.u32 %v1090_v9, %v893_v8  ;;  %p1083_p10 = scmp.ne.s32.totalorder %s1265_s15, 5 }
  0x30   : > { %644 = vmatpush.bf16.msra.mxu0 %v918_v49  ;;  %669 = vmatpush.bf16.msra.mxu2 %v1054_v51  ;;  %v957_v17 = vld [vmem:[%s1362_s18 + $0x80] sm:$0xf]  ;;  %v1106_v20 = vld [vmem:[%s1362_s18 + $0x84] sm:$0xf0]  ;;  %v1119_v21 = vld [vmem:[%s1362_s18 + $0xf4] sm:$0xf]  ;;  %v391_v26 = vunpack.c.l.b16 %v339_v15  ;;  %v1030_v28 = vor.u32 %v1124_v19, %v1029_v18  ;;  %v392_v29 = vunpack.c.h.b16 %v339_v15 }
  0x31   : > { %657 = vmatpush.bf16.msra.mxu1 %v982_v54  ;;  %v1015_v22 = vld [vmem:[%s1362_s18 + $0xf8] sm:$0xf0]  ;;  %v1135_v23 = vld [vmem:[%s1362_s18 + $0x174] sm:$0xf]  ;;  %v340_v32 = vld [vmem:[%s1357_s11 + $0x8] sm:$0xf]  ;;  %v958_v33 = vor.u32 %v1106_v20, %v957_v17 }
  0x32   : > { %682 = vmatpush.bf16.msra.mxu3 %v930_v60  ;;  %v1079_v24 = vld [vmem:[%s1362_s18 + $0x178] sm:$0xf0]  ;;  %v1091_v30 = vld [vmem:[%s1362_s18 + $0x14] sm:$0xf]  ;;  %v1018_v34 = vor.u32 %v1119_v21, %v1015_v22  ;;  %v1021_v35 = vld [vmem:[%s1362_s18 + $0x100] sm:$0xf]  ;;  %v394_v42 = vpack.c.b16 %v391_v26, %v391_v26  ;;  %v393_v44 = vunpack.c.l.b16 %v340_v32  ;;  %v1437_v45 = vpack.c.b16 %v392_v29, %v392_v29 }
  0x33   : > { %v903_v31 = vld [vmem:[%s1362_s18 + $0x18] sm:$0xf0]  ;;  %v1122_v36 = vld [vmem:[%s1362_s18 + $0x104] sm:$0xf0]  ;;  %v1082_v37 = vor.u32 %v1135_v23, %v1079_v24  ;;  %v1117_v38 = vld [vmem:[%s1362_s18 + $0xe4] sm:$0xf] }
  0x34   : > { %645 = vmatpush.bf16.msra.mxu0 %v910_v61  ;;  %670 = vmatpush.bf16.msra.mxu2 %v1046_v63  ;;  %v1007_v39 = vld [vmem:[%s1362_s18 + $0xe8] sm:$0xf0]  ;;  %v1133_v40 = vld [vmem:[%s1362_s18 + $0x164] sm:$0xf]  ;;  %v906_v43 = vor.u32 %v1091_v30, %v903_v31  ;;  %v1022_v46 = vor.u32 %v1122_v36, %v1021_v35  ;;  %v1115_v51 = vld [vmem:[%s1362_s18 + $0xd4] sm:$0xf]  ;;  %v396_v55 = vpack.c.b16 %v393_v44, %v393_v44 }
  0x35   : > { %658 = vmatpush.bf16.msra.mxu1 %v974_v2  ;;  %v1071_v41 = vld [vmem:[%s1362_s18 + $0x168] sm:$0xf0]  ;;  %v1089_v47 = vld [vmem:[%s1362_s18 + $0x4] sm:$0xf]  ;;  %v1010_v49 = vor.u32 %v1117_v38, %v1007_v39  ;;  %v999_v52 = vld [vmem:[%s1362_s18 + $0xd8] sm:$0xf0] }
  0x36   : > { %683 = vmatpush.bf16.msra.mxu3 %v922_v10  ;;  %v895_v48 = vld [vmem:[%s1362_s18 + $0x8] sm:$0xf0]  ;;  %v1074_v50 = vor.u32 %v1133_v40, %v1071_v41  ;;  %v1131_v53 = vld [vmem:[%s1362_s18 + $0x154] sm:$0xf]  ;;  %v1063_v54 = vld [vmem:[%s1362_s18 + $0x158] sm:$0xf0]  ;;  %v1002_v57 = vor.u32 %v1115_v51, %v999_v52 }
  0x37   : > { %v898_v56 = vor.u32 %v1089_v47, %v895_v48  ;;  %v1066_v58 = vor.u32 %v1131_v53, %v1063_v54  ;;  %v1113_v59 = vld [vmem:[%s1362_s18 + $0xc4] sm:$0xf]  ;;  %v991_v60 = vld [vmem:[%s1362_s18 + $0xc8] sm:$0xf0]  ;;  %v1111_v1 = vld [vmem:[%s1362_s18 + $0xb4] sm:$0xf] }
  0x38   : > { %646 = vmatpush.bf16.msra.mxu0 %v902_v11  ;;  %671 = vmatpush.bf16.msra.mxu2 %v1038_v12  ;;  %v1129_v61 = vld [vmem:[%s1362_s18 + $0x144] sm:$0xf]  ;;  %v1055_v62 = vld [vmem:[%s1362_s18 + $0x148] sm:$0xf0]  ;;  %v994_v63 = vor.u32 %v1113_v59, %v991_v60  ;;  %v983_v2 = vld [vmem:[%s1362_s18 + $0xb8] sm:$0xf0] }
  0x39   : > { %659 = vmatpush.bf16.msra.mxu1 %v966_v16  ;;  %v1058_v0 = vor.u32 %v1129_v61, %v1055_v62  ;;  %v1127_v3 = vld [vmem:[%s1362_s18 + $0x134] sm:$0xf]  ;;  %v1047_v4 = vld [vmem:[%s1362_s18 + $0x138] sm:$0xf0]  ;;  %v986_v5 = vor.u32 %v1111_v1, %v983_v2  ;;  %v1109_v7 = vld [vmem:[%s1362_s18 + $0xa4] sm:$0xf] }
  0x3a   : > { %684 = vmatpush.bf16.msra.mxu3 %v914_v25  ;;  %v1050_v6 = vor.u32 %v1127_v3, %v1047_v4  ;;  %v975_v8 = vld [vmem:[%s1362_s18 + $0xa8] sm:$0xf0]  ;;  %v1125_v9 = vld [vmem:[%s1362_s18 + $0x124] sm:$0xf]  ;;  %v1107_v13 = vld [vmem:[%s1362_s18 + $0x94] sm:$0xf] }
  0x3b   : > { %v1039_v10 = vld [vmem:[%s1362_s18 + $0x128] sm:$0xf0]  ;;  %v978_v11 = vor.u32 %v1109_v7, %v975_v8  ;;  %v967_v14 = vld [vmem:[%s1362_s18 + $0x98] sm:$0xf0]  ;;  %v1123_v15 = vld [vmem:[%s1362_s18 + $0x114] sm:$0xf] }
  0x3c   : > { %647 = vmatpush.bf16.msra.mxu0 %v894_v27  ;;  %672 = vmatpush.bf16.msra.mxu2 %v1030_v28  ;;  %v1042_v12 = vor.u32 %v1125_v9, %v1039_v10  ;;  %v1031_v16 = vld [vmem:[%s1362_s18 + $0x118] sm:$0xf0]  ;;  %v970_v17 = vor.u32 %v1107_v13, %v967_v14  ;;  %v1105_v19 = vld [vmem:[%s1362_s18 + $0x84] sm:$0xf]  ;;  %v959_v20 = vld [vmem:[%s1362_s18 + $0x88] sm:$0xf0] }
  0x3d   : > { %660 = vmatpush.bf16.msra.mxu1 %v958_v33  ;;  %v1034_v18 = vor.u32 %v1123_v15, %v1031_v16  ;;  %v1121_v21 = vld [vmem:[%s1362_s18 + $0x104] sm:$0xf]  ;;  %v1023_v22 = vld [vmem:[%s1362_s18 + $0x108] sm:$0xf0]  ;;  %v962_v23 = vor.u32 %v1105_v19, %v959_v20 }
  0x3e   : > { %685 = vmatpush.bf16.msra.mxu3 %v906_v43  ;;  %v1026_v24 = vor.u32 %v1121_v21, %v1023_v22  ;;  %v337_v30 = vld [vmem:[#allocation2] sm:$0xff]  ;;  %v338_v40 = vld [vmem:[#allocation2 + $0x8] sm:$0xff] }
  0x3f   : > { %648 = vmatmul.bf16.vlgmr.msra.gmra.mxu0 %v394_v42 }
  0x40   : > { %692 = vmatpush.bf16.msrb.mxu0 %v1018_v34  ;;  %661 = vmatmul.bf16.vlgmr.msra.gmra.mxu1 %v1437_v45 }
  0x41   : > { %705 = vmatpush.bf16.msrb.mxu1 %v1082_v37  ;;  %673 = vmatpush.bf16.msra.mxu2 %v1022_v46 }
  0x42   : > { %686 = vmatpush.bf16.msra.mxu3 %v898_v56 }
  0x44   : > { %693 = vmatpush.bf16.msrb.mxu0 %v1010_v49  ;;  %674 = vmatmul.bf16.vlgmr.msra.gmra.mxu2 %v396_v55 }
  0x45   : > { %706 = vmatpush.bf16.msrb.mxu1 %v1074_v50  ;;  %687 = vmatmul.bf16.vlgmr.msra.gmra.mxu3 %v394_v42 }
  0x48   : > { %694 = vmatpush.bf16.msrb.mxu0 %v1002_v57 }
  0x49   : > { %707 = vmatpush.bf16.msrb.mxu1 %v1066_v58 }
  0x4c   : > { %695 = vmatpush.bf16.msrb.mxu0 %v994_v63 }
  0x4d   : > { %708 = vmatpush.bf16.msrb.mxu1 %v1058_v0 }
  0x50   : > { %696 = vmatpush.bf16.msrb.mxu0 %v986_v5 }
  0x51   : > { %709 = vmatpush.bf16.msrb.mxu1 %v1050_v6 }
  0x54   : > { %697 = vmatpush.bf16.msrb.mxu0 %v978_v11 }
  0x55   : > { %710 = vmatpush.bf16.msrb.mxu1 %v1042_v12 }
  0x58   : > { %698 = vmatpush.bf16.msrb.mxu0 %v970_v17 }
  0x59   : > { %711 = vmatpush.bf16.msrb.mxu1 %v1034_v18 }
  0x5c   : > { %699 = vmatpush.bf16.msrb.mxu0 %v962_v23 }
  0x5d   : > { %712 = vmatpush.bf16.msrb.mxu1 %v1026_v24 }
  0x5f   : > { %700 = vmatmul.bf16.vlgmr.msrb.gmra.mxu0 %v1437_v45 }
  0x60   : > { %713 = vmatmul.bf16.vlgmr.msrb.gmra.mxu1 %v396_v55 }
  0xbc   : > { %v649_v25 = vpop.f32.mrf.mxu0 }
  0xbd   : > { %v662_v26 = vpop.f32.mrf.mxu1 }
  0xbe   : > { %v663_v27 = vadd.f32 %v662_v26, %v649_v25 }
  0xc4   : > { %v651_v28 = vpop.f32.mrf.mxu0 }
  0xc5   : > { %v664_v29 = vpop.f32.mrf.mxu1 }
  0xc7   : > { %v675_v31 = vpop.f32.mrf.mxu2 }
  0xc8   : > { %v676_v32 = vadd.f32 %v675_v31, %v663_v27  ;;  %v688_v34 = vpop.f32.mrf.mxu3 }
  0xca   : > { %v718_v33 = vadd.f32 %v676_v32, %v337_v30 }
  0xcc   : > { %720 = vst [vmem:[#allocation2] sm:$0xff] %v718_v33 }
  0xcf   : > { %v677_v35 = vpop.f32.mrf.mxu2 }
  0xd0   : > { %v690_v36 = vpop.f32.mrf.mxu3 }
  0xdc   : > { %v701_v37 = vpop.f32.mrf.mxu0 }
  0xdd   : > { %v702_v38 = vadd.f32 %v701_v37, %v688_v34  ;;  %v714_v39 = vpop.f32.mrf.mxu1 }
  0xdf   : > { %v715_v41 = vadd.f32 %v714_v39, %v702_v38 }
  0xe1   : > { %v719_v42 = vadd.f32 %v715_v41, %v338_v40  ;;  %725 = sbr.rel (%p1083_p10) target bundleno = 244 (0xf4), region = 52 }
  0xe3   : > { %721 = vst [vmem:[#allocation2 + $0x8] sm:$0xff] %v719_v42 }
  0xe4   : > { %v703_v43 = vpop.f32.mrf.mxu0 }
  0xe5   : > { %v716_v44 = vpop.f32.mrf.mxu1 }
  0xe6   : > { %v726_v45 = vld [vmem:[#allocation2] sm:$0xff]  ;;  %v728_v47 = vld [vmem:[#allocation3] sm:$0x3]  ;;  %v736_v50 = vld [vmem:[#allocation5] sm:$0x3] }
  0xe7   : > { %v730_v48 = vperm.slane %v728_v47, 0  ;;  %v731_v49 = vperm.slane %v728_v47, 1  ;;  %v738_v51 = vperm.slane %v736_v50, 0  ;;  %v739_v52 = vperm.slane %v736_v50, 1 }
  0xe9   : > { %v734_v53 = vmul.f32 %v730_v48, %v726_v45 }
  0xea   : > { %v727_v46 = vld [vmem:[#allocation2 + $0x8] sm:$0xff] }
  0xeb   : > { %v735_v54 = vmul.f32 %v731_v49, %v727_v46  ;;  %v742_v55 = vadd.f32 %v738_v51, %v734_v53 }
  0xed   : > { %v743_v56 = vadd.f32 %v739_v52, %v735_v54  ;;  %v744_v57 = vmax.f32 %v742_v55, 0.0 }
  0xef   : > { %v745_v58 = vmax.f32 %v743_v56, 0.0 }
  0xf1   : > { %v746_v59 = vpack.c.bf16 %v745_v58, %v744_v57 }
  0xf3   : > { %747 = vst [vmem:[%s1484_s4] sm:$0xff] %v746_v59 }
  0xf4 PF: > { %s16_s17 = sadd.s32 1, %s1273_s17   ;;  %s1487_s15 = smov %s1269_s16 }
  0xf5   : > { %p13_p11 = scmp.ge.s32.totalorder %s16_s17, 8   ;;  %s1488_s16 = smov %s1490_s19 }
  0xf7   :  { %15 = sbr.rel (!%p13_p11) target bundleno = 3 (0x3), region = 88 }
  0xfc   :  { %778 = vsyncpa [#allocation4], 1 }
  0xfd   :  { %780 = vsyncpa [#allocation4 + $0x1], 1 }
  0xfe   :  { %781 = vsyncpa [#allocation6], 1 }

// kernel: resnet_forward.37
= control target key start
LH: loop header
LB: loop body
LE: loop exit
PB: predicated region body
PF: predicated region fallthrough
CT: control target
= control target key end

     0   :  { %s1481_s15 = smov 0   ;;  %s1483_s16 = smov 0   ;;  %s1805_s0 = inlined_call_operand.vmem [shape: bf16[8,2304], index: 0, kind: input, shape index: {}]   ;;  %s1806_s1 = inlined_call_operand.vmem [shape: bf16[2304,512], index: 1, kind: input, shape index: {}]   ;;  %s1807_s2 = inlined_call_operand.vmem [shape: f32[1,512], index: 2, kind: input, shape index: {}]   ;;  %s1808_s3 = inlined_call_operand.vmem [shape: f32[1,512], index: 3, kind: input, shape index: {}]   ;;  %s1809_s4 = inlined_call_operand.vmem [shape: bf16[8,512], index: 4, kind: output, shape index: {}]  }
   0x1   :  { %s1485_s17 = smov 0   ;;  %s1487_s18 = smov 0  }
   0x2   :  { %s1489_s19 = smov 0   ;;  %s1491_s20 = smov 0  }
   0x3   :  { %s1493_s21 = smov 0  }
   0x4 LB: > { %s26_s22 = sadd.s32 1, %s1445_s19  ;;  %s29_s23 = sadd.s32 1, %s1449_s20  ;;  %s1453_s21 = sphi %s1493_s21, %s14_s21   ;;  %s1449_s20 = sphi %s1491_s20, %s1815_s20   ;;  %s1445_s19 = sphi %s1489_s19, %s1814_s19   ;;  %s1441_s18 = sphi %s1487_s18, %s1813_s18   ;;  %s1437_s17 = sphi %s1485_s17, %s1812_s17   ;;  %s1433_s16 = sphi %s1483_s16, %s1811_s16   ;;  %s1429_s15 = sphi %s1481_s15, %s1810_s15  }
   0x5   : > { %p27_p0 = scmp.ge.s32.totalorder %s26_s22, 6  ;;  %p77_p1 = scmp.ne.s32.totalorder %s1433_s16, %s1429_s15 }
   0x6   : > { %p78_p2 = scmp.eq.s32.totalorder %s1453_s21, 0  ;;  %s70_s27 = sadd.s32 1, %s1433_s16 }
   0x7   : > { %s1817_s22 = smov (%p27_p0, %s26_s22), 0  ;;  %s1819_s23 = smov (!%p27_p0, %s29_s23), %s1449_s20 }
   0x8   : > { %p79_p3 = por %p78_p2, %p77_p1  ;;  %p31_p4 = scmp.ge.s32.totalorder %s1819_s23, 2 }
   0x9   : > { %s65_s24 = ssub.s32 %s1445_s19, %s1817_s22  ;;  %p1085_p6 = scmp.ge.s32.totalorder %s1453_s21, 12 }
   0xa   : > { %s1821_s23 = smov (%p31_p4, %s1819_s23), 0 }
   0xb   : > { %s66_s25 = ssub.s32 %s1449_s20, %s1821_s23  ;;  %183 = sbr.rel (%p1085_p6) target bundleno = 72 (0x48), region = 16 }
   0xc   : > { %s67_s26 = sor.u32 %s66_s25, %s65_s24 }
   0xd   : > { %p68_p5 = scmp.eq.s32.totalorder %s67_s26, 0 }
   0xf   : > { %s1532_s28 = scalar_select %p68_p5, %s1433_s16, %s70_s27  }
  0x10   : > { %199 = sbr.rel (!%p79_p3) target bundleno = 72 (0x48), region = 24  ;;  %s201_s29 = sand.u32 (%p79_p3), 1, %s1433_s16  }
  0x11   : > { %s1340_s30 = smul.u32 (%p79_p3), 384, %s201_s29  ;;  %s1086_s5 = sshll.u32 (%p79_p3), %s1449_s20, 1 }
  0x12   : > { %s1291_s6 = smul.u32 (%p79_p3), 192, %s1445_s19 }
  0x13   : > { %s1546_s12 = scalar_lea.vmem (%p79_p3), [#allocation3], %s1340_s30 }
  0x14   : > { %s207_s7 = sadd.s32 (%p79_p3), %s1291_s6, %s1086_s5 }
  0x15   : > { %s1088_s8 = sshll.u32 %s207_s7, 2 }
  0x16   : > { %s1541_s11 = scalar_lea.vmem %s1806_s1, %s1088_s8 }
  0x17   : > { %v332_v0 = vld [vmem:[%s1541_s11] sm:$0xff]  ;;  %v334_v1 = vld [vmem:[%s1541_s11 + $0x10] sm:$0xff] }
  0x18   : > { %v336_v2 = vld [vmem:[%s1541_s11 + $0x20] sm:$0xff]  ;;  %333 = vst [vmem:[%s1546_s12] sm:$0xff] %v332_v0  ;;  %v338_v3 = vld [vmem:[%s1541_s11 + $0x30] sm:$0xff] }
  0x19   : > { %335 = vst [vmem:[%s1546_s12 + $0x8] sm:$0xff] %v334_v1  ;;  %v340_v4 = vld [vmem:[%s1541_s11 + $0x40] sm:$0xff]  ;;  %v342_v5 = vld [vmem:[%s1541_s11 + $0x50] sm:$0xff] }
  0x1a   : > { %337 = vst [vmem:[%s1546_s12 + $0x10] sm:$0xff] %v336_v2  ;;  %v344_v6 = vld [vmem:[%s1541_s11 + $0x60] sm:$0xff]  ;;  %v346_v7 = vld [vmem:[%s1541_s11 + $0x70] sm:$0xff] }
  0x1b   : > { %339 = vst [vmem:[%s1546_s12 + $0x18] sm:$0xff] %v338_v3  ;;  %v348_v8 = vld [vmem:[%s1541_s11 + $0x80] sm:$0xff]  ;;  %v350_v9 = vld [vmem:[%s1541_s11 + $0x90] sm:$0xff] }
  0x1c   : > { %341 = vst [vmem:[%s1546_s12 + $0x20] sm:$0xff] %v340_v4  ;;  %v352_v10 = vld [vmem:[%s1541_s11 + $0xa0] sm:$0xff]  ;;  %v354_v11 = vld [vmem:[%s1541_s11 + $0xb0] sm:$0xff] }
  0x1d   : > { %343 = vst [vmem:[%s1546_s12 + $0x28] sm:$0xff] %v342_v5  ;;  %v356_v12 = vld [vmem:[%s1541_s11 + $0xc0] sm:$0xff]  ;;  %v358_v13 = vld [vmem:[%s1541_s11 + $0xd0] sm:$0xff] }
  0x1e   : > { %345 = vst [vmem:[%s1546_s12 + $0x30] sm:$0xff] %v344_v6  ;;  %v360_v14 = vld [vmem:[%s1541_s11 + $0xe0] sm:$0xff]  ;;  %v362_v15 = vld [vmem:[%s1541_s11 + $0xf0] sm:$0xff] }
  0x1f   : > { %347 = vst [vmem:[%s1546_s12 + $0x38] sm:$0xff] %v346_v7  ;;  %v364_v16 = vld [vmem:[%s1541_s11 + $0x100] sm:$0xff]  ;;  %v366_v17 = vld [vmem:[%s1541_s11 + $0x110] sm:$0xff] }
  0x20   : > { %349 = vst [vmem:[%s1546_s12 + $0x40] sm:$0xff] %v348_v8  ;;  %v368_v18 = vld [vmem:[%s1541_s11 + $0x120] sm:$0xff]  ;;  %v370_v19 = vld [vmem:[%s1541_s11 + $0x130] sm:$0xff] }
  0x21   : > { %351 = vst [vmem:[%s1546_s12 + $0x48] sm:$0xff] %v350_v9  ;;  %v372_v20 = vld [vmem:[%s1541_s11 + $0x140] sm:$0xff]  ;;  %v374_v21 = vld [vmem:[%s1541_s11 + $0x150] sm:$0xff] }
  0x22   : > { %353 = vst [vmem:[%s1546_s12 + $0x50] sm:$0xff] %v352_v10  ;;  %v376_v22 = vld [vmem:[%s1541_s11 + $0x160] sm:$0xff]  ;;  %v378_v23 = vld [vmem:[%s1541_s11 + $0x170] sm:$0xff] }
  0x23   : > { %355 = vst [vmem:[%s1546_s12 + $0x58] sm:$0xff] %v354_v11  ;;  %v380_v24 = vld [vmem:[%s1541_s11 + $0x180] sm:$0xff]  ;;  %v382_v25 = vld [vmem:[%s1541_s11 + $0x190] sm:$0xff] }
  0x24   : > { %357 = vst [vmem:[%s1546_s12 + $0x60] sm:$0xff] %v356_v12  ;;  %v384_v26 = vld [vmem:[%s1541_s11 + $0x1a0] sm:$0xff]  ;;  %v386_v27 = vld [vmem:[%s1541_s11 + $0x1b0] sm:$0xff] }
  0x25   : > { %359 = vst [vmem:[%s1546_s12 + $0x68] sm:$0xff] %v358_v13  ;;  %v388_v28 = vld [vmem:[%s1541_s11 + $0x1c0] sm:$0xff]  ;;  %v390_v29 = vld [vmem:[%s1541_s11 + $0x1d0] sm:$0xff] }
  0x26   : > { %361 = vst [vmem:[%s1546_s12 + $0x70] sm:$0xff] %v360_v14  ;;  %v392_v30 = vld [vmem:[%s1541_s11 + $0x1e0] sm:$0xff]  ;;  %v394_v31 = vld [vmem:[%s1541_s11 + $0x1f0] sm:$0xff] }
  0x27   : > { %363 = vst [vmem:[%s1546_s12 + $0x78] sm:$0xff] %v362_v15  ;;  %v396_v32 = vld [vmem:[%s1541_s11 + $0x200] sm:$0xff]  ;;  %v398_v33 = vld [vmem:[%s1541_s11 + $0x210] sm:$0xff] }
  0x28   : > { %365 = vst [vmem:[%s1546_s12 + $0x80] sm:$0xff] %v364_v16  ;;  %v400_v34 = vld [vmem:[%s1541_s11 + $0x220] sm:$0xff]  ;;  %v402_v35 = vld [vmem:[%s1541_s11 + $0x230] sm:$0xff] }
  0x29   : > { %367 = vst [vmem:[%s1546_s12 + $0x88] sm:$0xff] %v366_v17  ;;  %v404_v36 = vld [vmem:[%s1541_s11 + $0x240] sm:$0xff]  ;;  %v406_v37 = vld [vmem:[%s1541_s11 + $0x250] sm:$0xff] }
  0x2a   : > { %369 = vst [vmem:[%s1546_s12 + $0x90] sm:$0xff] %v368_v18  ;;  %v408_v38 = vld [vmem:[%s1541_s11 + $0x260] sm:$0xff]  ;;  %v410_v39 = vld [vmem:[%s1541_s11 + $0x270] sm:$0xff] }
  0x2b   : > { %371 = vst [vmem:[%s1546_s12 + $0x98] sm:$0xff] %v370_v19  ;;  %v412_v40 = vld [vmem:[%s1541_s11 + $0x280] sm:$0xff]  ;;  %v414_v41 = vld [vmem:[%s1541_s11 + $0x290] sm:$0xff] }
  0x2c   : > { %373 = vst [vmem:[%s1546_s12 + $0xa0] sm:$0xff] %v372_v20  ;;  %v416_v42 = vld [vmem:[%s1541_s11 + $0x2a0] sm:$0xff]  ;;  %v418_v43 = vld [vmem:[%s1541_s11 + $0x2b0] sm:$0xff] }
  0x2d   : > { %375 = vst [vmem:[%s1546_s12 + $0xa8] sm:$0xff] %v374_v21  ;;  %v420_v44 = vld [vmem:[%s1541_s11 + $0x2c0] sm:$0xff]  ;;  %v422_v45 = vld [vmem:[%s1541_s11 + $0x2d0] sm:$0xff] }
  0x2e   : > { %377 = vst [vmem:[%s1546_s12 + $0xb0] sm:$0xff] %v376_v22  ;;  %v424_v46 = vld [vmem:[%s1541_s11 + $0x2e0] sm:$0xff]  ;;  %v426_v47 = vld [vmem:[%s1541_s11 + $0x2f0] sm:$0xff] }
  0x2f   : > { %379 = vst [vmem:[%s1546_s12 + $0xb8] sm:$0xff] %v378_v23 }
  0x30   : > { %381 = vst [vmem:[%s1546_s12 + $0xc0] sm:$0xff] %v380_v24 }
  0x31   : > { %383 = vst [vmem:[%s1546_s12 + $0xc8] sm:$0xff] %v382_v25 }
  0x32   : > { %385 = vst [vmem:[%s1546_s12 + $0xd0] sm:$0xff] %v384_v26 }
  0x33   : > { %387 = vst [vmem:[%s1546_s12 + $0xd8] sm:$0xff] %v386_v27 }
  0x34   : > { %389 = vst [vmem:[%s1546_s12 + $0xe0] sm:$0xff] %v388_v28 }
  0x35   : > { %391 = vst [vmem:[%s1546_s12 + $0xe8] sm:$0xff] %v390_v29 }
  0x36   : > { %393 = vst [vmem:[%s1546_s12 + $0xf0] sm:$0xff] %v392_v30 }
  0x37   : > { %395 = vst [vmem:[%s1546_s12 + $0xf8] sm:$0xff] %v394_v31 }
  0x38   : > { %397 = vst [vmem:[%s1546_s12 + $0x100] sm:$0xff] %v396_v32 }
  0x39   : > { %399 = vst [vmem:[%s1546_s12 + $0x108] sm:$0xff] %v398_v33 }
  0x3a   : > { %401 = vst [vmem:[%s1546_s12 + $0x110] sm:$0xff] %v400_v34 }
  0x3b   : > { %403 = vst [vmem:[%s1546_s12 + $0x118] sm:$0xff] %v402_v35 }
  0x3c   : > { %405 = vst [vmem:[%s1546_s12 + $0x120] sm:$0xff] %v404_v36 }
  0x3d   : > { %407 = vst [vmem:[%s1546_s12 + $0x128] sm:$0xff] %v406_v37 }
  0x3e   : > { %409 = vst [vmem:[%s1546_s12 + $0x130] sm:$0xff] %v408_v38 }
  0x3f   : > { %411 = vst [vmem:[%s1546_s12 + $0x138] sm:$0xff] %v410_v39 }
  0x40   : > { %413 = vst [vmem:[%s1546_s12 + $0x140] sm:$0xff] %v412_v40 }
  0x41   : > { %415 = vst [vmem:[%s1546_s12 + $0x148] sm:$0xff] %v414_v41 }
  0x42   : > { %417 = vst [vmem:[%s1546_s12 + $0x150] sm:$0xff] %v416_v42 }
  0x43   : > { %419 = vst [vmem:[%s1546_s12 + $0x158] sm:$0xff] %v418_v43 }
  0x44   : > { %421 = vst [vmem:[%s1546_s12 + $0x160] sm:$0xff] %v420_v44 }
  0x45   : > { %423 = vst [vmem:[%s1546_s12 + $0x168] sm:$0xff] %v422_v45 }
  0x46   : > { %425 = vst [vmem:[%s1546_s12 + $0x170] sm:$0xff] %v424_v46 }
  0x47   : > { %427 = vst [vmem:[%s1546_s12 + $0x178] sm:$0xff] %v426_v47 }
  0x48 PF: > { %p1089_p7 = scmp.ge.s32.totalorder %s1453_s21, 1  ;;  %p448_p8 = scmp.lt.s32.totalorder %s1453_s21, 13 }
  0x4a   : > { %p449_p9 = pnand %p1089_p7, %p448_p8 }
  0x4b   : > { %s455_s13 = sand.u32 (!%p449_p9), 1, %s1429_s15   ;;  %s501_s14 = smul.u32 (!%p449_p9), 3, %s1437_s17 }
  0x4c   : > { %452 = sbr.rel (%p449_p9) target bundleno = 307 (0x133), region = 70  ;;  %s1091_s25 = sshll.u32 (!%p449_p9), %s1441_s18, 1 }
  0x4d   : > { %s1341_s24 = smul.u32 (!%p449_p9), 384, %s455_s13  ;;  %p504_p10 = scmp.lt.s32.totalorder (!%p449_p9), %s501_s14, 17 }
  0x4e   : > { %p514_p11 = scmp.lt.s32.totalorder (!%p449_p9), %s1091_s25, 3  ;;  %p1095_p12 = scmp.ne.s32.totalorder (!%p449_p9), %s1437_s17, 0 }
  0x4f   : > { %s1667_s13 = scalar_lea.vmem (!%p449_p9), [#allocation3], %s1341_s24 }
  0x51   : > { %s1823_s14 = smov (!%p504_p10, %s501_s14), 17  ;;  %s1825_s25 = smov (!%p514_p11, %s1091_s25), 3 }
  0x52   : > { %s1090_s26 = sshll.u32 %s1823_s14, 2  ;;  %s516_s15 = scalar_lea.vmem %s1807_s2, %s1825_s25 }
  0x53   : > { %s1651_s30 = scalar_lea.vmem %s1805_s0, %s1090_s26  ;;  %s521_s8 = scalar_lea.vmem %s1808_s3, %s1825_s25 }
  0x54   : > { %s1094_s9 = sshll.u32 %s1825_s25, 2  ;;  %536 = sbr.rel (%p1095_p12) target bundleno = 92 (0x5c), region = 78 }
  0x55   : > { %s1665_s12 = scalar_lea.vmem %s1809_s4, %s1094_s9 }
  0x59   : > { %v1455_v48 = vmov 0.0  }
  0x5a   : > { %537 = vst [vmem:[#allocation2] sm:$0xff] %v1455_v48 }
  0x5b   : > { %538 = vst [vmem:[#allocation2 + $0x8] sm:$0xff] %v1455_v48 }
  0x5c PF: > { %v1154_v49 = vld [vmem:[%s1667_s13 + $0x70] sm:$0xf]  ;;  %v1307_v50 = vld [vmem:[%s1667_s13 + $0x74] sm:$0xf0]  ;;  %v1146_v54 = vld [vmem:[%s1667_s13 + $0x60] sm:$0xf] }
  0x5d   : > { %v1218_v51 = vld [vmem:[%s1667_s13 + $0xf0] sm:$0xf]  ;;  %v1155_v52 = vor.u32 %v1307_v50, %v1154_v49  ;;  %v1323_v53 = vld [vmem:[%s1667_s13 + $0xf4] sm:$0xf0]  ;;  %v1305_v55 = vld [vmem:[%s1667_s13 + $0x64] sm:$0xf0] }
  0x5e   : > { %v1219_v56 = vor.u32 %v1323_v53, %v1218_v51  ;;  %v1210_v57 = vld [vmem:[%s1667_s13 + $0xe0] sm:$0xf]  ;;  %v1321_v58 = vld [vmem:[%s1667_s13 + $0xe4] sm:$0xf0]  ;;  %v1147_v59 = vor.u32 %v1305_v55, %v1146_v54  ;;  %v1138_v60 = vld [vmem:[%s1667_s13 + $0x50] sm:$0xf] }
  0x5f   : > { %842 = vmatpush.bf16.msra.mxu0 %v1155_v52  ;;  %v1211_v61 = vor.u32 %v1321_v58, %v1210_v57  ;;  %v1303_v62 = vld [vmem:[%s1667_s13 + $0x54] sm:$0xf0]  ;;  %v1282_v63 = vld [vmem:[%s1667_s13 + $0x170] sm:$0xf]  ;;  %v1274_v4 = vld [vmem:[%s1667_s13 + $0x160] sm:$0xf] }
  0x60   : > { %855 = vmatpush.bf16.msra.mxu1 %v1219_v56  ;;  %v1339_v0 = vld [vmem:[%s1667_s13 + $0x174] sm:$0xf0]  ;;  %v1202_v1 = vld [vmem:[%s1667_s13 + $0xd0] sm:$0xf]  ;;  %v1337_v5 = vld [vmem:[%s1667_s13 + $0x164] sm:$0xf0]  ;;  %v1139_v7 = vor.u32 %v1303_v62, %v1138_v60 }
  0x61   : > { %v1319_v2 = vld [vmem:[%s1667_s13 + $0xd4] sm:$0xf0]  ;;  %v1283_v3 = vor.u32 %v1339_v0, %v1282_v63  ;;  %v1306_v6 = vld [vmem:[%s1667_s13 + $0x74] sm:$0xf]  ;;  %v1130_v8 = vld [vmem:[%s1667_s13 + $0x40] sm:$0xf]  ;;  %v1275_v10 = vor.u32 %v1337_v5, %v1274_v4 }
  0x62   : > { %v1301_v9 = vld [vmem:[%s1667_s13 + $0x44] sm:$0xf0]  ;;  %v1156_v11 = vld [vmem:[%s1667_s13 + $0x78] sm:$0xf0]  ;;  %v1203_v12 = vor.u32 %v1319_v2, %v1202_v1  ;;  %v1194_v13 = vld [vmem:[%s1667_s13 + $0xc0] sm:$0xf] }
  0x63   : > { %843 = vmatpush.bf16.msra.mxu0 %v1147_v59  ;;  %868 = vmatpush.bf16.msra.mxu2 %v1283_v3  ;;  %v1317_v14 = vld [vmem:[%s1667_s13 + $0xc4] sm:$0xf0]  ;;  %v1159_v15 = vor.u32 %v1306_v6, %v1156_v11  ;;  %v1266_v16 = vld [vmem:[%s1667_s13 + $0x150] sm:$0xf]  ;;  %v1335_v17 = vld [vmem:[%s1667_s13 + $0x154] sm:$0xf0]  ;;  %v1131_v21 = vor.u32 %v1301_v9, %v1130_v8 }
  0x64   : > { %856 = vmatpush.bf16.msra.mxu1 %v1211_v61  ;;  %v1304_v18 = vld [vmem:[%s1667_s13 + $0x64] sm:$0xf]  ;;  %v1148_v19 = vld [vmem:[%s1667_s13 + $0x68] sm:$0xf0]  ;;  %v1122_v22 = vld [vmem:[%s1667_s13 + $0x30] sm:$0xf]  ;;  %v1267_v24 = vor.u32 %v1335_v17, %v1266_v16  ;;  %v1195_v26 = vor.u32 %v1317_v14, %v1194_v13 }
  0x65   : > { %881 = vmatpush.bf16.msra.mxu3 %v1159_v15  ;;  %v1151_v20 = vor.u32 %v1304_v18, %v1148_v19  ;;  %v1299_v23 = vld [vmem:[%s1667_s13 + $0x34] sm:$0xf0]  ;;  %v1258_v25 = vld [vmem:[%s1667_s13 + $0x140] sm:$0xf]  ;;  %v1333_v27 = vld [vmem:[%s1667_s13 + $0x144] sm:$0xf0] }
  0x66   : > { %v1302_v28 = vld [vmem:[%s1667_s13 + $0x54] sm:$0xf]  ;;  %v1140_v29 = vld [vmem:[%s1667_s13 + $0x58] sm:$0xf0]  ;;  %v1186_v30 = vld [vmem:[%s1667_s13 + $0xb0] sm:$0xf]  ;;  %v1123_v33 = vor.u32 %v1299_v23, %v1122_v22  ;;  %v1259_v35 = vor.u32 %v1333_v27, %v1258_v25 }
  0x67   : > { %844 = vmatpush.bf16.msra.mxu0 %v1139_v7  ;;  %869 = vmatpush.bf16.msra.mxu2 %v1275_v10  ;;  %v1315_v31 = vld [vmem:[%s1667_s13 + $0xb4] sm:$0xf0]  ;;  %v1143_v32 = vor.u32 %v1302_v28, %v1140_v29  ;;  %v1114_v34 = vld [vmem:[%s1667_s13 + $0x20] sm:$0xf]  ;;  %v1300_v36 = vld [vmem:[%s1667_s13 + $0x44] sm:$0xf] }
  0x68   : > { %857 = vmatpush.bf16.msra.mxu1 %v1203_v12  ;;  %v1132_v37 = vld [vmem:[%s1667_s13 + $0x48] sm:$0xf0]  ;;  %v1187_v38 = vor.u32 %v1315_v31, %v1186_v30  ;;  %v1297_v39 = vld [vmem:[%s1667_s13 + $0x24] sm:$0xf0]  ;;  %v1250_v40 = vld [vmem:[%s1667_s13 + $0x130] sm:$0xf] }
  0x69   : > { %882 = vmatpush.bf16.msra.mxu3 %v1151_v20  ;;  %v1331_v41 = vld [vmem:[%s1667_s13 + $0x134] sm:$0xf0]  ;;  %v1178_v42 = vld [vmem:[%s1667_s13 + $0xa0] sm:$0xf]  ;;  %v1313_v43 = vld [vmem:[%s1667_s13 + $0xa4] sm:$0xf0]  ;;  %v1135_v44 = vor.u32 %v1300_v36, %v1132_v37  ;;  %v1115_v45 = vor.u32 %v1297_v39, %v1114_v34 }
  0x6a   : > { %v1106_v46 = vld [vmem:[%s1667_s13 + $0x10] sm:$0xf]  ;;  %v1251_v47 = vor.u32 %v1331_v41, %v1250_v40  ;;  %v1298_v48 = vld [vmem:[%s1667_s13 + $0x34] sm:$0xf]  ;;  %v1124_v49 = vld [vmem:[%s1667_s13 + $0x38] sm:$0xf0]  ;;  %v1179_v50 = vor.u32 %v1313_v43, %v1178_v42 }
  0x6b   : > { %845 = vmatpush.bf16.msra.mxu0 %v1131_v21  ;;  %870 = vmatpush.bf16.msra.mxu2 %v1267_v24  ;;  %v1295_v51 = vld [vmem:[%s1667_s13 + $0x14] sm:$0xf0]  ;;  %v1242_v52 = vld [vmem:[%s1667_s13 + $0x120] sm:$0xf]  ;;  %v1329_v53 = vld [vmem:[%s1667_s13 + $0x124] sm:$0xf0]  ;;  %v1127_v58 = vor.u32 %v1298_v48, %v1124_v49 }
  0x6c   : > { %858 = vmatpush.bf16.msra.mxu1 %v1195_v26  ;;  %v1170_v54 = vld [vmem:[%s1667_s13 + $0x90] sm:$0xf]  ;;  %v1311_v55 = vld [vmem:[%s1667_s13 + $0x94] sm:$0xf0]  ;;  %v1098_v56 = vld [vmem:[%s1667_s13] sm:$0xf]  ;;  %v1107_v59 = vor.u32 %v1295_v51, %v1106_v46  ;;  %v1243_v60 = vor.u32 %v1329_v53, %v1242_v52 }
  0x6d   : > { %883 = vmatpush.bf16.msra.mxu3 %v1143_v32  ;;  %v1293_v57 = vld [vmem:[%s1667_s13 + $0x4] sm:$0xf0]  ;;  %v1296_v61 = vld [vmem:[%s1667_s13 + $0x24] sm:$0xf]  ;;  %v1116_v62 = vld [vmem:[%s1667_s13 + $0x28] sm:$0xf0]  ;;  %v1171_v0 = vor.u32 %v1311_v55, %v1170_v54 }
  0x6e   : > { %v541_v63 = vld [vmem:[%s1651_s30] sm:$0xff]  ;;  %v1162_v1 = vld [vmem:[%s1667_s13 + $0x80] sm:$0xf]  ;;  %v1327_v3 = vld [vmem:[%s1667_s13 + $0x114] sm:$0xf0]  ;;  %v1119_v9 = vor.u32 %v1296_v61, %v1116_v62  ;;  %v1099_v11 = vor.u32 %v1293_v57, %v1098_v56  ;;  %p1288_p13 = scmp.ne.s32.totalorder %s1437_s17, 5 }
  0x6f   : > { %846 = vmatpush.bf16.msra.mxu0 %v1123_v33  ;;  %871 = vmatpush.bf16.msra.mxu2 %v1259_v35  ;;  %v1234_v2 = vld [vmem:[%s1667_s13 + $0x110] sm:$0xf]  ;;  %v1309_v4 = vld [vmem:[%s1667_s13 + $0x84] sm:$0xf0]  ;;  %v1322_v5 = vld [vmem:[%s1667_s13 + $0xf4] sm:$0xf]  ;;  %v593_v10 = vunpack.c.l.b16 %v541_v63  ;;  %v594_v13 = vunpack.c.h.b16 %v541_v63 }
  0x70   : > { %859 = vmatpush.bf16.msra.mxu1 %v1187_v38  ;;  %v1220_v6 = vld [vmem:[%s1667_s13 + $0xf8] sm:$0xf0]  ;;  %v1338_v7 = vld [vmem:[%s1667_s13 + $0x174] sm:$0xf]  ;;  %v1235_v12 = vor.u32 %v1327_v3, %v1234_v2  ;;  %v542_v16 = vld [vmem:[%s1651_s30 + $0x8] sm:$0xf]  ;;  %v1163_v17 = vor.u32 %v1309_v4, %v1162_v1 }
  0x71   : > { %884 = vmatpush.bf16.msra.mxu3 %v1135_v44  ;;  %v1284_v8 = vld [vmem:[%s1667_s13 + $0x178] sm:$0xf0]  ;;  %v1294_v14 = vld [vmem:[%s1667_s13 + $0x14] sm:$0xf]  ;;  %v1223_v18 = vor.u32 %v1322_v5, %v1220_v6  ;;  %v1226_v19 = vld [vmem:[%s1667_s13 + $0x100] sm:$0xf]  ;;  %v596_v26 = vpack.c.b16 %v593_v10, %v593_v10  ;;  %v595_v28 = vunpack.c.l.b16 %v542_v16  ;;  %v1742_v29 = vpack.c.b16 %v594_v13, %v594_v13 }
  0x72   : > { %v1108_v15 = vld [vmem:[%s1667_s13 + $0x18] sm:$0xf0]  ;;  %v1325_v20 = vld [vmem:[%s1667_s13 + $0x104] sm:$0xf0]  ;;  %v1287_v21 = vor.u32 %v1338_v7, %v1284_v8  ;;  %v1320_v22 = vld [vmem:[%s1667_s13 + $0xe4] sm:$0xf] }
  0x73   : > { %847 = vmatpush.bf16.msra.mxu0 %v1115_v45  ;;  %872 = vmatpush.bf16.msra.mxu2 %v1251_v47  ;;  %v1212_v23 = vld [vmem:[%s1667_s13 + $0xe8] sm:$0xf0]  ;;  %v1336_v24 = vld [vmem:[%s1667_s13 + $0x164] sm:$0xf]  ;;  %v1111_v27 = vor.u32 %v1294_v14, %v1108_v15  ;;  %v1227_v30 = vor.u32 %v1325_v20, %v1226_v19  ;;  %v1318_v35 = vld [vmem:[%s1667_s13 + $0xd4] sm:$0xf]  ;;  %v598_v39 = vpack.c.b16 %v595_v28, %v595_v28 }
  0x74   : > { %860 = vmatpush.bf16.msra.mxu1 %v1179_v50  ;;  %v1276_v25 = vld [vmem:[%s1667_s13 + $0x168] sm:$0xf0]  ;;  %v1292_v31 = vld [vmem:[%s1667_s13 + $0x4] sm:$0xf]  ;;  %v1215_v33 = vor.u32 %v1320_v22, %v1212_v23  ;;  %v1204_v36 = vld [vmem:[%s1667_s13 + $0xd8] sm:$0xf0] }
  0x75   : > { %885 = vmatpush.bf16.msra.mxu3 %v1127_v58  ;;  %v1100_v32 = vld [vmem:[%s1667_s13 + $0x8] sm:$0xf0]  ;;  %v1279_v34 = vor.u32 %v1336_v24, %v1276_v25  ;;  %v1334_v37 = vld [vmem:[%s1667_s13 + $0x154] sm:$0xf]  ;;  %v1268_v38 = vld [vmem:[%s1667_s13 + $0x158] sm:$0xf0]  ;;  %v1207_v41 = vor.u32 %v1318_v35, %v1204_v36 }
  0x76   : > { %v1103_v40 = vor.u32 %v1292_v31, %v1100_v32  ;;  %v1271_v42 = vor.u32 %v1334_v37, %v1268_v38  ;;  %v1316_v43 = vld [vmem:[%s1667_s13 + $0xc4] sm:$0xf]  ;;  %v1196_v44 = vld [vmem:[%s1667_s13 + $0xc8] sm:$0xf0]  ;;  %v1314_v49 = vld [vmem:[%s1667_s13 + $0xb4] sm:$0xf] }
  0x77   : > { %848 = vmatpush.bf16.msra.mxu0 %v1107_v59  ;;  %873 = vmatpush.bf16.msra.mxu2 %v1243_v60  ;;  %v1332_v45 = vld [vmem:[%s1667_s13 + $0x144] sm:$0xf]  ;;  %v1260_v46 = vld [vmem:[%s1667_s13 + $0x148] sm:$0xf0]  ;;  %v1199_v47 = vor.u32 %v1316_v43, %v1196_v44  ;;  %v1188_v50 = vld [vmem:[%s1667_s13 + $0xb8] sm:$0xf0] }
  0x78   : > { %861 = vmatpush.bf16.msra.mxu1 %v1171_v0  ;;  %v1263_v48 = vor.u32 %v1332_v45, %v1260_v46  ;;  %v1330_v51 = vld [vmem:[%s1667_s13 + $0x134] sm:$0xf]  ;;  %v1252_v52 = vld [vmem:[%s1667_s13 + $0x138] sm:$0xf0]  ;;  %v1191_v53 = vor.u32 %v1314_v49, %v1188_v50  ;;  %v1312_v55 = vld [vmem:[%s1667_s13 + $0xa4] sm:$0xf] }
  0x79   : > { %886 = vmatpush.bf16.msra.mxu3 %v1119_v9  ;;  %v1255_v54 = vor.u32 %v1330_v51, %v1252_v52  ;;  %v1180_v56 = vld [vmem:[%s1667_s13 + $0xa8] sm:$0xf0]  ;;  %v1328_v57 = vld [vmem:[%s1667_s13 + $0x124] sm:$0xf]  ;;  %v1310_v61 = vld [vmem:[%s1667_s13 + $0x94] sm:$0xf] }
  0x7a   : > { %v1244_v58 = vld [vmem:[%s1667_s13 + $0x128] sm:$0xf0]  ;;  %v1183_v59 = vor.u32 %v1312_v55, %v1180_v56  ;;  %v1172_v62 = vld [vmem:[%s1667_s13 + $0x98] sm:$0xf0]  ;;  %v1326_v63 = vld [vmem:[%s1667_s13 + $0x114] sm:$0xf] }
  0x7b   : > { %849 = vmatpush.bf16.msra.mxu0 %v1099_v11  ;;  %874 = vmatpush.bf16.msra.mxu2 %v1235_v12  ;;  %v1247_v60 = vor.u32 %v1328_v57, %v1244_v58  ;;  %v1236_v0 = vld [vmem:[%s1667_s13 + $0x118] sm:$0xf0]  ;;  %v1175_v1 = vor.u32 %v1310_v61, %v1172_v62  ;;  %v1308_v3 = vld [vmem:[%s1667_s13 + $0x84] sm:$0xf]  ;;  %v1164_v4 = vld [vmem:[%s1667_s13 + $0x88] sm:$0xf0] }
  0x7c   : > { %862 = vmatpush.bf16.msra.mxu1 %v1163_v17  ;;  %v1239_v2 = vor.u32 %v1326_v63, %v1236_v0  ;;  %v1324_v5 = vld [vmem:[%s1667_s13 + $0x104] sm:$0xf]  ;;  %v1228_v6 = vld [vmem:[%s1667_s13 + $0x108] sm:$0xf0]  ;;  %v1167_v7 = vor.u32 %v1308_v3, %v1164_v4  ;;  %v539_v14 = vld [vmem:[#allocation2] sm:$0xff] }
  0x7d   : > { %887 = vmatpush.bf16.msra.mxu3 %v1111_v27  ;;  %v1231_v8 = vor.u32 %v1324_v5, %v1228_v6  ;;  %v540_v24 = vld [vmem:[#allocation2 + $0x8] sm:$0xff] }
  0x7e   : > { %850 = vmatmul.bf16.vlgmr.msra.gmra.mxu0 %v596_v26 }
  0x7f   : > { %894 = vmatpush.bf16.msrb.mxu0 %v1223_v18  ;;  %863 = vmatmul.bf16.vlgmr.msra.gmra.mxu1 %v1742_v29 }
  0x80   : > { %907 = vmatpush.bf16.msrb.mxu1 %v1287_v21  ;;  %875 = vmatpush.bf16.msra.mxu2 %v1227_v30 }
  0x81   : > { %888 = vmatpush.bf16.msra.mxu3 %v1103_v40 }
  0x83   : > { %895 = vmatpush.bf16.msrb.mxu0 %v1215_v33  ;;  %876 = vmatmul.bf16.vlgmr.msra.gmra.mxu2 %v598_v39 }
  0x84   : > { %908 = vmatpush.bf16.msrb.mxu1 %v1279_v34  ;;  %889 = vmatmul.bf16.vlgmr.msra.gmra.mxu3 %v596_v26 }
  0x87   : > { %896 = vmatpush.bf16.msrb.mxu0 %v1207_v41 }
  0x88   : > { %909 = vmatpush.bf16.msrb.mxu1 %v1271_v42 }
  0x8b   : > { %897 = vmatpush.bf16.msrb.mxu0 %v1199_v47 }
  0x8c   : > { %910 = vmatpush.bf16.msrb.mxu1 %v1263_v48 }
  0x8f   : > { %898 = vmatpush.bf16.msrb.mxu0 %v1191_v53 }
  0x90   : > { %911 = vmatpush.bf16.msrb.mxu1 %v1255_v54 }
  0x93   : > { %899 = vmatpush.bf16.msrb.mxu0 %v1183_v59 }
  0x94   : > { %912 = vmatpush.bf16.msrb.mxu1 %v1247_v60 }
  0x97   : > { %900 = vmatpush.bf16.msrb.mxu0 %v1175_v1 }
  0x98   : > { %913 = vmatpush.bf16.msrb.mxu1 %v1239_v2 }
  0x9b   : > { %901 = vmatpush.bf16.msrb.mxu0 %v1167_v7 }
  0x9c   : > { %914 = vmatpush.bf16.msrb.mxu1 %v1231_v8 }
  0x9e   : > { %902 = vmatmul.bf16.vlgmr.msrb.gmra.mxu0 %v1742_v29 }
  0x9f   : > { %915 = vmatmul.bf16.vlgmr.msrb.gmra.mxu1 %v598_v39 }
  0xfb   : > { %v851_v9 = vpop.f32.mrf.mxu0 }
  0xfc   : > { %v864_v10 = vpop.f32.mrf.mxu1 }
  0xfd   : > { %v865_v11 = vadd.f32 %v864_v10, %v851_v9 }
 0x103   : > { %v853_v12 = vpop.f32.mrf.mxu0 }
 0x104   : > { %v866_v13 = vpop.f32.mrf.mxu1 }
 0x106   : > { %v877_v15 = vpop.f32.mrf.mxu2 }
 0x107   : > { %v878_v16 = vadd.f32 %v877_v15, %v865_v11  ;;  %v890_v18 = vpop.f32.mrf.mxu3 }
 0x109   : > { %v920_v17 = vadd.f32 %v878_v16, %v539_v14 }
 0x10b   : > { %922 = vst [vmem:[#allocation2] sm:$0xff] %v920_v17 }
 0x10e   : > { %v879_v19 = vpop.f32.mrf.mxu2 }
 0x10f   : > { %v892_v20 = vpop.f32.mrf.mxu3 }
 0x11b   : > { %v903_v21 = vpop.f32.mrf.mxu0 }
 0x11c   : > { %v904_v22 = vadd.f32 %v903_v21, %v890_v18  ;;  %v916_v23 = vpop.f32.mrf.mxu1 }
 0x11e   : > { %v917_v25 = vadd.f32 %v916_v23, %v904_v22 }
 0x120   : > { %v921_v26 = vadd.f32 %v917_v25, %v540_v24  ;;  %927 = sbr.rel (%p1288_p13) target bundleno = 307 (0x133), region = 82 }
 0x122   : > { %923 = vst [vmem:[#allocation2 + $0x8] sm:$0xff] %v921_v26 }
 0x123   : > { %v905_v27 = vpop.f32.mrf.mxu0 }
 0x124   : > { %v918_v28 = vpop.f32.mrf.mxu1 }
 0x125   : > { %v928_v29 = vld [vmem:[#allocation2] sm:$0xff] }
 0x126   : > { %v930_v31 = vld [vmem:[%s516_s15] sm:$0x3] }
 0x127   : > { %v932_v32 = vperm.slane %v930_v31, 0  ;;  %v933_v33 = vperm.slane %v930_v31, 1  ;;  %v938_v34 = vld [vmem:[%s521_s8] sm:$0x3] }
 0x128   : > { %v940_v35 = vperm.slane %v938_v34, 0  ;;  %v941_v36 = vperm.slane %v938_v34, 1 }
 0x129   : > { %v929_v30 = vld [vmem:[#allocation2 + $0x8] sm:$0xff]  ;;  %v936_v37 = vmul.f32 %v932_v32, %v928_v29 }
 0x12a   : > { %v937_v38 = vmul.f32 %v933_v33, %v929_v30 }
 0x12b   : > { %v944_v39 = vadd.f32 %v940_v35, %v936_v37 }
 0x12c   : > { %v945_v40 = vadd.f32 %v941_v36, %v937_v38 }
 0x12d   : > { %v946_v41 = vmax.f32 %v944_v39, 0.0 }
 0x12e   : > { %v947_v42 = vmax.f32 %v945_v40, 0.0 }
 0x130   : > { %v948_v43 = vpack.c.bf16 %v947_v42, %v946_v41 }
 0x132   : > { %949 = vst [vmem:[%s1665_s12] sm:$0xff] %v948_v43 }
 0x133 PF: > { %s14_s21 = sadd.s32 1, %s1453_s21   ;;  %s1810_s15 = smov %s1433_s16 }
 0x134   : > { %p11_p0 = scmp.ge.s32.totalorder %s14_s21, 14   ;;  %s1811_s16 = smov %s1532_s28 }
 0x135   : > { %s1812_s17 = smov %s1445_s19  ;;  %s1813_s18 = smov %s1449_s20 }
 0x136   : > { %s1814_s19 = smov %s1817_s22  ;;  %s1815_s20 = smov %s1821_s23 }
 0x137   :  { %13 = sbr.rel (!%p11_p0) target bundleno = 4 (0x4), region = 126 }

// kernel: resnet_forward.36
= control target key start
LH: loop header
LB: loop body
LE: loop exit
PB: predicated region body
PF: predicated region fallthrough
CT: control target
= control target key end

     0   :  { %s1170_s15 = smov 0   ;;  %s1172_s16 = smov 0   ;;  %s1378_s0 = inlined_call_operand.vmem [shape: bf16[8,256], index: 0, kind: input, shape index: {}]   ;;  %s1379_s1 = inlined_call_operand.vmem [shape: bf16[256,512], index: 1, kind: input, shape index: {}]   ;;  %s1380_s2 = inlined_call_operand.vmem [shape: f32[1,512], index: 2, kind: input, shape index: {}]   ;;  %s1381_s3 = inlined_call_operand.vmem [shape: f32[1,512], index: 3, kind: input, shape index: {}]   ;;  %s1382_s4 = inlined_call_operand.vmem [shape: bf16[8,512], index: 4, kind: output, shape index: {}]  }
   0x1   :  { %s1174_s17 = smov 0   ;;  %s1176_s18 = smov 0  }
   0x2   :  { %s1178_s19 = smov 0  }
   0x3 LB: > { %s29_s20 = sadd.s32 1, %s1139_s18  ;;  %p77_p1 = scmp.ne.s32.totalorder %s1131_s16, %s1127_s15  ;;  %s1143_s19 = sphi %s1178_s19, %s14_s19   ;;  %s1139_s18 = sphi %s1176_s18, %s1386_s18   ;;  %s1135_s17 = sphi %s1174_s17, %s1385_s17   ;;  %s1131_s16 = sphi %s1172_s16, %s1384_s16   ;;  %s1127_s15 = sphi %s1170_s15, %s1383_s15  }
   0x4   : > { %p31_p0 = scmp.ge.s32.totalorder %s29_s20, 2  ;;  %p78_p2 = scmp.eq.s32.totalorder %s1143_s19, 0 }
   0x5   : > { %s70_s22 = sadd.s32 1, %s1131_s16  ;;  %p892_p5 = scmp.ge.s32.totalorder %s1143_s19, 2 }
   0x6   : > { %s1388_s20 = smov (%p31_p0, %s29_s20), 0  ;;  %p79_p3 = por %p78_p2, %p77_p1 }
   0x7   : > { %s66_s21 = ssub.s32 %s1139_s18, %s1388_s20  ;;  %196 = sbr.rel (%p892_p5) target bundleno = 48 (0x30), region = 20 }
   0x8   : > { %p68_p4 = scmp.eq.s32.totalorder %s66_s21, 0 }
   0xa   : > { %s1205_s23 = scalar_select %p68_p4, %s1131_s16, %s70_s22  }
   0xc   : > { %199 = sbr.rel (!%p79_p3) target bundleno = 48 (0x30), region = 24  ;;  %s201_s24 = sand.u32 (%p79_p3), 1, %s1131_s16  }
   0xd   : > { %s1032_s25 = sshll.u32 (%p79_p3), %s1139_s18, 3  ;;  %s893_s26 = sshll.u32 (%p79_p3), %s201_s24, 8 }
   0xe   : > { %s1213_s29 = scalar_lea.vmem (%p79_p3), %s1379_s1, %s1032_s25  ;;  %s1218_s30 = scalar_lea.vmem (%p79_p3), [#allocation3], %s893_s26 }
   0xf   : > { %v300_v0 = vld [vmem:[%s1213_s29] sm:$0xff] (%p79_p3)  ;;  %v302_v1 = vld [vmem:[%s1213_s29 + $0x10] sm:$0xff] (%p79_p3) }
  0x10   : > { %v304_v2 = vld [vmem:[%s1213_s29 + $0x20] sm:$0xff] (%p79_p3)  ;;  %301 = vst [vmem:[%s1218_s30] sm:$0xff] (%p79_p3), %v300_v0  ;;  %v306_v3 = vld [vmem:[%s1213_s29 + $0x30] sm:$0xff] (%p79_p3) }
  0x11   : > { %303 = vst [vmem:[%s1218_s30 + $0x8] sm:$0xff] %v302_v1  ;;  %v308_v4 = vld [vmem:[%s1213_s29 + $0x40] sm:$0xff]  ;;  %v310_v5 = vld [vmem:[%s1213_s29 + $0x50] sm:$0xff] }
  0x12   : > { %305 = vst [vmem:[%s1218_s30 + $0x10] sm:$0xff] %v304_v2  ;;  %v312_v6 = vld [vmem:[%s1213_s29 + $0x60] sm:$0xff]  ;;  %v314_v7 = vld [vmem:[%s1213_s29 + $0x70] sm:$0xff] }
  0x13   : > { %307 = vst [vmem:[%s1218_s30 + $0x18] sm:$0xff] %v306_v3  ;;  %v316_v8 = vld [vmem:[%s1213_s29 + $0x80] sm:$0xff]  ;;  %v318_v9 = vld [vmem:[%s1213_s29 + $0x90] sm:$0xff] }
  0x14   : > { %309 = vst [vmem:[%s1218_s30 + $0x20] sm:$0xff] %v308_v4  ;;  %v320_v10 = vld [vmem:[%s1213_s29 + $0xa0] sm:$0xff]  ;;  %v322_v11 = vld [vmem:[%s1213_s29 + $0xb0] sm:$0xff] }
  0x15   : > { %311 = vst [vmem:[%s1218_s30 + $0x28] sm:$0xff] %v310_v5  ;;  %v324_v12 = vld [vmem:[%s1213_s29 + $0xc0] sm:$0xff]  ;;  %v326_v13 = vld [vmem:[%s1213_s29 + $0xd0] sm:$0xff] }
  0x16   : > { %313 = vst [vmem:[%s1218_s30 + $0x30] sm:$0xff] %v312_v6  ;;  %v328_v14 = vld [vmem:[%s1213_s29 + $0xe0] sm:$0xff]  ;;  %v330_v15 = vld [vmem:[%s1213_s29 + $0xf0] sm:$0xff] }
  0x17   : > { %315 = vst [vmem:[%s1218_s30 + $0x38] sm:$0xff] %v314_v7  ;;  %v332_v16 = vld [vmem:[%s1213_s29 + $0x100] sm:$0xff]  ;;  %v334_v17 = vld [vmem:[%s1213_s29 + $0x110] sm:$0xff] }
  0x18   : > { %317 = vst [vmem:[%s1218_s30 + $0x40] sm:$0xff] %v316_v8  ;;  %v336_v18 = vld [vmem:[%s1213_s29 + $0x120] sm:$0xff]  ;;  %v338_v19 = vld [vmem:[%s1213_s29 + $0x130] sm:$0xff] }
  0x19   : > { %319 = vst [vmem:[%s1218_s30 + $0x48] sm:$0xff] %v318_v9  ;;  %v340_v20 = vld [vmem:[%s1213_s29 + $0x140] sm:$0xff]  ;;  %v342_v21 = vld [vmem:[%s1213_s29 + $0x150] sm:$0xff] }
  0x1a   : > { %321 = vst [vmem:[%s1218_s30 + $0x50] sm:$0xff] %v320_v10  ;;  %v344_v22 = vld [vmem:[%s1213_s29 + $0x160] sm:$0xff]  ;;  %v346_v23 = vld [vmem:[%s1213_s29 + $0x170] sm:$0xff] }
  0x1b   : > { %323 = vst [vmem:[%s1218_s30 + $0x58] sm:$0xff] %v322_v11  ;;  %v348_v24 = vld [vmem:[%s1213_s29 + $0x180] sm:$0xff]  ;;  %v350_v25 = vld [vmem:[%s1213_s29 + $0x190] sm:$0xff] }
  0x1c   : > { %325 = vst [vmem:[%s1218_s30 + $0x60] sm:$0xff] %v324_v12  ;;  %v352_v26 = vld [vmem:[%s1213_s29 + $0x1a0] sm:$0xff]  ;;  %v354_v27 = vld [vmem:[%s1213_s29 + $0x1b0] sm:$0xff] }
  0x1d   : > { %327 = vst [vmem:[%s1218_s30 + $0x68] sm:$0xff] %v326_v13  ;;  %v356_v28 = vld [vmem:[%s1213_s29 + $0x1c0] sm:$0xff]  ;;  %v358_v29 = vld [vmem:[%s1213_s29 + $0x1d0] sm:$0xff] }
  0x1e   : > { %329 = vst [vmem:[%s1218_s30 + $0x70] sm:$0xff] %v328_v14  ;;  %v360_v30 = vld [vmem:[%s1213_s29 + $0x1e0] sm:$0xff]  ;;  %v362_v31 = vld [vmem:[%s1213_s29 + $0x1f0] sm:$0xff] }
  0x1f   : > { %331 = vst [vmem:[%s1218_s30 + $0x78] sm:$0xff] %v330_v15 }
  0x20   : > { %333 = vst [vmem:[%s1218_s30 + $0x80] sm:$0xff] %v332_v16 }
  0x21   : > { %335 = vst [vmem:[%s1218_s30 + $0x88] sm:$0xff] %v334_v17 }
  0x22   : > { %337 = vst [vmem:[%s1218_s30 + $0x90] sm:$0xff] %v336_v18 }
  0x23   : > { %339 = vst [vmem:[%s1218_s30 + $0x98] sm:$0xff] %v338_v19 }
  0x24   : > { %341 = vst [vmem:[%s1218_s30 + $0xa0] sm:$0xff] %v340_v20 }
  0x25   : > { %343 = vst [vmem:[%s1218_s30 + $0xa8] sm:$0xff] %v342_v21 }
  0x26   : > { %345 = vst [vmem:[%s1218_s30 + $0xb0] sm:$0xff] %v344_v22 }
  0x27   : > { %347 = vst [vmem:[%s1218_s30 + $0xb8] sm:$0xff] %v346_v23 }
  0x28   : > { %349 = vst [vmem:[%s1218_s30 + $0xc0] sm:$0xff] %v348_v24 }
  0x29   : > { %351 = vst [vmem:[%s1218_s30 + $0xc8] sm:$0xff] %v350_v25 }
  0x2a   : > { %353 = vst [vmem:[%s1218_s30 + $0xd0] sm:$0xff] %v352_v26 }
  0x2b   : > { %355 = vst [vmem:[%s1218_s30 + $0xd8] sm:$0xff] %v354_v27 }
  0x2c   : > { %357 = vst [vmem:[%s1218_s30 + $0xe0] sm:$0xff] %v356_v28 }
  0x2d   : > { %359 = vst [vmem:[%s1218_s30 + $0xe8] sm:$0xff] %v358_v29 }
  0x2e   : > { %361 = vst [vmem:[%s1218_s30 + $0xf0] sm:$0xff] %v360_v30 }
  0x2f   : > { %363 = vst [vmem:[%s1218_s30 + $0xf8] sm:$0xff] %v362_v31 }
  0x30 PF: > { %p896_p6 = scmp.ge.s32.totalorder %s1143_s19, 1  ;;  %p384_p7 = scmp.lt.s32.totalorder %s1143_s19, 3 }
  0x32   : > { %p385_p8 = pnand %p896_p6, %p384_p7 }
  0x33   : > { %s391_s5 = sand.u32 (!%p385_p8), 1, %s1127_s15   ;;  %s898_s10 = sshll.u32 (!%p385_p8), %s1135_s17, 1 }
  0x34   : > { %388 = sbr.rel (%p385_p8) target bundleno = 234 (0xea), region = 70  ;;  %s897_s6 = sshll.u32 (!%p385_p8), %s391_s5, 8 }
  0x35   : > { %s1284_s7 = scalar_lea.vmem (!%p385_p8), [#allocation3], %s897_s6  ;;  %p450_p9 = scmp.lt.s32.totalorder (!%p385_p8), %s898_s10, 3 }
  0x39   : > { %v960_v32 = vld [vmem:[%s1284_s7 + $0x70] sm:$0xf]  ;;  %v1048_v33 = vld [vmem:[%s1284_s7 + $0x74] sm:$0xf0]  ;;  %v1047_v37 = vld [vmem:[%s1284_s7 + $0x74] sm:$0xf] }
  0x3a   : > { %v1024_v34 = vld [vmem:[%s1284_s7 + $0xf0] sm:$0xf]  ;;  %v961_v35 = vor.u32 %v1048_v33, %v960_v32  ;;  %v1064_v36 = vld [vmem:[%s1284_s7 + $0xf4] sm:$0xf0]  ;;  %v962_v38 = vld [vmem:[%s1284_s7 + $0x78] sm:$0xf0] }
  0x3b   : > { %v1025_v39 = vor.u32 %v1064_v36, %v1024_v34  ;;  %v965_v40 = vor.u32 %v1047_v37, %v962_v38  ;;  %v1063_v41 = vld [vmem:[%s1284_s7 + $0xf4] sm:$0xf]  ;;  %v1026_v42 = vld [vmem:[%s1284_s7 + $0xf8] sm:$0xf0]  ;;  %v952_v43 = vld [vmem:[%s1284_s7 + $0x60] sm:$0xf] }
  0x3c   : > { %677 = vmatpush.bf16.msra.mxu0 %v961_v35  ;;  %v1029_v44 = vor.u32 %v1063_v41, %v1026_v42  ;;  %v1046_v45 = vld [vmem:[%s1284_s7 + $0x64] sm:$0xf0]  ;;  %v1016_v46 = vld [vmem:[%s1284_s7 + $0xe0] sm:$0xf]  ;;  %v1045_v50 = vld [vmem:[%s1284_s7 + $0x64] sm:$0xf] }
  0x3d   : > { %v1062_v47 = vld [vmem:[%s1284_s7 + $0xe4] sm:$0xf0]  ;;  %690 = vmatpush.bf16.msra.mxu1 %v1025_v39  ;;  %703 = vmatpush.bf16.msra.mxu2 %v965_v40  ;;  %v953_v48 = vor.u32 %v1046_v45, %v952_v43  ;;  %v954_v51 = vld [vmem:[%s1284_s7 + $0x68] sm:$0xf0]  ;;  %v1061_v52 = vld [vmem:[%s1284_s7 + $0xe4] sm:$0xf] }
  0x3e   : > { %v1017_v49 = vor.u32 %v1062_v47, %v1016_v46  ;;  %716 = vmatpush.bf16.msra.mxu3 %v1029_v44  ;;  %v957_v53 = vor.u32 %v1045_v50, %v954_v51  ;;  %v1018_v54 = vld [vmem:[%s1284_s7 + $0xe8] sm:$0xf0]  ;;  %v944_v55 = vld [vmem:[%s1284_s7 + $0x50] sm:$0xf]  ;;  %v1044_v56 = vld [vmem:[%s1284_s7 + $0x54] sm:$0xf0] }
  0x3f   : > { %v1021_v57 = vor.u32 %v1061_v52, %v1018_v54  ;;  %v1008_v58 = vld [vmem:[%s1284_s7 + $0xd0] sm:$0xf]  ;;  %v1060_v59 = vld [vmem:[%s1284_s7 + $0xd4] sm:$0xf0]  ;;  %v1043_v60 = vld [vmem:[%s1284_s7 + $0x54] sm:$0xf]  ;;  %v945_v61 = vor.u32 %v1044_v56, %v944_v55 }
  0x40   : > { %678 = vmatpush.bf16.msra.mxu0 %v953_v48  ;;  %v946_v62 = vld [vmem:[%s1284_s7 + $0x58] sm:$0xf0]  ;;  %v1059_v63 = vld [vmem:[%s1284_s7 + $0xd4] sm:$0xf]  ;;  %v1009_v1 = vor.u32 %v1060_v59, %v1008_v58  ;;  %v936_v3 = vld [vmem:[%s1284_s7 + $0x40] sm:$0xf] }
  0x41   : > { %v1010_v0 = vld [vmem:[%s1284_s7 + $0xd8] sm:$0xf0]  ;;  %691 = vmatpush.bf16.msra.mxu1 %v1017_v49  ;;  %704 = vmatpush.bf16.msra.mxu2 %v957_v53  ;;  %v949_v2 = vor.u32 %v1043_v60, %v946_v62  ;;  %v1042_v4 = vld [vmem:[%s1284_s7 + $0x44] sm:$0xf0]  ;;  %v1000_v5 = vld [vmem:[%s1284_s7 + $0xc0] sm:$0xf] }
  0x42   : > { %717 = vmatpush.bf16.msra.mxu3 %v1021_v57  ;;  %v1013_v6 = vor.u32 %v1059_v63, %v1010_v0  ;;  %v1058_v7 = vld [vmem:[%s1284_s7 + $0xc4] sm:$0xf0]  ;;  %v1041_v8 = vld [vmem:[%s1284_s7 + $0x44] sm:$0xf]  ;;  %v938_v9 = vld [vmem:[%s1284_s7 + $0x48] sm:$0xf0]  ;;  %v937_v12 = vor.u32 %v1042_v4, %v936_v3 }
  0x43   : > { %v1057_v10 = vld [vmem:[%s1284_s7 + $0xc4] sm:$0xf]  ;;  %v1002_v11 = vld [vmem:[%s1284_s7 + $0xc8] sm:$0xf0]  ;;  %v1001_v13 = vor.u32 %v1058_v7, %v1000_v5  ;;  %v941_v14 = vor.u32 %v1041_v8, %v938_v9  ;;  %v928_v15 = vld [vmem:[%s1284_s7 + $0x30] sm:$0xf] }
  0x44   : > { %679 = vmatpush.bf16.msra.mxu0 %v945_v61  ;;  %v1040_v16 = vld [vmem:[%s1284_s7 + $0x34] sm:$0xf0]  ;;  %v992_v17 = vld [vmem:[%s1284_s7 + $0xb0] sm:$0xf]  ;;  %v1005_v18 = vor.u32 %v1057_v10, %v1002_v11  ;;  %v1039_v20 = vld [vmem:[%s1284_s7 + $0x34] sm:$0xf] }
  0x45   : > { %692 = vmatpush.bf16.msra.mxu1 %v1009_v1  ;;  %705 = vmatpush.bf16.msra.mxu2 %v949_v2  ;;  %v1056_v19 = vld [vmem:[%s1284_s7 + $0xb4] sm:$0xf0]  ;;  %v930_v21 = vld [vmem:[%s1284_s7 + $0x38] sm:$0xf0]  ;;  %v1055_v22 = vld [vmem:[%s1284_s7 + $0xb4] sm:$0xf]  ;;  %v929_v24 = vor.u32 %v1040_v16, %v928_v15 }
  0x46   : > { %718 = vmatpush.bf16.msra.mxu3 %v1013_v6  ;;  %v994_v23 = vld [vmem:[%s1284_s7 + $0xb8] sm:$0xf0]  ;;  %v993_v25 = vor.u32 %v1056_v19, %v992_v17  ;;  %v933_v26 = vor.u32 %v1039_v20, %v930_v21  ;;  %v920_v27 = vld [vmem:[%s1284_s7 + $0x20] sm:$0xf]  ;;  %v1038_v28 = vld [vmem:[%s1284_s7 + $0x24] sm:$0xf0] }
  0x47   : > { %v984_v29 = vld [vmem:[%s1284_s7 + $0xa0] sm:$0xf]  ;;  %v997_v30 = vor.u32 %v1055_v22, %v994_v23  ;;  %v1054_v31 = vld [vmem:[%s1284_s7 + $0xa4] sm:$0xf0]  ;;  %v1037_v32 = vld [vmem:[%s1284_s7 + $0x24] sm:$0xf]  ;;  %v921_v36 = vor.u32 %v1038_v28, %v920_v27 }
  0x48   : > { %680 = vmatpush.bf16.msra.mxu0 %v937_v12  ;;  %v922_v33 = vld [vmem:[%s1284_s7 + $0x28] sm:$0xf0]  ;;  %v1053_v34 = vld [vmem:[%s1284_s7 + $0xa4] sm:$0xf]  ;;  %v985_v37 = vor.u32 %v1054_v31, %v984_v29  ;;  %v912_v39 = vld [vmem:[%s1284_s7 + $0x10] sm:$0xf] }
  0x49   : > { %693 = vmatpush.bf16.msra.mxu1 %v1001_v13  ;;  %706 = vmatpush.bf16.msra.mxu2 %v941_v14  ;;  %v986_v35 = vld [vmem:[%s1284_s7 + $0xa8] sm:$0xf0]  ;;  %v925_v38 = vor.u32 %v1037_v32, %v922_v33  ;;  %v1036_v40 = vld [vmem:[%s1284_s7 + $0x14] sm:$0xf0]  ;;  %v976_v41 = vld [vmem:[%s1284_s7 + $0x90] sm:$0xf] }
  0x4a   : > { %719 = vmatpush.bf16.msra.mxu3 %v1005_v18  ;;  %v989_v42 = vor.u32 %v1053_v34, %v986_v35  ;;  %v1052_v43 = vld [vmem:[%s1284_s7 + $0x94] sm:$0xf0]  ;;  %v1035_v44 = vld [vmem:[%s1284_s7 + $0x14] sm:$0xf]  ;;  %v914_v45 = vld [vmem:[%s1284_s7 + $0x18] sm:$0xf0]  ;;  %v913_v48 = vor.u32 %v1036_v40, %v912_v39 }
  0x4b   : > { %v1051_v46 = vld [vmem:[%s1284_s7 + $0x94] sm:$0xf]  ;;  %v978_v47 = vld [vmem:[%s1284_s7 + $0x98] sm:$0xf0]  ;;  %v477_v49 = vld [vmem:[%s1378_s0] sm:$0xff]  ;;  %v977_v50 = vor.u32 %v1052_v43, %v976_v41  ;;  %v917_v51 = vor.u32 %v1035_v44, %v914_v45  ;;  %s1390_s10 = smov (!%p450_p9, %s898_s10), 3 }
  0x4c   : > { %681 = vmatpush.bf16.msra.mxu0 %v929_v24  ;;  %v904_v52 = vld [vmem:[%s1284_s7] sm:$0xf]  ;;  %v1034_v53 = vld [vmem:[%s1284_s7 + $0x4] sm:$0xf0]  ;;  %v981_v55 = vor.u32 %v1051_v46, %v978_v47  ;;  %v1033_v57 = vld [vmem:[%s1284_s7 + $0x4] sm:$0xf]  ;;  %v511_v61 = vunpack.c.l.b16 %v477_v49  ;;  %v512_v63 = vunpack.c.h.b16 %v477_v49  ;;  %s452_s13 = scalar_lea.vmem %s1380_s2, %s1390_s10  ;;  %s457_s21 = scalar_lea.vmem %s1381_s3, %s1390_s10 }
  0x4d   : > { %694 = vmatpush.bf16.msra.mxu1 %v993_v25  ;;  %707 = vmatpush.bf16.msra.mxu2 %v933_v26  ;;  %v968_v54 = vld [vmem:[%s1284_s7 + $0x80] sm:$0xf]  ;;  %v1050_v56 = vld [vmem:[%s1284_s7 + $0x84] sm:$0xf0]  ;;  %v906_v58 = vld [vmem:[%s1284_s7 + $0x8] sm:$0xf0]  ;;  %v905_v62 = vor.u32 %v1034_v53, %v904_v52 }
  0x4e   : > { %720 = vmatpush.bf16.msra.mxu3 %v997_v30  ;;  %v1049_v59 = vld [vmem:[%s1284_s7 + $0x84] sm:$0xf]  ;;  %v970_v60 = vld [vmem:[%s1284_s7 + $0x88] sm:$0xf0]  ;;  %v969_v0 = vor.u32 %v1050_v56, %v968_v54  ;;  %v909_v1 = vor.u32 %v1033_v57, %v906_v58  ;;  %v513_v3 = vpack.c.b16 %v511_v61, %v511_v61  ;;  %v514_v4 = vpack.c.b16 %v512_v63, %v512_v63  ;;  %v738_v6 = vld [vmem:[%s452_s13] sm:$0x3] }
  0x4f   : > { %v973_v2 = vor.u32 %v1049_v59, %v970_v60  ;;  %v740_v9 = vperm.slane %v738_v6, 0  ;;  %v746_v10 = vld [vmem:[%s457_s21] sm:$0x3]  ;;  %v741_v14 = vperm.slane %v738_v6, 1  ;;  %s901_s17 = sshll.u32 %s1390_s10, 2 }
  0x50   : > { %682 = vmatpush.bf16.msra.mxu0 %v921_v36  ;;  %v748_v12 = vperm.slane %v746_v10, 0  ;;  %v749_v18 = vperm.slane %v746_v10, 1  ;;  %s467_s25 = scalar_lea.vmem %s1382_s4, %s901_s17 }
  0x51   : > { %695 = vmatpush.bf16.msra.mxu1 %v985_v37  ;;  %708 = vmatpush.bf16.msra.mxu2 %v925_v38 }
  0x52   : > { %721 = vmatpush.bf16.msra.mxu3 %v989_v42 }
  0x54   : > { %683 = vmatpush.bf16.msra.mxu0 %v913_v48 }
  0x55   : > { %696 = vmatpush.bf16.msra.mxu1 %v977_v50  ;;  %709 = vmatpush.bf16.msra.mxu2 %v917_v51 }
  0x56   : > { %722 = vmatpush.bf16.msra.mxu3 %v981_v55 }
  0x58   : > { %684 = vmatpush.bf16.msra.mxu0 %v905_v62 }
  0x59   : > { %697 = vmatpush.bf16.msra.mxu1 %v969_v0  ;;  %710 = vmatpush.bf16.msra.mxu2 %v909_v1 }
  0x5a   : > { %723 = vmatpush.bf16.msra.mxu3 %v973_v2 }
  0x5b   : > { %685 = vmatmul.bf16.vlgmr.msra.gmra.mxu0 %v513_v3 }
  0x5c   : > { %698 = vmatmul.bf16.vlgmr.msra.gmra.mxu1 %v514_v4  ;;  %711 = vmatmul.bf16.vlgmr.msra.gmra.mxu2 %v513_v3 }
  0x5d   : > { %724 = vmatmul.bf16.vlgmr.msra.gmra.mxu3 %v514_v4 }
  0xd8   : > { %v686_v5 = vpop.f32.mrf.mxu0 }
  0xd9   : > { %v699_v7 = vpop.f32.mrf.mxu1 }
  0xda   : > { %v700_v8 = vadd.f32 %v699_v7, %v686_v5 }
  0xdc   : > { %v744_v11 = vmul.f32 %v740_v9, %v700_v8 }
  0xde   : > { %v752_v20 = vadd.f32 %v748_v12, %v744_v11 }
  0xdf   : > { %v712_v13 = vpop.f32.mrf.mxu2 }
  0xe0   : > { %v725_v15 = vpop.f32.mrf.mxu3  ;;  %v688_v16 = vpop.f32.mrf.mxu0 }
  0xe1   : > { %v726_v17 = vadd.f32 %v725_v15, %v712_v13  ;;  %v701_v19 = vpop.f32.mrf.mxu1 }
  0xe3   : > { %v745_v21 = vmul.f32 %v741_v14, %v726_v17 }
  0xe5   : > { %v753_v22 = vadd.f32 %v749_v18, %v745_v21 }
  0xe7   : > { %v754_v23 = vpack.c.bf16 %v753_v22, %v752_v20  ;;  %v714_v24 = vpop.f32.mrf.mxu2 }
  0xe8   : > { %v727_v25 = vpop.f32.mrf.mxu3 }
  0xe9   : > { %755 = vst [vmem:[%s467_s25] sm:$0xff] %v754_v23 }
  0xea PF: > { %s14_s19 = sadd.s32 1, %s1143_s19   ;;  %s1383_s15 = smov %s1131_s16 }
  0xeb   : > { %p11_p10 = scmp.ge.s32.totalorder %s14_s19, 4   ;;  %s1384_s16 = smov %s1205_s23 }
  0xec   : > { %s1385_s17 = smov %s1139_s18  ;;  %s1386_s18 = smov %s1388_s20 }
  0xed   :  { %13 = sbr.rel (!%p11_p10) target bundleno = 3 (0x3), region = 126 }

// kernel: resnet_forward.38
= control target key start
LH: loop header
LB: loop body
LE: loop exit
PB: predicated region body
PF: predicated region fallthrough
CT: control target
= control target key end

     0   :  { %s1845_s18 = smov 0   ;;  %s1847_s19 = smov 0   ;;  %s2251_s0 = inlined_call_operand.vmem [shape: bf16[8,4608], index: 0, kind: input, shape index: {}]   ;;  %s2252_s1 = inlined_call_operand.vmem [shape: bf16[4608,512], index: 1, kind: input, shape index: {}]   ;;  %s2253_s2 = inlined_call_operand.vmem [shape: f32[1,512], index: 2, kind: input, shape index: {}]   ;;  %s2254_s3 = inlined_call_operand.vmem [shape: f32[1,512], index: 3, kind: input, shape index: {}]   ;;  %s2255_s4 = inlined_call_operand.vmem [shape: bf16[8,512], index: 4, kind: input, shape index: {}]   ;;  %s2256_s5 = inlined_call_operand.vmem [shape: bf16[8,512], index: 5, kind: output, shape index: {}]  }
   0x1   :  { %s1849_s20 = smov 0   ;;  %s1851_s21 = smov 0  }
   0x2   :  { %s1853_s22 = smov 0   ;;  %s1855_s23 = smov 0  }
   0x3   :  { %s1857_s24 = smov 0  }
   0x4 LB: > { %s27_s25 = sadd.s32 1, %s1804_s22  ;;  %s30_s26 = sadd.s32 1, %s1808_s23  ;;  %s1812_s24 = sphi %s1857_s24, %s15_s24   ;;  %s1808_s23 = sphi %s1855_s23, %s2262_s23   ;;  %s1804_s22 = sphi %s1853_s22, %s2261_s22   ;;  %s1800_s21 = sphi %s1851_s21, %s2260_s21   ;;  %s1796_s20 = sphi %s1849_s20, %s2259_s20   ;;  %s1792_s19 = sphi %s1847_s19, %s2258_s19   ;;  %s1788_s18 = sphi %s1845_s18, %s2257_s18  }
   0x5   : > { %p28_p0 = scmp.ge.s32.totalorder %s27_s25, 9  ;;  %p78_p1 = scmp.ne.s32.totalorder %s1792_s19, %s1788_s18 }
   0x6   : > { %p79_p2 = scmp.eq.s32.totalorder %s1812_s24, 0  ;;  %s71_s30 = sadd.s32 1, %s1792_s19 }
   0x7   : > { %s2264_s25 = smov (%p28_p0, %s27_s25), 0  ;;  %s2266_s26 = smov (!%p28_p0, %s30_s26), %s1808_s23 }
   0x8   : > { %p80_p3 = por %p79_p2, %p78_p1  ;;  %p32_p4 = scmp.ge.s32.totalorder %s2266_s26, 2 }
   0x9   : > { %s66_s27 = ssub.s32 %s1804_s22, %s2264_s25  ;;  %p1360_p6 = scmp.ge.s32.totalorder %s1812_s24, 18 }
   0xa   : > { %s2268_s26 = smov (%p32_p4, %s2266_s26), 0 }
   0xb   : > { %s67_s28 = ssub.s32 %s1808_s23, %s2268_s26  ;;  %212 = sbr.rel (%p1360_p6) target bundleno = 87 (0x57), region = 16 }
   0xc   : > { %s68_s29 = sor.u32 %s67_s28, %s66_s27 }
   0xd   : > { %p69_p5 = scmp.eq.s32.totalorder %s68_s29, 0 }
   0xf   : > { %s1896_s6 = scalar_select %p69_p5, %s1792_s19, %s71_s30  }
  0x10   : > { %228 = sbr.rel (!%p80_p3) target bundleno = 87 (0x57), region = 24  ;;  %s230_s7 = sand.u32 (%p80_p3), 1, %s1792_s19  }
  0x11   : > { %s1363_s8 = sshll.u32 (%p80_p3), %s1808_s23, 1  ;;  %s1361_s9 = sshll.u32 (%p80_p3), %s230_s7, 9 }
  0x12   : > { %s1636_s10 = sshll.u32 (%p80_p3), %s1804_s22, 8  ;;  %s1910_s16 = scalar_lea.vmem (%p80_p3), [#allocation3], %s1361_s9 }
  0x13   : > { %s236_s11 = sadd.s32 (%p80_p3), %s1636_s10, %s1363_s8 }
  0x14   : > { %s1365_s12 = sshll.u32 (%p80_p3), %s236_s11, 2 }
  0x15   : > { %s1905_s15 = scalar_lea.vmem %s2252_s1, %s1365_s12 }
  0x16   : > { %v393_v0 = vld [vmem:[%s1905_s15] sm:$0xff]  ;;  %v395_v1 = vld [vmem:[%s1905_s15 + $0x10] sm:$0xff] }
  0x17   : > { %v397_v2 = vld [vmem:[%s1905_s15 + $0x20] sm:$0xff]  ;;  %394 = vst [vmem:[%s1910_s16] sm:$0xff] %v393_v0  ;;  %v399_v3 = vld [vmem:[%s1905_s15 + $0x30] sm:$0xff] }
  0x18   : > { %396 = vst [vmem:[%s1910_s16 + $0x8] sm:$0xff] %v395_v1  ;;  %v401_v4 = vld [vmem:[%s1905_s15 + $0x40] sm:$0xff]  ;;  %v403_v5 = vld [vmem:[%s1905_s15 + $0x50] sm:$0xff] }
  0x19   : > { %398 = vst [vmem:[%s1910_s16 + $0x10] sm:$0xff] %v397_v2  ;;  %v405_v6 = vld [vmem:[%s1905_s15 + $0x60] sm:$0xff]  ;;  %v407_v7 = vld [vmem:[%s1905_s15 + $0x70] sm:$0xff] }
  0x1a   : > { %400 = vst [vmem:[%s1910_s16 + $0x18] sm:$0xff] %v399_v3  ;;  %v409_v8 = vld [vmem:[%s1905_s15 + $0x80] sm:$0xff]  ;;  %v411_v9 = vld [vmem:[%s1905_s15 + $0x90] sm:$0xff] }
  0x1b   : > { %402 = vst [vmem:[%s1910_s16 + $0x20] sm:$0xff] %v401_v4  ;;  %v413_v10 = vld [vmem:[%s1905_s15 + $0xa0] sm:$0xff]  ;;  %v415_v11 = vld [vmem:[%s1905_s15 + $0xb0] sm:$0xff] }
  0x1c   : > { %404 = vst [vmem:[%s1910_s16 + $0x28] sm:$0xff] %v403_v5  ;;  %v417_v12 = vld [vmem:[%s1905_s15 + $0xc0] sm:$0xff]  ;;  %v419_v13 = vld [vmem:[%s1905_s15 + $0xd0] sm:$0xff] }
  0x1d   : > { %406 = vst [vmem:[%s1910_s16 + $0x30] sm:$0xff] %v405_v6  ;;  %v421_v14 = vld [vmem:[%s1905_s15 + $0xe0] sm:$0xff]  ;;  %v423_v15 = vld [vmem:[%s1905_s15 + $0xf0] sm:$0xff] }
  0x1e   : > { %408 = vst [vmem:[%s1910_s16 + $0x38] sm:$0xff] %v407_v7  ;;  %v425_v16 = vld [vmem:[%s1905_s15 + $0x100] sm:$0xff]  ;;  %v427_v17 = vld [vmem:[%s1905_s15 + $0x110] sm:$0xff] }
  0x1f   : > { %410 = vst [vmem:[%s1910_s16 + $0x40] sm:$0xff] %v409_v8  ;;  %v429_v18 = vld [vmem:[%s1905_s15 + $0x120] sm:$0xff]  ;;  %v431_v19 = vld [vmem:[%s1905_s15 + $0x130] sm:$0xff] }
  0x20   : > { %412 = vst [vmem:[%s1910_s16 + $0x48] sm:$0xff] %v411_v9  ;;  %v433_v20 = vld [vmem:[%s1905_s15 + $0x140] sm:$0xff]  ;;  %v435_v21 = vld [vmem:[%s1905_s15 + $0x150] sm:$0xff] }
  0x21   : > { %414 = vst [vmem:[%s1910_s16 + $0x50] sm:$0xff] %v413_v10  ;;  %v437_v22 = vld [vmem:[%s1905_s15 + $0x160] sm:$0xff]  ;;  %v439_v23 = vld [vmem:[%s1905_s15 + $0x170] sm:$0xff] }
  0x22   : > { %416 = vst [vmem:[%s1910_s16 + $0x58] sm:$0xff] %v415_v11  ;;  %v441_v24 = vld [vmem:[%s1905_s15 + $0x180] sm:$0xff]  ;;  %v443_v25 = vld [vmem:[%s1905_s15 + $0x190] sm:$0xff] }
  0x23   : > { %418 = vst [vmem:[%s1910_s16 + $0x60] sm:$0xff] %v417_v12  ;;  %v445_v26 = vld [vmem:[%s1905_s15 + $0x1a0] sm:$0xff]  ;;  %v447_v27 = vld [vmem:[%s1905_s15 + $0x1b0] sm:$0xff] }
  0x24   : > { %420 = vst [vmem:[%s1910_s16 + $0x68] sm:$0xff] %v419_v13  ;;  %v449_v28 = vld [vmem:[%s1905_s15 + $0x1c0] sm:$0xff]  ;;  %v451_v29 = vld [vmem:[%s1905_s15 + $0x1d0] sm:$0xff] }
  0x25   : > { %422 = vst [vmem:[%s1910_s16 + $0x70] sm:$0xff] %v421_v14  ;;  %v453_v30 = vld [vmem:[%s1905_s15 + $0x1e0] sm:$0xff]  ;;  %v455_v31 = vld [vmem:[%s1905_s15 + $0x1f0] sm:$0xff] }
  0x26   : > { %424 = vst [vmem:[%s1910_s16 + $0x78] sm:$0xff] %v423_v15  ;;  %v457_v32 = vld [vmem:[%s1905_s15 + $0x200] sm:$0xff]  ;;  %v459_v33 = vld [vmem:[%s1905_s15 + $0x210] sm:$0xff] }
  0x27   : > { %426 = vst [vmem:[%s1910_s16 + $0x80] sm:$0xff] %v425_v16  ;;  %v461_v34 = vld [vmem:[%s1905_s15 + $0x220] sm:$0xff]  ;;  %v463_v35 = vld [vmem:[%s1905_s15 + $0x230] sm:$0xff] }
  0x28   : > { %428 = vst [vmem:[%s1910_s16 + $0x88] sm:$0xff] %v427_v17  ;;  %v465_v36 = vld [vmem:[%s1905_s15 + $0x240] sm:$0xff]  ;;  %v467_v37 = vld [vmem:[%s1905_s15 + $0x250] sm:$0xff] }
  0x29   : > { %430 = vst [vmem:[%s1910_s16 + $0x90] sm:$0xff] %v429_v18  ;;  %v469_v38 = vld [vmem:[%s1905_s15 + $0x260] sm:$0xff]  ;;  %v471_v39 = vld [vmem:[%s1905_s15 + $0x270] sm:$0xff] }
  0x2a   : > { %432 = vst [vmem:[%s1910_s16 + $0x98] sm:$0xff] %v431_v19  ;;  %v473_v40 = vld [vmem:[%s1905_s15 + $0x280] sm:$0xff]  ;;  %v475_v41 = vld [vmem:[%s1905_s15 + $0x290] sm:$0xff] }
  0x2b   : > { %434 = vst [vmem:[%s1910_s16 + $0xa0] sm:$0xff] %v433_v20  ;;  %v477_v42 = vld [vmem:[%s1905_s15 + $0x2a0] sm:$0xff]  ;;  %v479_v43 = vld [vmem:[%s1905_s15 + $0x2b0] sm:$0xff] }
  0x2c   : > { %436 = vst [vmem:[%s1910_s16 + $0xa8] sm:$0xff] %v435_v21  ;;  %v481_v44 = vld [vmem:[%s1905_s15 + $0x2c0] sm:$0xff]  ;;  %v483_v45 = vld [vmem:[%s1905_s15 + $0x2d0] sm:$0xff] }
  0x2d   : > { %438 = vst [vmem:[%s1910_s16 + $0xb0] sm:$0xff] %v437_v22  ;;  %v485_v46 = vld [vmem:[%s1905_s15 + $0x2e0] sm:$0xff]  ;;  %v487_v47 = vld [vmem:[%s1905_s15 + $0x2f0] sm:$0xff] }
  0x2e   : > { %440 = vst [vmem:[%s1910_s16 + $0xb8] sm:$0xff] %v439_v23  ;;  %v489_v48 = vld [vmem:[%s1905_s15 + $0x300] sm:$0xff]  ;;  %v491_v49 = vld [vmem:[%s1905_s15 + $0x310] sm:$0xff] }
  0x2f   : > { %442 = vst [vmem:[%s1910_s16 + $0xc0] sm:$0xff] %v441_v24  ;;  %v493_v50 = vld [vmem:[%s1905_s15 + $0x320] sm:$0xff]  ;;  %v495_v51 = vld [vmem:[%s1905_s15 + $0x330] sm:$0xff] }
  0x30   : > { %444 = vst [vmem:[%s1910_s16 + $0xc8] sm:$0xff] %v443_v25  ;;  %v497_v52 = vld [vmem:[%s1905_s15 + $0x340] sm:$0xff]  ;;  %v499_v53 = vld [vmem:[%s1905_s15 + $0x350] sm:$0xff] }
  0x31   : > { %446 = vst [vmem:[%s1910_s16 + $0xd0] sm:$0xff] %v445_v26  ;;  %v501_v54 = vld [vmem:[%s1905_s15 + $0x360] sm:$0xff]  ;;  %v503_v55 = vld [vmem:[%s1905_s15 + $0x370] sm:$0xff] }
  0x32   : > { %448 = vst [vmem:[%s1910_s16 + $0xd8] sm:$0xff] %v447_v27  ;;  %v505_v56 = vld [vmem:[%s1905_s15 + $0x380] sm:$0xff]  ;;  %v507_v57 = vld [vmem:[%s1905_s15 + $0x390] sm:$0xff] }
  0x33   : > { %450 = vst [vmem:[%s1910_s16 + $0xe0] sm:$0xff] %v449_v28  ;;  %v509_v58 = vld [vmem:[%s1905_s15 + $0x3a0] sm:$0xff]  ;;  %v511_v59 = vld [vmem:[%s1905_s15 + $0x3b0] sm:$0xff] }
  0x34   : > { %452 = vst [vmem:[%s1910_s16 + $0xe8] sm:$0xff] %v451_v29  ;;  %v513_v60 = vld [vmem:[%s1905_s15 + $0x3c0] sm:$0xff]  ;;  %v515_v61 = vld [vmem:[%s1905_s15 + $0x3d0] sm:$0xff] }
  0x35   : > { %454 = vst [vmem:[%s1910_s16 + $0xf0] sm:$0xff] %v453_v30  ;;  %v517_v62 = vld [vmem:[%s1905_s15 + $0x3e0] sm:$0xff]  ;;  %v519_v63 = vld [vmem:[%s1905_s15 + $0x3f0] sm:$0xff] }
  0x36   : > { %456 = vst [vmem:[%s1910_s16 + $0xf8] sm:$0xff] %v455_v31 }
  0x37   : > { %458 = vst [vmem:[%s1910_s16 + $0x100] sm:$0xff] %v457_v32 }
  0x38   : > { %460 = vst [vmem:[%s1910_s16 + $0x108] sm:$0xff] %v459_v33 }
  0x39   : > { %462 = vst [vmem:[%s1910_s16 + $0x110] sm:$0xff] %v461_v34 }
  0x3a   : > { %464 = vst [vmem:[%s1910_s16 + $0x118] sm:$0xff] %v463_v35 }
  0x3b   : > { %466 = vst [vmem:[%s1910_s16 + $0x120] sm:$0xff] %v465_v36 }
  0x3c   : > { %468 = vst [vmem:[%s1910_s16 + $0x128] sm:$0xff] %v467_v37 }
  0x3d   : > { %470 = vst [vmem:[%s1910_s16 + $0x130] sm:$0xff] %v469_v38 }
  0x3e   : > { %472 = vst [vmem:[%s1910_s16 + $0x138] sm:$0xff] %v471_v39 }
  0x3f   : > { %474 = vst [vmem:[%s1910_s16 + $0x140] sm:$0xff] %v473_v40 }
  0x40   : > { %476 = vst [vmem:[%s1910_s16 + $0x148] sm:$0xff] %v475_v41 }
  0x41   : > { %478 = vst [vmem:[%s1910_s16 + $0x150] sm:$0xff] %v477_v42 }
  0x42   : > { %480 = vst [vmem:[%s1910_s16 + $0x158] sm:$0xff] %v479_v43 }
  0x43   : > { %482 = vst [vmem:[%s1910_s16 + $0x160] sm:$0xff] %v481_v44 }
  0x44   : > { %484 = vst [vmem:[%s1910_s16 + $0x168] sm:$0xff] %v483_v45 }
  0x45   : > { %486 = vst [vmem:[%s1910_s16 + $0x170] sm:$0xff] %v485_v46 }
  0x46   : > { %488 = vst [vmem:[%s1910_s16 + $0x178] sm:$0xff] %v487_v47 }
  0x47   : > { %490 = vst [vmem:[%s1910_s16 + $0x180] sm:$0xff] %v489_v48 }
  0x48   : > { %492 = vst [vmem:[%s1910_s16 + $0x188] sm:$0xff] %v491_v49 }
  0x49   : > { %494 = vst [vmem:[%s1910_s16 + $0x190] sm:$0xff] %v493_v50 }
  0x4a   : > { %496 = vst [vmem:[%s1910_s16 + $0x198] sm:$0xff] %v495_v51 }
  0x4b   : > { %498 = vst [vmem:[%s1910_s16 + $0x1a0] sm:$0xff] %v497_v52 }
  0x4c   : > { %500 = vst [vmem:[%s1910_s16 + $0x1a8] sm:$0xff] %v499_v53 }
  0x4d   : > { %502 = vst [vmem:[%s1910_s16 + $0x1b0] sm:$0xff] %v501_v54 }
  0x4e   : > { %504 = vst [vmem:[%s1910_s16 + $0x1b8] sm:$0xff] %v503_v55 }
  0x4f   : > { %506 = vst [vmem:[%s1910_s16 + $0x1c0] sm:$0xff] %v505_v56 }
  0x50   : > { %508 = vst [vmem:[%s1910_s16 + $0x1c8] sm:$0xff] %v507_v57 }
  0x51   : > { %510 = vst [vmem:[%s1910_s16 + $0x1d0] sm:$0xff] %v509_v58 }
  0x52   : > { %512 = vst [vmem:[%s1910_s16 + $0x1d8] sm:$0xff] %v511_v59 }
  0x53   : > { %514 = vst [vmem:[%s1910_s16 + $0x1e0] sm:$0xff] %v513_v60 }
  0x54   : > { %516 = vst [vmem:[%s1910_s16 + $0x1e8] sm:$0xff] %v515_v61 }
  0x55   : > { %518 = vst [vmem:[%s1910_s16 + $0x1f0] sm:$0xff] %v517_v62 }
  0x56   : > { %520 = vst [vmem:[%s1910_s16 + $0x1f8] sm:$0xff] %v519_v63 }
  0x57 PF: > { %p1366_p7 = scmp.ge.s32.totalorder %s1812_s24, 1  ;;  %p554_p8 = scmp.lt.s32.totalorder %s1812_s24, 19 }
  0x59   : > { %p555_p9 = pnand %p1366_p7, %p554_p8 }
  0x5a   : > { %s561_s17 = sand.u32 (!%p555_p9), 1, %s1788_s18   ;;  %s1368_s27 = sshll.u32 (!%p555_p9), %s1796_s20, 2 }
  0x5b   : > { %558 = sbr.rel (%p555_p9) target bundleno = 332 (0x14c), region = 74  ;;  %s1367_s28 = sshll.u32 (!%p555_p9), %s561_s17, 9 }
  0x5c   : > { %p621_p10 = scmp.lt.s32.totalorder (!%p555_p9), %s1368_s27, 35  ;;  %s1370_s29 = sshll.u32 (!%p555_p9), %s1800_s21, 1 }
  0x5d   : > { %p631_p11 = scmp.lt.s32.totalorder (!%p555_p9), %s1370_s29, 3  ;;  %s2068_s8 = scalar_lea.vmem (!%p555_p9), [#allocation3], %s1367_s28 }
  0x5e   : > { %p1376_p12 = scmp.ne.s32.totalorder (!%p555_p9), %s1796_s20, 0 }
  0x60   : > { %s2270_s27 = smov (!%p621_p10, %s1368_s27), 35  ;;  %s2272_s29 = smov (!%p631_p11, %s1370_s29), 3 }
  0x61   : > { %s1369_s30 = sshll.u32 %s2270_s27, 2  ;;  %s633_s18 = scalar_lea.vmem %s2253_s2, %s2272_s29 }
  0x62   : > { %s2045_s9 = scalar_lea.vmem %s2251_s0, %s1369_s30  ;;  %s638_s21 = scalar_lea.vmem %s2254_s3, %s2272_s29 }
  0x63   : > { %s1373_s14 = sshll.u32 %s2272_s29, 2  ;;  %663 = sbr.rel (%p1376_p12) target bundleno = 107 (0x6b), region = 82 }
  0x64   : > { %s2061_s17 = scalar_lea.vmem %s2255_s4, %s1373_s14  ;;  %s2066_s7 = scalar_lea.vmem %s2256_s5, %s1373_s14 }
  0x68   : > { %v1814_v0 = vmov 0.0  }
  0x69   : > { %664 = vst [vmem:[#allocation2] sm:$0xff] %v1814_v0 }
  0x6a   : > { %665 = vst [vmem:[#allocation2 + $0x8] sm:$0xff] %v1814_v0 }
  0x6b PF: > { %v1435_v1 = vld [vmem:[%s2068_s8 + $0x70] sm:$0xf]  ;;  %v1652_v2 = vld [vmem:[%s2068_s8 + $0x74] sm:$0xf0]  ;;  %v1427_v12 = vld [vmem:[%s2068_s8 + $0x60] sm:$0xf] }
  0x6c   : > { %v1499_v3 = vld [vmem:[%s2068_s8 + $0xf0] sm:$0xf]  ;;  %v1436_v4 = vor.u32 %v1652_v2, %v1435_v1  ;;  %v1668_v5 = vld [vmem:[%s2068_s8 + $0xf4] sm:$0xf0]  ;;  %v1650_v14 = vld [vmem:[%s2068_s8 + $0x64] sm:$0xf0] }
  0x6d   : > { %v1563_v6 = vld [vmem:[%s2068_s8 + $0x170] sm:$0xf]  ;;  %v1684_v7 = vld [vmem:[%s2068_s8 + $0x174] sm:$0xf0]  ;;  %v1500_v8 = vor.u32 %v1668_v5, %v1499_v3  ;;  %v1491_v15 = vld [vmem:[%s2068_s8 + $0xe0] sm:$0xf]  ;;  %v1428_v17 = vor.u32 %v1650_v14, %v1427_v12 }
  0x6e   : > { %v1564_v9 = vor.u32 %v1684_v7, %v1563_v6  ;;  %v1627_v10 = vld [vmem:[%s2068_s8 + $0x1f0] sm:$0xf]  ;;  %v1700_v11 = vld [vmem:[%s2068_s8 + $0x1f4] sm:$0xf0]  ;;  %1068 = vmatpush.bf16.msra.mxu0 %v1436_v4  ;;  %v1666_v16 = vld [vmem:[%s2068_s8 + $0xe4] sm:$0xf0] }
  0x6f   : > { %v1628_v13 = vor.u32 %v1700_v11, %v1627_v10  ;;  %1081 = vmatpush.bf16.msra.mxu1 %v1500_v8  ;;  %v1492_v18 = vor.u32 %v1666_v16, %v1491_v15  ;;  %v1555_v19 = vld [vmem:[%s2068_s8 + $0x160] sm:$0xf]  ;;  %v1682_v20 = vld [vmem:[%s2068_s8 + $0x164] sm:$0xf0]  ;;  %v1419_v24 = vld [vmem:[%s2068_s8 + $0x50] sm:$0xf] }
  0x70   : > { %1094 = vmatpush.bf16.msra.mxu2 %v1564_v9  ;;  %v1619_v21 = vld [vmem:[%s2068_s8 + $0x1e0] sm:$0xf]  ;;  %v1556_v22 = vor.u32 %v1682_v20, %v1555_v19  ;;  %v1698_v23 = vld [vmem:[%s2068_s8 + $0x1e4] sm:$0xf0]  ;;  %v1648_v25 = vld [vmem:[%s2068_s8 + $0x54] sm:$0xf0] }
  0x71   : > { %1107 = vmatpush.bf16.msra.mxu3 %v1628_v13  ;;  %v1620_v26 = vor.u32 %v1698_v23, %v1619_v21  ;;  %v1483_v27 = vld [vmem:[%s2068_s8 + $0xd0] sm:$0xf]  ;;  %v1664_v28 = vld [vmem:[%s2068_s8 + $0xd4] sm:$0xf0]  ;;  %v1420_v30 = vor.u32 %v1648_v25, %v1419_v24  ;;  %v1411_v36 = vld [vmem:[%s2068_s8 + $0x40] sm:$0xf] }
  0x72   : > { %v1547_v29 = vld [vmem:[%s2068_s8 + $0x150] sm:$0xf]  ;;  %1069 = vmatpush.bf16.msra.mxu0 %v1428_v17  ;;  %v1680_v31 = vld [vmem:[%s2068_s8 + $0x154] sm:$0xf0]  ;;  %v1484_v34 = vor.u32 %v1664_v28, %v1483_v27  ;;  %v1646_v37 = vld [vmem:[%s2068_s8 + $0x44] sm:$0xf0] }
  0x73   : > { %v1611_v32 = vld [vmem:[%s2068_s8 + $0x1d0] sm:$0xf]  ;;  %v1696_v33 = vld [vmem:[%s2068_s8 + $0x1d4] sm:$0xf0]  ;;  %1082 = vmatpush.bf16.msra.mxu1 %v1492_v18  ;;  %v1548_v35 = vor.u32 %v1680_v31, %v1547_v29  ;;  %v1475_v38 = vld [vmem:[%s2068_s8 + $0xc0] sm:$0xf]  ;;  %v1412_v45 = vor.u32 %v1646_v37, %v1411_v36 }
  0x74   : > { %1095 = vmatpush.bf16.msra.mxu2 %v1556_v22  ;;  %v1612_v39 = vor.u32 %v1696_v33, %v1611_v32  ;;  %v1662_v40 = vld [vmem:[%s2068_s8 + $0xc4] sm:$0xf0]  ;;  %v1539_v41 = vld [vmem:[%s2068_s8 + $0x140] sm:$0xf]  ;;  %v1403_v48 = vld [vmem:[%s2068_s8 + $0x30] sm:$0xf] }
  0x75   : > { %1108 = vmatpush.bf16.msra.mxu3 %v1620_v26  ;;  %v1678_v42 = vld [vmem:[%s2068_s8 + $0x144] sm:$0xf0]  ;;  %v1603_v43 = vld [vmem:[%s2068_s8 + $0x1c0] sm:$0xf]  ;;  %v1476_v46 = vor.u32 %v1662_v40, %v1475_v38  ;;  %v1644_v49 = vld [vmem:[%s2068_s8 + $0x34] sm:$0xf0] }
  0x76   : > { %v1694_v44 = vld [vmem:[%s2068_s8 + $0x1c4] sm:$0xf0]  ;;  %1070 = vmatpush.bf16.msra.mxu0 %v1420_v30  ;;  %v1540_v47 = vor.u32 %v1678_v42, %v1539_v41  ;;  %v1467_v50 = vld [vmem:[%s2068_s8 + $0xb0] sm:$0xf]  ;;  %v1660_v52 = vld [vmem:[%s2068_s8 + $0xb4] sm:$0xf0]  ;;  %v1404_v57 = vor.u32 %v1644_v49, %v1403_v48 }
  0x77   : > { %1083 = vmatpush.bf16.msra.mxu1 %v1484_v34  ;;  %v1604_v51 = vor.u32 %v1694_v44, %v1603_v43  ;;  %v1531_v53 = vld [vmem:[%s2068_s8 + $0x130] sm:$0xf]  ;;  %v1676_v54 = vld [vmem:[%s2068_s8 + $0x134] sm:$0xf0]  ;;  %v1468_v58 = vor.u32 %v1660_v52, %v1467_v50  ;;  %v1395_v60 = vld [vmem:[%s2068_s8 + $0x20] sm:$0xf] }
  0x78   : > { %1096 = vmatpush.bf16.msra.mxu2 %v1548_v35  ;;  %v1595_v55 = vld [vmem:[%s2068_s8 + $0x1b0] sm:$0xf]  ;;  %v1692_v56 = vld [vmem:[%s2068_s8 + $0x1b4] sm:$0xf0]  ;;  %v1532_v59 = vor.u32 %v1676_v54, %v1531_v53  ;;  %v1642_v61 = vld [vmem:[%s2068_s8 + $0x24] sm:$0xf0] }
  0x79   : > { %1109 = vmatpush.bf16.msra.mxu3 %v1612_v39  ;;  %v1459_v62 = vld [vmem:[%s2068_s8 + $0xa0] sm:$0xf]  ;;  %v1596_v63 = vor.u32 %v1692_v56, %v1595_v55  ;;  %v1658_v0 = vld [vmem:[%s2068_s8 + $0xa4] sm:$0xf0]  ;;  %v1396_v5 = vor.u32 %v1642_v61, %v1395_v60  ;;  %v1387_v8 = vld [vmem:[%s2068_s8 + $0x10] sm:$0xf] }
  0x7a   : > { %1071 = vmatpush.bf16.msra.mxu0 %v1412_v45  ;;  %v1523_v1 = vld [vmem:[%s2068_s8 + $0x120] sm:$0xf]  ;;  %v1674_v2 = vld [vmem:[%s2068_s8 + $0x124] sm:$0xf0]  ;;  %v1460_v6 = vor.u32 %v1658_v0, %v1459_v62  ;;  %v1640_v9 = vld [vmem:[%s2068_s8 + $0x14] sm:$0xf0] }
  0x7b   : > { %1084 = vmatpush.bf16.msra.mxu1 %v1476_v46  ;;  %v1587_v3 = vld [vmem:[%s2068_s8 + $0x1a0] sm:$0xf]  ;;  %v1690_v4 = vld [vmem:[%s2068_s8 + $0x1a4] sm:$0xf0]  ;;  %v1524_v7 = vor.u32 %v1674_v2, %v1523_v1  ;;  %v1451_v10 = vld [vmem:[%s2068_s8 + $0x90] sm:$0xf]  ;;  %v1388_v17 = vor.u32 %v1640_v9, %v1387_v8 }
  0x7c   : > { %1097 = vmatpush.bf16.msra.mxu2 %v1540_v47  ;;  %v1588_v11 = vor.u32 %v1690_v4, %v1587_v3  ;;  %v1656_v12 = vld [vmem:[%s2068_s8 + $0x94] sm:$0xf0]  ;;  %v1515_v13 = vld [vmem:[%s2068_s8 + $0x110] sm:$0xf]  ;;  %v1379_v18 = vld [vmem:[%s2068_s8] sm:$0xf] }
  0x7d   : > { %1110 = vmatpush.bf16.msra.mxu3 %v1604_v51  ;;  %v1672_v14 = vld [vmem:[%s2068_s8 + $0x114] sm:$0xf0]  ;;  %v1579_v15 = vld [vmem:[%s2068_s8 + $0x190] sm:$0xf]  ;;  %v1638_v19 = vld [vmem:[%s2068_s8 + $0x4] sm:$0xf0]  ;;  %v1452_v21 = vor.u32 %v1656_v12, %v1451_v10 }
  0x7e   : > { %1072 = vmatpush.bf16.msra.mxu0 %v1404_v57  ;;  %v1688_v16 = vld [vmem:[%s2068_s8 + $0x194] sm:$0xf0]  ;;  %v1443_v20 = vld [vmem:[%s2068_s8 + $0x80] sm:$0xf]  ;;  %v1516_v22 = vor.u32 %v1672_v14, %v1515_v13  ;;  %v1654_v23 = vld [vmem:[%s2068_s8 + $0x84] sm:$0xf0]  ;;  %v1380_v33 = vor.u32 %v1638_v19, %v1379_v18 }
  0x7f   : > { %1085 = vmatpush.bf16.msra.mxu1 %v1468_v58  ;;  %v1507_v24 = vld [vmem:[%s2068_s8 + $0x100] sm:$0xf]  ;;  %v1670_v25 = vld [vmem:[%s2068_s8 + $0x104] sm:$0xf0]  ;;  %v1580_v26 = vor.u32 %v1688_v16, %v1579_v15  ;;  %v1651_v29 = vld [vmem:[%s2068_s8 + $0x74] sm:$0xf]  ;;  %v1444_v38 = vor.u32 %v1654_v23, %v1443_v20 }
  0x80   : > { %1098 = vmatpush.bf16.msra.mxu2 %v1532_v59  ;;  %v1571_v27 = vld [vmem:[%s2068_s8 + $0x180] sm:$0xf]  ;;  %v1686_v28 = vld [vmem:[%s2068_s8 + $0x184] sm:$0xf0]  ;;  %v1437_v30 = vld [vmem:[%s2068_s8 + $0x78] sm:$0xf0]  ;;  %v1508_v39 = vor.u32 %v1670_v25, %v1507_v24 }
  0x81   : > { %1111 = vmatpush.bf16.msra.mxu3 %v1596_v63  ;;  %v1667_v31 = vld [vmem:[%s2068_s8 + $0xf4] sm:$0xf]  ;;  %v669_v32 = vld [vmem:[%s2045_s9 + $0x8] sm:$0xff]  ;;  %v1572_v43 = vor.u32 %v1686_v28, %v1571_v27  ;;  %v1440_v44 = vor.u32 %v1651_v29, %v1437_v30  ;;  %v1649_v48 = vld [vmem:[%s2068_s8 + $0x64] sm:$0xf]  ;;  %p1633_p13 = scmp.ne.s32.totalorder %s1796_s20, 8 }
  0x82   : > { %1073 = vmatpush.bf16.msra.mxu0 %v1396_v5  ;;  %v1501_v34 = vld [vmem:[%s2068_s8 + $0xf8] sm:$0xf0]  ;;  %v1683_v35 = vld [vmem:[%s2068_s8 + $0x174] sm:$0xf]  ;;  %v738_v37 = vunpack.c.l.b16 %v669_v32  ;;  %v739_v42 = vunpack.c.h.b16 %v669_v32  ;;  %v1429_v49 = vld [vmem:[%s2068_s8 + $0x68] sm:$0xf0] }
  0x83   : > { %1086 = vmatpush.bf16.msra.mxu1 %v1460_v6  ;;  %v1565_v36 = vld [vmem:[%s2068_s8 + $0x178] sm:$0xf0]  ;;  %v1699_v40 = vld [vmem:[%s2068_s8 + $0x1f4] sm:$0xf]  ;;  %v1504_v46 = vor.u32 %v1667_v31, %v1501_v34  ;;  %v1665_v50 = vld [vmem:[%s2068_s8 + $0xe4] sm:$0xf]  ;;  %v1432_v62 = vor.u32 %v1649_v48, %v1429_v49 }
  0x84   : > { %1099 = vmatpush.bf16.msra.mxu2 %v1524_v7  ;;  %v1629_v41 = vld [vmem:[%s2068_s8 + $0x1f8] sm:$0xf0]  ;;  %v668_v45 = vld [vmem:[%s2045_s9] sm:$0xff]  ;;  %v1568_v47 = vor.u32 %v1683_v35, %v1565_v36  ;;  %v1493_v54 = vld [vmem:[%s2068_s8 + $0xe8] sm:$0xf0]  ;;  %v2151_v57 = vpack.c.b16 %v738_v37, %v738_v37  ;;  %v2155_v60 = vpack.c.b16 %v739_v42, %v739_v42 }
  0x85   : > { %1112 = vmatpush.bf16.msra.mxu3 %v1588_v11  ;;  %v736_v51 = vunpack.c.l.b16 %v668_v45  ;;  %v737_v52 = vunpack.c.h.b16 %v668_v45  ;;  %v1632_v53 = vor.u32 %v1699_v40, %v1629_v41  ;;  %v1681_v55 = vld [vmem:[%s2068_s8 + $0x164] sm:$0xf]  ;;  %v1557_v56 = vld [vmem:[%s2068_s8 + $0x168] sm:$0xf0]  ;;  %v1496_v0 = vor.u32 %v1665_v50, %v1493_v54  ;;  %v1647_v2 = vld [vmem:[%s2068_s8 + $0x54] sm:$0xf] }
  0x86   : > { %1074 = vmatpush.bf16.msra.mxu0 %v1388_v17  ;;  %v1697_v58 = vld [vmem:[%s2068_s8 + $0x1e4] sm:$0xf]  ;;  %v1621_v59 = vld [vmem:[%s2068_s8 + $0x1e8] sm:$0xf0]  ;;  %v1560_v1 = vor.u32 %v1681_v55, %v1557_v56  ;;  %v1421_v3 = vld [vmem:[%s2068_s8 + $0x58] sm:$0xf0] }
  0x87   : > { %1087 = vmatpush.bf16.msra.mxu1 %v1452_v21  ;;  %v2157_v61 = vpack.c.b16 %v736_v51, %v736_v51  ;;  %v2159_v63 = vpack.c.b16 %v737_v52, %v737_v52  ;;  %v1663_v4 = vld [vmem:[%s2068_s8 + $0xd4] sm:$0xf]  ;;  %v1624_v5 = vor.u32 %v1697_v58, %v1621_v59  ;;  %v1485_v6 = vld [vmem:[%s2068_s8 + $0xd8] sm:$0xf0]  ;;  %v1424_v11 = vor.u32 %v1647_v2, %v1421_v3  ;;  %v1645_v14 = vld [vmem:[%s2068_s8 + $0x44] sm:$0xf] }
  0x88   : > { %1100 = vmatpush.bf16.msra.mxu2 %v1516_v22  ;;  %v1679_v7 = vld [vmem:[%s2068_s8 + $0x154] sm:$0xf]  ;;  %v1549_v8 = vld [vmem:[%s2068_s8 + $0x158] sm:$0xf0]  ;;  %v1488_v12 = vor.u32 %v1663_v4, %v1485_v6  ;;  %v1413_v15 = vld [vmem:[%s2068_s8 + $0x48] sm:$0xf0] }
  0x89   : > { %1113 = vmatpush.bf16.msra.mxu3 %v1580_v26  ;;  %v1695_v9 = vld [vmem:[%s2068_s8 + $0x1d4] sm:$0xf]  ;;  %v1613_v10 = vld [vmem:[%s2068_s8 + $0x1d8] sm:$0xf0]  ;;  %v1552_v13 = vor.u32 %v1679_v7, %v1549_v8  ;;  %v1661_v16 = vld [vmem:[%s2068_s8 + $0xc4] sm:$0xf]  ;;  %v1416_v23 = vor.u32 %v1645_v14, %v1413_v15 }
  0x8a   : > { %1075 = vmatpush.bf16.msra.mxu0 %v1380_v33  ;;  %v1616_v17 = vor.u32 %v1695_v9, %v1613_v10  ;;  %v1477_v18 = vld [vmem:[%s2068_s8 + $0xc8] sm:$0xf0]  ;;  %v1677_v19 = vld [vmem:[%s2068_s8 + $0x144] sm:$0xf]  ;;  %v1643_v26 = vld [vmem:[%s2068_s8 + $0x34] sm:$0xf] }
  0x8b   : > { %1088 = vmatpush.bf16.msra.mxu1 %v1444_v38  ;;  %v1541_v20 = vld [vmem:[%s2068_s8 + $0x148] sm:$0xf0]  ;;  %v1693_v21 = vld [vmem:[%s2068_s8 + $0x1c4] sm:$0xf]  ;;  %v1480_v24 = vor.u32 %v1661_v16, %v1477_v18  ;;  %v1405_v27 = vld [vmem:[%s2068_s8 + $0x38] sm:$0xf0] }
  0x8c   : > { %1101 = vmatpush.bf16.msra.mxu2 %v1508_v39  ;;  %v1605_v22 = vld [vmem:[%s2068_s8 + $0x1c8] sm:$0xf0]  ;;  %v1544_v25 = vor.u32 %v1677_v19, %v1541_v20  ;;  %v1659_v28 = vld [vmem:[%s2068_s8 + $0xb4] sm:$0xf]  ;;  %v1469_v30 = vld [vmem:[%s2068_s8 + $0xb8] sm:$0xf0]  ;;  %v1408_v35 = vor.u32 %v1643_v26, %v1405_v27 }
  0x8d   : > { %1114 = vmatpush.bf16.msra.mxu3 %v1572_v43  ;;  %1076 = vmatmul.bf16.vlgmr.msra.gmra.mxu0 %v2157_v61  ;;  %v1608_v29 = vor.u32 %v1693_v21, %v1605_v22  ;;  %v1675_v31 = vld [vmem:[%s2068_s8 + $0x134] sm:$0xf]  ;;  %v1533_v32 = vld [vmem:[%s2068_s8 + $0x138] sm:$0xf0]  ;;  %v1472_v36 = vor.u32 %v1659_v28, %v1469_v30  ;;  %v1641_v38 = vld [vmem:[%s2068_s8 + $0x24] sm:$0xf] }
  0x8e   : > { %1120 = vmatpush.bf16.msrb.mxu0 %v1440_v44  ;;  %1089 = vmatmul.bf16.vlgmr.msra.gmra.mxu1 %v2159_v63  ;;  %v1691_v33 = vld [vmem:[%s2068_s8 + $0x1b4] sm:$0xf]  ;;  %v1597_v34 = vld [vmem:[%s2068_s8 + $0x1b8] sm:$0xf0]  ;;  %v1536_v37 = vor.u32 %v1675_v31, %v1533_v32  ;;  %v1397_v39 = vld [vmem:[%s2068_s8 + $0x28] sm:$0xf0] }
  0x8f   : > { %1133 = vmatpush.bf16.msrb.mxu1 %v1504_v46  ;;  %1102 = vmatmul.bf16.vlgmr.msra.gmra.mxu2 %v2151_v57  ;;  %v1657_v40 = vld [vmem:[%s2068_s8 + $0xa4] sm:$0xf]  ;;  %v1600_v41 = vor.u32 %v1691_v33, %v1597_v34  ;;  %v1461_v42 = vld [vmem:[%s2068_s8 + $0xa8] sm:$0xf0]  ;;  %v1639_v50 = vld [vmem:[%s2068_s8 + $0x14] sm:$0xf] }
  0x90   : > { %1146 = vmatpush.bf16.msrb.mxu2 %v1568_v47  ;;  %1115 = vmatmul.bf16.vlgmr.msra.gmra.mxu3 %v2155_v60  ;;  %v1673_v43 = vld [vmem:[%s2068_s8 + $0x124] sm:$0xf]  ;;  %v1525_v44 = vld [vmem:[%s2068_s8 + $0x128] sm:$0xf0]  ;;  %v1400_v47 = vor.u32 %v1641_v38, %v1397_v39  ;;  %v1464_v48 = vor.u32 %v1657_v40, %v1461_v42  ;;  %v1389_v51 = vld [vmem:[%s2068_s8 + $0x18] sm:$0xf0] }
  0x91   : > { %1159 = vmatpush.bf16.msrb.mxu3 %v1632_v53  ;;  %v1689_v45 = vld [vmem:[%s2068_s8 + $0x1a4] sm:$0xf]  ;;  %v1589_v46 = vld [vmem:[%s2068_s8 + $0x1a8] sm:$0xf0]  ;;  %v1528_v49 = vor.u32 %v1673_v43, %v1525_v44  ;;  %v1655_v52 = vld [vmem:[%s2068_s8 + $0x94] sm:$0xf] }
  0x92   : > { %1121 = vmatpush.bf16.msrb.mxu0 %v1432_v62  ;;  %v1592_v53 = vor.u32 %v1689_v45, %v1589_v46  ;;  %v1453_v54 = vld [vmem:[%s2068_s8 + $0x98] sm:$0xf0]  ;;  %v1671_v55 = vld [vmem:[%s2068_s8 + $0x114] sm:$0xf]  ;;  %v1392_v62 = vor.u32 %v1639_v50, %v1389_v51  ;;  %v1637_v2 = vld [vmem:[%s2068_s8 + $0x4] sm:$0xf] }
  0x93   : > { %1134 = vmatpush.bf16.msrb.mxu1 %v1496_v0  ;;  %v1517_v56 = vld [vmem:[%s2068_s8 + $0x118] sm:$0xf0]  ;;  %v1687_v58 = vld [vmem:[%s2068_s8 + $0x194] sm:$0xf]  ;;  %v1456_v0 = vor.u32 %v1655_v52, %v1453_v54  ;;  %v1381_v3 = vld [vmem:[%s2068_s8 + $0x8] sm:$0xf0] }
  0x94   : > { %1147 = vmatpush.bf16.msrb.mxu2 %v1560_v1  ;;  %v1581_v59 = vld [vmem:[%s2068_s8 + $0x198] sm:$0xf0]  ;;  %v1520_v1 = vor.u32 %v1671_v55, %v1517_v56  ;;  %v1653_v4 = vld [vmem:[%s2068_s8 + $0x84] sm:$0xf]  ;;  %v1445_v6 = vld [vmem:[%s2068_s8 + $0x88] sm:$0xf0] }
  0x95   : > { %1160 = vmatpush.bf16.msrb.mxu3 %v1624_v5  ;;  %v1584_v5 = vor.u32 %v1687_v58, %v1581_v59  ;;  %v1669_v7 = vld [vmem:[%s2068_s8 + $0x104] sm:$0xf]  ;;  %v1509_v8 = vld [vmem:[%s2068_s8 + $0x108] sm:$0xf0]  ;;  %v666_v21 = vld [vmem:[#allocation2] sm:$0xff] }
  0x96   : > { %1122 = vmatpush.bf16.msrb.mxu0 %v1424_v11  ;;  %v1685_v9 = vld [vmem:[%s2068_s8 + $0x184] sm:$0xf]  ;;  %v1573_v10 = vld [vmem:[%s2068_s8 + $0x188] sm:$0xf0]  ;;  %v1384_v11 = vor.u32 %v1637_v2, %v1381_v3  ;;  %v667_v31 = vld [vmem:[#allocation2 + $0x8] sm:$0xff] }
  0x97   : > { %1135 = vmatpush.bf16.msrb.mxu1 %v1488_v12  ;;  %v1448_v12 = vor.u32 %v1653_v4, %v1445_v6  ;;  %v1576_v14 = vor.u32 %v1685_v9, %v1573_v10 }
  0x98   : > { %1148 = vmatpush.bf16.msrb.mxu2 %v1552_v13  ;;  %v1512_v13 = vor.u32 %v1669_v7, %v1509_v8 }
  0x99   : > { %1161 = vmatpush.bf16.msrb.mxu3 %v1616_v17 }
  0x9a   : > { %1123 = vmatpush.bf16.msrb.mxu0 %v1416_v23 }
  0x9b   : > { %1136 = vmatpush.bf16.msrb.mxu1 %v1480_v24 }
  0x9c   : > { %1149 = vmatpush.bf16.msrb.mxu2 %v1544_v25 }
  0x9d   : > { %1162 = vmatpush.bf16.msrb.mxu3 %v1608_v29 }
  0x9e   : > { %1124 = vmatpush.bf16.msrb.mxu0 %v1408_v35 }
  0x9f   : > { %1137 = vmatpush.bf16.msrb.mxu1 %v1472_v36 }
  0xa0   : > { %1150 = vmatpush.bf16.msrb.mxu2 %v1536_v37 }
  0xa1   : > { %1163 = vmatpush.bf16.msrb.mxu3 %v1600_v41 }
  0xa2   : > { %1125 = vmatpush.bf16.msrb.mxu0 %v1400_v47 }
  0xa3   : > { %1138 = vmatpush.bf16.msrb.mxu1 %v1464_v48 }
  0xa4   : > { %1151 = vmatpush.bf16.msrb.mxu2 %v1528_v49 }
  0xa5   : > { %1164 = vmatpush.bf16.msrb.mxu3 %v1592_v53 }
  0xa6   : > { %1126 = vmatpush.bf16.msrb.mxu0 %v1392_v62 }
  0xa7   : > { %1139 = vmatpush.bf16.msrb.mxu1 %v1456_v0 }
  0xa8   : > { %1152 = vmatpush.bf16.msrb.mxu2 %v1520_v1 }
  0xa9   : > { %1165 = vmatpush.bf16.msrb.mxu3 %v1584_v5 }
  0xaa   : > { %1127 = vmatpush.bf16.msrb.mxu0 %v1384_v11 }
  0xab   : > { %1140 = vmatpush.bf16.msrb.mxu1 %v1448_v12 }
  0xac   : > { %1153 = vmatpush.bf16.msrb.mxu2 %v1512_v13 }
  0xad   : > { %1166 = vmatpush.bf16.msrb.mxu3 %v1576_v14  ;;  %1128 = vmatmul.bf16.vlgmr.msrb.gmra.mxu0 %v2157_v61 }
  0xae   : > { %1141 = vmatmul.bf16.vlgmr.msrb.gmra.mxu1 %v2159_v63 }
  0xaf   : > { %1154 = vmatmul.bf16.vlgmr.msrb.gmra.mxu2 %v2151_v57 }
  0xb0   : > { %1167 = vmatmul.bf16.vlgmr.msrb.gmra.mxu3 %v2155_v60 }
 0x10a   : > { %v1077_v15 = vpop.f32.mrf.mxu0 }
 0x10b   : > { %v1090_v16 = vpop.f32.mrf.mxu1 }
 0x10c   : > { %v1091_v17 = vadd.f32 %v1090_v16, %v1077_v15 }
 0x112   : > { %v1103_v18 = vpop.f32.mrf.mxu2  ;;  %v1079_v23 = vpop.f32.mrf.mxu0 }
 0x113   : > { %v1104_v19 = vadd.f32 %v1103_v18, %v1091_v17  ;;  %v1116_v20 = vpop.f32.mrf.mxu3  ;;  %v1092_v24 = vpop.f32.mrf.mxu1 }
 0x115   : > { %v1117_v22 = vadd.f32 %v1116_v20, %v1104_v19 }
 0x117   : > { %v1172_v25 = vadd.f32 %v1117_v22, %v666_v21 }
 0x119   : > { %1174 = vst [vmem:[#allocation2] sm:$0xff] %v1172_v25 }
 0x11a   : > { %v1105_v26 = vpop.f32.mrf.mxu2 }
 0x11b   : > { %v1118_v61 = vpop.f32.mrf.mxu3 }
 0x12a   : > { %v1129_v27 = vpop.f32.mrf.mxu0 }
 0x12b   : > { %v1142_v63 = vpop.f32.mrf.mxu1 }
 0x12c   : > { %v1143_v28 = vadd.f32 %v1142_v63, %v1129_v27 }
 0x132   : > { %v1155_v57 = vpop.f32.mrf.mxu2  ;;  %v1131_v30 = vpop.f32.mrf.mxu0 }
 0x133   : > { %v1156_v29 = vadd.f32 %v1155_v57, %v1143_v28  ;;  %v1168_v60 = vpop.f32.mrf.mxu3  ;;  %v1144_v32 = vpop.f32.mrf.mxu1 }
 0x135   : > { %v1169_v33 = vadd.f32 %v1168_v60, %v1156_v29 }
 0x137   : > { %v1173_v34 = vadd.f32 %v1169_v33, %v667_v31  ;;  %1179 = sbr.rel (%p1633_p13) target bundleno = 332 (0x14c), region = 86 }
 0x139   : > { %1175 = vst [vmem:[#allocation2 + $0x8] sm:$0xff] %v1173_v34 }
 0x13a   : > { %v1157_v35 = vpop.f32.mrf.mxu2 }
 0x13b   : > { %v1170_v36 = vpop.f32.mrf.mxu3 }
 0x13c   : > { %v1180_v37 = vld [vmem:[#allocation2] sm:$0xff] }
 0x13d   : > { %v1182_v39 = vld [vmem:[%s633_s18] sm:$0x3] }
 0x13e   : > { %v1184_v40 = vperm.slane %v1182_v39, 0  ;;  %v1185_v41 = vperm.slane %v1182_v39, 1  ;;  %v1190_v42 = vld [vmem:[%s638_s21] sm:$0x3] }
 0x13f   : > { %v1198_v43 = vld [vmem:[%s2061_s17] sm:$0xff]  ;;  %v1192_v44 = vperm.slane %v1190_v42, 0  ;;  %v1193_v45 = vperm.slane %v1190_v42, 1 }
 0x140   : > { %v1181_v38 = vld [vmem:[#allocation2 + $0x8] sm:$0xff]  ;;  %v1188_v46 = vmul.f32 %v1184_v40, %v1180_v37  ;;  %v1199_v48 = vunpack.c.l.bf16 %v1198_v43  ;;  %v1200_v49 = vunpack.c.h.bf16 %v1198_v43 }
 0x141   : > { %v1189_v47 = vmul.f32 %v1185_v41, %v1181_v38 }
 0x142   : > { %v1196_v50 = vadd.f32 %v1192_v44, %v1188_v46 }
 0x143   : > { %v1197_v51 = vadd.f32 %v1193_v45, %v1189_v47 }
 0x144   : > { %v1201_v52 = vadd.f32 %v1199_v48, %v1196_v50 }
 0x145   : > { %v1202_v53 = vadd.f32 %v1200_v49, %v1197_v51 }
 0x146   : > { %v1203_v54 = vmax.f32 %v1201_v52, 0.0 }
 0x147   : > { %v1204_v55 = vmax.f32 %v1202_v53, 0.0 }
 0x149   : > { %v1205_v56 = vpack.c.bf16 %v1204_v55, %v1203_v54 }
 0x14b   : > { %1206 = vst [vmem:[%s2066_s7] sm:$0xff] %v1205_v56 }
 0x14c PF: > { %s15_s24 = sadd.s32 1, %s1812_s24   ;;  %s2257_s18 = smov %s1792_s19 }
 0x14d   : > { %p12_p0 = scmp.ge.s32.totalorder %s15_s24, 20   ;;  %s2258_s19 = smov %s1896_s6 }
 0x14e   : > { %s2259_s20 = smov %s1804_s22  ;;  %s2260_s21 = smov %s1808_s23 }
 0x14f   : > { %s2261_s22 = smov %s2264_s25  ;;  %s2262_s23 = smov %s2268_s26 }
 0x150   :  { %14 = sbr.rel (!%p12_p0) target bundleno = 4 (0x4), region = 133 }

// kernel: resnet_forward.39
= control target key start
LH: loop header
LB: loop body
LE: loop exit
PB: predicated region body
PF: predicated region fallthrough
CT: control target
= control target key end

     0   :  { %s1752_s15 = smov 0   ;;  %s1754_s16 = smov 0   ;;  %s2152_s0 = inlined_call_operand.vmem [shape: bf16[8,4608], index: 0, kind: input, shape index: {}]   ;;  %s2153_s1 = inlined_call_operand.vmem [shape: bf16[4608,512], index: 1, kind: input, shape index: {}]   ;;  %s2154_s2 = inlined_call_operand.vmem [shape: f32[1,512], index: 2, kind: input, shape index: {}]   ;;  %s2155_s3 = inlined_call_operand.vmem [shape: f32[1,512], index: 3, kind: input, shape index: {}]   ;;  %s2156_s4 = inlined_call_operand.vmem [shape: bf16[8,512], index: 4, kind: output, shape index: {}]  }
   0x1   :  { %s1756_s17 = smov 0   ;;  %s1758_s18 = smov 0  }
   0x2   :  { %s1760_s19 = smov 0   ;;  %s1762_s20 = smov 0  }
   0x3   :  { %s1764_s21 = smov 0  }
   0x4 LB: > { %s26_s22 = sadd.s32 1, %s1716_s19  ;;  %s29_s23 = sadd.s32 1, %s1720_s20  ;;  %s1724_s21 = sphi %s1764_s21, %s14_s21   ;;  %s1720_s20 = sphi %s1762_s20, %s2162_s20   ;;  %s1716_s19 = sphi %s1760_s19, %s2161_s19   ;;  %s1712_s18 = sphi %s1758_s18, %s2160_s18   ;;  %s1708_s17 = sphi %s1756_s17, %s2159_s17   ;;  %s1704_s16 = sphi %s1754_s16, %s2158_s16   ;;  %s1700_s15 = sphi %s1752_s15, %s2157_s15  }
   0x5   : > { %p27_p0 = scmp.ge.s32.totalorder %s26_s22, 9  ;;  %p77_p1 = scmp.ne.s32.totalorder %s1704_s16, %s1700_s15 }
   0x6   : > { %p78_p2 = scmp.eq.s32.totalorder %s1724_s21, 0  ;;  %s70_s27 = sadd.s32 1, %s1704_s16 }
   0x7   : > { %s2164_s22 = smov (%p27_p0, %s26_s22), 0  ;;  %s2166_s23 = smov (!%p27_p0, %s29_s23), %s1720_s20 }
   0x8   : > { %p79_p3 = por %p78_p2, %p77_p1  ;;  %p31_p4 = scmp.ge.s32.totalorder %s2166_s23, 2 }
   0x9   : > { %s65_s24 = ssub.s32 %s1716_s19, %s2164_s22  ;;  %p1274_p6 = scmp.ge.s32.totalorder %s1724_s21, 18 }
   0xa   : > { %s2168_s23 = smov (%p31_p4, %s2166_s23), 0 }
   0xb   : > { %s66_s25 = ssub.s32 %s1720_s20, %s2168_s23  ;;  %183 = sbr.rel (%p1274_p6) target bundleno = 87 (0x57), region = 16 }
   0xc   : > { %s67_s26 = sor.u32 %s66_s25, %s65_s24 }
   0xd   : > { %p68_p5 = scmp.eq.s32.totalorder %s67_s26, 0 }
   0xf   : > { %s1803_s28 = scalar_select %p68_p5, %s1704_s16, %s70_s27  }
  0x10   : > { %199 = sbr.rel (!%p79_p3) target bundleno = 87 (0x57), region = 24  ;;  %s201_s29 = sand.u32 (%p79_p3), 1, %s1704_s16  }
  0x11   : > { %s1277_s30 = sshll.u32 (%p79_p3), %s1720_s20, 1  ;;  %s1275_s5 = sshll.u32 (%p79_p3), %s201_s29, 9 }
  0x12   : > { %s1548_s6 = sshll.u32 (%p79_p3), %s1716_s19, 8  ;;  %s1817_s12 = scalar_lea.vmem (%p79_p3), [#allocation3], %s1275_s5 }
  0x13   : > { %s207_s7 = sadd.s32 (%p79_p3), %s1548_s6, %s1277_s30 }
  0x14   : > { %s1279_s8 = sshll.u32 (%p79_p3), %s207_s7, 2 }
  0x15   : > { %s1812_s11 = scalar_lea.vmem %s2153_s1, %s1279_s8 }
  0x16   : > { %v364_v0 = vld [vmem:[%s1812_s11] sm:$0xff]  ;;  %v366_v1 = vld [vmem:[%s1812_s11 + $0x10] sm:$0xff] }
  0x17   : > { %v368_v2 = vld [vmem:[%s1812_s11 + $0x20] sm:$0xff]  ;;  %365 = vst [vmem:[%s1817_s12] sm:$0xff] %v364_v0  ;;  %v370_v3 = vld [vmem:[%s1812_s11 + $0x30] sm:$0xff] }
  0x18   : > { %367 = vst [vmem:[%s1817_s12 + $0x8] sm:$0xff] %v366_v1  ;;  %v372_v4 = vld [vmem:[%s1812_s11 + $0x40] sm:$0xff]  ;;  %v374_v5 = vld [vmem:[%s1812_s11 + $0x50] sm:$0xff] }
  0x19   : > { %369 = vst [vmem:[%s1817_s12 + $0x10] sm:$0xff] %v368_v2  ;;  %v376_v6 = vld [vmem:[%s1812_s11 + $0x60] sm:$0xff]  ;;  %v378_v7 = vld [vmem:[%s1812_s11 + $0x70] sm:$0xff] }
  0x1a   : > { %371 = vst [vmem:[%s1817_s12 + $0x18] sm:$0xff] %v370_v3  ;;  %v380_v8 = vld [vmem:[%s1812_s11 + $0x80] sm:$0xff]  ;;  %v382_v9 = vld [vmem:[%s1812_s11 + $0x90] sm:$0xff] }
  0x1b   : > { %373 = vst [vmem:[%s1817_s12 + $0x20] sm:$0xff] %v372_v4  ;;  %v384_v10 = vld [vmem:[%s1812_s11 + $0xa0] sm:$0xff]  ;;  %v386_v11 = vld [vmem:[%s1812_s11 + $0xb0] sm:$0xff] }
  0x1c   : > { %375 = vst [vmem:[%s1817_s12 + $0x28] sm:$0xff] %v374_v5  ;;  %v388_v12 = vld [vmem:[%s1812_s11 + $0xc0] sm:$0xff]  ;;  %v390_v13 = vld [vmem:[%s1812_s11 + $0xd0] sm:$0xff] }
  0x1d   : > { %377 = vst [vmem:[%s1817_s12 + $0x30] sm:$0xff] %v376_v6  ;;  %v392_v14 = vld [vmem:[%s1812_s11 + $0xe0] sm:$0xff]  ;;  %v394_v15 = vld [vmem:[%s1812_s11 + $0xf0] sm:$0xff] }
  0x1e   : > { %379 = vst [vmem:[%s1817_s12 + $0x38] sm:$0xff] %v378_v7  ;;  %v396_v16 = vld [vmem:[%s1812_s11 + $0x100] sm:$0xff]  ;;  %v398_v17 = vld [vmem:[%s1812_s11 + $0x110] sm:$0xff] }
  0x1f   : > { %381 = vst [vmem:[%s1817_s12 + $0x40] sm:$0xff] %v380_v8  ;;  %v400_v18 = vld [vmem:[%s1812_s11 + $0x120] sm:$0xff]  ;;  %v402_v19 = vld [vmem:[%s1812_s11 + $0x130] sm:$0xff] }
  0x20   : > { %383 = vst [vmem:[%s1817_s12 + $0x48] sm:$0xff] %v382_v9  ;;  %v404_v20 = vld [vmem:[%s1812_s11 + $0x140] sm:$0xff]  ;;  %v406_v21 = vld [vmem:[%s1812_s11 + $0x150] sm:$0xff] }
  0x21   : > { %385 = vst [vmem:[%s1817_s12 + $0x50] sm:$0xff] %v384_v10  ;;  %v408_v22 = vld [vmem:[%s1812_s11 + $0x160] sm:$0xff]  ;;  %v410_v23 = vld [vmem:[%s1812_s11 + $0x170] sm:$0xff] }
  0x22   : > { %387 = vst [vmem:[%s1817_s12 + $0x58] sm:$0xff] %v386_v11  ;;  %v412_v24 = vld [vmem:[%s1812_s11 + $0x180] sm:$0xff]  ;;  %v414_v25 = vld [vmem:[%s1812_s11 + $0x190] sm:$0xff] }
  0x23   : > { %389 = vst [vmem:[%s1817_s12 + $0x60] sm:$0xff] %v388_v12  ;;  %v416_v26 = vld [vmem:[%s1812_s11 + $0x1a0] sm:$0xff]  ;;  %v418_v27 = vld [vmem:[%s1812_s11 + $0x1b0] sm:$0xff] }
  0x24   : > { %391 = vst [vmem:[%s1817_s12 + $0x68] sm:$0xff] %v390_v13  ;;  %v420_v28 = vld [vmem:[%s1812_s11 + $0x1c0] sm:$0xff]  ;;  %v422_v29 = vld [vmem:[%s1812_s11 + $0x1d0] sm:$0xff] }
  0x25   : > { %393 = vst [vmem:[%s1817_s12 + $0x70] sm:$0xff] %v392_v14  ;;  %v424_v30 = vld [vmem:[%s1812_s11 + $0x1e0] sm:$0xff]  ;;  %v426_v31 = vld [vmem:[%s1812_s11 + $0x1f0] sm:$0xff] }
  0x26   : > { %395 = vst [vmem:[%s1817_s12 + $0x78] sm:$0xff] %v394_v15  ;;  %v428_v32 = vld [vmem:[%s1812_s11 + $0x200] sm:$0xff]  ;;  %v430_v33 = vld [vmem:[%s1812_s11 + $0x210] sm:$0xff] }
  0x27   : > { %397 = vst [vmem:[%s1817_s12 + $0x80] sm:$0xff] %v396_v16  ;;  %v432_v34 = vld [vmem:[%s1812_s11 + $0x220] sm:$0xff]  ;;  %v434_v35 = vld [vmem:[%s1812_s11 + $0x230] sm:$0xff] }
  0x28   : > { %399 = vst [vmem:[%s1817_s12 + $0x88] sm:$0xff] %v398_v17  ;;  %v436_v36 = vld [vmem:[%s1812_s11 + $0x240] sm:$0xff]  ;;  %v438_v37 = vld [vmem:[%s1812_s11 + $0x250] sm:$0xff] }
  0x29   : > { %401 = vst [vmem:[%s1817_s12 + $0x90] sm:$0xff] %v400_v18  ;;  %v440_v38 = vld [vmem:[%s1812_s11 + $0x260] sm:$0xff]  ;;  %v442_v39 = vld [vmem:[%s1812_s11 + $0x270] sm:$0xff] }
  0x2a   : > { %403 = vst [vmem:[%s1817_s12 + $0x98] sm:$0xff] %v402_v19  ;;  %v444_v40 = vld [vmem:[%s1812_s11 + $0x280] sm:$0xff]  ;;  %v446_v41 = vld [vmem:[%s1812_s11 + $0x290] sm:$0xff] }
  0x2b   : > { %405 = vst [vmem:[%s1817_s12 + $0xa0] sm:$0xff] %v404_v20  ;;  %v448_v42 = vld [vmem:[%s1812_s11 + $0x2a0] sm:$0xff]  ;;  %v450_v43 = vld [vmem:[%s1812_s11 + $0x2b0] sm:$0xff] }
  0x2c   : > { %407 = vst [vmem:[%s1817_s12 + $0xa8] sm:$0xff] %v406_v21  ;;  %v452_v44 = vld [vmem:[%s1812_s11 + $0x2c0] sm:$0xff]  ;;  %v454_v45 = vld [vmem:[%s1812_s11 + $0x2d0] sm:$0xff] }
  0x2d   : > { %409 = vst [vmem:[%s1817_s12 + $0xb0] sm:$0xff] %v408_v22  ;;  %v456_v46 = vld [vmem:[%s1812_s11 + $0x2e0] sm:$0xff]  ;;  %v458_v47 = vld [vmem:[%s1812_s11 + $0x2f0] sm:$0xff] }
  0x2e   : > { %411 = vst [vmem:[%s1817_s12 + $0xb8] sm:$0xff] %v410_v23  ;;  %v460_v48 = vld [vmem:[%s1812_s11 + $0x300] sm:$0xff]  ;;  %v462_v49 = vld [vmem:[%s1812_s11 + $0x310] sm:$0xff] }
  0x2f   : > { %413 = vst [vmem:[%s1817_s12 + $0xc0] sm:$0xff] %v412_v24  ;;  %v464_v50 = vld [vmem:[%s1812_s11 + $0x320] sm:$0xff]  ;;  %v466_v51 = vld [vmem:[%s1812_s11 + $0x330] sm:$0xff] }
  0x30   : > { %415 = vst [vmem:[%s1817_s12 + $0xc8] sm:$0xff] %v414_v25  ;;  %v468_v52 = vld [vmem:[%s1812_s11 + $0x340] sm:$0xff]  ;;  %v470_v53 = vld [vmem:[%s1812_s11 + $0x350] sm:$0xff] }
  0x31   : > { %417 = vst [vmem:[%s1817_s12 + $0xd0] sm:$0xff] %v416_v26  ;;  %v472_v54 = vld [vmem:[%s1812_s11 + $0x360] sm:$0xff]  ;;  %v474_v55 = vld [vmem:[%s1812_s11 + $0x370] sm:$0xff] }
  0x32   : > { %419 = vst [vmem:[%s1817_s12 + $0xd8] sm:$0xff] %v418_v27  ;;  %v476_v56 = vld [vmem:[%s1812_s11 + $0x380] sm:$0xff]  ;;  %v478_v57 = vld [vmem:[%s1812_s11 + $0x390] sm:$0xff] }
  0x33   : > { %421 = vst [vmem:[%s1817_s12 + $0xe0] sm:$0xff] %v420_v28  ;;  %v480_v58 = vld [vmem:[%s1812_s11 + $0x3a0] sm:$0xff]  ;;  %v482_v59 = vld [vmem:[%s1812_s11 + $0x3b0] sm:$0xff] }
  0x34   : > { %423 = vst [vmem:[%s1817_s12 + $0xe8] sm:$0xff] %v422_v29  ;;  %v484_v60 = vld [vmem:[%s1812_s11 + $0x3c0] sm:$0xff]  ;;  %v486_v61 = vld [vmem:[%s1812_s11 + $0x3d0] sm:$0xff] }
  0x35   : > { %425 = vst [vmem:[%s1817_s12 + $0xf0] sm:$0xff] %v424_v30  ;;  %v488_v62 = vld [vmem:[%s1812_s11 + $0x3e0] sm:$0xff]  ;;  %v490_v63 = vld [vmem:[%s1812_s11 + $0x3f0] sm:$0xff] }
  0x36   : > { %427 = vst [vmem:[%s1817_s12 + $0xf8] sm:$0xff] %v426_v31 }
  0x37   : > { %429 = vst [vmem:[%s1817_s12 + $0x100] sm:$0xff] %v428_v32 }
  0x38   : > { %431 = vst [vmem:[%s1817_s12 + $0x108] sm:$0xff] %v430_v33 }
  0x39   : > { %433 = vst [vmem:[%s1817_s12 + $0x110] sm:$0xff] %v432_v34 }
  0x3a   : > { %435 = vst [vmem:[%s1817_s12 + $0x118] sm:$0xff] %v434_v35 }
  0x3b   : > { %437 = vst [vmem:[%s1817_s12 + $0x120] sm:$0xff] %v436_v36 }
  0x3c   : > { %439 = vst [vmem:[%s1817_s12 + $0x128] sm:$0xff] %v438_v37 }
  0x3d   : > { %441 = vst [vmem:[%s1817_s12 + $0x130] sm:$0xff] %v440_v38 }
  0x3e   : > { %443 = vst [vmem:[%s1817_s12 + $0x138] sm:$0xff] %v442_v39 }
  0x3f   : > { %445 = vst [vmem:[%s1817_s12 + $0x140] sm:$0xff] %v444_v40 }
  0x40   : > { %447 = vst [vmem:[%s1817_s12 + $0x148] sm:$0xff] %v446_v41 }
  0x41   : > { %449 = vst [vmem:[%s1817_s12 + $0x150] sm:$0xff] %v448_v42 }
  0x42   : > { %451 = vst [vmem:[%s1817_s12 + $0x158] sm:$0xff] %v450_v43 }
  0x43   : > { %453 = vst [vmem:[%s1817_s12 + $0x160] sm:$0xff] %v452_v44 }
  0x44   : > { %455 = vst [vmem:[%s1817_s12 + $0x168] sm:$0xff] %v454_v45 }
  0x45   : > { %457 = vst [vmem:[%s1817_s12 + $0x170] sm:$0xff] %v456_v46 }
  0x46   : > { %459 = vst [vmem:[%s1817_s12 + $0x178] sm:$0xff] %v458_v47 }
  0x47   : > { %461 = vst [vmem:[%s1817_s12 + $0x180] sm:$0xff] %v460_v48 }
  0x48   : > { %463 = vst [vmem:[%s1817_s12 + $0x188] sm:$0xff] %v462_v49 }
  0x49   : > { %465 = vst [vmem:[%s1817_s12 + $0x190] sm:$0xff] %v464_v50 }
  0x4a   : > { %467 = vst [vmem:[%s1817_s12 + $0x198] sm:$0xff] %v466_v51 }
  0x4b   : > { %469 = vst [vmem:[%s1817_s12 + $0x1a0] sm:$0xff] %v468_v52 }
  0x4c   : > { %471 = vst [vmem:[%s1817_s12 + $0x1a8] sm:$0xff] %v470_v53 }
  0x4d   : > { %473 = vst [vmem:[%s1817_s12 + $0x1b0] sm:$0xff] %v472_v54 }
  0x4e   : > { %475 = vst [vmem:[%s1817_s12 + $0x1b8] sm:$0xff] %v474_v55 }
  0x4f   : > { %477 = vst [vmem:[%s1817_s12 + $0x1c0] sm:$0xff] %v476_v56 }
  0x50   : > { %479 = vst [vmem:[%s1817_s12 + $0x1c8] sm:$0xff] %v478_v57 }
  0x51   : > { %481 = vst [vmem:[%s1817_s12 + $0x1d0] sm:$0xff] %v480_v58 }
  0x52   : > { %483 = vst [vmem:[%s1817_s12 + $0x1d8] sm:$0xff] %v482_v59 }
  0x53   : > { %485 = vst [vmem:[%s1817_s12 + $0x1e0] sm:$0xff] %v484_v60 }
  0x54   : > { %487 = vst [vmem:[%s1817_s12 + $0x1e8] sm:$0xff] %v486_v61 }
  0x55   : > { %489 = vst [vmem:[%s1817_s12 + $0x1f0] sm:$0xff] %v488_v62 }
  0x56   : > { %491 = vst [vmem:[%s1817_s12 + $0x1f8] sm:$0xff] %v490_v63 }
  0x57 PF: > { %p1280_p7 = scmp.ge.s32.totalorder %s1724_s21, 1  ;;  %p512_p8 = scmp.lt.s32.totalorder %s1724_s21, 19 }
  0x59   : > { %p513_p9 = pnand %p1280_p7, %p512_p8 }
  0x5a   : > { %s519_s13 = sand.u32 (!%p513_p9), 1, %s1700_s15   ;;  %s1282_s14 = sshll.u32 (!%p513_p9), %s1708_s17, 2 }
  0x5b   : > { %516 = sbr.rel (%p513_p9) target bundleno = 330 (0x14a), region = 70  ;;  %s1281_s24 = sshll.u32 (!%p513_p9), %s519_s13, 9 }
  0x5c   : > { %p568_p10 = scmp.lt.s32.totalorder (!%p513_p9), %s1282_s14, 35  ;;  %s1284_s25 = sshll.u32 (!%p513_p9), %s1712_s18, 1 }
  0x5d   : > { %p578_p11 = scmp.lt.s32.totalorder (!%p513_p9), %s1284_s25, 3  ;;  %s1970_s13 = scalar_lea.vmem (!%p513_p9), [#allocation3], %s1281_s24 }
  0x5e   : > { %p1288_p12 = scmp.ne.s32.totalorder (!%p513_p9), %s1708_s17, 0 }
  0x60   : > { %s2170_s14 = smov (!%p568_p10, %s1282_s14), 35  ;;  %s2172_s25 = smov (!%p578_p11, %s1284_s25), 3 }
  0x61   : > { %s1283_s26 = sshll.u32 %s2170_s14, 2  ;;  %s580_s15 = scalar_lea.vmem %s2154_s2, %s2172_s25 }
  0x62   : > { %s1952_s30 = scalar_lea.vmem %s2152_s0, %s1283_s26  ;;  %s585_s18 = scalar_lea.vmem %s2155_s3, %s2172_s25 }
  0x63   : > { %s1287_s9 = sshll.u32 %s2172_s25, 2  ;;  %600 = sbr.rel (%p1288_p12) target bundleno = 107 (0x6b), region = 78 }
  0x64   : > { %s1968_s12 = scalar_lea.vmem %s2156_s4, %s1287_s9 }
  0x68   : > { %v1726_v0 = vmov 0.0  }
  0x69   : > { %601 = vst [vmem:[#allocation2] sm:$0xff] %v1726_v0 }
  0x6a   : > { %602 = vst [vmem:[#allocation2 + $0x8] sm:$0xff] %v1726_v0 }
  0x6b PF: > { %v1347_v1 = vld [vmem:[%s1970_s13 + $0x70] sm:$0xf]  ;;  %v1564_v2 = vld [vmem:[%s1970_s13 + $0x74] sm:$0xf0]  ;;  %v1339_v12 = vld [vmem:[%s1970_s13 + $0x60] sm:$0xf] }
  0x6c   : > { %v1411_v3 = vld [vmem:[%s1970_s13 + $0xf0] sm:$0xf]  ;;  %v1348_v4 = vor.u32 %v1564_v2, %v1347_v1  ;;  %v1580_v5 = vld [vmem:[%s1970_s13 + $0xf4] sm:$0xf0]  ;;  %v1562_v14 = vld [vmem:[%s1970_s13 + $0x64] sm:$0xf0] }
  0x6d   : > { %v1475_v6 = vld [vmem:[%s1970_s13 + $0x170] sm:$0xf]  ;;  %v1596_v7 = vld [vmem:[%s1970_s13 + $0x174] sm:$0xf0]  ;;  %v1412_v8 = vor.u32 %v1580_v5, %v1411_v3  ;;  %v1403_v15 = vld [vmem:[%s1970_s13 + $0xe0] sm:$0xf]  ;;  %v1340_v17 = vor.u32 %v1562_v14, %v1339_v12 }
  0x6e   : > { %v1476_v9 = vor.u32 %v1596_v7, %v1475_v6  ;;  %v1539_v10 = vld [vmem:[%s1970_s13 + $0x1f0] sm:$0xf]  ;;  %v1612_v11 = vld [vmem:[%s1970_s13 + $0x1f4] sm:$0xf0]  ;;  %1005 = vmatpush.bf16.msra.mxu0 %v1348_v4  ;;  %v1578_v16 = vld [vmem:[%s1970_s13 + $0xe4] sm:$0xf0] }
  0x6f   : > { %v1540_v13 = vor.u32 %v1612_v11, %v1539_v10  ;;  %1018 = vmatpush.bf16.msra.mxu1 %v1412_v8  ;;  %v1404_v18 = vor.u32 %v1578_v16, %v1403_v15  ;;  %v1467_v19 = vld [vmem:[%s1970_s13 + $0x160] sm:$0xf]  ;;  %v1594_v20 = vld [vmem:[%s1970_s13 + $0x164] sm:$0xf0]  ;;  %v1331_v24 = vld [vmem:[%s1970_s13 + $0x50] sm:$0xf] }
  0x70   : > { %1031 = vmatpush.bf16.msra.mxu2 %v1476_v9  ;;  %v1531_v21 = vld [vmem:[%s1970_s13 + $0x1e0] sm:$0xf]  ;;  %v1468_v22 = vor.u32 %v1594_v20, %v1467_v19  ;;  %v1610_v23 = vld [vmem:[%s1970_s13 + $0x1e4] sm:$0xf0]  ;;  %v1560_v25 = vld [vmem:[%s1970_s13 + $0x54] sm:$0xf0] }
  0x71   : > { %1044 = vmatpush.bf16.msra.mxu3 %v1540_v13  ;;  %v1532_v26 = vor.u32 %v1610_v23, %v1531_v21  ;;  %v1395_v27 = vld [vmem:[%s1970_s13 + $0xd0] sm:$0xf]  ;;  %v1576_v28 = vld [vmem:[%s1970_s13 + $0xd4] sm:$0xf0]  ;;  %v1332_v30 = vor.u32 %v1560_v25, %v1331_v24  ;;  %v1323_v36 = vld [vmem:[%s1970_s13 + $0x40] sm:$0xf] }
  0x72   : > { %v1459_v29 = vld [vmem:[%s1970_s13 + $0x150] sm:$0xf]  ;;  %1006 = vmatpush.bf16.msra.mxu0 %v1340_v17  ;;  %v1592_v31 = vld [vmem:[%s1970_s13 + $0x154] sm:$0xf0]  ;;  %v1396_v34 = vor.u32 %v1576_v28, %v1395_v27  ;;  %v1558_v37 = vld [vmem:[%s1970_s13 + $0x44] sm:$0xf0] }
  0x73   : > { %v1523_v32 = vld [vmem:[%s1970_s13 + $0x1d0] sm:$0xf]  ;;  %v1608_v33 = vld [vmem:[%s1970_s13 + $0x1d4] sm:$0xf0]  ;;  %1019 = vmatpush.bf16.msra.mxu1 %v1404_v18  ;;  %v1460_v35 = vor.u32 %v1592_v31, %v1459_v29  ;;  %v1387_v38 = vld [vmem:[%s1970_s13 + $0xc0] sm:$0xf]  ;;  %v1324_v45 = vor.u32 %v1558_v37, %v1323_v36 }
  0x74   : > { %1032 = vmatpush.bf16.msra.mxu2 %v1468_v22  ;;  %v1524_v39 = vor.u32 %v1608_v33, %v1523_v32  ;;  %v1574_v40 = vld [vmem:[%s1970_s13 + $0xc4] sm:$0xf0]  ;;  %v1451_v41 = vld [vmem:[%s1970_s13 + $0x140] sm:$0xf]  ;;  %v1315_v48 = vld [vmem:[%s1970_s13 + $0x30] sm:$0xf] }
  0x75   : > { %1045 = vmatpush.bf16.msra.mxu3 %v1532_v26  ;;  %v1590_v42 = vld [vmem:[%s1970_s13 + $0x144] sm:$0xf0]  ;;  %v1515_v43 = vld [vmem:[%s1970_s13 + $0x1c0] sm:$0xf]  ;;  %v1388_v46 = vor.u32 %v1574_v40, %v1387_v38  ;;  %v1556_v49 = vld [vmem:[%s1970_s13 + $0x34] sm:$0xf0] }
  0x76   : > { %v1606_v44 = vld [vmem:[%s1970_s13 + $0x1c4] sm:$0xf0]  ;;  %1007 = vmatpush.bf16.msra.mxu0 %v1332_v30  ;;  %v1452_v47 = vor.u32 %v1590_v42, %v1451_v41  ;;  %v1379_v50 = vld [vmem:[%s1970_s13 + $0xb0] sm:$0xf]  ;;  %v1572_v52 = vld [vmem:[%s1970_s13 + $0xb4] sm:$0xf0]  ;;  %v1316_v57 = vor.u32 %v1556_v49, %v1315_v48 }
  0x77   : > { %1020 = vmatpush.bf16.msra.mxu1 %v1396_v34  ;;  %v1516_v51 = vor.u32 %v1606_v44, %v1515_v43  ;;  %v1443_v53 = vld [vmem:[%s1970_s13 + $0x130] sm:$0xf]  ;;  %v1588_v54 = vld [vmem:[%s1970_s13 + $0x134] sm:$0xf0]  ;;  %v1380_v58 = vor.u32 %v1572_v52, %v1379_v50  ;;  %v1307_v60 = vld [vmem:[%s1970_s13 + $0x20] sm:$0xf] }
  0x78   : > { %1033 = vmatpush.bf16.msra.mxu2 %v1460_v35  ;;  %v1507_v55 = vld [vmem:[%s1970_s13 + $0x1b0] sm:$0xf]  ;;  %v1604_v56 = vld [vmem:[%s1970_s13 + $0x1b4] sm:$0xf0]  ;;  %v1444_v59 = vor.u32 %v1588_v54, %v1443_v53  ;;  %v1554_v61 = vld [vmem:[%s1970_s13 + $0x24] sm:$0xf0] }
  0x79   : > { %1046 = vmatpush.bf16.msra.mxu3 %v1524_v39  ;;  %v1371_v62 = vld [vmem:[%s1970_s13 + $0xa0] sm:$0xf]  ;;  %v1508_v63 = vor.u32 %v1604_v56, %v1507_v55  ;;  %v1570_v0 = vld [vmem:[%s1970_s13 + $0xa4] sm:$0xf0]  ;;  %v1308_v5 = vor.u32 %v1554_v61, %v1307_v60  ;;  %v1299_v8 = vld [vmem:[%s1970_s13 + $0x10] sm:$0xf] }
  0x7a   : > { %1008 = vmatpush.bf16.msra.mxu0 %v1324_v45  ;;  %v1435_v1 = vld [vmem:[%s1970_s13 + $0x120] sm:$0xf]  ;;  %v1586_v2 = vld [vmem:[%s1970_s13 + $0x124] sm:$0xf0]  ;;  %v1372_v6 = vor.u32 %v1570_v0, %v1371_v62  ;;  %v1552_v9 = vld [vmem:[%s1970_s13 + $0x14] sm:$0xf0] }
  0x7b   : > { %1021 = vmatpush.bf16.msra.mxu1 %v1388_v46  ;;  %v1499_v3 = vld [vmem:[%s1970_s13 + $0x1a0] sm:$0xf]  ;;  %v1602_v4 = vld [vmem:[%s1970_s13 + $0x1a4] sm:$0xf0]  ;;  %v1436_v7 = vor.u32 %v1586_v2, %v1435_v1  ;;  %v1363_v10 = vld [vmem:[%s1970_s13 + $0x90] sm:$0xf]  ;;  %v1300_v17 = vor.u32 %v1552_v9, %v1299_v8 }
  0x7c   : > { %1034 = vmatpush.bf16.msra.mxu2 %v1452_v47  ;;  %v1500_v11 = vor.u32 %v1602_v4, %v1499_v3  ;;  %v1568_v12 = vld [vmem:[%s1970_s13 + $0x94] sm:$0xf0]  ;;  %v1427_v13 = vld [vmem:[%s1970_s13 + $0x110] sm:$0xf]  ;;  %v1291_v18 = vld [vmem:[%s1970_s13] sm:$0xf] }
  0x7d   : > { %1047 = vmatpush.bf16.msra.mxu3 %v1516_v51  ;;  %v1584_v14 = vld [vmem:[%s1970_s13 + $0x114] sm:$0xf0]  ;;  %v1491_v15 = vld [vmem:[%s1970_s13 + $0x190] sm:$0xf]  ;;  %v1550_v19 = vld [vmem:[%s1970_s13 + $0x4] sm:$0xf0]  ;;  %v1364_v21 = vor.u32 %v1568_v12, %v1363_v10 }
  0x7e   : > { %1009 = vmatpush.bf16.msra.mxu0 %v1316_v57  ;;  %v1600_v16 = vld [vmem:[%s1970_s13 + $0x194] sm:$0xf0]  ;;  %v1355_v20 = vld [vmem:[%s1970_s13 + $0x80] sm:$0xf]  ;;  %v1428_v22 = vor.u32 %v1584_v14, %v1427_v13  ;;  %v1566_v23 = vld [vmem:[%s1970_s13 + $0x84] sm:$0xf0]  ;;  %v1292_v33 = vor.u32 %v1550_v19, %v1291_v18 }
  0x7f   : > { %1022 = vmatpush.bf16.msra.mxu1 %v1380_v58  ;;  %v1419_v24 = vld [vmem:[%s1970_s13 + $0x100] sm:$0xf]  ;;  %v1582_v25 = vld [vmem:[%s1970_s13 + $0x104] sm:$0xf0]  ;;  %v1492_v26 = vor.u32 %v1600_v16, %v1491_v15  ;;  %v1563_v29 = vld [vmem:[%s1970_s13 + $0x74] sm:$0xf]  ;;  %v1356_v38 = vor.u32 %v1566_v23, %v1355_v20 }
  0x80   : > { %1035 = vmatpush.bf16.msra.mxu2 %v1444_v59  ;;  %v1483_v27 = vld [vmem:[%s1970_s13 + $0x180] sm:$0xf]  ;;  %v1598_v28 = vld [vmem:[%s1970_s13 + $0x184] sm:$0xf0]  ;;  %v1349_v30 = vld [vmem:[%s1970_s13 + $0x78] sm:$0xf0]  ;;  %v1420_v39 = vor.u32 %v1582_v25, %v1419_v24 }
  0x81   : > { %1048 = vmatpush.bf16.msra.mxu3 %v1508_v63  ;;  %v1579_v31 = vld [vmem:[%s1970_s13 + $0xf4] sm:$0xf]  ;;  %v606_v32 = vld [vmem:[%s1952_s30 + $0x8] sm:$0xff]  ;;  %v1484_v43 = vor.u32 %v1598_v28, %v1483_v27  ;;  %v1352_v44 = vor.u32 %v1563_v29, %v1349_v30  ;;  %v1561_v48 = vld [vmem:[%s1970_s13 + $0x64] sm:$0xf]  ;;  %p1545_p13 = scmp.ne.s32.totalorder %s1708_s17, 8 }
  0x82   : > { %1010 = vmatpush.bf16.msra.mxu0 %v1308_v5  ;;  %v1413_v34 = vld [vmem:[%s1970_s13 + $0xf8] sm:$0xf0]  ;;  %v1595_v35 = vld [vmem:[%s1970_s13 + $0x174] sm:$0xf]  ;;  %v675_v37 = vunpack.c.l.b16 %v606_v32  ;;  %v676_v42 = vunpack.c.h.b16 %v606_v32  ;;  %v1341_v49 = vld [vmem:[%s1970_s13 + $0x68] sm:$0xf0] }
  0x83   : > { %1023 = vmatpush.bf16.msra.mxu1 %v1372_v6  ;;  %v1477_v36 = vld [vmem:[%s1970_s13 + $0x178] sm:$0xf0]  ;;  %v1611_v40 = vld [vmem:[%s1970_s13 + $0x1f4] sm:$0xf]  ;;  %v1416_v46 = vor.u32 %v1579_v31, %v1413_v34  ;;  %v1577_v50 = vld [vmem:[%s1970_s13 + $0xe4] sm:$0xf]  ;;  %v1344_v62 = vor.u32 %v1561_v48, %v1341_v49 }
  0x84   : > { %1036 = vmatpush.bf16.msra.mxu2 %v1436_v7  ;;  %v1541_v41 = vld [vmem:[%s1970_s13 + $0x1f8] sm:$0xf0]  ;;  %v605_v45 = vld [vmem:[%s1952_s30] sm:$0xff]  ;;  %v1480_v47 = vor.u32 %v1595_v35, %v1477_v36  ;;  %v1405_v54 = vld [vmem:[%s1970_s13 + $0xe8] sm:$0xf0]  ;;  %v2053_v57 = vpack.c.b16 %v675_v37, %v675_v37  ;;  %v2057_v60 = vpack.c.b16 %v676_v42, %v676_v42 }
  0x85   : > { %1049 = vmatpush.bf16.msra.mxu3 %v1500_v11  ;;  %v673_v51 = vunpack.c.l.b16 %v605_v45  ;;  %v674_v52 = vunpack.c.h.b16 %v605_v45  ;;  %v1544_v53 = vor.u32 %v1611_v40, %v1541_v41  ;;  %v1593_v55 = vld [vmem:[%s1970_s13 + $0x164] sm:$0xf]  ;;  %v1469_v56 = vld [vmem:[%s1970_s13 + $0x168] sm:$0xf0]  ;;  %v1408_v0 = vor.u32 %v1577_v50, %v1405_v54  ;;  %v1559_v2 = vld [vmem:[%s1970_s13 + $0x54] sm:$0xf] }
  0x86   : > { %1011 = vmatpush.bf16.msra.mxu0 %v1300_v17  ;;  %v1609_v58 = vld [vmem:[%s1970_s13 + $0x1e4] sm:$0xf]  ;;  %v1533_v59 = vld [vmem:[%s1970_s13 + $0x1e8] sm:$0xf0]  ;;  %v1472_v1 = vor.u32 %v1593_v55, %v1469_v56  ;;  %v1333_v3 = vld [vmem:[%s1970_s13 + $0x58] sm:$0xf0] }
  0x87   : > { %1024 = vmatpush.bf16.msra.mxu1 %v1364_v21  ;;  %v2059_v61 = vpack.c.b16 %v673_v51, %v673_v51  ;;  %v2061_v63 = vpack.c.b16 %v674_v52, %v674_v52  ;;  %v1575_v4 = vld [vmem:[%s1970_s13 + $0xd4] sm:$0xf]  ;;  %v1536_v5 = vor.u32 %v1609_v58, %v1533_v59  ;;  %v1397_v6 = vld [vmem:[%s1970_s13 + $0xd8] sm:$0xf0]  ;;  %v1336_v11 = vor.u32 %v1559_v2, %v1333_v3  ;;  %v1557_v14 = vld [vmem:[%s1970_s13 + $0x44] sm:$0xf] }
  0x88   : > { %1037 = vmatpush.bf16.msra.mxu2 %v1428_v22  ;;  %v1591_v7 = vld [vmem:[%s1970_s13 + $0x154] sm:$0xf]  ;;  %v1461_v8 = vld [vmem:[%s1970_s13 + $0x158] sm:$0xf0]  ;;  %v1400_v12 = vor.u32 %v1575_v4, %v1397_v6  ;;  %v1325_v15 = vld [vmem:[%s1970_s13 + $0x48] sm:$0xf0] }
  0x89   : > { %1050 = vmatpush.bf16.msra.mxu3 %v1492_v26  ;;  %v1607_v9 = vld [vmem:[%s1970_s13 + $0x1d4] sm:$0xf]  ;;  %v1525_v10 = vld [vmem:[%s1970_s13 + $0x1d8] sm:$0xf0]  ;;  %v1464_v13 = vor.u32 %v1591_v7, %v1461_v8  ;;  %v1573_v16 = vld [vmem:[%s1970_s13 + $0xc4] sm:$0xf]  ;;  %v1328_v23 = vor.u32 %v1557_v14, %v1325_v15 }
  0x8a   : > { %1012 = vmatpush.bf16.msra.mxu0 %v1292_v33  ;;  %v1528_v17 = vor.u32 %v1607_v9, %v1525_v10  ;;  %v1389_v18 = vld [vmem:[%s1970_s13 + $0xc8] sm:$0xf0]  ;;  %v1589_v19 = vld [vmem:[%s1970_s13 + $0x144] sm:$0xf]  ;;  %v1555_v26 = vld [vmem:[%s1970_s13 + $0x34] sm:$0xf] }
  0x8b   : > { %1025 = vmatpush.bf16.msra.mxu1 %v1356_v38  ;;  %v1453_v20 = vld [vmem:[%s1970_s13 + $0x148] sm:$0xf0]  ;;  %v1605_v21 = vld [vmem:[%s1970_s13 + $0x1c4] sm:$0xf]  ;;  %v1392_v24 = vor.u32 %v1573_v16, %v1389_v18  ;;  %v1317_v27 = vld [vmem:[%s1970_s13 + $0x38] sm:$0xf0] }
  0x8c   : > { %1038 = vmatpush.bf16.msra.mxu2 %v1420_v39  ;;  %v1517_v22 = vld [vmem:[%s1970_s13 + $0x1c8] sm:$0xf0]  ;;  %v1456_v25 = vor.u32 %v1589_v19, %v1453_v20  ;;  %v1571_v28 = vld [vmem:[%s1970_s13 + $0xb4] sm:$0xf]  ;;  %v1381_v30 = vld [vmem:[%s1970_s13 + $0xb8] sm:$0xf0]  ;;  %v1320_v35 = vor.u32 %v1555_v26, %v1317_v27 }
  0x8d   : > { %1051 = vmatpush.bf16.msra.mxu3 %v1484_v43  ;;  %1013 = vmatmul.bf16.vlgmr.msra.gmra.mxu0 %v2059_v61  ;;  %v1520_v29 = vor.u32 %v1605_v21, %v1517_v22  ;;  %v1587_v31 = vld [vmem:[%s1970_s13 + $0x134] sm:$0xf]  ;;  %v1445_v32 = vld [vmem:[%s1970_s13 + $0x138] sm:$0xf0]  ;;  %v1384_v36 = vor.u32 %v1571_v28, %v1381_v30  ;;  %v1553_v38 = vld [vmem:[%s1970_s13 + $0x24] sm:$0xf] }
  0x8e   : > { %1057 = vmatpush.bf16.msrb.mxu0 %v1352_v44  ;;  %1026 = vmatmul.bf16.vlgmr.msra.gmra.mxu1 %v2061_v63  ;;  %v1603_v33 = vld [vmem:[%s1970_s13 + $0x1b4] sm:$0xf]  ;;  %v1509_v34 = vld [vmem:[%s1970_s13 + $0x1b8] sm:$0xf0]  ;;  %v1448_v37 = vor.u32 %v1587_v31, %v1445_v32  ;;  %v1309_v39 = vld [vmem:[%s1970_s13 + $0x28] sm:$0xf0] }
  0x8f   : > { %1070 = vmatpush.bf16.msrb.mxu1 %v1416_v46  ;;  %1039 = vmatmul.bf16.vlgmr.msra.gmra.mxu2 %v2053_v57  ;;  %v1569_v40 = vld [vmem:[%s1970_s13 + $0xa4] sm:$0xf]  ;;  %v1512_v41 = vor.u32 %v1603_v33, %v1509_v34  ;;  %v1373_v42 = vld [vmem:[%s1970_s13 + $0xa8] sm:$0xf0]  ;;  %v1551_v50 = vld [vmem:[%s1970_s13 + $0x14] sm:$0xf] }
  0x90   : > { %1083 = vmatpush.bf16.msrb.mxu2 %v1480_v47  ;;  %1052 = vmatmul.bf16.vlgmr.msra.gmra.mxu3 %v2057_v60  ;;  %v1585_v43 = vld [vmem:[%s1970_s13 + $0x124] sm:$0xf]  ;;  %v1437_v44 = vld [vmem:[%s1970_s13 + $0x128] sm:$0xf0]  ;;  %v1312_v47 = vor.u32 %v1553_v38, %v1309_v39  ;;  %v1376_v48 = vor.u32 %v1569_v40, %v1373_v42  ;;  %v1301_v51 = vld [vmem:[%s1970_s13 + $0x18] sm:$0xf0] }
  0x91   : > { %1096 = vmatpush.bf16.msrb.mxu3 %v1544_v53  ;;  %v1601_v45 = vld [vmem:[%s1970_s13 + $0x1a4] sm:$0xf]  ;;  %v1501_v46 = vld [vmem:[%s1970_s13 + $0x1a8] sm:$0xf0]  ;;  %v1440_v49 = vor.u32 %v1585_v43, %v1437_v44  ;;  %v1567_v52 = vld [vmem:[%s1970_s13 + $0x94] sm:$0xf] }
  0x92   : > { %1058 = vmatpush.bf16.msrb.mxu0 %v1344_v62  ;;  %v1504_v53 = vor.u32 %v1601_v45, %v1501_v46  ;;  %v1365_v54 = vld [vmem:[%s1970_s13 + $0x98] sm:$0xf0]  ;;  %v1583_v55 = vld [vmem:[%s1970_s13 + $0x114] sm:$0xf]  ;;  %v1304_v62 = vor.u32 %v1551_v50, %v1301_v51  ;;  %v1549_v2 = vld [vmem:[%s1970_s13 + $0x4] sm:$0xf] }
  0x93   : > { %1071 = vmatpush.bf16.msrb.mxu1 %v1408_v0  ;;  %v1429_v56 = vld [vmem:[%s1970_s13 + $0x118] sm:$0xf0]  ;;  %v1599_v58 = vld [vmem:[%s1970_s13 + $0x194] sm:$0xf]  ;;  %v1368_v0 = vor.u32 %v1567_v52, %v1365_v54  ;;  %v1293_v3 = vld [vmem:[%s1970_s13 + $0x8] sm:$0xf0] }
  0x94   : > { %1084 = vmatpush.bf16.msrb.mxu2 %v1472_v1  ;;  %v1493_v59 = vld [vmem:[%s1970_s13 + $0x198] sm:$0xf0]  ;;  %v1432_v1 = vor.u32 %v1583_v55, %v1429_v56  ;;  %v1565_v4 = vld [vmem:[%s1970_s13 + $0x84] sm:$0xf]  ;;  %v1357_v6 = vld [vmem:[%s1970_s13 + $0x88] sm:$0xf0] }
  0x95   : > { %1097 = vmatpush.bf16.msrb.mxu3 %v1536_v5  ;;  %v1496_v5 = vor.u32 %v1599_v58, %v1493_v59  ;;  %v1581_v7 = vld [vmem:[%s1970_s13 + $0x104] sm:$0xf]  ;;  %v1421_v8 = vld [vmem:[%s1970_s13 + $0x108] sm:$0xf0]  ;;  %v603_v21 = vld [vmem:[#allocation2] sm:$0xff] }
  0x96   : > { %1059 = vmatpush.bf16.msrb.mxu0 %v1336_v11  ;;  %v1597_v9 = vld [vmem:[%s1970_s13 + $0x184] sm:$0xf]  ;;  %v1485_v10 = vld [vmem:[%s1970_s13 + $0x188] sm:$0xf0]  ;;  %v1296_v11 = vor.u32 %v1549_v2, %v1293_v3  ;;  %v604_v31 = vld [vmem:[#allocation2 + $0x8] sm:$0xff] }
  0x97   : > { %1072 = vmatpush.bf16.msrb.mxu1 %v1400_v12  ;;  %v1360_v12 = vor.u32 %v1565_v4, %v1357_v6  ;;  %v1488_v14 = vor.u32 %v1597_v9, %v1485_v10 }
  0x98   : > { %1085 = vmatpush.bf16.msrb.mxu2 %v1464_v13  ;;  %v1424_v13 = vor.u32 %v1581_v7, %v1421_v8 }
  0x99   : > { %1098 = vmatpush.bf16.msrb.mxu3 %v1528_v17 }
  0x9a   : > { %1060 = vmatpush.bf16.msrb.mxu0 %v1328_v23 }
  0x9b   : > { %1073 = vmatpush.bf16.msrb.mxu1 %v1392_v24 }
  0x9c   : > { %1086 = vmatpush.bf16.msrb.mxu2 %v1456_v25 }
  0x9d   : > { %1099 = vmatpush.bf16.msrb.mxu3 %v1520_v29 }
  0x9e   : > { %1061 = vmatpush.bf16.msrb.mxu0 %v1320_v35 }
  0x9f   : > { %1074 = vmatpush.bf16.msrb.mxu1 %v1384_v36 }
  0xa0   : > { %1087 = vmatpush.bf16.msrb.mxu2 %v1448_v37 }
  0xa1   : > { %1100 = vmatpush.bf16.msrb.mxu3 %v1512_v41 }
  0xa2   : > { %1062 = vmatpush.bf16.msrb.mxu0 %v1312_v47 }
  0xa3   : > { %1075 = vmatpush.bf16.msrb.mxu1 %v1376_v48 }
  0xa4   : > { %1088 = vmatpush.bf16.msrb.mxu2 %v1440_v49 }
  0xa5   : > { %1101 = vmatpush.bf16.msrb.mxu3 %v1504_v53 }
  0xa6   : > { %1063 = vmatpush.bf16.msrb.mxu0 %v1304_v62 }
  0xa7   : > { %1076 = vmatpush.bf16.msrb.mxu1 %v1368_v0 }
  0xa8   : > { %1089 = vmatpush.bf16.msrb.mxu2 %v1432_v1 }
  0xa9   : > { %1102 = vmatpush.bf16.msrb.mxu3 %v1496_v5 }
  0xaa   : > { %1064 = vmatpush.bf16.msrb.mxu0 %v1296_v11 }
  0xab   : > { %1077 = vmatpush.bf16.msrb.mxu1 %v1360_v12 }
  0xac   : > { %1090 = vmatpush.bf16.msrb.mxu2 %v1424_v13 }
  0xad   : > { %1103 = vmatpush.bf16.msrb.mxu3 %v1488_v14  ;;  %1065 = vmatmul.bf16.vlgmr.msrb.gmra.mxu0 %v2059_v61 }
  0xae   : > { %1078 = vmatmul.bf16.vlgmr.msrb.gmra.mxu1 %v2061_v63 }
  0xaf   : > { %1091 = vmatmul.bf16.vlgmr.msrb.gmra.mxu2 %v2053_v57 }
  0xb0   : > { %1104 = vmatmul.bf16.vlgmr.msrb.gmra.mxu3 %v2057_v60 }
 0x10a   : > { %v1014_v15 = vpop.f32.mrf.mxu0 }
 0x10b   : > { %v1027_v16 = vpop.f32.mrf.mxu1 }
 0x10c   : > { %v1028_v17 = vadd.f32 %v1027_v16, %v1014_v15 }
 0x112   : > { %v1040_v18 = vpop.f32.mrf.mxu2  ;;  %v1016_v23 = vpop.f32.mrf.mxu0 }
 0x113   : > { %v1041_v19 = vadd.f32 %v1040_v18, %v1028_v17  ;;  %v1053_v20 = vpop.f32.mrf.mxu3  ;;  %v1029_v24 = vpop.f32.mrf.mxu1 }
 0x115   : > { %v1054_v22 = vadd.f32 %v1053_v20, %v1041_v19 }
 0x117   : > { %v1109_v25 = vadd.f32 %v1054_v22, %v603_v21 }
 0x119   : > { %1111 = vst [vmem:[#allocation2] sm:$0xff] %v1109_v25 }
 0x11a   : > { %v1042_v26 = vpop.f32.mrf.mxu2 }
 0x11b   : > { %v1055_v61 = vpop.f32.mrf.mxu3 }
 0x12a   : > { %v1066_v27 = vpop.f32.mrf.mxu0 }
 0x12b   : > { %v1079_v63 = vpop.f32.mrf.mxu1 }
 0x12c   : > { %v1080_v28 = vadd.f32 %v1079_v63, %v1066_v27 }
 0x132   : > { %v1092_v57 = vpop.f32.mrf.mxu2  ;;  %v1068_v30 = vpop.f32.mrf.mxu0 }
 0x133   : > { %v1093_v29 = vadd.f32 %v1092_v57, %v1080_v28  ;;  %v1105_v60 = vpop.f32.mrf.mxu3  ;;  %v1081_v32 = vpop.f32.mrf.mxu1 }
 0x135   : > { %v1106_v33 = vadd.f32 %v1105_v60, %v1093_v29 }
 0x137   : > { %v1110_v34 = vadd.f32 %v1106_v33, %v604_v31  ;;  %1116 = sbr.rel (%p1545_p13) target bundleno = 330 (0x14a), region = 82 }
 0x139   : > { %1112 = vst [vmem:[#allocation2 + $0x8] sm:$0xff] %v1110_v34 }
 0x13a   : > { %v1094_v35 = vpop.f32.mrf.mxu2 }
 0x13b   : > { %v1107_v36 = vpop.f32.mrf.mxu3 }
 0x13c   : > { %v1117_v37 = vld [vmem:[#allocation2] sm:$0xff] }
 0x13d   : > { %v1119_v39 = vld [vmem:[%s580_s15] sm:$0x3] }
 0x13e   : > { %v1121_v40 = vperm.slane %v1119_v39, 0  ;;  %v1122_v41 = vperm.slane %v1119_v39, 1  ;;  %v1127_v42 = vld [vmem:[%s585_s18] sm:$0x3] }
 0x13f   : > { %v1129_v43 = vperm.slane %v1127_v42, 0  ;;  %v1130_v44 = vperm.slane %v1127_v42, 1 }
 0x140   : > { %v1118_v38 = vld [vmem:[#allocation2 + $0x8] sm:$0xff]  ;;  %v1125_v45 = vmul.f32 %v1121_v40, %v1117_v37 }
 0x141   : > { %v1126_v46 = vmul.f32 %v1122_v41, %v1118_v38 }
 0x142   : > { %v1133_v47 = vadd.f32 %v1129_v43, %v1125_v45 }
 0x143   : > { %v1134_v48 = vadd.f32 %v1130_v44, %v1126_v46 }
 0x144   : > { %v1135_v49 = vmax.f32 %v1133_v47, 0.0 }
 0x145   : > { %v1136_v50 = vmax.f32 %v1134_v48, 0.0 }
 0x147   : > { %v1137_v51 = vpack.c.bf16 %v1136_v50, %v1135_v49 }
 0x149   : > { %1138 = vst [vmem:[%s1968_s12] sm:$0xff] %v1137_v51 }
 0x14a PF: > { %s14_s21 = sadd.s32 1, %s1724_s21   ;;  %s2157_s15 = smov %s1704_s16 }
 0x14b   : > { %p11_p0 = scmp.ge.s32.totalorder %s14_s21, 20   ;;  %s2158_s16 = smov %s1803_s28 }
 0x14c   : > { %s2159_s17 = smov %s1716_s19  ;;  %s2160_s18 = smov %s1720_s20 }
 0x14d   : > { %s2161_s19 = smov %s2164_s22  ;;  %s2162_s20 = smov %s2168_s23 }
 0x14e   :  { %13 = sbr.rel (!%p11_p0) target bundleno = 4 (0x4), region = 126 }

// kernel: resnet_forward.41
= control target key start
LH: loop header
LB: loop body
LE: loop exit
PB: predicated region body
PF: predicated region fallthrough
CT: control target
= control target key end

     0   :  { %s432_s1 = inlined_call_operand.vmem [shape: f32[512,128], index: 1, kind: input, shape index: {}]   ;;  %s433_s0 = inlined_call_operand.vmem [shape: f32[8,512], index: 0, kind: input, shape index: {}]   ;;  %s434_s2 = inlined_call_operand.vmem [shape: f32[1,128], index: 2, kind: input, shape index: {}]   ;;  %s435_s3 = inlined_call_operand.vmem [shape: f32[1,128], index: 3, kind: input, shape index: {}]   ;;  %s436_s4 = inlined_call_operand.vmem [shape: f32[8,128], index: 4, kind: output, shape index: {}]  }
   0x1   :  { %v74_v0 = vld [vmem:[%s432_s1 + $0x178] sm:$0xff]  ;;  %v73_v1 = vld [vmem:[%s432_s1 + $0x170] sm:$0xff]  ;;  %v72_v5 = vld [vmem:[%s432_s1 + $0x168] sm:$0xff] }
   0x2   :  { %v90_v2 = vld [vmem:[%s432_s1 + $0x1f8] sm:$0xff]  ;;  %131 = vmatpush.msra.mxu2 %v74_v0  ;;  %v89_v6 = vld [vmem:[%s432_s1 + $0x1f0] sm:$0xff]  ;;  %v88_v9 = vld [vmem:[%s432_s1 + $0x1e8] sm:$0xff] }
   0x3   :  { %151 = vmatpush.msra.mxu3 %v90_v2  ;;  %v42_v3 = vld [vmem:[%s432_s1 + $0x78] sm:$0xff]  ;;  %v41_v7 = vld [vmem:[%s432_s1 + $0x70] sm:$0xff]  ;;  %v40_v10 = vld [vmem:[%s432_s1 + $0x68] sm:$0xff] }
   0x4   :  { %v58_v4 = vld [vmem:[%s432_s1 + $0xf8] sm:$0xff]  ;;  %91 = vmatpush.msra.mxu0 %v42_v3  ;;  %v57_v8 = vld [vmem:[%s432_s1 + $0xf0] sm:$0xff]  ;;  %132 = vmatpush.msra.mxu2 %v73_v1  ;;  %v71_v11 = vld [vmem:[%s432_s1 + $0x160] sm:$0xff] }
   0x5   :  { %111 = vmatpush.msra.mxu1 %v58_v4  ;;  %152 = vmatpush.msra.mxu3 %v89_v6  ;;  %v56_v12 = vld [vmem:[%s432_s1 + $0xe8] sm:$0xff]  ;;  %v87_v13 = vld [vmem:[%s432_s1 + $0x1e0] sm:$0xff]  ;;  %v70_v16 = vld [vmem:[%s432_s1 + $0x158] sm:$0xff] }
   0x6   :  { %92 = vmatpush.msra.mxu0 %v41_v7  ;;  %133 = vmatpush.msra.mxu2 %v72_v5  ;;  %v39_v14 = vld [vmem:[%s432_s1 + $0x60] sm:$0xff]  ;;  %v86_v17 = vld [vmem:[%s432_s1 + $0x1d8] sm:$0xff]  ;;  %v69_v20 = vld [vmem:[%s432_s1 + $0x150] sm:$0xff] }
   0x7   :  { %112 = vmatpush.msra.mxu1 %v57_v8  ;;  %153 = vmatpush.msra.mxu3 %v88_v9  ;;  %v55_v15 = vld [vmem:[%s432_s1 + $0xe0] sm:$0xff]  ;;  %v38_v18 = vld [vmem:[%s432_s1 + $0x58] sm:$0xff]  ;;  %v85_v21 = vld [vmem:[%s432_s1 + $0x1d0] sm:$0xff] }
   0x8   :  { %93 = vmatpush.msra.mxu0 %v40_v10  ;;  %134 = vmatpush.msra.mxu2 %v71_v11  ;;  %v54_v19 = vld [vmem:[%s432_s1 + $0xd8] sm:$0xff]  ;;  %v37_v22 = vld [vmem:[%s432_s1 + $0x50] sm:$0xff]  ;;  %v68_v24 = vld [vmem:[%s432_s1 + $0x148] sm:$0xff] }
   0x9   :  { %113 = vmatpush.msra.mxu1 %v56_v12  ;;  %154 = vmatpush.msra.mxu3 %v87_v13  ;;  %v53_v23 = vld [vmem:[%s432_s1 + $0xd0] sm:$0xff]  ;;  %v84_v25 = vld [vmem:[%s432_s1 + $0x1c8] sm:$0xff]  ;;  %v67_v28 = vld [vmem:[%s432_s1 + $0x140] sm:$0xff] }
   0xa   :  { %94 = vmatpush.msra.mxu0 %v39_v14  ;;  %135 = vmatpush.msra.mxu2 %v70_v16  ;;  %v36_v26 = vld [vmem:[%s432_s1 + $0x48] sm:$0xff]  ;;  %v83_v29 = vld [vmem:[%s432_s1 + $0x1c0] sm:$0xff]  ;;  %v66_v32 = vld [vmem:[%s432_s1 + $0x138] sm:$0xff] }
   0xb   :  { %114 = vmatpush.msra.mxu1 %v55_v15  ;;  %155 = vmatpush.msra.mxu3 %v86_v17  ;;  %v52_v27 = vld [vmem:[%s432_s1 + $0xc8] sm:$0xff]  ;;  %v35_v30 = vld [vmem:[%s432_s1 + $0x40] sm:$0xff]  ;;  %v82_v33 = vld [vmem:[%s432_s1 + $0x1b8] sm:$0xff] }
   0xc   :  { %95 = vmatpush.msra.mxu0 %v38_v18  ;;  %136 = vmatpush.msra.mxu2 %v69_v20  ;;  %v51_v31 = vld [vmem:[%s432_s1 + $0xc0] sm:$0xff]  ;;  %v34_v34 = vld [vmem:[%s432_s1 + $0x38] sm:$0xff]  ;;  %v65_v36 = vld [vmem:[%s432_s1 + $0x130] sm:$0xff] }
   0xd   :  { %115 = vmatpush.msra.mxu1 %v54_v19  ;;  %156 = vmatpush.msra.mxu3 %v85_v21  ;;  %v50_v35 = vld [vmem:[%s432_s1 + $0xb8] sm:$0xff]  ;;  %v81_v37 = vld [vmem:[%s432_s1 + $0x1b0] sm:$0xff]  ;;  %v64_v40 = vld [vmem:[%s432_s1 + $0x128] sm:$0xff] }
   0xe   :  { %96 = vmatpush.msra.mxu0 %v37_v22  ;;  %137 = vmatpush.msra.mxu2 %v68_v24  ;;  %v33_v38 = vld [vmem:[%s432_s1 + $0x30] sm:$0xff]  ;;  %v80_v41 = vld [vmem:[%s432_s1 + $0x1a8] sm:$0xff]  ;;  %v63_v44 = vld [vmem:[%s432_s1 + $0x120] sm:$0xff] }
   0xf   :  { %116 = vmatpush.msra.mxu1 %v53_v23  ;;  %157 = vmatpush.msra.mxu3 %v84_v25  ;;  %v49_v39 = vld [vmem:[%s432_s1 + $0xb0] sm:$0xff]  ;;  %v32_v42 = vld [vmem:[%s432_s1 + $0x28] sm:$0xff]  ;;  %v79_v45 = vld [vmem:[%s432_s1 + $0x1a0] sm:$0xff] }
  0x10   :  { %97 = vmatpush.msra.mxu0 %v36_v26  ;;  %138 = vmatpush.msra.mxu2 %v67_v28  ;;  %v48_v43 = vld [vmem:[%s432_s1 + $0xa8] sm:$0xff]  ;;  %v31_v46 = vld [vmem:[%s432_s1 + $0x20] sm:$0xff]  ;;  %v62_v48 = vld [vmem:[%s432_s1 + $0x118] sm:$0xff] }
  0x11   :  { %117 = vmatpush.msra.mxu1 %v52_v27  ;;  %158 = vmatpush.msra.mxu3 %v83_v29  ;;  %v47_v47 = vld [vmem:[%s432_s1 + $0xa0] sm:$0xff]  ;;  %v78_v49 = vld [vmem:[%s432_s1 + $0x198] sm:$0xff]  ;;  %v61_v52 = vld [vmem:[%s432_s1 + $0x110] sm:$0xff] }
  0x12   :  { %98 = vmatpush.msra.mxu0 %v35_v30  ;;  %139 = vmatpush.msra.mxu2 %v66_v32  ;;  %v30_v50 = vld [vmem:[%s432_s1 + $0x18] sm:$0xff]  ;;  %v77_v53 = vld [vmem:[%s432_s1 + $0x190] sm:$0xff]  ;;  %v60_v56 = vld [vmem:[%s432_s1 + $0x108] sm:$0xff] }
  0x13   :  { %118 = vmatpush.msra.mxu1 %v51_v31  ;;  %159 = vmatpush.msra.mxu3 %v82_v33  ;;  %v46_v51 = vld [vmem:[%s432_s1 + $0x98] sm:$0xff]  ;;  %v29_v54 = vld [vmem:[%s432_s1 + $0x10] sm:$0xff]  ;;  %v76_v57 = vld [vmem:[%s432_s1 + $0x188] sm:$0xff] }
  0x14   :  { %99 = vmatpush.msra.mxu0 %v34_v34  ;;  %140 = vmatpush.msra.mxu2 %v65_v36  ;;  %v45_v55 = vld [vmem:[%s432_s1 + $0x90] sm:$0xff]  ;;  %v28_v58 = vld [vmem:[%s432_s1 + $0x8] sm:$0xff]  ;;  %v59_v60 = vld [vmem:[%s432_s1 + $0x100] sm:$0xff] }
  0x15   :  { %119 = vmatpush.msra.mxu1 %v50_v35  ;;  %160 = vmatpush.msra.mxu3 %v81_v37  ;;  %v44_v59 = vld [vmem:[%s432_s1 + $0x88] sm:$0xff]  ;;  %v75_v61 = vld [vmem:[%s432_s1 + $0x180] sm:$0xff]  ;;  %v25_v62 = vld [vmem:[%s433_s0 + $0x10] sm:$0xff] }
  0x16   :  { %100 = vmatpush.msra.mxu0 %v33_v38  ;;  %141 = vmatpush.msra.mxu2 %v64_v40  ;;  %v26_v63 = vld [vmem:[%s433_s0 + $0x18] sm:$0xff]  ;;  %v27_v0 = vld [vmem:[%s432_s1] sm:$0xff]  ;;  %v24_v3 = vld [vmem:[%s433_s0 + $0x8] sm:$0xff] }
  0x17   :  { %120 = vmatpush.msra.mxu1 %v49_v39  ;;  %161 = vmatpush.msra.mxu3 %v80_v41  ;;  %v43_v1 = vld [vmem:[%s432_s1 + $0x80] sm:$0xff] }
  0x18   :  { %101 = vmatpush.msra.mxu0 %v32_v42  ;;  %142 = vmatpush.msra.mxu2 %v63_v44  ;;  %v23_v2 = vld [vmem:[%s433_s0] sm:$0xff] }
  0x19   :  { %121 = vmatpush.msra.mxu1 %v48_v43  ;;  %162 = vmatpush.msra.mxu3 %v79_v45  ;;  %v192_v10 = vld [vmem:[%s434_s2] ss:$0 sm:$0xff] }
  0x1a   :  { %102 = vmatpush.msra.mxu0 %v31_v46  ;;  %143 = vmatpush.msra.mxu2 %v62_v48  ;;  %v193_v12 = vld [vmem:[%s435_s3] ss:$0 sm:$0xff] }
  0x1b   :  { %122 = vmatpush.msra.mxu1 %v47_v47  ;;  %163 = vmatpush.msra.mxu3 %v78_v49 }
  0x1c   :  { %103 = vmatpush.msra.mxu0 %v30_v50  ;;  %144 = vmatpush.msra.mxu2 %v61_v52 }
  0x1d   :  { %123 = vmatpush.msra.mxu1 %v46_v51  ;;  %164 = vmatpush.msra.mxu3 %v77_v53 }
  0x1e   :  { %104 = vmatpush.msra.mxu0 %v29_v54  ;;  %145 = vmatpush.msra.mxu2 %v60_v56 }
  0x1f   :  { %124 = vmatpush.msra.mxu1 %v45_v55  ;;  %165 = vmatpush.msra.mxu3 %v76_v57 }
  0x20   :  { %105 = vmatpush.msra.mxu0 %v28_v58  ;;  %146 = vmatpush.msra.mxu2 %v59_v60 }
  0x21   :  { %125 = vmatpush.msra.mxu1 %v44_v59  ;;  %166 = vmatpush.msra.mxu3 %v75_v61 }
  0x22   :  { %147 = vmatmul.f32.vlgmr.msra.gmra.mxu2 %v25_v62  ;;  %167 = vmatmul.f32.vlgmr.msra.gmra.mxu3 %v26_v63 }
  0x23   :  { %106 = vmatpush.msra.mxu0 %v27_v0  ;;  %126 = vmatpush.msra.mxu1 %v43_v1 }
  0x24   :  { %107 = vmatmul.f32.vlgmr.msra.gmra.mxu0 %v23_v2  ;;  %127 = vmatmul.f32.vlgmr.msra.gmra.mxu1 %v24_v3 }
  0xa1   :  { %v108_v4 = vpop.f32.mrf.mxu0  ;;  %v128_v5 = vpop.f32.mrf.mxu1 }
  0xa2   :  { %v129_v6 = vadd.f32 %v128_v5, %v108_v4 }
  0xa5   :  { %v148_v7 = vpop.f32.mrf.mxu2  ;;  %v168_v8 = vpop.f32.mrf.mxu3 }
  0xa6   :  { %v149_v9 = vadd.f32 %v148_v7, %v129_v6 }
  0xa8   :  { %v169_v11 = vadd.f32 %v168_v8, %v149_v9 }
  0xaa   :  { %v181_v13 = vmul.f32 %v192_v10, %v169_v11 }
  0xac   :  { %v186_v14 = vadd.f32 %v193_v12, %v181_v13 }
  0xae   :  { %187 = vst [vmem:[%s436_s4] sm:$0xff] %v186_v14 }

</bundles_post_ra>
